<compile_context>
chip_gen: v6e
topology: v6e:2x2x1
jax: 0.10.0
libtpu: 0.0.40
codegen_flags: <defaults>
</compile_context>

<pallas_src>
import functools
import math

import jax
import jax.numpy as jnp
from jax.experimental import pallas as pl
from jax.experimental.pallas import tpu as pltpu


_VMEM_LIMIT = 32 * 1024 * 1024  # sized for v7x (64 MiB physical VMEM); safe on v5e/v6e


# -----------------------------------------------------------------------------
# Kernels
# -----------------------------------------------------------------------------
def _linear_kernel(x_ref, w_ref, s_ref, b_ref, o_ref, *, relu):
    """o = act((x @ w) * s + b)  — conv/fc bias and inference BN folded into s, b."""
    y = jnp.dot(x_ref[...], w_ref[...], preferred_element_type=jnp.float32)
    y = y * s_ref[...] + b_ref[...]
    if relu:
        y = jnp.maximum(y, 0.0)
    o_ref[...] = y.astype(o_ref.dtype)


def _bmm_kernel(x_ref, t_ref, o_ref):
    """Per-batch point transform: (N, 3) @ (3, 3) -> (N, 3)."""
    o_ref[...] = jnp.dot(
        x_ref[...], t_ref[...], preferred_element_type=jnp.float32
    ).astype(o_ref.dtype)


def _maxpool_kernel(x_ref, o_ref):
    """MaxPool2d((num_points, 1)): (B, N, TC) -> (B, TC)."""
    o_ref[...] = jnp.max(x_ref[...], axis=1)


def _gem_kernel(p_ref, x_ref, o_ref, *, eps):
    """GeM: (mean_n clamp(x, eps)^p)^(1/p) over the points axis. (B,N,TC)->(B,TC)."""
    p = p_ref[0]                                   # learned scalar, read from SMEM
    x = jnp.maximum(x_ref[...].astype(jnp.float32), eps)
    xp = jnp.exp(p * jnp.log(x))                   # x^p (x >= eps > 0)
    m = jnp.mean(xp, axis=1)
    o_ref[...] = jnp.exp(jnp.log(m) / p).astype(o_ref.dtype)


# -----------------------------------------------------------------------------
# Pallas wrappers
# -----------------------------------------------------------------------------
def fused_linear(x, w, b, *, bn_scale=None, bn_shift=None, relu=True, block_m=128):
    """act(BN(x @ w + b)). x: (M, K), w: (K, N). BN is inference-mode, pre-folded."""
    m, k = x.shape
    n = w.shape[1]
    if bn_scale is None:
        scale = jnp.ones((1, n), x.dtype)
        bias = b.reshape(1, n).astype(x.dtype)
    else:
        scale = bn_scale.reshape(1, n).astype(x.dtype)
        bias = (b * bn_scale + bn_shift).reshape(1, n).astype(x.dtype)

    tm = block_m if (m % block_m == 0 and m >= block_m) else m
    return pl.pallas_call(
        functools.partial(_linear_kernel, relu=relu),
        out_shape=jax.ShapeDtypeStruct((m, n), x.dtype),
        grid=(m // tm,),
        in_specs=[
            pl.BlockSpec((tm, k), lambda i: (i, 0)),
            pl.BlockSpec((k, n), lambda i: (0, 0)),
            pl.BlockSpec((1, n), lambda i: (0, 0)),
            pl.BlockSpec((1, n), lambda i: (0, 0)),
        ],
        out_specs=pl.BlockSpec((tm, n), lambda i: (i, 0)),
        compiler_params=pltpu.CompilerParams(
            dimension_semantics=("parallel",),
            vmem_limit_bytes=_VMEM_LIMIT,
        ),
    )(x, w, scale, bias)


def batched_transform(pts, trans):
    """torch.matmul(squeeze(x), trans): (B, N, 3) @ (B, 3, 3) -> (B, N, 3)."""
    b, n, d = pts.shape
    return pl.pallas_call(
        _bmm_kernel,
        out_shape=jax.ShapeDtypeStruct((b, n, d), pts.dtype),
        grid=(b,),
        in_specs=[
            pl.BlockSpec((None, n, d), lambda i: (i, 0, 0)),
            pl.BlockSpec((None, d, d), lambda i: (i, 0, 0)),
        ],
        out_specs=pl.BlockSpec((None, n, d), lambda i: (i, 0, 0)),
        compiler_params=pltpu.CompilerParams(
            dimension_semantics=("parallel",),
            vmem_limit_bytes=_VMEM_LIMIT,
        ),
    )(pts, trans)


def max_over_points(x, *, block_c=512):
    """MaxPool2d((num_points, 1)) on per-point features: (B, N, C) -> (B, C)."""
    b, n, c = x.shape
    tc = block_c if (c % block_c == 0 and c >= block_c) else c
    return pl.pallas_call(
        _maxpool_kernel,
        out_shape=jax.ShapeDtypeStruct((b, c), x.dtype),
        grid=(c // tc,),
        in_specs=[pl.BlockSpec((b, n, tc), lambda j: (0, 0, j))],
        out_specs=pl.BlockSpec((b, tc), lambda j: (0, j)),
        compiler_params=pltpu.CompilerParams(
            dimension_semantics=("parallel",),
            vmem_limit_bytes=_VMEM_LIMIT,
        ),
    )(x)


def gem_pool(x, p, *, eps=1e-6, block_c=512):
    """GeM pooling over the points axis: (B, N, C) -> (B, C). p: shape (1,) scalar."""
    b, n, c = x.shape
    tc = block_c if (c % block_c == 0 and c >= block_c) else c
    return pl.pallas_call(
        functools.partial(_gem_kernel, eps=eps),
        out_shape=jax.ShapeDtypeStruct((b, c), x.dtype),
        grid=(c // tc,),
        in_specs=[
            pl.BlockSpec(memory_space=pltpu.MemorySpace.SMEM),  # learned p scalar
            pl.BlockSpec((b, n, tc), lambda j: (0, 0, j)),
        ],
        out_specs=pl.BlockSpec((b, tc), lambda j: (0, j)),
        compiler_params=pltpu.CompilerParams(
            dimension_semantics=("parallel",),
            vmem_limit_bytes=_VMEM_LIMIT,
        ),
    )(p, x)


# -----------------------------------------------------------------------------
# Model forward (wrapper does only free reshapes + small constant folding)
# -----------------------------------------------------------------------------
def fold_bn(gamma, beta, mean, var, eps=1e-5):
    scale = gamma / jnp.sqrt(var + eps)
    shift = beta - mean * scale
    return scale, shift


def pointnet_gem_forward(x, p):
    """PointNetGeM.forward: x (B, 1, num_points, 3) float32 -> (B, 64)."""
    b = x.shape[0]
    n = x.shape[2]
    pts = x.reshape(b, n, 3)            # squeeze / view: metadata-only
    flat = pts.reshape(b * n, 3)

    # ---- STN3d (k=3, use_bn=False): conv1(1x3) -> conv2(1x1) -> conv3(1x1) ----
    h = fused_linear(flat, p["stn_w1"], p["stn_b1"], relu=True)
    h = fused_linear(h, p["stn_w2"], p["stn_b2"], relu=True)
    h = fused_linear(h, p["stn_w3"], p["stn_b3"], relu=True)
    g = max_over_points(h.reshape(b, n, -1))          # MaxPool2d((num_points, 1))
    g = fused_linear(g, p["stn_fc1_w"], p["stn_fc1_b"], relu=True)
    g = fused_linear(g, p["stn_fc2_w"], p["stn_fc2_b"], relu=True)
    t = fused_linear(g, p["stn_fc3_w"], p["stn_fc3_b"], relu=False)
    trans = (t + jnp.eye(3, dtype=t.dtype).reshape(1, 9)).reshape(b, 3, 3)

    # ---- apply learned input transform: matmul(squeeze(x), trans) ----
    xt = batched_transform(pts, trans)                 # (B, N, 3)

    # ---- PointNetfeat: conv1(1x3)+BN+ReLU, conv2(1x1)+BN+ReLU ----
    s1, sh1 = fold_bn(p["bn1_gamma"], p["bn1_beta"], p["bn1_mean"], p["bn1_var"])
    s2, sh2 = fold_bn(p["bn2_gamma"], p["bn2_beta"], p["bn2_mean"], p["bn2_var"])
    f = fused_linear(xt.reshape(b * n, 3), p["c1_w"], p["c1_b"],
                     bn_scale=s1, bn_shift=sh1, relu=True)
    f = fused_linear(f, p["c2_w"], p["c2_b"],
                     bn_scale=s2, bn_shift=sh2, relu=True)

    # ---- GeM pooling over the num_points axis ----
    return gem_pool(f.reshape(b, n, -1), p["gem_p"], eps=1e-6)


# -----------------------------------------------------------------------------
# Pure-JAX reference for verification
# -----------------------------------------------------------------------------
def reference_forward(x, p):
    hp = jax.lax.Precision.HIGHEST
    b, n = x.shape[0], x.shape[2]
    pts = x.reshape(b, n, 3)
    flat = pts.reshape(b * n, 3)
    h = jax.nn.relu(jnp.dot(flat, p["stn_w1"], precision=hp) + p["stn_b1"])
    h = jax.nn.relu(jnp.dot(h, p["stn_w2"], precision=hp) + p["stn_b2"])
    h = jax.nn.relu(jnp.dot(h, p["stn_w3"], precision=hp) + p["stn_b3"])
    g = jnp.max(h.reshape(b, n, -1), axis=1)
    g = jax.nn.relu(jnp.dot(g, p["stn_fc1_w"], precision=hp) + p["stn_fc1_b"])
    g = jax.nn.relu(jnp.dot(g, p["stn_fc2_w"], precision=hp) + p["stn_fc2_b"])
    t = jnp.dot(g, p["stn_fc3_w"], precision=hp) + p["stn_fc3_b"]
    trans = (t + jnp.eye(3, dtype=t.dtype).reshape(1, 9)).reshape(b, 3, 3)
    xt = jnp.einsum("bnd,bde->bne", pts, trans, precision=hp)
    s1, sh1 = fold_bn(p["bn1_gamma"], p["bn1_beta"], p["bn1_mean"], p["bn1_var"])
    s2, sh2 = fold_bn(p["bn2_gamma"], p["bn2_beta"], p["bn2_mean"], p["bn2_var"])
    f = xt.reshape(b * n, 3)
    f = jax.nn.relu((jnp.dot(f, p["c1_w"], precision=hp) + p["c1_b"]) * s1 + sh1)
    f = jax.nn.relu((jnp.dot(f, p["c2_w"], precision=hp) + p["c2_b"]) * s2 + sh2)
    feats = f.reshape(b, n, -1)
    pv = p["gem_p"][0]
    g = jnp.maximum(feats, 1e-6)
    return jnp.mean(g ** pv, axis=1) ** (1.0 / pv)


# -----------------------------------------------------------------------------
# Main
# -----------------------------------------------------------------------------
def _dense(key, fan_in, fan_out, w_scale=None, b_scale=0.02):
    if w_scale is None:
        w_scale = 1.0 / math.sqrt(fan_in)
    kw, kb = jax.random.split(key)
    w = jax.random.normal(kw, (fan_in, fan_out), jnp.float32) * w_scale
    b = jax.random.normal(kb, (fan_out,), jnp.float32) * b_scale
    return w, b


if __name__ == "__main__":
    B, N = 2, 128   # small num_points for the test; module parameterizes num_points
    ks = jax.random.split(jax.random.PRNGKey(0), 18)

    x = jax.random.normal(ks[0], (B, 1, N, 3), jnp.float32)

    p = {}
    p["stn_w1"], p["stn_b1"] = _dense(ks[1], 3, 64)
    p["stn_w2"], p["stn_b2"] = _dense(ks[2], 64, 128)
    p["stn_w3"], p["stn_b3"] = _dense(ks[3], 128, 1024)
    p["stn_fc1_w"], p["stn_fc1_b"] = _dense(ks[4], 1024, 512)
    p["stn_fc2_w"], p["stn_fc2_b"] = _dense(ks[5], 512, 256)
    # PyTorch zero-inits fc3; keep it near zero so trans stays near the identity.
    p["stn_fc3_w"], p["stn_fc3_b"] = _dense(ks[6], 256, 9, w_scale=0.01, b_scale=0.0)
    p["c1_w"], p["c1_b"] = _dense(ks[7], 3, 64)
    p["c2_w"], p["c2_b"] = _dense(ks[8], 64, 64)
    p["bn1_gamma"] = 1.0 + 0.1 * jax.random.normal(ks[9], (64,), jnp.float32)
    p["bn1_beta"] = 0.1 * jax.random.normal(ks[10], (64,), jnp.float32)
    p["bn1_mean"] = 0.1 * jax.random.normal(ks[11], (64,), jnp.float32)
    p["bn1_var"] = 1.0 + 0.1 * jnp.abs(jax.random.normal(ks[12], (64,), jnp.float32))
    p["bn2_gamma"] = 1.0 + 0.1 * jax.random.normal(ks[13], (64,), jnp.float32)
    p["bn2_beta"] = 0.1 * jax.random.normal(ks[14], (64,), jnp.float32)
    p["bn2_mean"] = 0.1 * jax.random.normal(ks[15], (64,), jnp.float32)
    p["bn2_var"] = 1.0 + 0.1 * jnp.abs(jax.random.normal(ks[16], (64,), jnp.float32))
    p["gem_p"] = jnp.full((1,), 3.0, jnp.float32)   # GeM learned exponent, init p=3

    out = jax.jit(pointnet_gem_forward)(x, p)
    out = jax.block_until_ready(out)

    ref = reference_forward(x, p)
    assert out.shape == (B, 64), out.shape
    assert out.dtype == jnp.float32
    max_diff = float(jnp.max(jnp.abs(out - ref)))
    assert jnp.allclose(out, ref, rtol=2e-2, atol=2e-2), f"mismatch, max|diff|={max_diff}"

    print("KERNEL_OK")
</pallas_src>

<mosaic_0001>
module attributes {stable_mosaic.version = 11 : i64} {
  func.func @_linear_kernel(%arg0: i32, %arg1: memref<128x3xf32, #tpu.memory_space<vmem>>, %arg2: memref<3x64xf32, #tpu.memory_space<vmem>>, %arg3: memref<1x64xf32, #tpu.memory_space<vmem>>, %arg4: memref<1x64xf32, #tpu.memory_space<vmem>>, %arg5: memref<128x64xf32, #tpu.memory_space<vmem>>) attributes {dimension_semantics = [#tpu.dimension_semantics<parallel>], iteration_bounds = array<i64: 2>, scalar_prefetch = 0 : i64, scratch_operands = 0 : i64, tpu.core_type = #tpu.core_type<tc>, window_params = [{transform_indices = @transform_0, window_bounds = array<i64: 128, 3>}, {pipeline_mode = #tpu.pipeline_mode<synchronous>, transform_indices = @transform_1, window_bounds = array<i64: 3, 64>}, {pipeline_mode = #tpu.pipeline_mode<synchronous>, transform_indices = @transform_2, window_bounds = array<i64: 1, 64>}, {pipeline_mode = #tpu.pipeline_mode<synchronous>, transform_indices = @transform_3, window_bounds = array<i64: 1, 64>}, {transform_indices = @transform_4, window_bounds = array<i64: 128, 64>}]} {
    %c0 = arith.constant 0 : index
    %c0_0 = arith.constant 0 : index
    %0 = vector.load %arg1[%c0, %c0_0] : memref<128x3xf32, #tpu.memory_space<vmem>>, vector<128x3xf32>
    %c0_1 = arith.constant 0 : index
    %c0_2 = arith.constant 0 : index
    %1 = vector.load %arg2[%c0_1, %c0_2] : memref<3x64xf32, #tpu.memory_space<vmem>>, vector<3x64xf32>
    %cst = arith.constant dense<0.000000e+00> : vector<128x64xf32>
    %2 = tpu.matmul %0, %1, %cst {dimension_numbers = #tpu.dot_dimension_numbers<[1], [0], [0], [1], [0, 0, 1, 1], [], []>} : vector<128x3xf32>, vector<3x64xf32>, vector<128x64xf32> -> vector<128x64xf32>
    %c0_3 = arith.constant 0 : index
    %c0_4 = arith.constant 0 : index
    %3 = vector.load %arg3[%c0_3, %c0_4] : memref<1x64xf32, #tpu.memory_space<vmem>>, vector<1x64xf32>
    %4 = vector.broadcast %3 : vector<1x64xf32> to vector<128x64xf32>
    %5 = arith.mulf %2, %4 : vector<128x64xf32>
    %c0_5 = arith.constant 0 : index
    %c0_6 = arith.constant 0 : index
    %6 = vector.load %arg4[%c0_5, %c0_6] : memref<1x64xf32, #tpu.memory_space<vmem>>, vector<1x64xf32>
    %7 = vector.broadcast %6 : vector<1x64xf32> to vector<128x64xf32>
    %8 = arith.addf %5, %7 : vector<128x64xf32>
    %cst_7 = arith.constant 0.000000e+00 : f32
    %9 = vector.broadcast %cst_7 : f32 to vector<128x64xf32>
    %10 = arith.maximumf %8, %9 : vector<128x64xf32>
    %c0_8 = arith.constant 0 : index
    %c0_9 = arith.constant 0 : index
    %11 = vector.load %arg5[%c0_8, %c0_9] : memref<128x64xf32, #tpu.memory_space<vmem>>, vector<128x64xf32>
    tpu.vector_store %arg5[%c0_8, %c0_9], %10 {strides = array<i32>} : memref<128x64xf32, #tpu.memory_space<vmem>>, vector<128x64xf32>,
    return
  }
  func.func @transform_0(%arg0: i32) -> (i32, i32) {
    %c0_i32 = arith.constant 0 : i32
    %c0_i32_0 = arith.constant 0 : i32
    return %arg0, %c0_i32 : i32, i32
  }
  func.func @transform_1(%arg0: i32) -> (i32, i32) {
    %c0_i32 = arith.constant 0 : i32
    %c0_i32_0 = arith.constant 0 : i32
    %c0_i32_1 = arith.constant 0 : i32
    return %c0_i32, %c0_i32_0 : i32, i32
  }
  func.func @transform_2(%arg0: i32) -> (i32, i32) {
    %c0_i32 = arith.constant 0 : i32
    %c0_i32_0 = arith.constant 0 : i32
    %c0_i32_1 = arith.constant 0 : i32
    return %c0_i32, %c0_i32_0 : i32, i32
  }
  func.func @transform_3(%arg0: i32) -> (i32, i32) {
    %c0_i32 = arith.constant 0 : i32
    %c0_i32_0 = arith.constant 0 : i32
    %c0_i32_1 = arith.constant 0 : i32
    return %c0_i32, %c0_i32_0 : i32, i32
  }
  func.func @transform_4(%arg0: i32) -> (i32, i32) {
    %c0_i32 = arith.constant 0 : i32
    %c0_i32_0 = arith.constant 0 : i32
    return %arg0, %c0_i32 : i32, i32
  }
}

module attributes {stable_mosaic.version = 11 : i64} {
  func.func @_linear_kernel(%arg0: i32, %arg1: memref<128x64xf32, #tpu.memory_space<vmem>>, %arg2: memref<64x128xf32, #tpu.memory_space<vmem>>, %arg3: memref<1x128xf32, #tpu.memory_space<vmem>>, %arg4: memref<1x128xf32, #tpu.memory_space<vmem>>, %arg5: memref<128x128xf32, #tpu.memory_space<vmem>>) attributes {dimension_semantics = [#tpu.dimension_semantics<parallel>], iteration_bounds = array<i64: 2>, scalar_prefetch = 0 : i64, scratch_operands = 0 : i64, tpu.core_type = #tpu.core_type<tc>, window_params = [{transform_indices = @transform_0, window_bounds = array<i64: 128, 64>}, {pipeline_mode = #tpu.pipeline_mode<synchronous>, transform_indices = @transform_1, window_bounds = array<i64: 64, 128>}, {pipeline_mode = #tpu.pipeline_mode<synchronous>, transform_indices = @transform_2, window_bounds = array<i64: 1, 128>}, {pipeline_mode = #tpu.pipeline_mode<synchronous>, transform_indices = @transform_3, window_bounds = array<i64: 1, 128>}, {transform_indices = @transform_4, window_bounds = array<i64: 128, 128>}]} {
    %c0 = arith.constant 0 : index
    %c0_0 = arith.constant 0 : index
    %0 = vector.load %arg1[%c0, %c0_0] : memref<128x64xf32, #tpu.memory_space<vmem>>, vector<128x64xf32>
    %c0_1 = arith.constant 0 : index
    %c0_2 = arith.constant 0 : index
    %1 = vector.load %arg2[%c0_1, %c0_2] : memref<64x128xf32, #tpu.memory_space<vmem>>, vector<64x128xf32>
    %cst = arith.constant dense<0.000000e+00> : vector<128x128xf32>
    %2 = tpu.matmul %0, %1, %cst {dimension_numbers = #tpu.dot_dimension_numbers<[1], [0], [0], [1], [0, 0, 1, 1], [], []>} : vector<128x64xf32>, vector<64x128xf32>, vector<128x128xf32> -> vector<128x128xf32>
    %c0_3 = arith.constant 0 : index
    %c0_4 = arith.constant 0 : index
    %3 = vector.load %arg3[%c0_3, %c0_4] : memref<1x128xf32, #tpu.memory_space<vmem>>, vector<1x128xf32>
    %4 = vector.broadcast %3 : vector<1x128xf32> to vector<128x128xf32>
    %5 = arith.mulf %2, %4 : vector<128x128xf32>
    %c0_5 = arith.constant 0 : index
    %c0_6 = arith.constant 0 : index
    %6 = vector.load %arg4[%c0_5, %c0_6] : memref<1x128xf32, #tpu.memory_space<vmem>>, vector<1x128xf32>
    %7 = vector.broadcast %6 : vector<1x128xf32> to vector<128x128xf32>
    %8 = arith.addf %5, %7 : vector<128x128xf32>
    %cst_7 = arith.constant 0.000000e+00 : f32
    %9 = vector.broadcast %cst_7 : f32 to vector<128x128xf32>
    %10 = arith.maximumf %8, %9 : vector<128x128xf32>
    %c0_8 = arith.constant 0 : index
    %c0_9 = arith.constant 0 : index
    %11 = vector.load %arg5[%c0_8, %c0_9] : memref<128x128xf32, #tpu.memory_space<vmem>>, vector<128x128xf32>
    tpu.vector_store %arg5[%c0_8, %c0_9], %10 {strides = array<i32>} : memref<128x128xf32, #tpu.memory_space<vmem>>, vector<128x128xf32>,
    return
  }
  func.func @transform_0(%arg0: i32) -> (i32, i32) {
    %c0_i32 = arith.constant 0 : i32
    %c0_i32_0 = arith.constant 0 : i32
    return %arg0, %c0_i32 : i32, i32
  }
  func.func @transform_1(%arg0: i32) -> (i32, i32) {
    %c0_i32 = arith.constant 0 : i32
    %c0_i32_0 = arith.constant 0 : i32
    %c0_i32_1 = arith.constant 0 : i32
    return %c0_i32, %c0_i32_0 : i32, i32
  }
  func.func @transform_2(%arg0: i32) -> (i32, i32) {
    %c0_i32 = arith.constant 0 : i32
    %c0_i32_0 = arith.constant 0 : i32
    %c0_i32_1 = arith.constant 0 : i32
    return %c0_i32, %c0_i32_0 : i32, i32
  }
  func.func @transform_3(%arg0: i32) -> (i32, i32) {
    %c0_i32 = arith.constant 0 : i32
    %c0_i32_0 = arith.constant 0 : i32
    %c0_i32_1 = arith.constant 0 : i32
    return %c0_i32, %c0_i32_0 : i32, i32
  }
  func.func @transform_4(%arg0: i32) -> (i32, i32) {
    %c0_i32 = arith.constant 0 : i32
    %c0_i32_0 = arith.constant 0 : i32
    return %arg0, %c0_i32 : i32, i32
  }
}

module attributes {stable_mosaic.version = 11 : i64} {
  func.func @_linear_kernel(%arg0: i32, %arg1: memref<128x128xf32, #tpu.memory_space<vmem>>, %arg2: memref<128x1024xf32, #tpu.memory_space<vmem>>, %arg3: memref<1x1024xf32, #tpu.memory_space<vmem>>, %arg4: memref<1x1024xf32, #tpu.memory_space<vmem>>, %arg5: memref<128x1024xf32, #tpu.memory_space<vmem>>) attributes {dimension_semantics = [#tpu.dimension_semantics<parallel>], iteration_bounds = array<i64: 2>, scalar_prefetch = 0 : i64, scratch_operands = 0 : i64, tpu.core_type = #tpu.core_type<tc>, window_params = [{transform_indices = @transform_0, window_bounds = array<i64: 128, 128>}, {pipeline_mode = #tpu.pipeline_mode<synchronous>, transform_indices = @transform_1, window_bounds = array<i64: 128, 1024>}, {pipeline_mode = #tpu.pipeline_mode<synchronous>, transform_indices = @transform_2, window_bounds = array<i64: 1, 1024>}, {pipeline_mode = #tpu.pipeline_mode<synchronous>, transform_indices = @transform_3, window_bounds = array<i64: 1, 1024>}, {transform_indices = @transform_4, window_bounds = array<i64: 128, 1024>}]} {
    %c0 = arith.constant 0 : index
    %c0_0 = arith.constant 0 : index
    %0 = vector.load %arg1[%c0, %c0_0] : memref<128x128xf32, #tpu.memory_space<vmem>>, vector<128x128xf32>
    %c0_1 = arith.constant 0 : index
    %c0_2 = arith.constant 0 : index
    %1 = vector.load %arg2[%c0_1, %c0_2] : memref<128x1024xf32, #tpu.memory_space<vmem>>, vector<128x1024xf32>
    %cst = arith.constant dense<0.000000e+00> : vector<128x1024xf32>
    %2 = tpu.matmul %0, %1, %cst {dimension_numbers = #tpu.dot_dimension_numbers<[1], [0], [0], [1], [0, 0, 1, 1], [], []>} : vector<128x128xf32>, vector<128x1024xf32>, vector<128x1024xf32> -> vector<128x1024xf32>
    %c0_3 = arith.constant 0 : index
    %c0_4 = arith.constant 0 : index
    %3 = vector.load %arg3[%c0_3, %c0_4] : memref<1x1024xf32, #tpu.memory_space<vmem>>, vector<1x1024xf32>
    %4 = vector.broadcast %3 : vector<1x1024xf32> to vector<128x1024xf32>
    %5 = arith.mulf %2, %4 : vector<128x1024xf32>
    %c0_5 = arith.constant 0 : index
    %c0_6 = arith.constant 0 : index
    %6 = vector.load %arg4[%c0_5, %c0_6] : memref<1x1024xf32, #tpu.memory_space<vmem>>, vector<1x1024xf32>
    %7 = vector.broadcast %6 : vector<1x1024xf32> to vector<128x1024xf32>
    %8 = arith.addf %5, %7 : vector<128x1024xf32>
    %cst_7 = arith.constant 0.000000e+00 : f32
    %9 = vector.broadcast %cst_7 : f32 to vector<128x1024xf32>
    %10 = arith.maximumf %8, %9 : vector<128x1024xf32>
    %c0_8 = arith.constant 0 : index
    %c0_9 = arith.constant 0 : index
    %11 = vector.load %arg5[%c0_8, %c0_9] : memref<128x1024xf32, #tpu.memory_space<vmem>>, vector<128x1024xf32>
    tpu.vector_store %arg5[%c0_8, %c0_9], %10 {strides = array<i32>} : memref<128x1024xf32, #tpu.memory_space<vmem>>, vector<128x1024xf32>,
    return
  }
  func.func @transform_0(%arg0: i32) -> (i32, i32) {
    %c0_i32 = arith.constant 0 : i32
    %c0_i32_0 = arith.constant 0 : i32
    return %arg0, %c0_i32 : i32, i32
  }
  func.func @transform_1(%arg0: i32) -> (i32, i32) {
    %c0_i32 = arith.constant 0 : i32
    %c0_i32_0 = arith.constant 0 : i32
    %c0_i32_1 = arith.constant 0 : i32
    return %c0_i32, %c0_i32_0 : i32, i32
  }
  func.func @transform_2(%arg0: i32) -> (i32, i32) {
    %c0_i32 = arith.constant 0 : i32
    %c0_i32_0 = arith.constant 0 : i32
    %c0_i32_1 = arith.constant 0 : i32
    return %c0_i32, %c0_i32_0 : i32, i32
  }
  func.func @transform_3(%arg0: i32) -> (i32, i32) {
    %c0_i32 = arith.constant 0 : i32
    %c0_i32_0 = arith.constant 0 : i32
    %c0_i32_1 = arith.constant 0 : i32
    return %c0_i32, %c0_i32_0 : i32, i32
  }
  func.func @transform_4(%arg0: i32) -> (i32, i32) {
    %c0_i32 = arith.constant 0 : i32
    %c0_i32_0 = arith.constant 0 : i32
    return %arg0, %c0_i32 : i32, i32
  }
}

module attributes {stable_mosaic.version = 11 : i64} {
  func.func @_maxpool_kernel(%arg0: i32, %arg1: memref<2x128x512xf32, #tpu.memory_space<vmem>>, %arg2: memref<2x512xf32, #tpu.memory_space<vmem>>) attributes {dimension_semantics = [#tpu.dimension_semantics<parallel>], iteration_bounds = array<i64: 2>, scalar_prefetch = 0 : i64, scratch_operands = 0 : i64, tpu.core_type = #tpu.core_type<tc>, window_params = [{transform_indices = @transform_0, window_bounds = array<i64: 2, 128, 512>}, {transform_indices = @transform_1, window_bounds = array<i64: 2, 512>}]} {
    %c0 = arith.constant 0 : index
    %c0_0 = arith.constant 0 : index
    %c0_1 = arith.constant 0 : index
    %0 = vector.load %arg1[%c0, %c0_0, %c0_1] : memref<2x128x512xf32, #tpu.memory_space<vmem>>, vector<2x128x512xf32>
    %cst = arith.constant dense<0xFF800000> : vector<2x512xf32>
    %1 = vector.multi_reduction <maximumf>, %0, %cst [1] : vector<2x128x512xf32> to vector<2x512xf32>
    %c0_2 = arith.constant 0 : index
    %c0_3 = arith.constant 0 : index
    %2 = vector.load %arg2[%c0_2, %c0_3] : memref<2x512xf32, #tpu.memory_space<vmem>>, vector<2x512xf32>
    tpu.vector_store %arg2[%c0_2, %c0_3], %1 {strides = array<i32>} : memref<2x512xf32, #tpu.memory_space<vmem>>, vector<2x512xf32>,
    return
  }
  func.func @transform_0(%arg0: i32) -> (i32, i32, i32) {
    %c0_i32 = arith.constant 0 : i32
    %c0_i32_0 = arith.constant 0 : i32
    %c0_i32_1 = arith.constant 0 : i32
    return %c0_i32, %c0_i32_0, %arg0 : i32, i32, i32
  }
  func.func @transform_1(%arg0: i32) -> (i32, i32) {
    %c0_i32 = arith.constant 0 : i32
    %c0_i32_0 = arith.constant 0 : i32
    return %c0_i32, %arg0 : i32, i32
  }
}

module attributes {stable_mosaic.version = 11 : i64} {
  func.func @_linear_kernel(%arg0: i32, %arg1: memref<2x1024xf32, #tpu.memory_space<vmem>>, %arg2: memref<1024x512xf32, #tpu.memory_space<vmem>>, %arg3: memref<1x512xf32, #tpu.memory_space<vmem>>, %arg4: memref<1x512xf32, #tpu.memory_space<vmem>>, %arg5: memref<2x512xf32, #tpu.memory_space<vmem>>) attributes {dimension_semantics = [#tpu.dimension_semantics<parallel>], iteration_bounds = array<i64: 1>, scalar_prefetch = 0 : i64, scratch_operands = 0 : i64, tpu.core_type = #tpu.core_type<tc>, window_params = [{transform_indices = @transform_0, window_bounds = array<i64: 2, 1024>}, {pipeline_mode = #tpu.pipeline_mode<synchronous>, transform_indices = @transform_1, window_bounds = array<i64: 1024, 512>}, {pipeline_mode = #tpu.pipeline_mode<synchronous>, transform_indices = @transform_2, window_bounds = array<i64: 1, 512>}, {pipeline_mode = #tpu.pipeline_mode<synchronous>, transform_indices = @transform_3, window_bounds = array<i64: 1, 512>}, {transform_indices = @transform_4, window_bounds = array<i64: 2, 512>}]} {
    %c0 = arith.constant 0 : index
    %c0_0 = arith.constant 0 : index
    %0 = vector.load %arg1[%c0, %c0_0] : memref<2x1024xf32, #tpu.memory_space<vmem>>, vector<2x1024xf32>
    %c0_1 = arith.constant 0 : index
    %c0_2 = arith.constant 0 : index
    %1 = vector.load %arg2[%c0_1, %c0_2] : memref<1024x512xf32, #tpu.memory_space<vmem>>, vector<1024x512xf32>
    %cst = arith.constant dense<0.000000e+00> : vector<2x512xf32>
    %2 = tpu.matmul %0, %1, %cst {dimension_numbers = #tpu.dot_dimension_numbers<[1], [0], [0], [1], [0, 0, 1, 1], [], []>} : vector<2x1024xf32>, vector<1024x512xf32>, vector<2x512xf32> -> vector<2x512xf32>
    %c0_3 = arith.constant 0 : index
    %c0_4 = arith.constant 0 : index
    %3 = vector.load %arg3[%c0_3, %c0_4] : memref<1x512xf32, #tpu.memory_space<vmem>>, vector<1x512xf32>
    %4 = vector.broadcast %3 : vector<1x512xf32> to vector<2x512xf32>
    %5 = arith.mulf %2, %4 : vector<2x512xf32>
    %c0_5 = arith.constant 0 : index
    %c0_6 = arith.constant 0 : index
    %6 = vector.load %arg4[%c0_5, %c0_6] : memref<1x512xf32, #tpu.memory_space<vmem>>, vector<1x512xf32>
    %7 = vector.broadcast %6 : vector<1x512xf32> to vector<2x512xf32>
    %8 = arith.addf %5, %7 : vector<2x512xf32>
    %cst_7 = arith.constant 0.000000e+00 : f32
    %9 = vector.broadcast %cst_7 : f32 to vector<2x512xf32>
    %10 = arith.maximumf %8, %9 : vector<2x512xf32>
    %c0_8 = arith.constant 0 : index
    %c0_9 = arith.constant 0 : index
    %11 = vector.load %arg5[%c0_8, %c0_9] : memref<2x512xf32, #tpu.memory_space<vmem>>, vector<2x512xf32>
    tpu.vector_store %arg5[%c0_8, %c0_9], %10 {strides = array<i32>} : memref<2x512xf32, #tpu.memory_space<vmem>>, vector<2x512xf32>,
    return
  }
  func.func @transform_0(%arg0: i32) -> (i32, i32) {
    %c0_i32 = arith.constant 0 : i32
    %c0_i32_0 = arith.constant 0 : i32
    return %arg0, %c0_i32 : i32, i32
  }
  func.func @transform_1(%arg0: i32) -> (i32, i32) {
    %c0_i32 = arith.constant 0 : i32
    %c0_i32_0 = arith.constant 0 : i32
    %c0_i32_1 = arith.constant 0 : i32
    return %c0_i32, %c0_i32_0 : i32, i32
  }
  func.func @transform_2(%arg0: i32) -> (i32, i32) {
    %c0_i32 = arith.constant 0 : i32
    %c0_i32_0 = arith.constant 0 : i32
    %c0_i32_1 = arith.constant 0 : i32
    return %c0_i32, %c0_i32_0 : i32, i32
  }
  func.func @transform_3(%arg0: i32) -> (i32, i32) {
    %c0_i32 = arith.constant 0 : i32
    %c0_i32_0 = arith.constant 0 : i32
    %c0_i32_1 = arith.constant 0 : i32
    return %c0_i32, %c0_i32_0 : i32, i32
  }
  func.func @transform_4(%arg0: i32) -> (i32, i32) {
    %c0_i32 = arith.constant 0 : i32
    %c0_i32_0 = arith.constant 0 : i32
    return %arg0, %c0_i32 : i32, i32
  }
}

module attributes {stable_mosaic.version = 11 : i64} {
  func.func @_linear_kernel(%arg0: i32, %arg1: memref<2x512xf32, #tpu.memory_space<vmem>>, %arg2: memref<512x256xf32, #tpu.memory_space<vmem>>, %arg3: memref<1x256xf32, #tpu.memory_space<vmem>>, %arg4: memref<1x256xf32, #tpu.memory_space<vmem>>, %arg5: memref<2x256xf32, #tpu.memory_space<vmem>>) attributes {dimension_semantics = [#tpu.dimension_semantics<parallel>], iteration_bounds = array<i64: 1>, scalar_prefetch = 0 : i64, scratch_operands = 0 : i64, tpu.core_type = #tpu.core_type<tc>, window_params = [{transform_indices = @transform_0, window_bounds = array<i64: 2, 512>}, {pipeline_mode = #tpu.pipeline_mode<synchronous>, transform_indices = @transform_1, window_bounds = array<i64: 512, 256>}, {pipeline_mode = #tpu.pipeline_mode<synchronous>, transform_indices = @transform_2, window_bounds = array<i64: 1, 256>}, {pipeline_mode = #tpu.pipeline_mode<synchronous>, transform_indices = @transform_3, window_bounds = array<i64: 1, 256>}, {transform_indices = @transform_4, window_bounds = array<i64: 2, 256>}]} {
    %c0 = arith.constant 0 : index
    %c0_0 = arith.constant 0 : index
    %0 = vector.load %arg1[%c0, %c0_0] : memref<2x512xf32, #tpu.memory_space<vmem>>, vector<2x512xf32>
    %c0_1 = arith.constant 0 : index
    %c0_2 = arith.constant 0 : index
    %1 = vector.load %arg2[%c0_1, %c0_2] : memref<512x256xf32, #tpu.memory_space<vmem>>, vector<512x256xf32>
    %cst = arith.constant dense<0.000000e+00> : vector<2x256xf32>
    %2 = tpu.matmul %0, %1, %cst {dimension_numbers = #tpu.dot_dimension_numbers<[1], [0], [0], [1], [0, 0, 1, 1], [], []>} : vector<2x512xf32>, vector<512x256xf32>, vector<2x256xf32> -> vector<2x256xf32>
    %c0_3 = arith.constant 0 : index
    %c0_4 = arith.constant 0 : index
    %3 = vector.load %arg3[%c0_3, %c0_4] : memref<1x256xf32, #tpu.memory_space<vmem>>, vector<1x256xf32>
    %4 = vector.broadcast %3 : vector<1x256xf32> to vector<2x256xf32>
    %5 = arith.mulf %2, %4 : vector<2x256xf32>
    %c0_5 = arith.constant 0 : index
    %c0_6 = arith.constant 0 : index
    %6 = vector.load %arg4[%c0_5, %c0_6] : memref<1x256xf32, #tpu.memory_space<vmem>>, vector<1x256xf32>
    %7 = vector.broadcast %6 : vector<1x256xf32> to vector<2x256xf32>
    %8 = arith.addf %5, %7 : vector<2x256xf32>
    %cst_7 = arith.constant 0.000000e+00 : f32
    %9 = vector.broadcast %cst_7 : f32 to vector<2x256xf32>
    %10 = arith.maximumf %8, %9 : vector<2x256xf32>
    %c0_8 = arith.constant 0 : index
    %c0_9 = arith.constant 0 : index
    %11 = vector.load %arg5[%c0_8, %c0_9] : memref<2x256xf32, #tpu.memory_space<vmem>>, vector<2x256xf32>
    tpu.vector_store %arg5[%c0_8, %c0_9], %10 {strides = array<i32>} : memref<2x256xf32, #tpu.memory_space<vmem>>, vector<2x256xf32>,
    return
  }
  func.func @transform_0(%arg0: i32) -> (i32, i32) {
    %c0_i32 = arith.constant 0 : i32
    %c0_i32_0 = arith.constant 0 : i32
    return %arg0, %c0_i32 : i32, i32
  }
  func.func @transform_1(%arg0: i32) -> (i32, i32) {
    %c0_i32 = arith.constant 0 : i32
    %c0_i32_0 = arith.constant 0 : i32
    %c0_i32_1 = arith.constant 0 : i32
    return %c0_i32, %c0_i32_0 : i32, i32
  }
  func.func @transform_2(%arg0: i32) -> (i32, i32) {
    %c0_i32 = arith.constant 0 : i32
    %c0_i32_0 = arith.constant 0 : i32
    %c0_i32_1 = arith.constant 0 : i32
    return %c0_i32, %c0_i32_0 : i32, i32
  }
  func.func @transform_3(%arg0: i32) -> (i32, i32) {
    %c0_i32 = arith.constant 0 : i32
    %c0_i32_0 = arith.constant 0 : i32
    %c0_i32_1 = arith.constant 0 : i32
    return %c0_i32, %c0_i32_0 : i32, i32
  }
  func.func @transform_4(%arg0: i32) -> (i32, i32) {
    %c0_i32 = arith.constant 0 : i32
    %c0_i32_0 = arith.constant 0 : i32
    return %arg0, %c0_i32 : i32, i32
  }
}

module attributes {stable_mosaic.version = 11 : i64} {
  func.func @_linear_kernel(%arg0: i32, %arg1: memref<2x256xf32, #tpu.memory_space<vmem>>, %arg2: memref<256x9xf32, #tpu.memory_space<vmem>>, %arg3: memref<1x9xf32, #tpu.memory_space<vmem>>, %arg4: memref<1x9xf32, #tpu.memory_space<vmem>>, %arg5: memref<2x9xf32, #tpu.memory_space<vmem>>) attributes {dimension_semantics = [#tpu.dimension_semantics<parallel>], iteration_bounds = array<i64: 1>, scalar_prefetch = 0 : i64, scratch_operands = 0 : i64, tpu.core_type = #tpu.core_type<tc>, window_params = [{transform_indices = @transform_0, window_bounds = array<i64: 2, 256>}, {pipeline_mode = #tpu.pipeline_mode<synchronous>, transform_indices = @transform_1, window_bounds = array<i64: 256, 9>}, {pipeline_mode = #tpu.pipeline_mode<synchronous>, transform_indices = @transform_2, window_bounds = array<i64: 1, 9>}, {pipeline_mode = #tpu.pipeline_mode<synchronous>, transform_indices = @transform_3, window_bounds = array<i64: 1, 9>}, {transform_indices = @transform_4, window_bounds = array<i64: 2, 9>}]} {
    %c0 = arith.constant 0 : index
    %c0_0 = arith.constant 0 : index
    %0 = vector.load %arg1[%c0, %c0_0] : memref<2x256xf32, #tpu.memory_space<vmem>>, vector<2x256xf32>
    %c0_1 = arith.constant 0 : index
    %c0_2 = arith.constant 0 : index
    %1 = vector.load %arg2[%c0_1, %c0_2] : memref<256x9xf32, #tpu.memory_space<vmem>>, vector<256x9xf32>
    %cst = arith.constant dense<0.000000e+00> : vector<2x9xf32>
    %2 = tpu.matmul %0, %1, %cst {dimension_numbers = #tpu.dot_dimension_numbers<[1], [0], [0], [1], [0, 0, 1, 1], [], []>} : vector<2x256xf32>, vector<256x9xf32>, vector<2x9xf32> -> vector<2x9xf32>
    %c0_3 = arith.constant 0 : index
    %c0_4 = arith.constant 0 : index
    %3 = vector.load %arg3[%c0_3, %c0_4] : memref<1x9xf32, #tpu.memory_space<vmem>>, vector<1x9xf32>
    %4 = vector.broadcast %3 : vector<1x9xf32> to vector<2x9xf32>
    %5 = arith.mulf %2, %4 : vector<2x9xf32>
    %c0_5 = arith.constant 0 : index
    %c0_6 = arith.constant 0 : index
    %6 = vector.load %arg4[%c0_5, %c0_6] : memref<1x9xf32, #tpu.memory_space<vmem>>, vector<1x9xf32>
    %7 = vector.broadcast %6 : vector<1x9xf32> to vector<2x9xf32>
    %8 = arith.addf %5, %7 : vector<2x9xf32>
    %c0_7 = arith.constant 0 : index
    %c0_8 = arith.constant 0 : index
    %9 = vector.load %arg5[%c0_7, %c0_8] : memref<2x9xf32, #tpu.memory_space<vmem>>, vector<2x9xf32>
    tpu.vector_store %arg5[%c0_7, %c0_8], %8 {strides = array<i32>} : memref<2x9xf32, #tpu.memory_space<vmem>>, vector<2x9xf32>,
    return
  }
  func.func @transform_0(%arg0: i32) -> (i32, i32) {
    %c0_i32 = arith.constant 0 : i32
    %c0_i32_0 = arith.constant 0 : i32
    return %arg0, %c0_i32 : i32, i32
  }
  func.func @transform_1(%arg0: i32) -> (i32, i32) {
    %c0_i32 = arith.constant 0 : i32
    %c0_i32_0 = arith.constant 0 : i32
    %c0_i32_1 = arith.constant 0 : i32
    return %c0_i32, %c0_i32_0 : i32, i32
  }
  func.func @transform_2(%arg0: i32) -> (i32, i32) {
    %c0_i32 = arith.constant 0 : i32
    %c0_i32_0 = arith.constant 0 : i32
    %c0_i32_1 = arith.constant 0 : i32
    return %c0_i32, %c0_i32_0 : i32, i32
  }
  func.func @transform_3(%arg0: i32) -> (i32, i32) {
    %c0_i32 = arith.constant 0 : i32
    %c0_i32_0 = arith.constant 0 : i32
    %c0_i32_1 = arith.constant 0 : i32
    return %c0_i32, %c0_i32_0 : i32, i32
  }
  func.func @transform_4(%arg0: i32) -> (i32, i32) {
    %c0_i32 = arith.constant 0 : i32
    %c0_i32_0 = arith.constant 0 : i32
    return %arg0, %c0_i32 : i32, i32
  }
}

module attributes {stable_mosaic.version = 11 : i64} {
  func.func @_bmm_kernel(%arg0: i32, %arg1: memref<1x128x3xf32, #tpu.memory_space<vmem>>, %arg2: memref<1x3x3xf32, #tpu.memory_space<vmem>>, %arg3: memref<1x128x3xf32, #tpu.memory_space<vmem>>) attributes {dimension_semantics = [#tpu.dimension_semantics<parallel>], iteration_bounds = array<i64: 2>, scalar_prefetch = 0 : i64, scratch_operands = 0 : i64, tpu.core_type = #tpu.core_type<tc>, window_params = [{transform_indices = @transform_0, window_bounds = array<i64: 1, 128, 3>}, {transform_indices = @transform_1, window_bounds = array<i64: 1, 3, 3>}, {transform_indices = @transform_2, window_bounds = array<i64: 1, 128, 3>}]} {
    %c0 = arith.constant 0 : index
    %c0_0 = arith.constant 0 : index
    %c0_1 = arith.constant 0 : index
    %0 = vector.load %arg1[%c0, %c0_0, %c0_1] : memref<1x128x3xf32, #tpu.memory_space<vmem>>, vector<1x128x3xf32>
    %1 = vector.shape_cast %0 : vector<1x128x3xf32> to vector<128x3xf32>
    %c0_2 = arith.constant 0 : index
    %c0_3 = arith.constant 0 : index
    %c0_4 = arith.constant 0 : index
    %2 = vector.load %arg2[%c0_2, %c0_3, %c0_4] : memref<1x3x3xf32, #tpu.memory_space<vmem>>, vector<1x3x3xf32>
    %3 = vector.shape_cast %2 : vector<1x3x3xf32> to vector<3x3xf32>
    %cst = arith.constant dense<0.000000e+00> : vector<128x3xf32>
    %4 = tpu.matmul %1, %3, %cst {dimension_numbers = #tpu.dot_dimension_numbers<[1], [0], [0], [1], [0, 0, 1, 1], [], []>} : vector<128x3xf32>, vector<3x3xf32>, vector<128x3xf32> -> vector<128x3xf32>
    %c0_5 = arith.constant 0 : index
    %c0_6 = arith.constant 0 : index
    %c0_7 = arith.constant 0 : index
    %5 = vector.load %arg3[%c0_5, %c0_6, %c0_7] : memref<1x128x3xf32, #tpu.memory_space<vmem>>, vector<1x128x3xf32>
    %6 = vector.shape_cast %5 : vector<1x128x3xf32> to vector<128x3xf32>
    %7 = vector.shape_cast %4 : vector<128x3xf32> to vector<1x128x3xf32>
    tpu.vector_store %arg3[%c0_5, %c0_6, %c0_7], %7 {strides = array<i32>} : memref<1x128x3xf32, #tpu.memory_space<vmem>>, vector<1x128x3xf32>,
    return
  }
  func.func @transform_0(%arg0: i32) -> (i32, i32, i32) {
    %c0_i32 = arith.constant 0 : i32
    %c0_i32_0 = arith.constant 0 : i32
    %c0_i32_1 = arith.constant 0 : i32
    return %arg0, %c0_i32, %c0_i32_0 : i32, i32, i32
  }
  func.func @transform_1(%arg0: i32) -> (i32, i32, i32) {
    %c0_i32 = arith.constant 0 : i32
    %c0_i32_0 = arith.constant 0 : i32
    %c0_i32_1 = arith.constant 0 : i32
    return %arg0, %c0_i32, %c0_i32_0 : i32, i32, i32
  }
  func.func @transform_2(%arg0: i32) -> (i32, i32, i32) {
    %c0_i32 = arith.constant 0 : i32
    %c0_i32_0 = arith.constant 0 : i32
    %c0_i32_1 = arith.constant 0 : i32
    return %arg0, %c0_i32, %c0_i32_0 : i32, i32, i32
  }
}

module attributes {stable_mosaic.version = 11 : i64} {
  func.func @_linear_kernel(%arg0: i32, %arg1: memref<128x3xf32, #tpu.memory_space<vmem>>, %arg2: memref<3x64xf32, #tpu.memory_space<vmem>>, %arg3: memref<1x64xf32, #tpu.memory_space<vmem>>, %arg4: memref<1x64xf32, #tpu.memory_space<vmem>>, %arg5: memref<128x64xf32, #tpu.memory_space<vmem>>) attributes {dimension_semantics = [#tpu.dimension_semantics<parallel>], iteration_bounds = array<i64: 2>, scalar_prefetch = 0 : i64, scratch_operands = 0 : i64, tpu.core_type = #tpu.core_type<tc>, window_params = [{transform_indices = @transform_0, window_bounds = array<i64: 128, 3>}, {pipeline_mode = #tpu.pipeline_mode<synchronous>, transform_indices = @transform_1, window_bounds = array<i64: 3, 64>}, {pipeline_mode = #tpu.pipeline_mode<synchronous>, transform_indices = @transform_2, window_bounds = array<i64: 1, 64>}, {pipeline_mode = #tpu.pipeline_mode<synchronous>, transform_indices = @transform_3, window_bounds = array<i64: 1, 64>}, {transform_indices = @transform_4, window_bounds = array<i64: 128, 64>}]} {
    %c0 = arith.constant 0 : index
    %c0_0 = arith.constant 0 : index
    %0 = vector.load %arg1[%c0, %c0_0] : memref<128x3xf32, #tpu.memory_space<vmem>>, vector<128x3xf32>
    %c0_1 = arith.constant 0 : index
    %c0_2 = arith.constant 0 : index
    %1 = vector.load %arg2[%c0_1, %c0_2] : memref<3x64xf32, #tpu.memory_space<vmem>>, vector<3x64xf32>
    %cst = arith.constant dense<0.000000e+00> : vector<128x64xf32>
    %2 = tpu.matmul %0, %1, %cst {dimension_numbers = #tpu.dot_dimension_numbers<[1], [0], [0], [1], [0, 0, 1, 1], [], []>} : vector<128x3xf32>, vector<3x64xf32>, vector<128x64xf32> -> vector<128x64xf32>
    %c0_3 = arith.constant 0 : index
    %c0_4 = arith.constant 0 : index
    %3 = vector.load %arg3[%c0_3, %c0_4] : memref<1x64xf32, #tpu.memory_space<vmem>>, vector<1x64xf32>
    %4 = vector.broadcast %3 : vector<1x64xf32> to vector<128x64xf32>
    %5 = arith.mulf %2, %4 : vector<128x64xf32>
    %c0_5 = arith.constant 0 : index
    %c0_6 = arith.constant 0 : index
    %6 = vector.load %arg4[%c0_5, %c0_6] : memref<1x64xf32, #tpu.memory_space<vmem>>, vector<1x64xf32>
    %7 = vector.broadcast %6 : vector<1x64xf32> to vector<128x64xf32>
    %8 = arith.addf %5, %7 : vector<128x64xf32>
    %cst_7 = arith.constant 0.000000e+00 : f32
    %9 = vector.broadcast %cst_7 : f32 to vector<128x64xf32>
    %10 = arith.maximumf %8, %9 : vector<128x64xf32>
    %c0_8 = arith.constant 0 : index
    %c0_9 = arith.constant 0 : index
    %11 = vector.load %arg5[%c0_8, %c0_9] : memref<128x64xf32, #tpu.memory_space<vmem>>, vector<128x64xf32>
    tpu.vector_store %arg5[%c0_8, %c0_9], %10 {strides = array<i32>} : memref<128x64xf32, #tpu.memory_space<vmem>>, vector<128x64xf32>,
    return
  }
  func.func @transform_0(%arg0: i32) -> (i32, i32) {
    %c0_i32 = arith.constant 0 : i32
    %c0_i32_0 = arith.constant 0 : i32
    return %arg0, %c0_i32 : i32, i32
  }
  func.func @transform_1(%arg0: i32) -> (i32, i32) {
    %c0_i32 = arith.constant 0 : i32
    %c0_i32_0 = arith.constant 0 : i32
    %c0_i32_1 = arith.constant 0 : i32
    return %c0_i32, %c0_i32_0 : i32, i32
  }
  func.func @transform_2(%arg0: i32) -> (i32, i32) {
    %c0_i32 = arith.constant 0 : i32
    %c0_i32_0 = arith.constant 0 : i32
    %c0_i32_1 = arith.constant 0 : i32
    return %c0_i32, %c0_i32_0 : i32, i32
  }
  func.func @transform_3(%arg0: i32) -> (i32, i32) {
    %c0_i32 = arith.constant 0 : i32
    %c0_i32_0 = arith.constant 0 : i32
    %c0_i32_1 = arith.constant 0 : i32
    return %c0_i32, %c0_i32_0 : i32, i32
  }
  func.func @transform_4(%arg0: i32) -> (i32, i32) {
    %c0_i32 = arith.constant 0 : i32
    %c0_i32_0 = arith.constant 0 : i32
    return %arg0, %c0_i32 : i32, i32
  }
}

module attributes {stable_mosaic.version = 11 : i64} {
  func.func @_linear_kernel(%arg0: i32, %arg1: memref<128x64xf32, #tpu.memory_space<vmem>>, %arg2: memref<64x64xf32, #tpu.memory_space<vmem>>, %arg3: memref<1x64xf32, #tpu.memory_space<vmem>>, %arg4: memref<1x64xf32, #tpu.memory_space<vmem>>, %arg5: memref<128x64xf32, #tpu.memory_space<vmem>>) attributes {dimension_semantics = [#tpu.dimension_semantics<parallel>], iteration_bounds = array<i64: 2>, scalar_prefetch = 0 : i64, scratch_operands = 0 : i64, tpu.core_type = #tpu.core_type<tc>, window_params = [{transform_indices = @transform_0, window_bounds = array<i64: 128, 64>}, {pipeline_mode = #tpu.pipeline_mode<synchronous>, transform_indices = @transform_1, window_bounds = array<i64: 64, 64>}, {pipeline_mode = #tpu.pipeline_mode<synchronous>, transform_indices = @transform_2, window_bounds = array<i64: 1, 64>}, {pipeline_mode = #tpu.pipeline_mode<synchronous>, transform_indices = @transform_3, window_bounds = array<i64: 1, 64>}, {transform_indices = @transform_4, window_bounds = array<i64: 128, 64>}]} {
    %c0 = arith.constant 0 : index
    %c0_0 = arith.constant 0 : index
    %0 = vector.load %arg1[%c0, %c0_0] : memref<128x64xf32, #tpu.memory_space<vmem>>, vector<128x64xf32>
    %c0_1 = arith.constant 0 : index
    %c0_2 = arith.constant 0 : index
    %1 = vector.load %arg2[%c0_1, %c0_2] : memref<64x64xf32, #tpu.memory_space<vmem>>, vector<64x64xf32>
    %cst = arith.constant dense<0.000000e+00> : vector<128x64xf32>
    %2 = tpu.matmul %0, %1, %cst {dimension_numbers = #tpu.dot_dimension_numbers<[1], [0], [0], [1], [0, 0, 1, 1], [], []>} : vector<128x64xf32>, vector<64x64xf32>, vector<128x64xf32> -> vector<128x64xf32>
    %c0_3 = arith.constant 0 : index
    %c0_4 = arith.constant 0 : index
    %3 = vector.load %arg3[%c0_3, %c0_4] : memref<1x64xf32, #tpu.memory_space<vmem>>, vector<1x64xf32>
    %4 = vector.broadcast %3 : vector<1x64xf32> to vector<128x64xf32>
    %5 = arith.mulf %2, %4 : vector<128x64xf32>
    %c0_5 = arith.constant 0 : index
    %c0_6 = arith.constant 0 : index
    %6 = vector.load %arg4[%c0_5, %c0_6] : memref<1x64xf32, #tpu.memory_space<vmem>>, vector<1x64xf32>
    %7 = vector.broadcast %6 : vector<1x64xf32> to vector<128x64xf32>
    %8 = arith.addf %5, %7 : vector<128x64xf32>
    %cst_7 = arith.constant 0.000000e+00 : f32
    %9 = vector.broadcast %cst_7 : f32 to vector<128x64xf32>
    %10 = arith.maximumf %8, %9 : vector<128x64xf32>
    %c0_8 = arith.constant 0 : index
    %c0_9 = arith.constant 0 : index
    %11 = vector.load %arg5[%c0_8, %c0_9] : memref<128x64xf32, #tpu.memory_space<vmem>>, vector<128x64xf32>
    tpu.vector_store %arg5[%c0_8, %c0_9], %10 {strides = array<i32>} : memref<128x64xf32, #tpu.memory_space<vmem>>, vector<128x64xf32>,
    return
  }
  func.func @transform_0(%arg0: i32) -> (i32, i32) {
    %c0_i32 = arith.constant 0 : i32
    %c0_i32_0 = arith.constant 0 : i32
    return %arg0, %c0_i32 : i32, i32
  }
  func.func @transform_1(%arg0: i32) -> (i32, i32) {
    %c0_i32 = arith.constant 0 : i32
    %c0_i32_0 = arith.constant 0 : i32
    %c0_i32_1 = arith.constant 0 : i32
    return %c0_i32, %c0_i32_0 : i32, i32
  }
  func.func @transform_2(%arg0: i32) -> (i32, i32) {
    %c0_i32 = arith.constant 0 : i32
    %c0_i32_0 = arith.constant 0 : i32
    %c0_i32_1 = arith.constant 0 : i32
    return %c0_i32, %c0_i32_0 : i32, i32
  }
  func.func @transform_3(%arg0: i32) -> (i32, i32) {
    %c0_i32 = arith.constant 0 : i32
    %c0_i32_0 = arith.constant 0 : i32
    %c0_i32_1 = arith.constant 0 : i32
    return %c0_i32, %c0_i32_0 : i32, i32
  }
  func.func @transform_4(%arg0: i32) -> (i32, i32) {
    %c0_i32 = arith.constant 0 : i32
    %c0_i32_0 = arith.constant 0 : i32
    return %arg0, %c0_i32 : i32, i32
  }
}

module attributes {stable_mosaic.version = 11 : i64} {
  func.func @_gem_kernel(%arg0: i32, %arg1: memref<1xf32, #tpu.memory_space<smem>>, %arg2: memref<2x128x64xf32, #tpu.memory_space<vmem>>, %arg3: memref<2x64xf32, #tpu.memory_space<vmem>>) attributes {dimension_semantics = [#tpu.dimension_semantics<parallel>], iteration_bounds = array<i64: 1>, scalar_prefetch = 0 : i64, scratch_operands = 0 : i64, tpu.core_type = #tpu.core_type<tc>, window_params = [{transform_indices = @transform_0, window_bounds = array<i64: 1>}, {transform_indices = @transform_1, window_bounds = array<i64: 2, 128, 64>}, {transform_indices = @transform_2, window_bounds = array<i64: 2, 64>}]} {
    %c0 = arith.constant 0 : index
    %0 = memref.load %arg1[%c0] : memref<1xf32, #tpu.memory_space<smem>>
    %c0_0 = arith.constant 0 : index
    %c0_1 = arith.constant 0 : index
    %c0_2 = arith.constant 0 : index
    %1 = vector.load %arg2[%c0_0, %c0_1, %c0_2] : memref<2x128x64xf32, #tpu.memory_space<vmem>>, vector<2x128x64xf32>
    %cst = arith.constant 9.99999997E-7 : f32
    %2 = vector.broadcast %cst : f32 to vector<2x128x64xf32>
    %3 = arith.maximumf %1, %2 : vector<2x128x64xf32>
    %4 = math.log %3 : vector<2x128x64xf32>
    %5 = vector.broadcast %0 : f32 to vector<2x128x64xf32>
    %6 = arith.mulf %5, %4 : vector<2x128x64xf32>
    %7 = math.exp %6 : vector<2x128x64xf32>
    %cst_3 = arith.constant dense<0.000000e+00> : vector<2x64xf32>
    %8 = vector.multi_reduction <add>, %7, %cst_3 [1] : vector<2x128x64xf32> to vector<2x64xf32>
    %cst_4 = arith.constant 1.280000e+02 : f32
    %9 = vector.broadcast %cst_4 : f32 to vector<2x64xf32>
    %10 = arith.divf %8, %9 : vector<2x64xf32>
    %11 = math.log %10 : vector<2x64xf32>
    %12 = vector.broadcast %0 : f32 to vector<2x64xf32>
    %13 = arith.divf %11, %12 : vector<2x64xf32>
    %14 = math.exp %13 : vector<2x64xf32>
    %c0_5 = arith.constant 0 : index
    %c0_6 = arith.constant 0 : index
    %15 = vector.load %arg3[%c0_5, %c0_6] : memref<2x64xf32, #tpu.memory_space<vmem>>, vector<2x64xf32>
    tpu.vector_store %arg3[%c0_5, %c0_6], %14 {strides = array<i32>} : memref<2x64xf32, #tpu.memory_space<vmem>>, vector<2x64xf32>,
    return
  }
  func.func @transform_0(%arg0: i32) -> i32 {
    %c0_i32 = arith.constant 0 : i32
    %c0_i32_0 = arith.constant 0 : i32
    return %c0_i32 : i32
  }
  func.func @transform_1(%arg0: i32) -> (i32, i32, i32) {
    %c0_i32 = arith.constant 0 : i32
    %c0_i32_0 = arith.constant 0 : i32
    %c0_i32_1 = arith.constant 0 : i32
    return %c0_i32, %c0_i32_0, %arg0 : i32, i32, i32
  }
  func.func @transform_2(%arg0: i32) -> (i32, i32) {
    %c0_i32 = arith.constant 0 : i32
    %c0_i32_0 = arith.constant 0 : i32
    return %c0_i32, %arg0 : i32, i32
  }
}

</mosaic_0001>

<bundles_post_ra>
// kernel: pointnet_gem_forward.11
= control target key start
LH: loop header
LB: loop body
LE: loop exit
PB: predicated region body
PF: predicated region fallthrough
CT: control target
= control target key end

     0   :  { %9 = vsyncpa [#allocation3], 0  ;;  %s981_s0 = inlined_call_operand.vmem [shape: f32[256,3], index: 0, kind: input, shape index: {}]   ;;  %s982_s1 = inlined_call_operand.hbm [shape: f32[3,64], index: 1, kind: input, shape index: {}]   ;;  %s983_s2 = inlined_call_operand.vmem [shape: f32[1,64], index: 2, kind: input, shape index: {}]   ;;  %s984_s3 = inlined_call_operand.hbm [shape: f32[1,64], index: 3, kind: input, shape index: {}]   ;;  %s985_s4 = inlined_call_operand.vmem [shape: f32[256,64], index: 4, kind: output, shape index: {}]  }
   0x1   :  { %10 = vsyncpa [#allocation5], 0  ;;  %s802_s15 = smov 0  }
   0x2 LB: > { %s599_s16 = sadd.s32 4294967295, %s773_s15   ;;  %p601_p0 = scmp.ge.s32.totalorder %s773_s15, 1  ;;  %s773_s15 = sphi %s802_s15, %s16_s15  }
   0x3   : > { %p136_p1 = scmp.lt.s32.totalorder %s773_s15, 3  ;;  %p812_p2 = scmp.eq.s32.totalorder %s599_s16, 0 }
   0x4   : > { %s775_s19 = smov [#allocation2]   ;;  %s776_s21 = smov [#allocation4]  }
   0x5   : > { %s988_s17 = scalar_select %p812_p2, 1, 0 }
   0x6   : > { %p816_p3 = pnand %p601_p0, %p136_p1  ;;  %s149_s20 = sshll.u32 %s775_s19, 4  ;;  %s150_s20 = int_to_ptr.vmem [resolvable:$true] %s149_s20 }
   0x7   : > { %s163_s22 = sshll.u32 %s776_s21, 4  ;;  %s718_s24 = scalar_lea.vmem %s150_s20, 64  ;;  %s164_s22 = int_to_ptr.vmem [resolvable:$true] %s163_s22 }
   0x8   : > { %p686_p4 = pneg %p816_p3  ;;  %p719_p7 = scmp.ne.s32.totalorder %s150_s20, %s718_s24 }
   0x9   : > { %p726_p10 = scmp.lt.s32.totalorder %s150_s20, %s150_s20  ;;  %p727_p11 = scmp.lt.s32.totalorder %s718_s24, %s718_s24 }
   0xa   : > { %p824_p5 = pnand %p812_p2, %p686_p4 }
   0xb   : > { %p728_p12 = por %p727_p11, %p726_p10 }
   0xc   : > { %p709_p6 = pneg %p824_p5 }
   0xe   : > { %p721_p8 = pnand %p719_p7, %p709_p6 }
  0x10   : > { %p722_p9 = pneg %p721_p8 }
  0x12   : > { %p729_p13 = pnand %p728_p12, %p722_p9 }
  0x14   : > { %732 = shalt.err (!%p729_p13)
}
  0x15   : > { %689 = dma.hbm_to_vmem [thread:$0]  (!%p824_p5), %s982_s1, 64, %s150_s20, [#allocation3]  }
  0x16   : > { %s744_s27 = scalar_lea.vmem %s164_s22, 16  ;;  %s751_s28 = scalar_lea.vmem %s164_s22, 32 }
  0x17   : > { %p745_p0 = scmp.ne.s32.totalorder %s164_s22, %s744_s27  ;;  %p752_p7 = scmp.lt.s32.totalorder %s164_s22, %s164_s22 }
  0x18   : > { %p753_p8 = scmp.lt.s32.totalorder %s751_s28, %s744_s27 }
  0x19   : > { %p747_p1 = pnand %p745_p0, %p709_p6 }
  0x1a   : > { %p754_p2 = por %p753_p8, %p752_p7 }
  0x1b   : > { %p748_p4 = pneg %p747_p1 }
  0x1d   : > { %p755_p10 = pnand %p754_p2, %p748_p4 }
  0x1f   : > { %758 = shalt.err (!%p755_p10)
}
  0x20   : > { %692 = dma.hbm_to_vmem [thread:$0]  (!%p824_p5), %s984_s3, 16, %s164_s22, [#allocation5]  }
  0x21   : > { %185 = sbr.rel (%p816_p3) target bundleno = 264 (0x108), region = 36  ;;  %p991_p9 = scmp.ne.s32.totalorder (!%p816_p3), %s988_s17, 0 }
  0x26   : > { %764 = dma.done.wait (%p991_p9), [#allocation3], 64  }
  0x27   : > { %766 = vsyncadd (%p991_p9), [#allocation3], 4294967232 }
  0x28   : > { %768 = dma.done.wait (%p991_p9), [#allocation5], 16  }
  0x29   : > { %770 = vsyncadd (%p991_p9), [#allocation5], 4294967280  ;;  %s608_s5 = sshll.u32 %s599_s16, 4  ;;  %vm293_vm0 = vcmask 1042432   ;;  %v243_v0 = vld [vmem:[#allocation2] sm:$0x7] }
  0x2a   : > { %p216_p2 = scmp.lt.s32.totalorder %s608_s5, 31  ;;  %vm244_vm1 = vcmask 23552   ;;  %650 = vmatprep.subr.msk.mxu0 %vm293_vm0, %v243_v0  ;;  %676 = vmatprep.subr.msk.mxu1 %vm293_vm0, %v243_v0  ;;  %v903_v17 = vld [vmem:[%s983_s2] ss:$0 sm:$0xff]  ;;  %v905_v19 = vld [vmem:[#allocation4] ss:$0 sm:$0xff] }
  0x2b   : > { %651 = vmatpush3.msk.msra.mxu0 %vm293_vm0, %v243_v0  ;;  %677 = vmatpush3.msk.msra.mxu1 %vm293_vm0, %v243_v0  ;;  %vm504_vm2 = vcmask 523264  }
  0x2c   : > { %s993_s5 = smov (!%p216_p2, %s608_s5), 31 }
  0x2d   : > { %s609_s6 = sshll.u32 %s993_s5, 3 }
  0x2e   : > { %s866_s9 = scalar_lea.vmem %s981_s0, %s609_s6  ;;  %s918_s14 = scalar_lea.vmem %s985_s4, %s609_s6 }
  0x2f   : > { %v227_v1 = vld [vmem:[%s866_s9] sm:$0xff]  ;;  %v228_v3 = vld [vmem:[%s866_s9 + $0x8] sm:$0xff]  ;;  %v229_v5 = vld [vmem:[%s866_s9 + $0x10] sm:$0xff] }
  0x30   : > { %v235_v2 = vld [vmem:[%s866_s9 + $0x40] sm:$0xff]  ;;  %v236_v4 = vld [vmem:[%s866_s9 + $0x48] sm:$0xff]  ;;  %v237_v6 = vld [vmem:[%s866_s9 + $0x50] sm:$0xff]  ;;  %652 = vmatprep.mubr.msk.f32.mxu0 %vm244_vm1, %v227_v1 }
  0x31   : > { %664 = vmatprep.mubr.msk.f32.mxu1 %vm244_vm1, %v235_v2  ;;  %653 = vmatmul.mubr.msk.f32.vlgmr.msra.gmra.mxu0 %vm244_vm1, %v228_v3  ;;  %v230_v7 = vld [vmem:[%s866_s9 + $0x18] sm:$0xff]  ;;  %v231_v9 = vld [vmem:[%s866_s9 + $0x20] sm:$0xff]  ;;  %v232_v11 = vld [vmem:[%s866_s9 + $0x28] sm:$0xff] }
  0x32   : > { %665 = vmatmul.mubr.msk.f32.vlgmr.msra.gmra.mxu1 %vm244_vm1, %v236_v4  ;;  %655 = vmatprep.mubr.msk.f32.mxu0 %vm244_vm1, %v229_v5  ;;  %v238_v8 = vld [vmem:[%s866_s9 + $0x58] sm:$0xff]  ;;  %v239_v10 = vld [vmem:[%s866_s9 + $0x60] sm:$0xff]  ;;  %v240_v12 = vld [vmem:[%s866_s9 + $0x68] sm:$0xff] }
  0x33   : > { %667 = vmatprep.mubr.msk.f32.mxu1 %vm244_vm1, %v237_v6  ;;  %v233_v13 = vld [vmem:[%s866_s9 + $0x30] sm:$0xff]  ;;  %v234_v15 = vld [vmem:[%s866_s9 + $0x38] sm:$0xff] }
  0x34   : > { %v241_v14 = vld [vmem:[%s866_s9 + $0x70] sm:$0xff]  ;;  %v242_v16 = vld [vmem:[%s866_s9 + $0x78] sm:$0xff] }
  0x35   : > { %656 = vmatmul.mubr.msk.f32.gmra.mxu0 %vm244_vm1, %v230_v7 }
  0x36   : > { %668 = vmatmul.mubr.msk.f32.gmra.mxu1 %vm244_vm1, %v238_v8  ;;  %658 = vmatprep.mubr.msk.f32.mxu0 %vm244_vm1, %v231_v9 }
  0x37   : > { %670 = vmatprep.mubr.msk.f32.mxu1 %vm244_vm1, %v239_v10 }
  0x39   : > { %659 = vmatmul.mubr.msk.f32.gmra.mxu0 %vm244_vm1, %v232_v11 }
  0x3a   : > { %671 = vmatmul.mubr.msk.f32.gmra.mxu1 %vm244_vm1, %v240_v12  ;;  %661 = vmatprep.mubr.msk.f32.mxu0 %vm244_vm1, %v233_v13 }
  0x3b   : > { %673 = vmatprep.mubr.msk.f32.mxu1 %vm244_vm1, %v241_v14 }
  0x3d   : > { %662 = vmatmul.mubr.msk.f32.gmra.mxu0 %vm244_vm1, %v234_v15 }
  0x3e   : > { %674 = vmatmul.mubr.msk.f32.gmra.mxu1 %vm244_vm1, %v242_v16 }
  0xf1   : > { %v654_v18 = vpop.f32.mrf.mxu0 }
  0xf2   : > { %v666_v20 = vpop.f32.mrf.mxu1  ;;  %v450_v21 = vmul.f32 %v654_v18, %v903_v17 }
  0xf3   : > { %v458_v22 = vmul.f32 %v666_v20, %v903_v17  ;;  %v363_v23 = vpop.f32.mrf.mxu0 }
  0xf4   : > { %v403_v24 = vpop.f32.mrf.mxu1  ;;  %v473_v25 = vadd.f32 %v905_v19, %v450_v21  ;;  %v449_v27 = vmul.f32 %v903_v17, %v363_v23 }
  0xf5   : > { %v481_v26 = vadd.f32 %v905_v19, %v458_v22  ;;  %v457_v28 = vmul.f32 %v903_v17, %v403_v24  ;;  %v657_v29 = vpop.f32.mrf.mxu0 }
  0xf6   : > { %v669_v30 = vpop.f32.mrf.mxu1  ;;  %v489_v31 = vmax.f32 %v473_v25, 0.0  ;;  %v472_v33 = vadd.f32 %v905_v19, %v449_v27  ;;  %v452_v35 = vmul.f32 %v657_v29, %v903_v17 }
  0xf7   : > { %v497_v32 = vmax.f32 %v481_v26, 0.0  ;;  %v480_v34 = vadd.f32 %v905_v19, %v457_v28  ;;  %v460_v36 = vmul.f32 %v669_v30, %v903_v17  ;;  %v373_v37 = vpop.f32.mrf.mxu0 }
  0xf8   : > { %v413_v38 = vpop.f32.mrf.mxu1  ;;  %506 = vst.msk [vmem:[%s918_s14 + $0x8] sm:$0xff] %vm504_vm2, %v489_v31  ;;  %v488_v39 = vmax.f32 %v472_v33, 0.0  ;;  %v451_v41 = vmul.f32 %v903_v17, %v373_v37  ;;  %v475_v43 = vadd.f32 %v905_v19, %v452_v35 }
  0xf9   : > { %514 = vst.msk [vmem:[%s918_s14 + $0x48] sm:$0xff] %vm504_vm2, %v497_v32  ;;  %v496_v40 = vmax.f32 %v480_v34, 0.0  ;;  %v459_v42 = vmul.f32 %v903_v17, %v413_v38  ;;  %v483_v44 = vadd.f32 %v905_v19, %v460_v36  ;;  %v660_v45 = vpop.f32.mrf.mxu0 }
  0xfa   : > { %v672_v46 = vpop.f32.mrf.mxu1  ;;  %505 = vst.msk [vmem:[%s918_s14] sm:$0xff] %vm504_vm2, %v488_v39  ;;  %v474_v47 = vadd.f32 %v905_v19, %v451_v41  ;;  %v454_v49 = vmul.f32 %v660_v45, %v903_v17  ;;  %v491_v51 = vmax.f32 %v475_v43, 0.0 }
  0xfb   : > { %513 = vst.msk [vmem:[%s918_s14 + $0x40] sm:$0xff] %vm504_vm2, %v496_v40  ;;  %v482_v48 = vadd.f32 %v905_v19, %v459_v42  ;;  %v462_v50 = vmul.f32 %v672_v46, %v903_v17  ;;  %v499_v52 = vmax.f32 %v483_v44, 0.0  ;;  %v383_v53 = vpop.f32.mrf.mxu0 }
  0xfc   : > { %v423_v54 = vpop.f32.mrf.mxu1  ;;  %v490_v55 = vmax.f32 %v474_v47, 0.0  ;;  %v477_v57 = vadd.f32 %v905_v19, %v454_v49  ;;  %508 = vst.msk [vmem:[%s918_s14 + $0x18] sm:$0xff] %vm504_vm2, %v491_v51  ;;  %v453_v59 = vmul.f32 %v903_v17, %v383_v53 }
  0xfd   : > { %v498_v56 = vmax.f32 %v482_v48, 0.0  ;;  %v485_v58 = vadd.f32 %v905_v19, %v462_v50  ;;  %516 = vst.msk [vmem:[%s918_s14 + $0x58] sm:$0xff] %vm504_vm2, %v499_v52  ;;  %v461_v60 = vmul.f32 %v903_v17, %v423_v54  ;;  %v663_v61 = vpop.f32.mrf.mxu0 }
  0xfe   : > { %v675_v62 = vpop.f32.mrf.mxu1  ;;  %507 = vst.msk [vmem:[%s918_s14 + $0x10] sm:$0xff] %vm504_vm2, %v490_v55  ;;  %v493_v63 = vmax.f32 %v477_v57, 0.0  ;;  %v456_v1 = vmul.f32 %v663_v61, %v903_v17  ;;  %v476_v3 = vadd.f32 %v905_v19, %v453_v59 }
  0xff   : > { %515 = vst.msk [vmem:[%s918_s14 + $0x50] sm:$0xff] %vm504_vm2, %v498_v56  ;;  %v501_v0 = vmax.f32 %v485_v58, 0.0  ;;  %v464_v2 = vmul.f32 %v675_v62, %v903_v17  ;;  %v484_v4 = vadd.f32 %v905_v19, %v461_v60  ;;  %v393_v5 = vpop.f32.mrf.mxu0 }
 0x100   : > { %v433_v6 = vpop.f32.mrf.mxu1  ;;  %510 = vst.msk [vmem:[%s918_s14 + $0x28] sm:$0xff] %vm504_vm2, %v493_v63  ;;  %v479_v7 = vadd.f32 %v905_v19, %v456_v1  ;;  %v455_v9 = vmul.f32 %v903_v17, %v393_v5  ;;  %v492_v11 = vmax.f32 %v476_v3, 0.0 }
 0x101   : > { %518 = vst.msk [vmem:[%s918_s14 + $0x68] sm:$0xff] %vm504_vm2, %v501_v0  ;;  %v487_v8 = vadd.f32 %v905_v19, %v464_v2  ;;  %v463_v10 = vmul.f32 %v903_v17, %v433_v6  ;;  %v500_v12 = vmax.f32 %v484_v4, 0.0 }
 0x102   : > { %v495_v13 = vmax.f32 %v479_v7, 0.0  ;;  %v478_v15 = vadd.f32 %v905_v19, %v455_v9  ;;  %509 = vst.msk [vmem:[%s918_s14 + $0x20] sm:$0xff] %vm504_vm2, %v492_v11 }
 0x103   : > { %v503_v14 = vmax.f32 %v487_v8, 0.0  ;;  %v486_v16 = vadd.f32 %v905_v19, %v463_v10  ;;  %517 = vst.msk [vmem:[%s918_s14 + $0x60] sm:$0xff] %vm504_vm2, %v500_v12 }
 0x104   : > { %512 = vst.msk [vmem:[%s918_s14 + $0x38] sm:$0xff] %vm504_vm2, %v495_v13  ;;  %v494_v18 = vmax.f32 %v478_v15, 0.0 }
 0x105   : > { %520 = vst.msk [vmem:[%s918_s14 + $0x78] sm:$0xff] %vm504_vm2, %v503_v14  ;;  %v502_v20 = vmax.f32 %v486_v16, 0.0 }
 0x106   : > { %511 = vst.msk [vmem:[%s918_s14 + $0x30] sm:$0xff] %vm504_vm2, %v494_v18 }
 0x107   : > { %519 = vst.msk [vmem:[%s918_s14 + $0x70] sm:$0xff] %vm504_vm2, %v502_v20 }
 0x108 PF: > { %s16_s15 = sadd.s32 1, %s773_s15  }
 0x109   : > { %p13_p3 = scmp.ge.s32.totalorder %s16_s15, 4  }
 0x10b   :  { %15 = sbr.rel (!%p13_p3) target bundleno = 2 (0x2), region = 75 }
 0x110   :  { %543 = vsyncpa [#allocation3], 1 }
 0x111   :  { %545 = vsyncpa [#allocation3 + $0x1], 1 }
 0x112   :  { %546 = vsyncpa [#allocation5], 1 }

// kernel: pointnet_gem_forward.12
= control target key start
LH: loop header
LB: loop body
LE: loop exit
PB: predicated region body
PF: predicated region fallthrough
CT: control target
= control target key end

     0   :  { %9 = vsyncpa [#allocation3], 0  ;;  %s1007_s0 = inlined_call_operand.vmem [shape: f32[256,64], index: 0, kind: input, shape index: {}]   ;;  %s1008_s1 = inlined_call_operand.hbm [shape: f32[64,128], index: 1, kind: input, shape index: {}]   ;;  %s1009_s2 = inlined_call_operand.vmem [shape: f32[1,128], index: 2, kind: input, shape index: {}]   ;;  %s1010_s3 = inlined_call_operand.hbm [shape: f32[1,128], index: 3, kind: input, shape index: {}]   ;;  %s1011_s4 = inlined_call_operand.vmem [shape: f32[256,128], index: 4, kind: output, shape index: {}]  }
   0x1   :  { %10 = vsyncpa [#allocation5], 0  ;;  %s844_s15 = smov 0  }
   0x2 LB: > { %s603_s16 = sadd.s32 4294967295, %s813_s15   ;;  %p605_p0 = scmp.ge.s32.totalorder %s813_s15, 1  ;;  %s813_s15 = sphi %s844_s15, %s16_s15  }
   0x3   : > { %p136_p1 = scmp.lt.s32.totalorder %s813_s15, 3  ;;  %s815_s17 = smov [#allocation2]  }
   0x4   : > { %s148_s18 = sshll.u32 %s815_s17, 4  ;;  %p858_p3 = scmp.eq.s32.totalorder %s603_s16, 0  ;;  %s149_s18 = int_to_ptr.vmem [resolvable:$true] %s148_s18 }
   0x5   : > { %p852_p2 = pnand %p605_p0, %p136_p1  ;;  %s816_s21 = smov [#allocation4]  }
   0x6   : > { %s165_s22 = sshll.u32 %s816_s21, 4  ;;  %s758_s24 = scalar_lea.vmem %s149_s18, 1024  ;;  %s166_s22 = int_to_ptr.vmem [resolvable:$true] %s165_s22 }
   0x7   : > { %p724_p4 = pneg %p852_p2  ;;  %p759_p7 = scmp.ne.s32.totalorder %s149_s18, %s758_s24 }
   0x8   : > { %p766_p10 = scmp.lt.s32.totalorder %s149_s18, %s149_s18  ;;  %p767_p11 = scmp.lt.s32.totalorder %s758_s24, %s758_s24 }
   0x9   : > { %p866_p5 = pnand %p858_p3, %p724_p4 }
   0xa   : > { %p768_p12 = por %p767_p11, %p766_p10 }
   0xb   : > { %p749_p6 = pneg %p866_p5 }
   0xd   : > { %p761_p8 = pnand %p759_p7, %p749_p6 }
   0xf   : > { %p762_p9 = pneg %p761_p8 }
  0x11   : > { %p769_p13 = pnand %p768_p12, %p762_p9 }
  0x13   : > { %772 = shalt.err (!%p769_p13)
}
  0x14   : > { %s817_s25 = smov 128   ;;  %s818_s26 = smov 8  }
  0x15   : > { %727 = dma.hbm_to_vmem [thread:$0]  (!%p866_p5), %s1008_s1, 1024, %s149_s18, [#allocation3], %s817_s25, %s817_s25, %s818_s26  }
  0x16   : > { %s784_s29 = scalar_lea.vmem %s166_s22, 16  ;;  %s791_s30 = scalar_lea.vmem %s166_s22, 32 }
  0x17   : > { %p785_p0 = scmp.ne.s32.totalorder %s166_s22, %s784_s29  ;;  %p792_p7 = scmp.lt.s32.totalorder %s166_s22, %s166_s22 }
  0x18   : > { %p793_p8 = scmp.lt.s32.totalorder %s791_s30, %s784_s29 }
  0x19   : > { %p787_p1 = pnand %p785_p0, %p749_p6 }
  0x1a   : > { %p794_p9 = por %p793_p8, %p792_p7 }
  0x1b   : > { %p788_p4 = pneg %p787_p1 }
  0x1d   : > { %p795_p10 = pnand %p794_p9, %p788_p4 }
  0x1f   : > { %798 = shalt.err (!%p795_p10)
}
  0x20   : > { %730 = dma.hbm_to_vmem [thread:$0]  (!%p866_p5), %s1010_s3, 16, %s166_s22, [#allocation5]  }
  0x21   : > { %187 = sbr.rel (%p852_p2) target bundleno = 273 (0x111), region = 36 }
  0x26   : > { %804 = dma.done.wait (%p858_p3), [#allocation3], 1024  }
  0x27   : > { %806 = vsyncadd (%p858_p3), [#allocation3], 4294966272 }
  0x28   : > { %808 = dma.done.wait (%p858_p3), [#allocation5], 16  }
  0x29   : > { %810 = vsyncadd (%p858_p3), [#allocation5], 4294967280  ;;  %s612_s7 = sshll.u32 %s603_s16, 4  ;;  %v252_v0 = vld [vmem:[#allocation2 + $0x38] sm:$0xff]  ;;  %v251_v1 = vld [vmem:[#allocation2 + $0x30] sm:$0xff]  ;;  %vm253_vm0 = vcmask 523264  }
  0x2a   : > { %p218_p5 = scmp.lt.s32.totalorder %s612_s7, 31  ;;  %660 = vmatprep.subr.mxu0 %v252_v0  ;;  %700 = vmatprep.subr.mxu1 %v252_v0  ;;  %v250_v2 = vld [vmem:[#allocation2 + $0x28] sm:$0xff]  ;;  %v249_v3 = vld [vmem:[#allocation2 + $0x20] sm:$0xff]  ;;  %v248_v4 = vld [vmem:[#allocation2 + $0x18] sm:$0xff] }
  0x2b   : > { %661 = vmatpush3.msra.mxu0 %v252_v0  ;;  %708 = vmatpush3.msra.mxu1 %v252_v0  ;;  %v247_v5 = vld [vmem:[#allocation2 + $0x10] sm:$0xff]  ;;  %v246_v6 = vld [vmem:[#allocation2 + $0x8] sm:$0xff]  ;;  %v245_v7 = vld [vmem:[#allocation2] sm:$0xff] }
  0x2c   : > { %662 = vmatprep.subr.mxu0 %v251_v1  ;;  %701 = vmatprep.subr.mxu1 %v251_v1  ;;  %s1016_s7 = smov (!%p218_p5, %s612_s7), 31  ;;  %v945_v24 = vld [vmem:[%s1009_s2] ss:$0 sm:$0xff] }
  0x2d   : > { %663 = vmatpush3.msra.mxu0 %v251_v1  ;;  %709 = vmatpush3.msra.mxu1 %v251_v1  ;;  %s613_s8 = sshll.u32 %s1016_s7, 3  ;;  %v947_v26 = vld [vmem:[#allocation4] ss:$0 sm:$0xff] }
  0x2e   : > { %664 = vmatprep.subr.mxu0 %v250_v2  ;;  %702 = vmatprep.subr.mxu1 %v250_v2  ;;  %s908_s11 = scalar_lea.vmem %s1007_s0, %s613_s8  ;;  %s960_s17 = scalar_lea.vmem %s1011_s4, %s613_s8 }
  0x2f   : > { %665 = vmatpush3.msra.mxu0 %v250_v2  ;;  %710 = vmatpush3.msra.mxu1 %v250_v2  ;;  %v229_v8 = vld [vmem:[%s908_s11] sm:$0xff]  ;;  %v230_v10 = vld [vmem:[%s908_s11 + $0x8] sm:$0xff]  ;;  %v231_v12 = vld [vmem:[%s908_s11 + $0x10] sm:$0xff] }
  0x30   : > { %666 = vmatprep.subr.mxu0 %v249_v3  ;;  %703 = vmatprep.subr.mxu1 %v249_v3  ;;  %v237_v9 = vld [vmem:[%s908_s11 + $0x40] sm:$0xff]  ;;  %v238_v11 = vld [vmem:[%s908_s11 + $0x48] sm:$0xff]  ;;  %v239_v13 = vld [vmem:[%s908_s11 + $0x50] sm:$0xff] }
  0x31   : > { %667 = vmatpush3.msra.mxu0 %v249_v3  ;;  %711 = vmatpush3.msra.mxu1 %v249_v3  ;;  %v232_v14 = vld [vmem:[%s908_s11 + $0x18] sm:$0xff]  ;;  %v233_v16 = vld [vmem:[%s908_s11 + $0x20] sm:$0xff]  ;;  %v234_v18 = vld [vmem:[%s908_s11 + $0x28] sm:$0xff] }
  0x32   : > { %668 = vmatprep.subr.mxu0 %v248_v4  ;;  %704 = vmatprep.subr.mxu1 %v248_v4  ;;  %v240_v15 = vld [vmem:[%s908_s11 + $0x58] sm:$0xff]  ;;  %v241_v17 = vld [vmem:[%s908_s11 + $0x60] sm:$0xff]  ;;  %v242_v19 = vld [vmem:[%s908_s11 + $0x68] sm:$0xff] }
  0x33   : > { %669 = vmatpush3.msra.mxu0 %v248_v4  ;;  %712 = vmatpush3.msra.mxu1 %v248_v4  ;;  %v235_v20 = vld [vmem:[%s908_s11 + $0x30] sm:$0xff]  ;;  %v236_v22 = vld [vmem:[%s908_s11 + $0x38] sm:$0xff] }
  0x34   : > { %670 = vmatprep.subr.mxu0 %v247_v5  ;;  %705 = vmatprep.subr.mxu1 %v247_v5  ;;  %v243_v21 = vld [vmem:[%s908_s11 + $0x70] sm:$0xff]  ;;  %v244_v23 = vld [vmem:[%s908_s11 + $0x78] sm:$0xff] }
  0x35   : > { %671 = vmatpush3.msra.mxu0 %v247_v5  ;;  %713 = vmatpush3.msra.mxu1 %v247_v5 }
  0x36   : > { %672 = vmatprep.subr.mxu0 %v246_v6  ;;  %706 = vmatprep.subr.mxu1 %v246_v6 }
  0x37   : > { %673 = vmatpush3.msra.mxu0 %v246_v6  ;;  %714 = vmatpush3.msra.mxu1 %v246_v6 }
  0x38   : > { %674 = vmatprep.subr.mxu0 %v245_v7  ;;  %707 = vmatprep.subr.mxu1 %v245_v7 }
  0x39   : > { %675 = vmatpush3.msra.mxu0 %v245_v7  ;;  %715 = vmatpush3.msra.mxu1 %v245_v7 }
  0x3a   : > { %676 = vmatprep.mubr.msk.f32.mxu0 %vm253_vm0, %v229_v8  ;;  %688 = vmatprep.mubr.msk.f32.mxu1 %vm253_vm0, %v237_v9 }
  0x3b   : > { %677 = vmatmul.mubr.msk.f32.vlgmr.msra.gmra.mxu0 %vm253_vm0, %v230_v10  ;;  %689 = vmatmul.mubr.msk.f32.vlgmr.msra.gmra.mxu1 %vm253_vm0, %v238_v11 }
  0x3c   : > { %679 = vmatprep.mubr.msk.f32.mxu0 %vm253_vm0, %v231_v12  ;;  %691 = vmatprep.mubr.msk.f32.mxu1 %vm253_vm0, %v239_v13 }
  0x3f   : > { %680 = vmatmul.mubr.msk.f32.gmra.mxu0 %vm253_vm0, %v232_v14  ;;  %692 = vmatmul.mubr.msk.f32.gmra.mxu1 %vm253_vm0, %v240_v15 }
  0x40   : > { %682 = vmatprep.mubr.msk.f32.mxu0 %vm253_vm0, %v233_v16  ;;  %694 = vmatprep.mubr.msk.f32.mxu1 %vm253_vm0, %v241_v17 }
  0x43   : > { %683 = vmatmul.mubr.msk.f32.gmra.mxu0 %vm253_vm0, %v234_v18  ;;  %695 = vmatmul.mubr.msk.f32.gmra.mxu1 %vm253_vm0, %v242_v19 }
  0x44   : > { %685 = vmatprep.mubr.msk.f32.mxu0 %vm253_vm0, %v235_v20  ;;  %697 = vmatprep.mubr.msk.f32.mxu1 %vm253_vm0, %v243_v21 }
  0x47   : > { %686 = vmatmul.mubr.msk.f32.gmra.mxu0 %vm253_vm0, %v236_v22  ;;  %698 = vmatmul.mubr.msk.f32.gmra.mxu1 %vm253_vm0, %v244_v23 }
  0xfb   : > { %v678_v25 = vpop.f32.mrf.mxu0  ;;  %v690_v27 = vpop.f32.mrf.mxu1 }
  0xfc   : > { %v455_v28 = vmul.f32 %v678_v25, %v945_v24  ;;  %v463_v29 = vmul.f32 %v690_v27, %v945_v24 }
  0xfd   : > { %v368_v30 = vpop.f32.mrf.mxu0  ;;  %v408_v31 = vpop.f32.mrf.mxu1 }
  0xfe   : > { %v478_v32 = vadd.f32 %v947_v26, %v455_v28  ;;  %v486_v33 = vadd.f32 %v947_v26, %v463_v29  ;;  %v454_v34 = vmul.f32 %v945_v24, %v368_v30  ;;  %v462_v35 = vmul.f32 %v945_v24, %v408_v31 }
  0xff   : > { %v681_v36 = vpop.f32.mrf.mxu0  ;;  %v693_v37 = vpop.f32.mrf.mxu1 }
 0x100   : > { %v494_v38 = vmax.f32 %v478_v32, 0.0  ;;  %v502_v39 = vmax.f32 %v486_v33, 0.0  ;;  %v477_v40 = vadd.f32 %v947_v26, %v454_v34  ;;  %v485_v41 = vadd.f32 %v947_v26, %v462_v35 }
 0x101   : > { %v457_v42 = vmul.f32 %v681_v36, %v945_v24  ;;  %v465_v43 = vmul.f32 %v693_v37, %v945_v24  ;;  %v378_v44 = vpop.f32.mrf.mxu0  ;;  %v418_v45 = vpop.f32.mrf.mxu1 }
 0x102   : > { %510 = vst [vmem:[%s960_s17 + $0x8] sm:$0xff] %v494_v38  ;;  %518 = vst [vmem:[%s960_s17 + $0x48] sm:$0xff] %v502_v39  ;;  %v493_v46 = vmax.f32 %v477_v40, 0.0  ;;  %v501_v47 = vmax.f32 %v485_v41, 0.0  ;;  %v456_v48 = vmul.f32 %v945_v24, %v378_v44  ;;  %v464_v49 = vmul.f32 %v945_v24, %v418_v45 }
 0x103   : > { %v480_v50 = vadd.f32 %v947_v26, %v457_v42  ;;  %v488_v51 = vadd.f32 %v947_v26, %v465_v43  ;;  %v684_v52 = vpop.f32.mrf.mxu0  ;;  %v696_v53 = vpop.f32.mrf.mxu1 }
 0x104   : > { %509 = vst [vmem:[%s960_s17] sm:$0xff] %v493_v46  ;;  %517 = vst [vmem:[%s960_s17 + $0x40] sm:$0xff] %v501_v47  ;;  %v479_v54 = vadd.f32 %v947_v26, %v456_v48  ;;  %v487_v55 = vadd.f32 %v947_v26, %v464_v49  ;;  %v459_v56 = vmul.f32 %v684_v52, %v945_v24 }
 0x105   : > { %v467_v57 = vmul.f32 %v696_v53, %v945_v24  ;;  %v496_v58 = vmax.f32 %v480_v50, 0.0  ;;  %v504_v59 = vmax.f32 %v488_v51, 0.0  ;;  %v388_v60 = vpop.f32.mrf.mxu0  ;;  %v428_v61 = vpop.f32.mrf.mxu1 }
 0x106   : > { %v495_v62 = vmax.f32 %v479_v54, 0.0  ;;  %v503_v63 = vmax.f32 %v487_v55, 0.0  ;;  %v482_v0 = vadd.f32 %v947_v26, %v459_v56  ;;  %v458_v2 = vmul.f32 %v945_v24, %v388_v60 }
 0x107   : > { %v490_v1 = vadd.f32 %v947_v26, %v467_v57  ;;  %512 = vst [vmem:[%s960_s17 + $0x18] sm:$0xff] %v496_v58  ;;  %520 = vst [vmem:[%s960_s17 + $0x58] sm:$0xff] %v504_v59  ;;  %v466_v3 = vmul.f32 %v945_v24, %v428_v61  ;;  %v687_v4 = vpop.f32.mrf.mxu0  ;;  %v699_v5 = vpop.f32.mrf.mxu1 }
 0x108   : > { %511 = vst [vmem:[%s960_s17 + $0x10] sm:$0xff] %v495_v62  ;;  %519 = vst [vmem:[%s960_s17 + $0x50] sm:$0xff] %v503_v63  ;;  %v498_v6 = vmax.f32 %v482_v0, 0.0  ;;  %v461_v8 = vmul.f32 %v687_v4, %v945_v24  ;;  %v469_v9 = vmul.f32 %v699_v5, %v945_v24  ;;  %v481_v10 = vadd.f32 %v947_v26, %v458_v2 }
 0x109   : > { %v506_v7 = vmax.f32 %v490_v1, 0.0  ;;  %v489_v11 = vadd.f32 %v947_v26, %v466_v3  ;;  %v398_v12 = vpop.f32.mrf.mxu0  ;;  %v438_v13 = vpop.f32.mrf.mxu1 }
 0x10a   : > { %514 = vst [vmem:[%s960_s17 + $0x28] sm:$0xff] %v498_v6  ;;  %v484_v14 = vadd.f32 %v947_v26, %v461_v8  ;;  %v492_v15 = vadd.f32 %v947_v26, %v469_v9  ;;  %v460_v16 = vmul.f32 %v945_v24, %v398_v12  ;;  %v468_v17 = vmul.f32 %v945_v24, %v438_v13 }
 0x10b   : > { %522 = vst [vmem:[%s960_s17 + $0x68] sm:$0xff] %v506_v7  ;;  %v497_v18 = vmax.f32 %v481_v10, 0.0  ;;  %v505_v19 = vmax.f32 %v489_v11, 0.0 }
 0x10c   : > { %v500_v20 = vmax.f32 %v484_v14, 0.0  ;;  %v508_v21 = vmax.f32 %v492_v15, 0.0  ;;  %v483_v22 = vadd.f32 %v947_v26, %v460_v16  ;;  %v491_v23 = vadd.f32 %v947_v26, %v468_v17 }
 0x10d   : > { %513 = vst [vmem:[%s960_s17 + $0x20] sm:$0xff] %v497_v18  ;;  %521 = vst [vmem:[%s960_s17 + $0x60] sm:$0xff] %v505_v19 }
 0x10e   : > { %516 = vst [vmem:[%s960_s17 + $0x38] sm:$0xff] %v500_v20  ;;  %524 = vst [vmem:[%s960_s17 + $0x78] sm:$0xff] %v508_v21  ;;  %v499_v25 = vmax.f32 %v483_v22, 0.0  ;;  %v507_v27 = vmax.f32 %v491_v23, 0.0 }
 0x110   : > { %515 = vst [vmem:[%s960_s17 + $0x30] sm:$0xff] %v499_v25  ;;  %523 = vst [vmem:[%s960_s17 + $0x70] sm:$0xff] %v507_v27 }
 0x111 PF: > { %s16_s15 = sadd.s32 1, %s813_s15  }
 0x112   : > { %p13_p2 = scmp.ge.s32.totalorder %s16_s15, 4  }
 0x114   :  { %15 = sbr.rel (!%p13_p2) target bundleno = 2 (0x2), region = 75 }
 0x119   :  { %547 = vsyncpa [#allocation3], 1 }
 0x11a   :  { %549 = vsyncpa [#allocation3 + $0x1], 1 }
 0x11b   :  { %550 = vsyncpa [#allocation5], 1 }

// kernel: pointnet_gem_forward.14
= control target key start
LH: loop header
LB: loop body
LE: loop exit
PB: predicated region body
PF: predicated region fallthrough
CT: control target
= control target key end

     0   :  { %s882_s6 = smov 0   ;;  %s884_s7 = smov 0   ;;  %s1354_s0 = inlined_call_operand.vmem [shape: f32[2,128,1024], index: 0, kind: input, shape index: {}]   ;;  %s1355_s1 = inlined_call_operand.vmem [shape: f32[2,1024], index: 1, kind: output, shape index: {}]  }
   0x1   :  { %s886_s8 = smov 0  }
   0x2 LB: > { %s808_s9 = sadd.s32 4294967295, %s869_s8   ;;  %s899_s10 = sadd.s32 1, %s869_s8   ;;  %s869_s8 = sphi %s886_s8, %s1358_s8   ;;  %s865_s7 = sphi %s884_s7, %s1357_s7   ;;  %s861_s6 = sphi %s882_s6, %s1356_s6  }
   0x3   : > { %s15_s11 = ssub.s32 %s869_s8, %s899_s10  ;;  %s18_s12 = sadd.s32 1, %s865_s7 }
   0x4   : > { %p16_p0 = scmp.eq.s32.totalorder %s15_s11, 0  ;;  %p25_p1 = scmp.ne.s32.totalorder %s865_s7, %s861_s6 }
   0x5   : > { %p26_p2 = scmp.eq.s32.totalorder %s869_s8, 0  ;;  %p811_p4 = scmp.ge.s32.totalorder %s869_s8, 2 }
   0x6   : > { %s908_s13 = scalar_select %p16_p0, %s865_s7, %s18_s12  }
   0x7   : > { %p27_p3 = por %p26_p2, %p25_p1  ;;  %77 = sbr.rel (%p811_p4) target bundleno = 80 (0x50), region = 16 }
   0xc   : > { %80 = sbr.rel (!%p27_p3) target bundleno = 80 (0x50), region = 20  ;;  %s82_s14 = sand.u32 (%p27_p3), 1, %s865_s7  }
   0xd   : > { %s821_s15 = sshll.u32 (%p27_p3), %s869_s8, 5  ;;  %s812_s16 = sshll.u32 (%p27_p3), %s82_s14, 10 }
   0xe   : > { %s916_s19 = scalar_lea.vmem (%p27_p3), %s1354_s0, %s821_s15  ;;  %s921_s20 = scalar_lea.vmem (%p27_p3), [#allocation2], %s812_s16 }
   0xf   : > { %v100_v0 = vld [vmem:[%s916_s19] sm:$0xff] (%p27_p3)  ;;  %v102_v1 = vld [vmem:[%s916_s19 + $0x8] sm:$0xff] (%p27_p3)  ;;  %v104_v2 = vld [vmem:[%s916_s19 + $0x10] sm:$0xff] (%p27_p3) }
  0x10   : > { %101 = vst [vmem:[%s921_s20] sm:$0xff] (%p27_p3), %v100_v0  ;;  %103 = vst [vmem:[%s921_s20 + $0x8] sm:$0xff] (%p27_p3), %v102_v1  ;;  %v106_v3 = vld [vmem:[%s916_s19 + $0x18] sm:$0xff] (%p27_p3)  ;;  %v108_v4 = vld [vmem:[%s916_s19 + $0x40] sm:$0xff] (%p27_p3) }
  0x11   : > { %105 = vst [vmem:[%s921_s20 + $0x10] sm:$0xff] %v104_v2  ;;  %v110_v5 = vld [vmem:[%s916_s19 + $0x48] sm:$0xff]  ;;  %107 = vst [vmem:[%s921_s20 + $0x18] sm:$0xff] %v106_v3  ;;  %v112_v6 = vld [vmem:[%s916_s19 + $0x50] sm:$0xff] }
  0x12   : > { %109 = vst [vmem:[%s921_s20 + $0x20] sm:$0xff] %v108_v4  ;;  %111 = vst [vmem:[%s921_s20 + $0x28] sm:$0xff] %v110_v5  ;;  %v114_v7 = vld [vmem:[%s916_s19 + $0x58] sm:$0xff]  ;;  %v116_v8 = vld [vmem:[%s916_s19 + $0x80] sm:$0xff] }
  0x13   : > { %113 = vst [vmem:[%s921_s20 + $0x30] sm:$0xff] %v112_v6  ;;  %115 = vst [vmem:[%s921_s20 + $0x38] sm:$0xff] %v114_v7  ;;  %v118_v9 = vld [vmem:[%s916_s19 + $0x88] sm:$0xff]  ;;  %v120_v10 = vld [vmem:[%s916_s19 + $0x90] sm:$0xff] }
  0x14   : > { %117 = vst [vmem:[%s921_s20 + $0x40] sm:$0xff] %v116_v8  ;;  %v122_v11 = vld [vmem:[%s916_s19 + $0x98] sm:$0xff]  ;;  %119 = vst [vmem:[%s921_s20 + $0x48] sm:$0xff] %v118_v9  ;;  %v124_v12 = vld [vmem:[%s916_s19 + $0xc0] sm:$0xff] }
  0x15   : > { %121 = vst [vmem:[%s921_s20 + $0x50] sm:$0xff] %v120_v10  ;;  %123 = vst [vmem:[%s921_s20 + $0x58] sm:$0xff] %v122_v11  ;;  %v126_v13 = vld [vmem:[%s916_s19 + $0xc8] sm:$0xff]  ;;  %v128_v14 = vld [vmem:[%s916_s19 + $0xd0] sm:$0xff] }
  0x16   : > { %125 = vst [vmem:[%s921_s20 + $0x60] sm:$0xff] %v124_v12  ;;  %127 = vst [vmem:[%s921_s20 + $0x68] sm:$0xff] %v126_v13  ;;  %v130_v15 = vld [vmem:[%s916_s19 + $0xd8] sm:$0xff]  ;;  %v132_v16 = vld [vmem:[%s916_s19 + $0x100] sm:$0xff] }
  0x17   : > { %129 = vst [vmem:[%s921_s20 + $0x70] sm:$0xff] %v128_v14  ;;  %v134_v17 = vld [vmem:[%s916_s19 + $0x108] sm:$0xff]  ;;  %131 = vst [vmem:[%s921_s20 + $0x78] sm:$0xff] %v130_v15  ;;  %v136_v18 = vld [vmem:[%s916_s19 + $0x110] sm:$0xff] }
  0x18   : > { %133 = vst [vmem:[%s921_s20 + $0x80] sm:$0xff] %v132_v16  ;;  %135 = vst [vmem:[%s921_s20 + $0x88] sm:$0xff] %v134_v17  ;;  %v138_v19 = vld [vmem:[%s916_s19 + $0x118] sm:$0xff]  ;;  %v140_v20 = vld [vmem:[%s916_s19 + $0x140] sm:$0xff] }
  0x19   : > { %137 = vst [vmem:[%s921_s20 + $0x90] sm:$0xff] %v136_v18  ;;  %139 = vst [vmem:[%s921_s20 + $0x98] sm:$0xff] %v138_v19  ;;  %v142_v21 = vld [vmem:[%s916_s19 + $0x148] sm:$0xff]  ;;  %v144_v22 = vld [vmem:[%s916_s19 + $0x150] sm:$0xff] }
  0x1a   : > { %141 = vst [vmem:[%s921_s20 + $0xa0] sm:$0xff] %v140_v20  ;;  %v146_v23 = vld [vmem:[%s916_s19 + $0x158] sm:$0xff]  ;;  %143 = vst [vmem:[%s921_s20 + $0xa8] sm:$0xff] %v142_v21  ;;  %v148_v24 = vld [vmem:[%s916_s19 + $0x180] sm:$0xff] }
  0x1b   : > { %145 = vst [vmem:[%s921_s20 + $0xb0] sm:$0xff] %v144_v22  ;;  %147 = vst [vmem:[%s921_s20 + $0xb8] sm:$0xff] %v146_v23  ;;  %v150_v25 = vld [vmem:[%s916_s19 + $0x188] sm:$0xff]  ;;  %v152_v26 = vld [vmem:[%s916_s19 + $0x190] sm:$0xff] }
  0x1c   : > { %149 = vst [vmem:[%s921_s20 + $0xc0] sm:$0xff] %v148_v24  ;;  %151 = vst [vmem:[%s921_s20 + $0xc8] sm:$0xff] %v150_v25  ;;  %v154_v27 = vld [vmem:[%s916_s19 + $0x198] sm:$0xff]  ;;  %v156_v28 = vld [vmem:[%s916_s19 + $0x1c0] sm:$0xff] }
  0x1d   : > { %153 = vst [vmem:[%s921_s20 + $0xd0] sm:$0xff] %v152_v26  ;;  %v158_v29 = vld [vmem:[%s916_s19 + $0x1c8] sm:$0xff]  ;;  %155 = vst [vmem:[%s921_s20 + $0xd8] sm:$0xff] %v154_v27  ;;  %v160_v30 = vld [vmem:[%s916_s19 + $0x1d0] sm:$0xff] }
  0x1e   : > { %157 = vst [vmem:[%s921_s20 + $0xe0] sm:$0xff] %v156_v28  ;;  %159 = vst [vmem:[%s921_s20 + $0xe8] sm:$0xff] %v158_v29  ;;  %v162_v31 = vld [vmem:[%s916_s19 + $0x1d8] sm:$0xff]  ;;  %v164_v32 = vld [vmem:[%s916_s19 + $0x200] sm:$0xff] }
  0x1f   : > { %161 = vst [vmem:[%s921_s20 + $0xf0] sm:$0xff] %v160_v30  ;;  %163 = vst [vmem:[%s921_s20 + $0xf8] sm:$0xff] %v162_v31  ;;  %v166_v33 = vld [vmem:[%s916_s19 + $0x208] sm:$0xff]  ;;  %v168_v34 = vld [vmem:[%s916_s19 + $0x210] sm:$0xff] }
  0x20   : > { %165 = vst [vmem:[%s921_s20 + $0x100] sm:$0xff] %v164_v32  ;;  %v170_v35 = vld [vmem:[%s916_s19 + $0x218] sm:$0xff]  ;;  %167 = vst [vmem:[%s921_s20 + $0x108] sm:$0xff] %v166_v33  ;;  %v172_v36 = vld [vmem:[%s916_s19 + $0x240] sm:$0xff] }
  0x21   : > { %169 = vst [vmem:[%s921_s20 + $0x110] sm:$0xff] %v168_v34  ;;  %171 = vst [vmem:[%s921_s20 + $0x118] sm:$0xff] %v170_v35  ;;  %v174_v37 = vld [vmem:[%s916_s19 + $0x248] sm:$0xff]  ;;  %v176_v38 = vld [vmem:[%s916_s19 + $0x250] sm:$0xff] }
  0x22   : > { %173 = vst [vmem:[%s921_s20 + $0x120] sm:$0xff] %v172_v36  ;;  %175 = vst [vmem:[%s921_s20 + $0x128] sm:$0xff] %v174_v37  ;;  %v178_v39 = vld [vmem:[%s916_s19 + $0x258] sm:$0xff]  ;;  %v180_v40 = vld [vmem:[%s916_s19 + $0x280] sm:$0xff] }
  0x23   : > { %177 = vst [vmem:[%s921_s20 + $0x130] sm:$0xff] %v176_v38  ;;  %v182_v41 = vld [vmem:[%s916_s19 + $0x288] sm:$0xff]  ;;  %179 = vst [vmem:[%s921_s20 + $0x138] sm:$0xff] %v178_v39  ;;  %v184_v42 = vld [vmem:[%s916_s19 + $0x290] sm:$0xff] }
  0x24   : > { %181 = vst [vmem:[%s921_s20 + $0x140] sm:$0xff] %v180_v40  ;;  %183 = vst [vmem:[%s921_s20 + $0x148] sm:$0xff] %v182_v41  ;;  %v186_v43 = vld [vmem:[%s916_s19 + $0x298] sm:$0xff]  ;;  %v188_v44 = vld [vmem:[%s916_s19 + $0x2c0] sm:$0xff] }
  0x25   : > { %185 = vst [vmem:[%s921_s20 + $0x150] sm:$0xff] %v184_v42  ;;  %187 = vst [vmem:[%s921_s20 + $0x158] sm:$0xff] %v186_v43  ;;  %v190_v45 = vld [vmem:[%s916_s19 + $0x2c8] sm:$0xff]  ;;  %v192_v46 = vld [vmem:[%s916_s19 + $0x2d0] sm:$0xff] }
  0x26   : > { %189 = vst [vmem:[%s921_s20 + $0x160] sm:$0xff] %v188_v44  ;;  %v194_v47 = vld [vmem:[%s916_s19 + $0x2d8] sm:$0xff]  ;;  %191 = vst [vmem:[%s921_s20 + $0x168] sm:$0xff] %v190_v45  ;;  %v196_v48 = vld [vmem:[%s916_s19 + $0x300] sm:$0xff] }
  0x27   : > { %193 = vst [vmem:[%s921_s20 + $0x170] sm:$0xff] %v192_v46  ;;  %195 = vst [vmem:[%s921_s20 + $0x178] sm:$0xff] %v194_v47  ;;  %v198_v49 = vld [vmem:[%s916_s19 + $0x308] sm:$0xff]  ;;  %v200_v50 = vld [vmem:[%s916_s19 + $0x310] sm:$0xff] }
  0x28   : > { %197 = vst [vmem:[%s921_s20 + $0x180] sm:$0xff] %v196_v48  ;;  %199 = vst [vmem:[%s921_s20 + $0x188] sm:$0xff] %v198_v49  ;;  %v202_v51 = vld [vmem:[%s916_s19 + $0x318] sm:$0xff]  ;;  %v204_v52 = vld [vmem:[%s916_s19 + $0x340] sm:$0xff] }
  0x29   : > { %201 = vst [vmem:[%s921_s20 + $0x190] sm:$0xff] %v200_v50  ;;  %v206_v53 = vld [vmem:[%s916_s19 + $0x348] sm:$0xff]  ;;  %203 = vst [vmem:[%s921_s20 + $0x198] sm:$0xff] %v202_v51  ;;  %v208_v54 = vld [vmem:[%s916_s19 + $0x350] sm:$0xff] }
  0x2a   : > { %205 = vst [vmem:[%s921_s20 + $0x1a0] sm:$0xff] %v204_v52  ;;  %207 = vst [vmem:[%s921_s20 + $0x1a8] sm:$0xff] %v206_v53  ;;  %v210_v55 = vld [vmem:[%s916_s19 + $0x358] sm:$0xff]  ;;  %v212_v56 = vld [vmem:[%s916_s19 + $0x380] sm:$0xff] }
  0x2b   : > { %209 = vst [vmem:[%s921_s20 + $0x1b0] sm:$0xff] %v208_v54  ;;  %211 = vst [vmem:[%s921_s20 + $0x1b8] sm:$0xff] %v210_v55  ;;  %v214_v57 = vld [vmem:[%s916_s19 + $0x388] sm:$0xff]  ;;  %v216_v58 = vld [vmem:[%s916_s19 + $0x390] sm:$0xff] }
  0x2c   : > { %213 = vst [vmem:[%s921_s20 + $0x1c0] sm:$0xff] %v212_v56  ;;  %v218_v59 = vld [vmem:[%s916_s19 + $0x398] sm:$0xff]  ;;  %215 = vst [vmem:[%s921_s20 + $0x1c8] sm:$0xff] %v214_v57  ;;  %v220_v60 = vld [vmem:[%s916_s19 + $0x3c0] sm:$0xff] }
  0x2d   : > { %217 = vst [vmem:[%s921_s20 + $0x1d0] sm:$0xff] %v216_v58  ;;  %219 = vst [vmem:[%s921_s20 + $0x1d8] sm:$0xff] %v218_v59  ;;  %v222_v61 = vld [vmem:[%s916_s19 + $0x3c8] sm:$0xff]  ;;  %v224_v62 = vld [vmem:[%s916_s19 + $0x3d0] sm:$0xff] }
  0x2e   : > { %221 = vst [vmem:[%s921_s20 + $0x1e0] sm:$0xff] %v220_v60  ;;  %223 = vst [vmem:[%s921_s20 + $0x1e8] sm:$0xff] %v222_v61  ;;  %v226_v63 = vld [vmem:[%s916_s19 + $0x3d8] sm:$0xff]  ;;  %v228_v0 = vld [vmem:[%s916_s19 + $0x400] sm:$0xff] }
  0x2f   : > { %225 = vst [vmem:[%s921_s20 + $0x1f0] sm:$0xff] %v224_v62  ;;  %v230_v1 = vld [vmem:[%s916_s19 + $0x408] sm:$0xff]  ;;  %227 = vst [vmem:[%s921_s20 + $0x1f8] sm:$0xff] %v226_v63  ;;  %v232_v2 = vld [vmem:[%s916_s19 + $0x410] sm:$0xff] }
  0x30   : > { %229 = vst [vmem:[%s921_s20 + $0x200] sm:$0xff] %v228_v0  ;;  %231 = vst [vmem:[%s921_s20 + $0x208] sm:$0xff] %v230_v1  ;;  %v234_v3 = vld [vmem:[%s916_s19 + $0x418] sm:$0xff]  ;;  %v236_v4 = vld [vmem:[%s916_s19 + $0x440] sm:$0xff] }
  0x31   : > { %233 = vst [vmem:[%s921_s20 + $0x210] sm:$0xff] %v232_v2  ;;  %235 = vst [vmem:[%s921_s20 + $0x218] sm:$0xff] %v234_v3  ;;  %v238_v5 = vld [vmem:[%s916_s19 + $0x448] sm:$0xff]  ;;  %v240_v6 = vld [vmem:[%s916_s19 + $0x450] sm:$0xff] }
  0x32   : > { %237 = vst [vmem:[%s921_s20 + $0x220] sm:$0xff] %v236_v4  ;;  %v242_v7 = vld [vmem:[%s916_s19 + $0x458] sm:$0xff]  ;;  %239 = vst [vmem:[%s921_s20 + $0x228] sm:$0xff] %v238_v5  ;;  %v244_v8 = vld [vmem:[%s916_s19 + $0x480] sm:$0xff] }
  0x33   : > { %241 = vst [vmem:[%s921_s20 + $0x230] sm:$0xff] %v240_v6  ;;  %243 = vst [vmem:[%s921_s20 + $0x238] sm:$0xff] %v242_v7  ;;  %v246_v9 = vld [vmem:[%s916_s19 + $0x488] sm:$0xff]  ;;  %v248_v10 = vld [vmem:[%s916_s19 + $0x490] sm:$0xff] }
  0x34   : > { %245 = vst [vmem:[%s921_s20 + $0x240] sm:$0xff] %v244_v8  ;;  %247 = vst [vmem:[%s921_s20 + $0x248] sm:$0xff] %v246_v9  ;;  %v250_v11 = vld [vmem:[%s916_s19 + $0x498] sm:$0xff]  ;;  %v252_v12 = vld [vmem:[%s916_s19 + $0x4c0] sm:$0xff] }
  0x35   : > { %249 = vst [vmem:[%s921_s20 + $0x250] sm:$0xff] %v248_v10  ;;  %v254_v13 = vld [vmem:[%s916_s19 + $0x4c8] sm:$0xff]  ;;  %251 = vst [vmem:[%s921_s20 + $0x258] sm:$0xff] %v250_v11  ;;  %v256_v14 = vld [vmem:[%s916_s19 + $0x4d0] sm:$0xff] }
  0x36   : > { %253 = vst [vmem:[%s921_s20 + $0x260] sm:$0xff] %v252_v12  ;;  %255 = vst [vmem:[%s921_s20 + $0x268] sm:$0xff] %v254_v13  ;;  %v258_v15 = vld [vmem:[%s916_s19 + $0x4d8] sm:$0xff]  ;;  %v260_v16 = vld [vmem:[%s916_s19 + $0x500] sm:$0xff] }
  0x37   : > { %257 = vst [vmem:[%s921_s20 + $0x270] sm:$0xff] %v256_v14  ;;  %259 = vst [vmem:[%s921_s20 + $0x278] sm:$0xff] %v258_v15  ;;  %v262_v17 = vld [vmem:[%s916_s19 + $0x508] sm:$0xff]  ;;  %v264_v18 = vld [vmem:[%s916_s19 + $0x510] sm:$0xff] }
  0x38   : > { %261 = vst [vmem:[%s921_s20 + $0x280] sm:$0xff] %v260_v16  ;;  %v266_v19 = vld [vmem:[%s916_s19 + $0x518] sm:$0xff]  ;;  %263 = vst [vmem:[%s921_s20 + $0x288] sm:$0xff] %v262_v17  ;;  %v268_v20 = vld [vmem:[%s916_s19 + $0x540] sm:$0xff] }
  0x39   : > { %265 = vst [vmem:[%s921_s20 + $0x290] sm:$0xff] %v264_v18  ;;  %267 = vst [vmem:[%s921_s20 + $0x298] sm:$0xff] %v266_v19  ;;  %v270_v21 = vld [vmem:[%s916_s19 + $0x548] sm:$0xff]  ;;  %v272_v22 = vld [vmem:[%s916_s19 + $0x550] sm:$0xff] }
  0x3a   : > { %269 = vst [vmem:[%s921_s20 + $0x2a0] sm:$0xff] %v268_v20  ;;  %271 = vst [vmem:[%s921_s20 + $0x2a8] sm:$0xff] %v270_v21  ;;  %v274_v23 = vld [vmem:[%s916_s19 + $0x558] sm:$0xff]  ;;  %v276_v24 = vld [vmem:[%s916_s19 + $0x580] sm:$0xff] }
  0x3b   : > { %273 = vst [vmem:[%s921_s20 + $0x2b0] sm:$0xff] %v272_v22  ;;  %v278_v25 = vld [vmem:[%s916_s19 + $0x588] sm:$0xff]  ;;  %275 = vst [vmem:[%s921_s20 + $0x2b8] sm:$0xff] %v274_v23  ;;  %v280_v26 = vld [vmem:[%s916_s19 + $0x590] sm:$0xff] }
  0x3c   : > { %277 = vst [vmem:[%s921_s20 + $0x2c0] sm:$0xff] %v276_v24  ;;  %279 = vst [vmem:[%s921_s20 + $0x2c8] sm:$0xff] %v278_v25  ;;  %v282_v27 = vld [vmem:[%s916_s19 + $0x598] sm:$0xff]  ;;  %v284_v28 = vld [vmem:[%s916_s19 + $0x5c0] sm:$0xff] }
  0x3d   : > { %281 = vst [vmem:[%s921_s20 + $0x2d0] sm:$0xff] %v280_v26  ;;  %283 = vst [vmem:[%s921_s20 + $0x2d8] sm:$0xff] %v282_v27  ;;  %v286_v29 = vld [vmem:[%s916_s19 + $0x5c8] sm:$0xff]  ;;  %v288_v30 = vld [vmem:[%s916_s19 + $0x5d0] sm:$0xff] }
  0x3e   : > { %285 = vst [vmem:[%s921_s20 + $0x2e0] sm:$0xff] %v284_v28  ;;  %v290_v31 = vld [vmem:[%s916_s19 + $0x5d8] sm:$0xff]  ;;  %287 = vst [vmem:[%s921_s20 + $0x2e8] sm:$0xff] %v286_v29  ;;  %v292_v32 = vld [vmem:[%s916_s19 + $0x600] sm:$0xff] }
  0x3f   : > { %289 = vst [vmem:[%s921_s20 + $0x2f0] sm:$0xff] %v288_v30  ;;  %291 = vst [vmem:[%s921_s20 + $0x2f8] sm:$0xff] %v290_v31  ;;  %v294_v33 = vld [vmem:[%s916_s19 + $0x608] sm:$0xff]  ;;  %v296_v34 = vld [vmem:[%s916_s19 + $0x610] sm:$0xff] }
  0x40   : > { %293 = vst [vmem:[%s921_s20 + $0x300] sm:$0xff] %v292_v32  ;;  %295 = vst [vmem:[%s921_s20 + $0x308] sm:$0xff] %v294_v33  ;;  %v298_v35 = vld [vmem:[%s916_s19 + $0x618] sm:$0xff]  ;;  %v300_v36 = vld [vmem:[%s916_s19 + $0x640] sm:$0xff] }
  0x41   : > { %297 = vst [vmem:[%s921_s20 + $0x310] sm:$0xff] %v296_v34  ;;  %v302_v37 = vld [vmem:[%s916_s19 + $0x648] sm:$0xff]  ;;  %299 = vst [vmem:[%s921_s20 + $0x318] sm:$0xff] %v298_v35  ;;  %v304_v38 = vld [vmem:[%s916_s19 + $0x650] sm:$0xff] }
  0x42   : > { %301 = vst [vmem:[%s921_s20 + $0x320] sm:$0xff] %v300_v36  ;;  %303 = vst [vmem:[%s921_s20 + $0x328] sm:$0xff] %v302_v37  ;;  %v306_v39 = vld [vmem:[%s916_s19 + $0x658] sm:$0xff]  ;;  %v308_v40 = vld [vmem:[%s916_s19 + $0x680] sm:$0xff] }
  0x43   : > { %305 = vst [vmem:[%s921_s20 + $0x330] sm:$0xff] %v304_v38  ;;  %307 = vst [vmem:[%s921_s20 + $0x338] sm:$0xff] %v306_v39  ;;  %v310_v41 = vld [vmem:[%s916_s19 + $0x688] sm:$0xff]  ;;  %v312_v42 = vld [vmem:[%s916_s19 + $0x690] sm:$0xff] }
  0x44   : > { %309 = vst [vmem:[%s921_s20 + $0x340] sm:$0xff] %v308_v40  ;;  %v314_v43 = vld [vmem:[%s916_s19 + $0x698] sm:$0xff]  ;;  %311 = vst [vmem:[%s921_s20 + $0x348] sm:$0xff] %v310_v41  ;;  %v316_v44 = vld [vmem:[%s916_s19 + $0x6c0] sm:$0xff] }
  0x45   : > { %313 = vst [vmem:[%s921_s20 + $0x350] sm:$0xff] %v312_v42  ;;  %315 = vst [vmem:[%s921_s20 + $0x358] sm:$0xff] %v314_v43  ;;  %v318_v45 = vld [vmem:[%s916_s19 + $0x6c8] sm:$0xff]  ;;  %v320_v46 = vld [vmem:[%s916_s19 + $0x6d0] sm:$0xff] }
  0x46   : > { %317 = vst [vmem:[%s921_s20 + $0x360] sm:$0xff] %v316_v44  ;;  %319 = vst [vmem:[%s921_s20 + $0x368] sm:$0xff] %v318_v45  ;;  %v322_v47 = vld [vmem:[%s916_s19 + $0x6d8] sm:$0xff]  ;;  %v324_v48 = vld [vmem:[%s916_s19 + $0x700] sm:$0xff] }
  0x47   : > { %321 = vst [vmem:[%s921_s20 + $0x370] sm:$0xff] %v320_v46  ;;  %v326_v49 = vld [vmem:[%s916_s19 + $0x708] sm:$0xff]  ;;  %323 = vst [vmem:[%s921_s20 + $0x378] sm:$0xff] %v322_v47  ;;  %v328_v50 = vld [vmem:[%s916_s19 + $0x710] sm:$0xff] }
  0x48   : > { %325 = vst [vmem:[%s921_s20 + $0x380] sm:$0xff] %v324_v48  ;;  %327 = vst [vmem:[%s921_s20 + $0x388] sm:$0xff] %v326_v49  ;;  %v330_v51 = vld [vmem:[%s916_s19 + $0x718] sm:$0xff]  ;;  %v332_v52 = vld [vmem:[%s916_s19 + $0x740] sm:$0xff] }
  0x49   : > { %329 = vst [vmem:[%s921_s20 + $0x390] sm:$0xff] %v328_v50  ;;  %331 = vst [vmem:[%s921_s20 + $0x398] sm:$0xff] %v330_v51  ;;  %v334_v53 = vld [vmem:[%s916_s19 + $0x748] sm:$0xff]  ;;  %v336_v54 = vld [vmem:[%s916_s19 + $0x750] sm:$0xff] }
  0x4a   : > { %333 = vst [vmem:[%s921_s20 + $0x3a0] sm:$0xff] %v332_v52  ;;  %v338_v55 = vld [vmem:[%s916_s19 + $0x758] sm:$0xff]  ;;  %335 = vst [vmem:[%s921_s20 + $0x3a8] sm:$0xff] %v334_v53  ;;  %v340_v56 = vld [vmem:[%s916_s19 + $0x780] sm:$0xff] }
  0x4b   : > { %337 = vst [vmem:[%s921_s20 + $0x3b0] sm:$0xff] %v336_v54  ;;  %339 = vst [vmem:[%s921_s20 + $0x3b8] sm:$0xff] %v338_v55  ;;  %v342_v57 = vld [vmem:[%s916_s19 + $0x788] sm:$0xff]  ;;  %v344_v58 = vld [vmem:[%s916_s19 + $0x790] sm:$0xff] }
  0x4c   : > { %341 = vst [vmem:[%s921_s20 + $0x3c0] sm:$0xff] %v340_v56  ;;  %343 = vst [vmem:[%s921_s20 + $0x3c8] sm:$0xff] %v342_v57  ;;  %v346_v59 = vld [vmem:[%s916_s19 + $0x798] sm:$0xff]  ;;  %v348_v60 = vld [vmem:[%s916_s19 + $0x7c0] sm:$0xff] }
  0x4d   : > { %345 = vst [vmem:[%s921_s20 + $0x3d0] sm:$0xff] %v344_v58  ;;  %v350_v61 = vld [vmem:[%s916_s19 + $0x7c8] sm:$0xff]  ;;  %347 = vst [vmem:[%s921_s20 + $0x3d8] sm:$0xff] %v346_v59  ;;  %v352_v62 = vld [vmem:[%s916_s19 + $0x7d0] sm:$0xff] }
  0x4e   : > { %349 = vst [vmem:[%s921_s20 + $0x3e0] sm:$0xff] %v348_v60  ;;  %351 = vst [vmem:[%s921_s20 + $0x3e8] sm:$0xff] %v350_v61  ;;  %v354_v63 = vld [vmem:[%s916_s19 + $0x7d8] sm:$0xff] }
  0x4f   : > { %353 = vst [vmem:[%s921_s20 + $0x3f0] sm:$0xff] %v352_v62  ;;  %355 = vst [vmem:[%s921_s20 + $0x3f8] sm:$0xff] %v354_v63 }
  0x50 PF: > { %p815_p5 = scmp.ge.s32.totalorder %s869_s8, 1  ;;  %p360_p6 = scmp.lt.s32.totalorder %s869_s8, 3 }
  0x52   : > { %p361_p7 = pnand %p815_p5, %p360_p6 }
  0x53   : > { %s367_s21 = sand.u32 (!%p361_p7), 1, %s861_s6   ;;  %s817_s24 = sshll.u32 (!%p361_p7), %s808_s9, 2 }
  0x54   : > { %364 = sbr.rel (%p361_p7) target bundleno = 166 (0xa6), region = 43  ;;  %s816_s22 = sshll.u32 (!%p361_p7), %s367_s21, 10 }
  0x55   : > { %s1179_s23 = scalar_lea.vmem (!%p361_p7), [#allocation2], %s816_s22  ;;  %p388_p8 = scmp.lt.s32.totalorder (!%p361_p7), %s817_s24, 7 }
  0x59   : > { %v401_v0 = vld [vmem:[%s1179_s23 + $0x40] sm:$0xff]  ;;  %v402_v1 = vld [vmem:[%s1179_s23 + $0x48] sm:$0xff]  ;;  %v403_v2 = vld [vmem:[%s1179_s23 + $0x50] sm:$0xff]  ;;  %s1360_s24 = smov (!%p388_p8, %s817_s24), 7  ;;  %vm736_vm0 = vcmask 1041409   ;;  %vm738_vm1 = vcmask 1043459  }
  0x5a   : > { %v404_v3 = vld [vmem:[%s1179_s23 + $0x58] sm:$0xff]  ;;  %v405_v4 = vld [vmem:[%s1179_s23 + $0x60] sm:$0xff]  ;;  %v406_v5 = vld [vmem:[%s1179_s23 + $0x68] sm:$0xff]  ;;  %s818_s25 = sshll.u32 %s1360_s24, 1  ;;  %vm740_vm2 = vcmask 1045509   ;;  %vm742_vm3 = vcmask 1047559  }
  0x5b   : > { %v407_v6 = vld [vmem:[%s1179_s23 + $0x70] sm:$0xff]  ;;  %v522_v7 = vmax.f32 %v405_v4, %v401_v0  ;;  %v543_v8 = vmax.f32 %v406_v5, %v402_v1  ;;  %v408_v10 = vld [vmem:[%s1179_s23 + $0x78] sm:$0xff]  ;;  %v409_v11 = vld [vmem:[%s1179_s23 + $0x80] sm:$0xff]  ;;  %s391_s28 = scalar_lea.vmem %s1355_s1, %s818_s25 }
  0x5c   : > { %v564_v9 = vmax.f32 %v407_v6, %v403_v2  ;;  %v410_v12 = vld [vmem:[%s1179_s23 + $0x88] sm:$0xff]  ;;  %v585_v13 = vmax.f32 %v408_v10, %v404_v3  ;;  %v411_v14 = vld [vmem:[%s1179_s23 + $0x90] sm:$0xff]  ;;  %v412_v15 = vld [vmem:[%s1179_s23 + $0x98] sm:$0xff] }
  0x5d   : > { %v413_v16 = vld [vmem:[%s1179_s23 + $0xa0] sm:$0xff]  ;;  %v523_v17 = vmax.f32 %v522_v7, %v409_v11  ;;  %v544_v18 = vmax.f32 %v543_v8, %v410_v12  ;;  %v414_v20 = vld [vmem:[%s1179_s23 + $0xa8] sm:$0xff]  ;;  %v415_v21 = vld [vmem:[%s1179_s23 + $0xb0] sm:$0xff] }
  0x5e   : > { %v565_v19 = vmax.f32 %v564_v9, %v411_v14  ;;  %v416_v22 = vld [vmem:[%s1179_s23 + $0xb8] sm:$0xff]  ;;  %v586_v23 = vmax.f32 %v585_v13, %v412_v15  ;;  %v417_v24 = vld [vmem:[%s1179_s23 + $0xc0] sm:$0xff]  ;;  %v418_v25 = vld [vmem:[%s1179_s23 + $0xc8] sm:$0xff] }
  0x5f   : > { %v419_v26 = vld [vmem:[%s1179_s23 + $0xd0] sm:$0xff]  ;;  %v524_v27 = vmax.f32 %v523_v17, %v413_v16  ;;  %v545_v28 = vmax.f32 %v544_v18, %v414_v20  ;;  %v420_v30 = vld [vmem:[%s1179_s23 + $0xd8] sm:$0xff]  ;;  %v421_v32 = vld [vmem:[%s1179_s23 + $0xe0] sm:$0xff] }
  0x60   : > { %v566_v29 = vmax.f32 %v565_v19, %v415_v21  ;;  %v587_v31 = vmax.f32 %v586_v23, %v416_v22  ;;  %v422_v33 = vld [vmem:[%s1179_s23 + $0xe8] sm:$0xff]  ;;  %v423_v34 = vld [vmem:[%s1179_s23 + $0xf0] sm:$0xff]  ;;  %v424_v38 = vld [vmem:[%s1179_s23 + $0xf8] sm:$0xff] }
  0x61   : > { %v525_v35 = vmax.f32 %v524_v27, %v417_v24  ;;  %v546_v36 = vmax.f32 %v545_v28, %v418_v25  ;;  %v425_v40 = vld [vmem:[%s1179_s23 + $0x100] sm:$0xff]  ;;  %v426_v41 = vld [vmem:[%s1179_s23 + $0x108] sm:$0xff]  ;;  %v427_v42 = vld [vmem:[%s1179_s23 + $0x110] sm:$0xff] }
  0x62   : > { %v567_v37 = vmax.f32 %v566_v29, %v419_v26  ;;  %v588_v39 = vmax.f32 %v587_v31, %v420_v30  ;;  %v428_v46 = vld [vmem:[%s1179_s23 + $0x118] sm:$0xff]  ;;  %v429_v48 = vld [vmem:[%s1179_s23 + $0x120] sm:$0xff]  ;;  %v430_v49 = vld [vmem:[%s1179_s23 + $0x128] sm:$0xff] }
  0x63   : > { %v526_v43 = vmax.f32 %v525_v35, %v421_v32  ;;  %v547_v44 = vmax.f32 %v546_v36, %v422_v33  ;;  %v431_v50 = vld [vmem:[%s1179_s23 + $0x130] sm:$0xff]  ;;  %v432_v54 = vld [vmem:[%s1179_s23 + $0x138] sm:$0xff]  ;;  %v433_v56 = vld [vmem:[%s1179_s23 + $0x140] sm:$0xff] }
  0x64   : > { %v568_v45 = vmax.f32 %v567_v37, %v423_v34  ;;  %v589_v47 = vmax.f32 %v588_v39, %v424_v38  ;;  %v434_v57 = vld [vmem:[%s1179_s23 + $0x148] sm:$0xff]  ;;  %v435_v58 = vld [vmem:[%s1179_s23 + $0x150] sm:$0xff]  ;;  %v436_v62 = vld [vmem:[%s1179_s23 + $0x158] sm:$0xff] }
  0x65   : > { %v527_v51 = vmax.f32 %v526_v43, %v425_v40  ;;  %v548_v52 = vmax.f32 %v547_v44, %v426_v41  ;;  %v437_v0 = vld [vmem:[%s1179_s23 + $0x160] sm:$0xff]  ;;  %v438_v1 = vld [vmem:[%s1179_s23 + $0x168] sm:$0xff]  ;;  %v439_v2 = vld [vmem:[%s1179_s23 + $0x170] sm:$0xff] }
  0x66   : > { %v569_v53 = vmax.f32 %v568_v45, %v427_v42  ;;  %v590_v55 = vmax.f32 %v589_v47, %v428_v46  ;;  %v440_v6 = vld [vmem:[%s1179_s23 + $0x178] sm:$0xff]  ;;  %v441_v8 = vld [vmem:[%s1179_s23 + $0x180] sm:$0xff]  ;;  %v442_v9 = vld [vmem:[%s1179_s23 + $0x188] sm:$0xff] }
  0x67   : > { %v528_v59 = vmax.f32 %v527_v51, %v429_v48  ;;  %v549_v60 = vmax.f32 %v548_v52, %v430_v49  ;;  %v443_v10 = vld [vmem:[%s1179_s23 + $0x190] sm:$0xff]  ;;  %v444_v14 = vld [vmem:[%s1179_s23 + $0x198] sm:$0xff]  ;;  %v445_v15 = vld [vmem:[%s1179_s23 + $0x1a0] sm:$0xff] }
  0x68   : > { %v570_v61 = vmax.f32 %v569_v53, %v431_v50  ;;  %v591_v63 = vmax.f32 %v590_v55, %v432_v54  ;;  %v446_v16 = vld [vmem:[%s1179_s23 + $0x1a8] sm:$0xff]  ;;  %v447_v18 = vld [vmem:[%s1179_s23 + $0x1b0] sm:$0xff]  ;;  %v448_v19 = vld [vmem:[%s1179_s23 + $0x1b8] sm:$0xff] }
  0x69   : > { %v529_v3 = vmax.f32 %v528_v59, %v433_v56  ;;  %v550_v4 = vmax.f32 %v549_v60, %v434_v57  ;;  %v449_v20 = vld [vmem:[%s1179_s23 + $0x1c0] sm:$0xff]  ;;  %v450_v24 = vld [vmem:[%s1179_s23 + $0x1c8] sm:$0xff]  ;;  %v451_v25 = vld [vmem:[%s1179_s23 + $0x1d0] sm:$0xff] }
  0x6a   : > { %v571_v5 = vmax.f32 %v570_v61, %v435_v58  ;;  %v592_v7 = vmax.f32 %v591_v63, %v436_v62  ;;  %v452_v26 = vld [vmem:[%s1179_s23 + $0x1d8] sm:$0xff]  ;;  %v1234_v27 = vld [vmem:[%s1179_s23] sm:$0xff]  ;;  %v1237_v28 = vld [vmem:[%s1179_s23 + $0x8] sm:$0xff] }
  0x6b   : > { %v530_v11 = vmax.f32 %v529_v3, %v437_v0  ;;  %v551_v12 = vmax.f32 %v550_v4, %v438_v1  ;;  %v1240_v29 = vld [vmem:[%s1179_s23 + $0x10] sm:$0xff]  ;;  %v1243_v30 = vld [vmem:[%s1179_s23 + $0x20] sm:$0xff]  ;;  %v1246_v31 = vld [vmem:[%s1179_s23 + $0x28] sm:$0xff] }
  0x6c   : > { %v572_v13 = vmax.f32 %v571_v5, %v439_v2  ;;  %v593_v17 = vmax.f32 %v592_v7, %v440_v6  ;;  %v1249_v32 = vld [vmem:[%s1179_s23 + $0x30] sm:$0xff]  ;;  %v465_v34 = vld [vmem:[%s1179_s23 + $0x240] sm:$0xff]  ;;  %v466_v35 = vld [vmem:[%s1179_s23 + $0x248] sm:$0xff] }
  0x6d   : > { %v531_v21 = vmax.f32 %v530_v11, %v441_v8  ;;  %v552_v22 = vmax.f32 %v551_v12, %v442_v9  ;;  %v467_v36 = vld [vmem:[%s1179_s23 + $0x250] sm:$0xff]  ;;  %v1255_v37 = vld [vmem:[%s1179_s23 + $0x18] sm:$0xff]  ;;  %v469_v43 = vld [vmem:[%s1179_s23 + $0x260] sm:$0xff]  ;;  %v521_v9 = vmax.f32 %v1234_v27, %v1243_v30  ;;  %v563_v11 = vmax.f32 %v1240_v29, %v1249_v32 }
  0x6e   : > { %v573_v23 = vmax.f32 %v572_v13, %v443_v10  ;;  %v594_v33 = vmax.f32 %v593_v17, %v444_v14  ;;  %v1258_v38 = vld [vmem:[%s1179_s23 + $0x38] sm:$0xff]  ;;  %v470_v44 = vld [vmem:[%s1179_s23 + $0x268] sm:$0xff]  ;;  %v453_v46 = vld [vmem:[%s1179_s23 + $0x1e0] sm:$0xff]  ;;  %v606_v49 = vmax.f32 %v469_v43, %v465_v34  ;;  %v542_v10 = vmax.f32 %v1237_v28, %v1246_v31 }
  0x6f   : > { %v532_v39 = vmax.f32 %v531_v21, %v445_v15  ;;  %v553_v40 = vmax.f32 %v552_v22, %v446_v16  ;;  %v468_v42 = vld [vmem:[%s1179_s23 + $0x258] sm:$0xff]  ;;  %v454_v47 = vld [vmem:[%s1179_s23 + $0x1e8] sm:$0xff]  ;;  %v455_v48 = vld [vmem:[%s1179_s23 + $0x1f0] sm:$0xff]  ;;  %v627_v50 = vmax.f32 %v470_v44, %v466_v35  ;;  %v584_v16 = vmax.f32 %v1255_v37, %v1258_v38 }
  0x70   : > { %v574_v41 = vmax.f32 %v573_v23, %v447_v18  ;;  %v595_v45 = vmax.f32 %v594_v33, %v448_v19  ;;  %v471_v51 = vld [vmem:[%s1179_s23 + $0x270] sm:$0xff]  ;;  %v472_v52 = vld [vmem:[%s1179_s23 + $0x278] sm:$0xff]  ;;  %v473_v53 = vld [vmem:[%s1179_s23 + $0x280] sm:$0xff] }
  0x71   : > { %v533_v54 = vmax.f32 %v532_v39, %v449_v20  ;;  %v554_v55 = vmax.f32 %v553_v40, %v450_v24  ;;  %v456_v57 = vld [vmem:[%s1179_s23 + $0x1f8] sm:$0xff]  ;;  %v648_v58 = vmax.f32 %v471_v51, %v467_v36  ;;  %v474_v59 = vld [vmem:[%s1179_s23 + $0x288] sm:$0xff]  ;;  %v475_v60 = vld [vmem:[%s1179_s23 + $0x290] sm:$0xff]  ;;  %v669_v63 = vmax.f32 %v472_v52, %v468_v42 }
  0x72   : > { %v575_v56 = vmax.f32 %v574_v41, %v451_v25  ;;  %v476_v61 = vld [vmem:[%s1179_s23 + $0x298] sm:$0xff]  ;;  %v596_v62 = vmax.f32 %v595_v45, %v452_v26  ;;  %v607_v0 = vmax.f32 %v606_v49, %v473_v53  ;;  %v628_v1 = vmax.f32 %v627_v50, %v474_v59  ;;  %v477_v2 = vld [vmem:[%s1179_s23 + $0x2a0] sm:$0xff]  ;;  %v478_v3 = vld [vmem:[%s1179_s23 + $0x2a8] sm:$0xff] }
  0x73   : > { %v479_v4 = vld [vmem:[%s1179_s23 + $0x2b0] sm:$0xff]  ;;  %v649_v5 = vmax.f32 %v648_v58, %v475_v60  ;;  %v480_v6 = vld [vmem:[%s1179_s23 + $0x2b8] sm:$0xff]  ;;  %v481_v7 = vld [vmem:[%s1179_s23 + $0x2c0] sm:$0xff]  ;;  %v670_v12 = vmax.f32 %v669_v63, %v476_v61  ;;  %v534_v17 = vmax.f32 %v533_v54, %v453_v46  ;;  %v555_v18 = vmax.f32 %v554_v55, %v454_v47 }
  0x74   : > { %v482_v8 = vld [vmem:[%s1179_s23 + $0x2c8] sm:$0xff]  ;;  %v608_v13 = vmax.f32 %v607_v0, %v477_v2  ;;  %v629_v14 = vmax.f32 %v628_v1, %v478_v3  ;;  %v483_v15 = vld [vmem:[%s1179_s23 + $0x2d0] sm:$0xff]  ;;  %v576_v19 = vmax.f32 %v575_v56, %v455_v48  ;;  %v484_v21 = vld [vmem:[%s1179_s23 + $0x2d8] sm:$0xff]  ;;  %v597_v24 = vmax.f32 %v596_v62, %v456_v57 }
  0x75   : > { %v650_v20 = vmax.f32 %v649_v5, %v479_v4  ;;  %v485_v22 = vld [vmem:[%s1179_s23 + $0x2e0] sm:$0xff]  ;;  %v486_v23 = vld [vmem:[%s1179_s23 + $0x2e8] sm:$0xff]  ;;  %v671_v25 = vmax.f32 %v670_v12, %v480_v6  ;;  %v487_v28 = vld [vmem:[%s1179_s23 + $0x2f0] sm:$0xff]  ;;  %v535_v41 = vmax.f32 %v534_v17, %v521_v9  ;;  %v556_v42 = vmax.f32 %v555_v18, %v542_v10 }
  0x76   : > { %v609_v26 = vmax.f32 %v608_v13, %v481_v7  ;;  %v630_v27 = vmax.f32 %v629_v14, %v482_v8  ;;  %v488_v30 = vld [vmem:[%s1179_s23 + $0x2f8] sm:$0xff]  ;;  %v489_v31 = vld [vmem:[%s1179_s23 + $0x300] sm:$0xff]  ;;  %v490_v32 = vld [vmem:[%s1179_s23 + $0x308] sm:$0xff]  ;;  %v577_v43 = vmax.f32 %v576_v19, %v563_v11  ;;  %v598_v48 = vmax.f32 %v597_v24, %v584_v16 }
  0x77   : > { %v651_v29 = vmax.f32 %v650_v20, %v483_v15  ;;  %v672_v33 = vmax.f32 %v671_v25, %v484_v21  ;;  %v491_v36 = vld [vmem:[%s1179_s23 + $0x310] sm:$0xff]  ;;  %v492_v38 = vld [vmem:[%s1179_s23 + $0x318] sm:$0xff]  ;;  %v493_v39 = vld [vmem:[%s1179_s23 + $0x320] sm:$0xff]  ;;  %v536_v61 = vrot.slane %v535_v41, 4  ;;  %v557_v62 = vrot.slane %v556_v42, 4 }
  0x78   : > { %v610_v34 = vmax.f32 %v609_v26, %v485_v22  ;;  %v631_v35 = vmax.f32 %v630_v27, %v486_v23  ;;  %v494_v40 = vld [vmem:[%s1179_s23 + $0x328] sm:$0xff]  ;;  %v495_v47 = vld [vmem:[%s1179_s23 + $0x330] sm:$0xff]  ;;  %v496_v50 = vld [vmem:[%s1179_s23 + $0x338] sm:$0xff]  ;;  %v578_v63 = vrot.slane %v577_v43, 4  ;;  %v599_v5 = vrot.slane %v598_v48, 4 }
  0x79   : > { %v652_v37 = vmax.f32 %v651_v29, %v487_v28  ;;  %v673_v44 = vmax.f32 %v672_v33, %v488_v30  ;;  %v497_v51 = vld [vmem:[%s1179_s23 + $0x340] sm:$0xff]  ;;  %v498_v52 = vld [vmem:[%s1179_s23 + $0x348] sm:$0xff]  ;;  %v499_v56 = vld [vmem:[%s1179_s23 + $0x350] sm:$0xff]  ;;  %v537_v21 = vmax.f32 %v535_v41, %v536_v61  ;;  %v558_v22 = vmax.f32 %v556_v42, %v557_v62 }
  0x7a   : > { %v611_v45 = vmax.f32 %v610_v34, %v489_v31  ;;  %v632_v46 = vmax.f32 %v631_v35, %v490_v32  ;;  %v500_v58 = vld [vmem:[%s1179_s23 + $0x358] sm:$0xff]  ;;  %v501_v59 = vld [vmem:[%s1179_s23 + $0x360] sm:$0xff]  ;;  %v502_v60 = vld [vmem:[%s1179_s23 + $0x368] sm:$0xff]  ;;  %v579_v23 = vmax.f32 %v577_v43, %v578_v63  ;;  %v600_v29 = vmax.f32 %v598_v48, %v599_v5 }
  0x7b   : > { %v653_v49 = vmax.f32 %v652_v37, %v491_v36  ;;  %v674_v53 = vmax.f32 %v673_v44, %v492_v38  ;;  %v1308_v0 = vld [vmem:[%s1179_s23 + $0x200] sm:$0xff]  ;;  %v503_v4 = vld [vmem:[%s1179_s23 + $0x370] sm:$0xff]  ;;  %v1312_v6 = vld [vmem:[%s1179_s23 + $0x208] sm:$0xff]  ;;  %v559_v48 = vrot.slane %v558_v22, 2 }
  0x7c   : > { %v612_v54 = vmax.f32 %v611_v45, %v493_v39  ;;  %v633_v55 = vmax.f32 %v632_v46, %v494_v40  ;;  %v504_v8 = vld [vmem:[%s1179_s23 + $0x378] sm:$0xff]  ;;  %v505_v9 = vld [vmem:[%s1179_s23 + $0x380] sm:$0xff]  ;;  %v506_v10 = vld [vmem:[%s1179_s23 + $0x388] sm:$0xff] }
  0x7d   : > { %v654_v57 = vmax.f32 %v653_v49, %v495_v47  ;;  %v675_v1 = vmax.f32 %v674_v53, %v496_v50  ;;  %v461_v11 = vld [vmem:[%s1179_s23 + $0x220] sm:$0xff]  ;;  %v462_v12 = vld [vmem:[%s1179_s23 + $0x228] sm:$0xff]  ;;  %v507_v16 = vld [vmem:[%s1179_s23 + $0x390] sm:$0xff]  ;;  %v538_v47 = vrot.slane %v537_v21, 2  ;;  %v580_v49 = vrot.slane %v579_v23, 2 }
  0x7e   : > { %v613_v2 = vmax.f32 %v612_v54, %v497_v51  ;;  %v634_v3 = vmax.f32 %v633_v55, %v498_v52  ;;  %v508_v18 = vld [vmem:[%s1179_s23 + $0x398] sm:$0xff]  ;;  %v509_v19 = vld [vmem:[%s1179_s23 + $0x3a0] sm:$0xff]  ;;  %v510_v20 = vld [vmem:[%s1179_s23 + $0x3a8] sm:$0xff]  ;;  %v605_v35 = vmax.f32 %v1308_v0, %v461_v11  ;;  %v626_v42 = vmax.f32 %v1312_v6, %v462_v12 }
  0x7f   : > { %v655_v7 = vmax.f32 %v654_v57, %v499_v56  ;;  %v676_v13 = vmax.f32 %v675_v1, %v500_v58  ;;  %v459_v24 = vld [vmem:[%s1179_s23 + $0x210] sm:$0xff]  ;;  %v460_v30 = vld [vmem:[%s1179_s23 + $0x218] sm:$0xff]  ;;  %v513_v33 = vld [vmem:[%s1179_s23 + $0x3c0] sm:$0xff]  ;;  %v601_v54 = vrot.slane %v600_v29, 2  ;;  %v539_v63 = vmax.f32 %v537_v21, %v538_v47 }
  0x80   : > { %v614_v14 = vmax.f32 %v613_v2, %v501_v59  ;;  %v635_v15 = vmax.f32 %v634_v3, %v502_v60  ;;  %v511_v28 = vld [vmem:[%s1179_s23 + $0x3b0] sm:$0xff]  ;;  %v512_v32 = vld [vmem:[%s1179_s23 + $0x3b8] sm:$0xff]  ;;  %v514_v34 = vld [vmem:[%s1179_s23 + $0x3c8] sm:$0xff]  ;;  %v560_v0 = vmax.f32 %v558_v22, %v559_v48  ;;  %v581_v1 = vmax.f32 %v579_v23, %v580_v49 }
  0x81   : > { %v656_v17 = vmax.f32 %v655_v7, %v503_v4  ;;  %v677_v25 = vmax.f32 %v676_v13, %v504_v8  ;;  %v463_v36 = vld [vmem:[%s1179_s23 + $0x230] sm:$0xff]  ;;  %v464_v37 = vld [vmem:[%s1179_s23 + $0x238] sm:$0xff]  ;;  %v517_v45 = vld [vmem:[%s1179_s23 + $0x3e0] sm:$0xff]  ;;  %v602_v3 = vmax.f32 %v600_v29, %v601_v54  ;;  %v702_v7 = vlaneseq }
  0x82   : > { %v615_v26 = vmax.f32 %v614_v14, %v505_v9  ;;  %v636_v27 = vmax.f32 %v635_v15, %v506_v10  ;;  %v515_v41 = vld [vmem:[%s1179_s23 + $0x3d0] sm:$0xff]  ;;  %v516_v44 = vld [vmem:[%s1179_s23 + $0x3d8] sm:$0xff]  ;;  %v518_v46 = vld [vmem:[%s1179_s23 + $0x3e8] sm:$0xff]  ;;  %v647_v57 = vmax.f32 %v459_v24, %v463_v36  ;;  %v668_v61 = vmax.f32 %v460_v30, %v464_v37 }
  0x83   : > { %v657_v31 = vmax.f32 %v656_v17, %v507_v16  ;;  %v678_v38 = vmax.f32 %v677_v25, %v508_v18  ;;  %v519_v53 = vld [vmem:[%s1179_s23 + $0x3f0] sm:$0xff]  ;;  %v520_v56 = vld [vmem:[%s1179_s23 + $0x3f8] sm:$0xff]  ;;  %v871_v11 = vmov 1983009808   ;;  %v540_v13 = vrot.slane %v539_v63, 1 }
  0x84   : > { %v616_v39 = vmax.f32 %v615_v26, %v509_v19  ;;  %v637_v40 = vmax.f32 %v636_v27, %v510_v20  ;;  %v700_v12 = vunpack.c.l.s4 %v871_v11  ;;  %v561_v14 = vrot.slane %v560_v0, 1 }
  0x85   : > { %v658_v43 = vmax.f32 %v657_v31, %v511_v28  ;;  %v679_v50 = vmax.f32 %v678_v38, %v512_v32  ;;  %v582_v15 = vrot.slane %v581_v1, 1  ;;  %v603_v17 = vrot.slane %v602_v3, 1 }
  0x86   : > { %v617_v51 = vmax.f32 %v616_v39, %v513_v33  ;;  %v638_v52 = vmax.f32 %v637_v40, %v514_v34  ;;  %v703_v22 = vshrl.u32 %v702_v7, 7  ;;  %v701_v26 = vunpack.c.0.s8 %v700_v12 }
  0x87   : > { %v659_v55 = vmax.f32 %v658_v43, %v515_v41  ;;  %v680_v58 = vmax.f32 %v679_v50, %v516_v44  ;;  %v541_v27 = vmax.f32 %v539_v63, %v540_v13  ;;  %v562_v28 = vmax.f32 %v560_v0, %v561_v14 }
  0x88   : > { %v618_v59 = vmax.f32 %v617_v51, %v517_v45  ;;  %v639_v60 = vmax.f32 %v638_v52, %v518_v46  ;;  %v583_v29 = vmax.f32 %v581_v1, %v582_v15  ;;  %v604_v31 = vmax.f32 %v602_v3, %v603_v17 }
  0x89   : > { %v660_v62 = vmax.f32 %v659_v55, %v519_v53  ;;  %v681_v2 = vmax.f32 %v680_v58, %v520_v56  ;;  %v697_v40 = vcombine.low %v541_v27, %v562_v28  ;;  %v704_v41 = vsub.s32 %v701_v26, %v703_v22 }
  0x8a   : > { %v619_v4 = vmax.f32 %v618_v59, %v605_v35  ;;  %v640_v5 = vmax.f32 %v639_v60, %v626_v42  ;;  %v698_v45 = vcombine.low %v583_v29, %v604_v31 }
  0x8b   : > { %v661_v6 = vmax.f32 %v660_v62, %v647_v57  ;;  %v682_v10 = vmax.f32 %v681_v2, %v668_v61  ;;  %v705_v49 = vrot.slane %v697_v40, %v704_v41 }
  0x8c   : > { %v620_v8 = vrot.slane %v619_v4, 4  ;;  %v641_v9 = vrot.slane %v640_v5, 4  ;;  %v712_v50 = vrot.slane %v698_v45, %v704_v41 }
  0x8d   : > { %v662_v16 = vrot.slane %v661_v6, 4  ;;  %v683_v20 = vrot.slane %v682_v10, 4 }
  0x8e   : > { %v621_v18 = vmax.f32 %v619_v4, %v620_v8  ;;  %v642_v19 = vmax.f32 %v640_v5, %v641_v9  ;;  %v713_v54 = vcombine.low %v705_v49, %v712_v50 }
  0x8f   : > { %v663_v21 = vmax.f32 %v661_v6, %v662_v16  ;;  %v684_v25 = vmax.f32 %v682_v10, %v683_v20 }
  0x90   : > { %v622_v23 = vrot.slane %v621_v18, 2  ;;  %v643_v24 = vrot.slane %v642_v19, 2 }
  0x91   : > { %v664_v30 = vrot.slane %v663_v21, 2  ;;  %v685_v34 = vrot.slane %v684_v25, 2 }
  0x92   : > { %v623_v32 = vmax.f32 %v621_v18, %v622_v23  ;;  %v644_v33 = vmax.f32 %v642_v19, %v643_v24 }
  0x93   : > { %v665_v35 = vmax.f32 %v663_v21, %v664_v30  ;;  %v686_v38 = vmax.f32 %v684_v25, %v685_v34 }
  0x94   : > { %v624_v36 = vrot.slane %v623_v32, 1  ;;  %v645_v37 = vrot.slane %v644_v33, 1 }
  0x95   : > { %v666_v39 = vrot.slane %v665_v35, 1  ;;  %v687_v44 = vrot.slane %v686_v38, 1 }
  0x96   : > { %v625_v42 = vmax.f32 %v623_v32, %v624_v36  ;;  %v646_v43 = vmax.f32 %v644_v33, %v645_v37 }
  0x97   : > { %v667_v46 = vmax.f32 %v665_v35, %v666_v39  ;;  %v688_v47 = vmax.f32 %v686_v38, %v687_v44 }
  0x98   : > { %v714_v48 = vcombine.low %v625_v42, %v646_v43 }
  0x99   : > { %v715_v51 = vcombine.low %v667_v46, %v688_v47 }
  0x9a   : > { %v722_v52 = vrot.slane %v714_v48, %v704_v41 }
  0x9b   : > { %v729_v53 = vrot.slane %v715_v51, %v704_v41 }
  0x9d   : > { %v730_v55 = vcombine.low %v722_v52, %v729_v53 }
  0x9f   : > { %v735_v56 = vrot.slane %v730_v55, 7 }
  0xa1   : > { %v737_v57 = vsel %vm736_vm0, %v735_v56, %v713_v54 }
  0xa2   : > { %v739_v58 = vsel %vm738_vm1, %v735_v56, %v737_v57 }
  0xa3   : > { %v741_v59 = vsel %vm740_vm2, %v735_v56, %v739_v58 }
  0xa4   : > { %v743_v60 = vsel %vm742_vm3, %v735_v56, %v741_v59 }
  0xa5   : > { %745 = vst [vmem:[%s391_s28] sm:$0xff] %v743_v60 }
  0xa6 PF: > { %p8_p9 = scmp.ge.s32.totalorder %s899_s10, 4   ;;  %s1356_s6 = smov %s865_s7 }
  0xa7   : > { %s1357_s7 = smov %s908_s13  ;;  %s1358_s8 = smov %s899_s10 }
  0xa8   :  { %10 = sbr.rel (!%p8_p9) target bundleno = 2 (0x2), region = 82 }

// kernel: pointnet_gem_forward.13
= control target key start
LH: loop header
LB: loop body
LE: loop exit
PB: predicated region body
PF: predicated region fallthrough
CT: control target
= control target key end

     0   :  { %9 = vsyncpa [#allocation3], 0  ;;  %s2546_s0 = inlined_call_operand.vmem [shape: f32[256,128], index: 0, kind: input, shape index: {}]   ;;  %s2547_s1 = inlined_call_operand.hbm [shape: f32[128,1024], index: 1, kind: input, shape index: {}]   ;;  %s2548_s2 = inlined_call_operand.vmem [shape: f32[1,1024], index: 2, kind: input, shape index: {}]   ;;  %s2549_s3 = inlined_call_operand.hbm [shape: f32[1,1024], index: 3, kind: input, shape index: {}]   ;;  %s2550_s4 = inlined_call_operand.vmem [shape: f32[256,1024], index: 4, kind: output, shape index: {}]  }
   0x1   :  { %10 = vsyncpa [#allocation5], 0  ;;  %s1842_s15 = smov 0  }
   0x2 LB: > { %s1695_s16 = sadd.s32 4294967295, %s1810_s15   ;;  %p1697_p0 = scmp.ge.s32.totalorder %s1810_s15, 1  ;;  %s1810_s15 = sphi %s1842_s15, %s16_s15  }
   0x3   : > { %p136_p1 = scmp.lt.s32.totalorder %s1810_s15, 3  ;;  %s1812_s17 = smov [#allocation2]  }
   0x4   : > { %s148_s18 = sshll.u32 %s1812_s17, 4  ;;  %p1856_p3 = scmp.eq.s32.totalorder %s1695_s16, 0  ;;  %s149_s18 = int_to_ptr.vmem [resolvable:$true] %s148_s18 }
   0x5   : > { %p1850_p2 = pnand %p1697_p0, %p136_p1  ;;  %s1813_s21 = smov [#allocation4]  }
   0x6   : > { %s165_s22 = sshll.u32 %s1813_s21, 4  ;;  %s1755_s24 = scalar_lea.vmem %s149_s18, 16384  ;;  %s166_s22 = int_to_ptr.vmem [resolvable:$true] %s165_s22 }
   0x7   : > { %p1720_p4 = pneg %p1850_p2  ;;  %p1756_p7 = scmp.ne.s32.totalorder %s149_s18, %s1755_s24 }
   0x8   : > { %p1763_p10 = scmp.lt.s32.totalorder %s149_s18, %s149_s18  ;;  %p1764_p11 = scmp.lt.s32.totalorder %s1755_s24, %s1755_s24 }
   0x9   : > { %p1864_p5 = pnand %p1856_p3, %p1720_p4 }
   0xa   : > { %p1765_p12 = por %p1764_p11, %p1763_p10 }
   0xb   : > { %p1746_p6 = pneg %p1864_p5 }
   0xd   : > { %p1758_p8 = pnand %p1756_p7, %p1746_p6 }
   0xf   : > { %p1759_p9 = pneg %p1758_p8 }
  0x11   : > { %p1766_p13 = pnand %p1765_p12, %p1759_p9 }
  0x13   : > { %1769 = shalt.err (!%p1766_p13)
}
  0x14   : > { %s1814_s25 = smov 1024   ;;  %s1815_s26 = smov 64  }
  0x15   : > { %1723 = dma.hbm_to_vmem [thread:$0]  (!%p1864_p5), %s2547_s1, 16384, %s149_s18, [#allocation3], %s1814_s25, %s1814_s25, %s1815_s26  }
  0x16   : > { %s1781_s29 = scalar_lea.vmem %s166_s22, 128  ;;  %p1789_p7 = scmp.lt.s32.totalorder %s166_s22, %s166_s22 }
  0x17   : > { %p1782_p0 = scmp.ne.s32.totalorder %s166_s22, %s1781_s29  ;;  %p1790_p8 = scmp.lt.s32.totalorder %s1781_s29, %s1781_s29 }
  0x19   : > { %p1784_p1 = pnand %p1782_p0, %p1746_p6  ;;  %p1791_p10 = por %p1790_p8, %p1789_p7 }
  0x1b   : > { %p1785_p4 = pneg %p1784_p1 }
  0x1d   : > { %p1792_p9 = pnand %p1791_p10, %p1785_p4 }
  0x1f   : > { %1795 = shalt.err (!%p1792_p9)
}
  0x20   : > { %1726 = dma.hbm_to_vmem [thread:$0]  (!%p1864_p5), %s2549_s3, 128, %s166_s22, [#allocation5]  }
  0x21   : > { %187 = sbr.rel (%p1850_p2) target bundleno = 401 (0x191), region = 36 }
  0x26   : > { %1801 = dma.done.wait (%p1856_p3), [#allocation3], 16384  }
  0x27   : > { %1803 = vsyncadd (%p1856_p3), [#allocation3], 4294950912 }
  0x28   : > { %1805 = dma.done.wait (%p1856_p3), [#allocation5], 128  }
  0x29   : > { %1807 = vsyncadd (%p1856_p3), [#allocation5], 4294967168  ;;  %v1816_v0 = vmov 0.0   ;;  %v368_v1 = vld [vmem:[#allocation2 + $0x3c8] sm:$0xff]  ;;  %v370_v2 = vld [vmem:[#allocation2 + $0x3d8] sm:$0xff]  ;;  %s1900_s6 = sshll.u32 %s1695_s16, 4 }
  0x2a   : > { %439 = vmatprep.mubr.f32.mxu0 %v1816_v0  ;;  %600 = vmatprep.mubr.f32.mxu1 %v1816_v0  ;;  %v367_v3 = vld [vmem:[#allocation2 + $0x3c0] sm:$0xff]  ;;  %v369_v4 = vld [vmem:[#allocation2 + $0x3d0] sm:$0xff]  ;;  %v360_v5 = vld [vmem:[#allocation2 + $0x388] sm:$0xff]  ;;  %p219_p2 = scmp.lt.s32.totalorder %s1900_s6, 31 }
  0x2b   : > { %375 = vmatprep.subr.mxu0 %v368_v1  ;;  %536 = vmatprep.subr.mxu1 %v370_v2  ;;  %v362_v6 = vld [vmem:[#allocation2 + $0x398] sm:$0xff]  ;;  %v359_v7 = vld [vmem:[#allocation2 + $0x380] sm:$0xff]  ;;  %v361_v8 = vld [vmem:[#allocation2 + $0x390] sm:$0xff] }
  0x2c   : > { %376 = vmatpush1.msra.mxu0 %v367_v3  ;;  %537 = vmatpush1.msra.mxu1 %v369_v4  ;;  %v352_v9 = vld [vmem:[#allocation2 + $0x348] sm:$0xff]  ;;  %v354_v10 = vld [vmem:[#allocation2 + $0x358] sm:$0xff]  ;;  %v351_v11 = vld [vmem:[#allocation2 + $0x340] sm:$0xff]  ;;  %s2555_s6 = smov (!%p219_p2, %s1900_s6), 31 }
  0x2d   : > { %377 = vmatprep.subr.mxu0 %v360_v5  ;;  %538 = vmatprep.subr.mxu1 %v362_v6  ;;  %v353_v12 = vld [vmem:[#allocation2 + $0x350] sm:$0xff]  ;;  %v344_v13 = vld [vmem:[#allocation2 + $0x308] sm:$0xff]  ;;  %v346_v14 = vld [vmem:[#allocation2 + $0x318] sm:$0xff]  ;;  %s1705_s7 = sshll.u32 %s2555_s6, 3  ;;  %s1711_s13 = sshll.u32 %s2555_s6, 6 }
  0x2e   : > { %378 = vmatpush1.msra.mxu0 %v359_v7  ;;  %539 = vmatpush1.msra.mxu1 %v361_v8  ;;  %v343_v15 = vld [vmem:[#allocation2 + $0x300] sm:$0xff]  ;;  %v345_v16 = vld [vmem:[#allocation2 + $0x310] sm:$0xff]  ;;  %v336_v17 = vld [vmem:[#allocation2 + $0x2c8] sm:$0xff]  ;;  %s1912_s10 = scalar_lea.vmem %s2546_s0, %s1705_s7  ;;  %s2135_s17 = scalar_lea.vmem %s2550_s4, %s1711_s13 }
  0x2f   : > { %379 = vmatprep.subr.mxu0 %v352_v9  ;;  %540 = vmatprep.subr.mxu1 %v354_v10  ;;  %v338_v18 = vld [vmem:[#allocation2 + $0x2d8] sm:$0xff]  ;;  %v335_v19 = vld [vmem:[#allocation2 + $0x2c0] sm:$0xff]  ;;  %v337_v20 = vld [vmem:[#allocation2 + $0x2d0] sm:$0xff] }
  0x30   : > { %380 = vmatpush1.msra.mxu0 %v351_v11  ;;  %541 = vmatpush1.msra.mxu1 %v353_v12  ;;  %v328_v21 = vld [vmem:[#allocation2 + $0x288] sm:$0xff]  ;;  %v330_v22 = vld [vmem:[#allocation2 + $0x298] sm:$0xff]  ;;  %v327_v23 = vld [vmem:[#allocation2 + $0x280] sm:$0xff] }
  0x31   : > { %381 = vmatprep.subr.mxu0 %v344_v13  ;;  %542 = vmatprep.subr.mxu1 %v346_v14  ;;  %v329_v24 = vld [vmem:[#allocation2 + $0x290] sm:$0xff]  ;;  %v320_v25 = vld [vmem:[#allocation2 + $0x248] sm:$0xff]  ;;  %v322_v26 = vld [vmem:[#allocation2 + $0x258] sm:$0xff] }
  0x32   : > { %382 = vmatpush1.msra.mxu0 %v343_v15  ;;  %543 = vmatpush1.msra.mxu1 %v345_v16  ;;  %v319_v27 = vld [vmem:[#allocation2 + $0x240] sm:$0xff]  ;;  %v321_v28 = vld [vmem:[#allocation2 + $0x250] sm:$0xff]  ;;  %v312_v29 = vld [vmem:[#allocation2 + $0x208] sm:$0xff] }
  0x33   : > { %383 = vmatprep.subr.mxu0 %v336_v17  ;;  %544 = vmatprep.subr.mxu1 %v338_v18  ;;  %v314_v30 = vld [vmem:[#allocation2 + $0x218] sm:$0xff]  ;;  %v311_v31 = vld [vmem:[#allocation2 + $0x200] sm:$0xff]  ;;  %v313_v32 = vld [vmem:[#allocation2 + $0x210] sm:$0xff] }
  0x34   : > { %384 = vmatpush1.msra.mxu0 %v335_v19  ;;  %545 = vmatpush1.msra.mxu1 %v337_v20  ;;  %v304_v33 = vld [vmem:[#allocation2 + $0x1c8] sm:$0xff]  ;;  %v306_v34 = vld [vmem:[#allocation2 + $0x1d8] sm:$0xff]  ;;  %v303_v35 = vld [vmem:[#allocation2 + $0x1c0] sm:$0xff] }
  0x35   : > { %385 = vmatprep.subr.mxu0 %v328_v21  ;;  %546 = vmatprep.subr.mxu1 %v330_v22  ;;  %v305_v36 = vld [vmem:[#allocation2 + $0x1d0] sm:$0xff]  ;;  %v296_v37 = vld [vmem:[#allocation2 + $0x188] sm:$0xff]  ;;  %v298_v38 = vld [vmem:[#allocation2 + $0x198] sm:$0xff] }
  0x36   : > { %386 = vmatpush1.msra.mxu0 %v327_v23  ;;  %547 = vmatpush1.msra.mxu1 %v329_v24  ;;  %v295_v39 = vld [vmem:[#allocation2 + $0x180] sm:$0xff]  ;;  %v297_v40 = vld [vmem:[#allocation2 + $0x190] sm:$0xff]  ;;  %v288_v41 = vld [vmem:[#allocation2 + $0x148] sm:$0xff] }
  0x37   : > { %387 = vmatprep.subr.mxu0 %v320_v25  ;;  %548 = vmatprep.subr.mxu1 %v322_v26  ;;  %v290_v42 = vld [vmem:[#allocation2 + $0x158] sm:$0xff]  ;;  %v287_v43 = vld [vmem:[#allocation2 + $0x140] sm:$0xff]  ;;  %v289_v44 = vld [vmem:[#allocation2 + $0x150] sm:$0xff] }
  0x38   : > { %388 = vmatpush1.msra.mxu0 %v319_v27  ;;  %549 = vmatpush1.msra.mxu1 %v321_v28  ;;  %v280_v45 = vld [vmem:[#allocation2 + $0x108] sm:$0xff]  ;;  %v282_v46 = vld [vmem:[#allocation2 + $0x118] sm:$0xff]  ;;  %v279_v47 = vld [vmem:[#allocation2 + $0x100] sm:$0xff] }
  0x39   : > { %389 = vmatprep.subr.mxu0 %v312_v29  ;;  %550 = vmatprep.subr.mxu1 %v314_v30  ;;  %v281_v48 = vld [vmem:[#allocation2 + $0x110] sm:$0xff]  ;;  %v272_v49 = vld [vmem:[#allocation2 + $0xc8] sm:$0xff]  ;;  %v274_v50 = vld [vmem:[#allocation2 + $0xd8] sm:$0xff] }
  0x3a   : > { %390 = vmatpush1.msra.mxu0 %v311_v31  ;;  %551 = vmatpush1.msra.mxu1 %v313_v32  ;;  %v271_v51 = vld [vmem:[#allocation2 + $0xc0] sm:$0xff]  ;;  %v273_v52 = vld [vmem:[#allocation2 + $0xd0] sm:$0xff]  ;;  %v264_v53 = vld [vmem:[#allocation2 + $0x88] sm:$0xff] }
  0x3b   : > { %391 = vmatprep.subr.mxu0 %v304_v33  ;;  %552 = vmatprep.subr.mxu1 %v306_v34  ;;  %v266_v54 = vld [vmem:[#allocation2 + $0x98] sm:$0xff]  ;;  %v263_v55 = vld [vmem:[#allocation2 + $0x80] sm:$0xff]  ;;  %v265_v56 = vld [vmem:[#allocation2 + $0x90] sm:$0xff] }
  0x3c   : > { %392 = vmatpush1.msra.mxu0 %v303_v35  ;;  %553 = vmatpush1.msra.mxu1 %v305_v36  ;;  %v256_v57 = vld [vmem:[#allocation2 + $0x48] sm:$0xff]  ;;  %v258_v58 = vld [vmem:[#allocation2 + $0x58] sm:$0xff]  ;;  %v255_v59 = vld [vmem:[#allocation2 + $0x40] sm:$0xff] }
  0x3d   : > { %393 = vmatprep.subr.mxu0 %v296_v37  ;;  %554 = vmatprep.subr.mxu1 %v298_v38  ;;  %v257_v60 = vld [vmem:[#allocation2 + $0x50] sm:$0xff]  ;;  %v248_v61 = vld [vmem:[#allocation2 + $0x8] sm:$0xff]  ;;  %v250_v62 = vld [vmem:[#allocation2 + $0x18] sm:$0xff] }
  0x3e   : > { %394 = vmatpush1.msra.mxu0 %v295_v39  ;;  %555 = vmatpush1.msra.mxu1 %v297_v40  ;;  %v247_v63 = vld [vmem:[#allocation2] sm:$0xff]  ;;  %v249_v1 = vld [vmem:[#allocation2 + $0x10] sm:$0xff]  ;;  %v372_v3 = vld [vmem:[#allocation2 + $0x3e8] sm:$0xff] }
  0x3f   : > { %395 = vmatprep.subr.mxu0 %v288_v41  ;;  %556 = vmatprep.subr.mxu1 %v290_v42  ;;  %v1915_v2 = vld [vmem:[%s1912_s10] sm:$0xff]  ;;  %v374_v4 = vld [vmem:[#allocation2 + $0x3f8] sm:$0xff]  ;;  %v373_v6 = vld [vmem:[#allocation2 + $0x3f0] sm:$0xff] }
  0x40   : > { %396 = vmatpush1.msra.mxu0 %v287_v43  ;;  %557 = vmatpush1.msra.mxu1 %v289_v44  ;;  %v371_v5 = vld [vmem:[#allocation2 + $0x3e0] sm:$0xff]  ;;  %v1920_v7 = vld [vmem:[%s1912_s10 + $0x8] sm:$0xff]  ;;  %v366_v9 = vld [vmem:[#allocation2 + $0x3b8] sm:$0xff] }
  0x41   : > { %397 = vmatprep.subr.mxu0 %v280_v45  ;;  %558 = vmatprep.subr.mxu1 %v282_v46  ;;  %v364_v8 = vld [vmem:[#allocation2 + $0x3a8] sm:$0xff]  ;;  %v363_v10 = vld [vmem:[#allocation2 + $0x3a0] sm:$0xff]  ;;  %v365_v11 = vld [vmem:[#allocation2 + $0x3b0] sm:$0xff] }
  0x42   : > { %398 = vmatpush1.msra.mxu0 %v279_v47  ;;  %559 = vmatpush1.msra.mxu1 %v281_v48  ;;  %v1927_v12 = vld [vmem:[%s1912_s10 + $0x10] sm:$0xff]  ;;  %v356_v13 = vld [vmem:[#allocation2 + $0x368] sm:$0xff]  ;;  %v358_v14 = vld [vmem:[#allocation2 + $0x378] sm:$0xff] }
  0x43   : > { %399 = vmatprep.subr.mxu0 %v272_v49  ;;  %560 = vmatprep.subr.mxu1 %v274_v50  ;;  %v355_v15 = vld [vmem:[#allocation2 + $0x360] sm:$0xff]  ;;  %v357_v16 = vld [vmem:[#allocation2 + $0x370] sm:$0xff]  ;;  %v1934_v17 = vld [vmem:[%s1912_s10 + $0x18] sm:$0xff] }
  0x44   : > { %400 = vmatpush1.msra.mxu0 %v271_v51  ;;  %561 = vmatpush1.msra.mxu1 %v273_v52  ;;  %v348_v18 = vld [vmem:[#allocation2 + $0x328] sm:$0xff]  ;;  %v350_v19 = vld [vmem:[#allocation2 + $0x338] sm:$0xff]  ;;  %v347_v20 = vld [vmem:[#allocation2 + $0x320] sm:$0xff] }
  0x45   : > { %401 = vmatprep.subr.mxu0 %v264_v53  ;;  %562 = vmatprep.subr.mxu1 %v266_v54  ;;  %v349_v21 = vld [vmem:[#allocation2 + $0x330] sm:$0xff]  ;;  %v1941_v22 = vld [vmem:[%s1912_s10 + $0x20] sm:$0xff]  ;;  %v340_v23 = vld [vmem:[#allocation2 + $0x2e8] sm:$0xff] }
  0x46   : > { %402 = vmatpush1.msra.mxu0 %v263_v55  ;;  %563 = vmatpush1.msra.mxu1 %v265_v56  ;;  %v342_v24 = vld [vmem:[#allocation2 + $0x2f8] sm:$0xff]  ;;  %v339_v25 = vld [vmem:[#allocation2 + $0x2e0] sm:$0xff]  ;;  %v341_v26 = vld [vmem:[#allocation2 + $0x2f0] sm:$0xff] }
  0x47   : > { %403 = vmatprep.subr.mxu0 %v256_v57  ;;  %564 = vmatprep.subr.mxu1 %v258_v58  ;;  %v1948_v27 = vld [vmem:[%s1912_s10 + $0x28] sm:$0xff]  ;;  %v334_v29 = vld [vmem:[#allocation2 + $0x2b8] sm:$0xff]  ;;  %v331_v30 = vld [vmem:[#allocation2 + $0x2a0] sm:$0xff] }
  0x48   : > { %404 = vmatpush1.msra.mxu0 %v255_v59  ;;  %565 = vmatpush1.msra.mxu1 %v257_v60  ;;  %v332_v28 = vld [vmem:[#allocation2 + $0x2a8] sm:$0xff]  ;;  %v333_v31 = vld [vmem:[#allocation2 + $0x2b0] sm:$0xff]  ;;  %v326_v34 = vld [vmem:[#allocation2 + $0x278] sm:$0xff] }
  0x49   : > { %405 = vmatprep.subr.mxu0 %v248_v61  ;;  %566 = vmatprep.subr.mxu1 %v250_v62  ;;  %v1955_v32 = vld [vmem:[%s1912_s10 + $0x30] sm:$0xff]  ;;  %v324_v33 = vld [vmem:[#allocation2 + $0x268] sm:$0xff]  ;;  %v323_v35 = vld [vmem:[#allocation2 + $0x260] sm:$0xff] }
  0x4a   : > { %406 = vmatpush1.msra.mxu0 %v247_v63  ;;  %567 = vmatpush1.msra.mxu1 %v249_v1  ;;  %v325_v36 = vld [vmem:[#allocation2 + $0x270] sm:$0xff]  ;;  %v1962_v37 = vld [vmem:[%s1912_s10 + $0x38] sm:$0xff]  ;;  %v316_v38 = vld [vmem:[#allocation2 + $0x228] sm:$0xff] }
  0x4b   : > { %440 = vmatmul.mubr.f32.vlgmr.msra.gmra.mxu0 %v1915_v2  ;;  %601 = vmatmul.mubr.f32.vlgmr.msra.gmra.mxu1 %v1915_v2  ;;  %v318_v39 = vld [vmem:[#allocation2 + $0x238] sm:$0xff]  ;;  %v315_v40 = vld [vmem:[#allocation2 + $0x220] sm:$0xff]  ;;  %v317_v41 = vld [vmem:[#allocation2 + $0x230] sm:$0xff] }
  0x4c   : > { %697 = vmatprep.subr.mxu0 %v372_v3  ;;  %858 = vmatprep.subr.mxu1 %v374_v4  ;;  %v1969_v42 = vld [vmem:[%s1912_s10 + $0x40] sm:$0xff]  ;;  %v308_v43 = vld [vmem:[#allocation2 + $0x1e8] sm:$0xff]  ;;  %v310_v44 = vld [vmem:[#allocation2 + $0x1f8] sm:$0xff] }
  0x4d   : > { %698 = vmatpush1.msra.mxu0 %v371_v5  ;;  %859 = vmatpush1.msra.mxu1 %v373_v6  ;;  %v307_v45 = vld [vmem:[#allocation2 + $0x1e0] sm:$0xff]  ;;  %v309_v46 = vld [vmem:[#allocation2 + $0x1f0] sm:$0xff]  ;;  %v1976_v47 = vld [vmem:[%s1912_s10 + $0x48] sm:$0xff] }
  0x4e   : > { %445 = vmatprep.mubr.f32.mxu0 %v1816_v0  ;;  %606 = vmatprep.mubr.f32.mxu1 %v1816_v0  ;;  %v300_v48 = vld [vmem:[#allocation2 + $0x1a8] sm:$0xff]  ;;  %v302_v49 = vld [vmem:[#allocation2 + $0x1b8] sm:$0xff]  ;;  %v299_v50 = vld [vmem:[#allocation2 + $0x1a0] sm:$0xff] }
  0x4f   : > { %446 = vmatmul.mubr.f32.gmra.mxu0 %v1920_v7  ;;  %607 = vmatmul.mubr.f32.gmra.mxu1 %v1920_v7  ;;  %v301_v51 = vld [vmem:[#allocation2 + $0x1b0] sm:$0xff]  ;;  %v292_v53 = vld [vmem:[#allocation2 + $0x168] sm:$0xff]  ;;  %v294_v54 = vld [vmem:[#allocation2 + $0x178] sm:$0xff] }
  0x50   : > { %699 = vmatprep.subr.mxu0 %v364_v8  ;;  %860 = vmatprep.subr.mxu1 %v366_v9  ;;  %v1983_v52 = vld [vmem:[%s1912_s10 + $0x50] sm:$0xff]  ;;  %v291_v55 = vld [vmem:[#allocation2 + $0x160] sm:$0xff]  ;;  %v1990_v57 = vld [vmem:[%s1912_s10 + $0x58] sm:$0xff] }
  0x51   : > { %700 = vmatpush1.msra.mxu0 %v363_v10  ;;  %861 = vmatpush1.msra.mxu1 %v365_v11  ;;  %v293_v56 = vld [vmem:[#allocation2 + $0x170] sm:$0xff]  ;;  %v284_v58 = vld [vmem:[#allocation2 + $0x128] sm:$0xff]  ;;  %v286_v59 = vld [vmem:[#allocation2 + $0x138] sm:$0xff] }
  0x52   : > { %451 = vmatprep.mubr.f32.mxu0 %v1816_v0  ;;  %612 = vmatprep.mubr.f32.mxu1 %v1816_v0  ;;  %v283_v60 = vld [vmem:[#allocation2 + $0x120] sm:$0xff]  ;;  %v285_v61 = vld [vmem:[#allocation2 + $0x130] sm:$0xff]  ;;  %v276_v63 = vld [vmem:[#allocation2 + $0xe8] sm:$0xff] }
  0x53   : > { %452 = vmatmul.mubr.f32.gmra.mxu0 %v1927_v12  ;;  %613 = vmatmul.mubr.f32.gmra.mxu1 %v1927_v12  ;;  %v1997_v62 = vld [vmem:[%s1912_s10 + $0x60] sm:$0xff]  ;;  %v278_v1 = vld [vmem:[#allocation2 + $0xf8] sm:$0xff]  ;;  %v277_v4 = vld [vmem:[#allocation2 + $0xf0] sm:$0xff] }
  0x54   : > { %701 = vmatprep.subr.mxu0 %v356_v13  ;;  %862 = vmatprep.subr.mxu1 %v358_v14  ;;  %v275_v3 = vld [vmem:[#allocation2 + $0xe0] sm:$0xff]  ;;  %v2004_v5 = vld [vmem:[%s1912_s10 + $0x68] sm:$0xff]  ;;  %v270_v8 = vld [vmem:[#allocation2 + $0xb8] sm:$0xff] }
  0x55   : > { %702 = vmatpush1.msra.mxu0 %v355_v15  ;;  %863 = vmatpush1.msra.mxu1 %v357_v16  ;;  %v268_v6 = vld [vmem:[#allocation2 + $0xa8] sm:$0xff]  ;;  %v267_v9 = vld [vmem:[#allocation2 + $0xa0] sm:$0xff]  ;;  %v269_v10 = vld [vmem:[#allocation2 + $0xb0] sm:$0xff] }
  0x56   : > { %457 = vmatprep.mubr.f32.mxu0 %v1816_v0  ;;  %618 = vmatprep.mubr.f32.mxu1 %v1816_v0  ;;  %v2011_v11 = vld [vmem:[%s1912_s10 + $0x70] sm:$0xff]  ;;  %v260_v13 = vld [vmem:[#allocation2 + $0x68] sm:$0xff]  ;;  %v262_v14 = vld [vmem:[#allocation2 + $0x78] sm:$0xff] }
  0x57   : > { %458 = vmatmul.mubr.f32.gmra.mxu0 %v1934_v17  ;;  %619 = vmatmul.mubr.f32.gmra.mxu1 %v1934_v17  ;;  %v259_v15 = vld [vmem:[#allocation2 + $0x60] sm:$0xff]  ;;  %v261_v16 = vld [vmem:[#allocation2 + $0x70] sm:$0xff] }
  0x58   : > { %703 = vmatprep.subr.mxu0 %v348_v18  ;;  %864 = vmatprep.subr.mxu1 %v350_v19  ;;  %v2018_v18 = vld [vmem:[%s1912_s10 + $0x78] sm:$0xff]  ;;  %v252_v19 = vld [vmem:[#allocation2 + $0x28] sm:$0xff] }
  0x59   : > { %704 = vmatpush1.msra.mxu0 %v347_v20  ;;  %865 = vmatpush1.msra.mxu1 %v349_v21  ;;  %v254_v20 = vld [vmem:[#allocation2 + $0x38] sm:$0xff]  ;;  %v251_v21 = vld [vmem:[#allocation2 + $0x20] sm:$0xff] }
  0x5a   : > { %463 = vmatprep.mubr.f32.mxu0 %v1816_v0  ;;  %624 = vmatprep.mubr.f32.mxu1 %v1816_v0 }
  0x5b   : > { %464 = vmatmul.mubr.f32.gmra.mxu0 %v1941_v22  ;;  %625 = vmatmul.mubr.f32.gmra.mxu1 %v1941_v22 }
  0x5c   : > { %705 = vmatprep.subr.mxu0 %v340_v23  ;;  %866 = vmatprep.subr.mxu1 %v342_v24  ;;  %v253_v23 = vld [vmem:[#allocation2 + $0x30] sm:$0xff] }
  0x5d   : > { %706 = vmatpush1.msra.mxu0 %v339_v25  ;;  %867 = vmatpush1.msra.mxu1 %v341_v26  ;;  %v2099_v25 = vld [vmem:[#allocation4] sm:$0xff] }
  0x5e   : > { %469 = vmatprep.mubr.f32.mxu0 %v1816_v0  ;;  %630 = vmatprep.mubr.f32.mxu1 %v1816_v0 }
  0x5f   : > { %470 = vmatmul.mubr.f32.gmra.mxu0 %v1948_v27  ;;  %631 = vmatmul.mubr.f32.gmra.mxu1 %v1948_v27 }
  0x60   : > { %707 = vmatprep.subr.mxu0 %v332_v28  ;;  %868 = vmatprep.subr.mxu1 %v334_v29 }
  0x61   : > { %708 = vmatpush1.msra.mxu0 %v331_v30  ;;  %869 = vmatpush1.msra.mxu1 %v333_v31 }
  0x62   : > { %475 = vmatprep.mubr.f32.mxu0 %v1816_v0  ;;  %636 = vmatprep.mubr.f32.mxu1 %v1816_v0 }
  0x63   : > { %476 = vmatmul.mubr.f32.gmra.mxu0 %v1955_v32  ;;  %637 = vmatmul.mubr.f32.gmra.mxu1 %v1955_v32 }
  0x64   : > { %709 = vmatprep.subr.mxu0 %v324_v33  ;;  %870 = vmatprep.subr.mxu1 %v326_v34 }
  0x65   : > { %710 = vmatpush1.msra.mxu0 %v323_v35  ;;  %871 = vmatpush1.msra.mxu1 %v325_v36 }
  0x66   : > { %481 = vmatprep.mubr.f32.mxu0 %v1816_v0  ;;  %642 = vmatprep.mubr.f32.mxu1 %v1816_v0 }
  0x67   : > { %482 = vmatmul.mubr.f32.gmra.mxu0 %v1962_v37  ;;  %643 = vmatmul.mubr.f32.gmra.mxu1 %v1962_v37 }
  0x68   : > { %711 = vmatprep.subr.mxu0 %v316_v38  ;;  %872 = vmatprep.subr.mxu1 %v318_v39 }
  0x69   : > { %712 = vmatpush1.msra.mxu0 %v315_v40  ;;  %873 = vmatpush1.msra.mxu1 %v317_v41 }
  0x6a   : > { %487 = vmatprep.mubr.f32.mxu0 %v1816_v0  ;;  %648 = vmatprep.mubr.f32.mxu1 %v1816_v0 }
  0x6b   : > { %488 = vmatmul.mubr.f32.gmra.mxu0 %v1969_v42  ;;  %649 = vmatmul.mubr.f32.gmra.mxu1 %v1969_v42 }
  0x6c   : > { %713 = vmatprep.subr.mxu0 %v308_v43  ;;  %874 = vmatprep.subr.mxu1 %v310_v44 }
  0x6d   : > { %714 = vmatpush1.msra.mxu0 %v307_v45  ;;  %875 = vmatpush1.msra.mxu1 %v309_v46 }
  0x6e   : > { %493 = vmatprep.mubr.f32.mxu0 %v1816_v0  ;;  %654 = vmatprep.mubr.f32.mxu1 %v1816_v0 }
  0x6f   : > { %494 = vmatmul.mubr.f32.gmra.mxu0 %v1976_v47  ;;  %655 = vmatmul.mubr.f32.gmra.mxu1 %v1976_v47 }
  0x70   : > { %715 = vmatprep.subr.mxu0 %v300_v48  ;;  %876 = vmatprep.subr.mxu1 %v302_v49 }
  0x71   : > { %716 = vmatpush1.msra.mxu0 %v299_v50  ;;  %877 = vmatpush1.msra.mxu1 %v301_v51 }
  0x72   : > { %499 = vmatprep.mubr.f32.mxu0 %v1816_v0  ;;  %660 = vmatprep.mubr.f32.mxu1 %v1816_v0 }
  0x73   : > { %500 = vmatmul.mubr.f32.gmra.mxu0 %v1983_v52  ;;  %661 = vmatmul.mubr.f32.gmra.mxu1 %v1983_v52 }
  0x74   : > { %717 = vmatprep.subr.mxu0 %v292_v53  ;;  %878 = vmatprep.subr.mxu1 %v294_v54 }
  0x75   : > { %718 = vmatpush1.msra.mxu0 %v291_v55  ;;  %879 = vmatpush1.msra.mxu1 %v293_v56 }
  0x76   : > { %505 = vmatprep.mubr.f32.mxu0 %v1816_v0  ;;  %666 = vmatprep.mubr.f32.mxu1 %v1816_v0 }
  0x77   : > { %506 = vmatmul.mubr.f32.gmra.mxu0 %v1990_v57  ;;  %667 = vmatmul.mubr.f32.gmra.mxu1 %v1990_v57 }
  0x78   : > { %719 = vmatprep.subr.mxu0 %v284_v58  ;;  %880 = vmatprep.subr.mxu1 %v286_v59 }
  0x79   : > { %720 = vmatpush1.msra.mxu0 %v283_v60  ;;  %881 = vmatpush1.msra.mxu1 %v285_v61 }
  0x7a   : > { %511 = vmatprep.mubr.f32.mxu0 %v1816_v0  ;;  %672 = vmatprep.mubr.f32.mxu1 %v1816_v0 }
  0x7b   : > { %512 = vmatmul.mubr.f32.gmra.mxu0 %v1997_v62  ;;  %673 = vmatmul.mubr.f32.gmra.mxu1 %v1997_v62 }
  0x7c   : > { %721 = vmatprep.subr.mxu0 %v276_v63  ;;  %882 = vmatprep.subr.mxu1 %v278_v1 }
  0x7d   : > { %722 = vmatpush1.msra.mxu0 %v275_v3  ;;  %883 = vmatpush1.msra.mxu1 %v277_v4 }
  0x7e   : > { %517 = vmatprep.mubr.f32.mxu0 %v1816_v0  ;;  %678 = vmatprep.mubr.f32.mxu1 %v1816_v0 }
  0x7f   : > { %518 = vmatmul.mubr.f32.gmra.mxu0 %v2004_v5  ;;  %679 = vmatmul.mubr.f32.gmra.mxu1 %v2004_v5 }
  0x80   : > { %723 = vmatprep.subr.mxu0 %v268_v6  ;;  %884 = vmatprep.subr.mxu1 %v270_v8 }
  0x81   : > { %724 = vmatpush1.msra.mxu0 %v267_v9  ;;  %885 = vmatpush1.msra.mxu1 %v269_v10 }
  0x82   : > { %523 = vmatprep.mubr.f32.mxu0 %v1816_v0  ;;  %684 = vmatprep.mubr.f32.mxu1 %v1816_v0 }
  0x83   : > { %524 = vmatmul.mubr.f32.gmra.mxu0 %v2011_v11  ;;  %685 = vmatmul.mubr.f32.gmra.mxu1 %v2011_v11 }
  0x84   : > { %725 = vmatprep.subr.mxu0 %v260_v13  ;;  %886 = vmatprep.subr.mxu1 %v262_v14 }
  0x85   : > { %726 = vmatpush1.msra.mxu0 %v259_v15  ;;  %887 = vmatpush1.msra.mxu1 %v261_v16 }
  0x86   : > { %529 = vmatprep.mubr.f32.mxu0 %v1816_v0  ;;  %690 = vmatprep.mubr.f32.mxu1 %v1816_v0 }
  0x87   : > { %530 = vmatmul.mubr.f32.gmra.mxu0 %v2018_v18  ;;  %691 = vmatmul.mubr.f32.gmra.mxu1 %v2018_v18 }
  0x88   : > { %727 = vmatprep.subr.mxu0 %v252_v19  ;;  %888 = vmatprep.subr.mxu1 %v254_v20 }
  0x89   : > { %728 = vmatpush1.msra.mxu0 %v251_v21  ;;  %889 = vmatpush1.msra.mxu1 %v253_v23 }
  0x8a   : > { %761 = vmatprep.mubr.f32.mxu0 %v1816_v0  ;;  %922 = vmatprep.mubr.f32.mxu1 %v1816_v0 }
  0x8b   : > { %762 = vmatmul.mubr.f32.vlgmr.msra.gmra.mxu0 %v1915_v2  ;;  %923 = vmatmul.mubr.f32.vlgmr.msra.gmra.mxu1 %v1915_v2  ;;  %v1021_v2 = vlaneseq }
  0x8c   : > { %767 = vmatprep.mubr.f32.mxu0 %v1816_v0  ;;  %928 = vmatprep.mubr.f32.mxu1 %v1816_v0 }
  0x8f   : > { %768 = vmatmul.mubr.f32.gmra.mxu0 %v1920_v7  ;;  %929 = vmatmul.mubr.f32.gmra.mxu1 %v1920_v7  ;;  %v2088_v7 = vshrl.u32 %v1021_v2, 7 }
  0x90   : > { %773 = vmatprep.mubr.f32.mxu0 %v1816_v0  ;;  %934 = vmatprep.mubr.f32.mxu1 %v1816_v0 }
  0x91   : > { %v1027_v24 = vsub.s32 1, %v2088_v7 }
  0x93   : > { %774 = vmatmul.mubr.f32.gmra.mxu0 %v1927_v12  ;;  %935 = vmatmul.mubr.f32.gmra.mxu1 %v1927_v12  ;;  %v1023_v12 = vsub.s32 0, %v2088_v7  ;;  %v2123_v36 = vrot.slane %v2099_v25, %v1027_v24 }
  0x94   : > { %779 = vmatprep.mubr.f32.mxu0 %v1816_v0  ;;  %940 = vmatprep.mubr.f32.mxu1 %v1816_v0 }
  0x95   : > { %v2108_v28 = vrot.slane %v2099_v25, %v1023_v12 }
  0x97   : > { %780 = vmatmul.mubr.f32.gmra.mxu0 %v1934_v17  ;;  %941 = vmatmul.mubr.f32.gmra.mxu1 %v1934_v17  ;;  %v1031_v17 = vsub.s32 2, %v2088_v7 }
  0x98   : > { %785 = vmatprep.mubr.f32.mxu0 %v1816_v0  ;;  %946 = vmatprep.mubr.f32.mxu1 %v1816_v0 }
  0x99   : > { %v2111_v29 = vrot.slane %v2099_v25, %v1031_v17 }
  0x9b   : > { %786 = vmatmul.mubr.f32.gmra.mxu0 %v1941_v22  ;;  %947 = vmatmul.mubr.f32.gmra.mxu1 %v1941_v22  ;;  %v2095_v22 = vld [vmem:[%s2548_s2] sm:$0xff] }
  0x9c   : > { %791 = vmatprep.mubr.f32.mxu0 %v1816_v0  ;;  %952 = vmatprep.mubr.f32.mxu1 %v1816_v0  ;;  %v2102_v26 = vrot.slane %v2095_v22, %v1023_v12  ;;  %v2114_v30 = vrot.slane %v2095_v22, %v1027_v24 }
  0x9f   : > { %792 = vmatmul.mubr.f32.gmra.mxu0 %v1948_v27  ;;  %953 = vmatmul.mubr.f32.gmra.mxu1 %v1948_v27  ;;  %v2105_v27 = vrot.slane %v2095_v22, %v1031_v17 }
  0xa0   : > { %797 = vmatprep.mubr.f32.mxu0 %v1816_v0  ;;  %958 = vmatprep.mubr.f32.mxu1 %v1816_v0 }
  0xa3   : > { %798 = vmatmul.mubr.f32.gmra.mxu0 %v1955_v32  ;;  %959 = vmatmul.mubr.f32.gmra.mxu1 %v1955_v32 }
  0xa4   : > { %803 = vmatprep.mubr.f32.mxu0 %v1816_v0  ;;  %964 = vmatprep.mubr.f32.mxu1 %v1816_v0 }
  0xa7   : > { %804 = vmatmul.mubr.f32.gmra.mxu0 %v1962_v37  ;;  %965 = vmatmul.mubr.f32.gmra.mxu1 %v1962_v37 }
  0xa8   : > { %809 = vmatprep.mubr.f32.mxu0 %v1816_v0  ;;  %970 = vmatprep.mubr.f32.mxu1 %v1816_v0 }
  0xab   : > { %810 = vmatmul.mubr.f32.gmra.mxu0 %v1969_v42  ;;  %971 = vmatmul.mubr.f32.gmra.mxu1 %v1969_v42 }
  0xac   : > { %815 = vmatprep.mubr.f32.mxu0 %v1816_v0  ;;  %976 = vmatprep.mubr.f32.mxu1 %v1816_v0 }
  0xaf   : > { %816 = vmatmul.mubr.f32.gmra.mxu0 %v1976_v47  ;;  %977 = vmatmul.mubr.f32.gmra.mxu1 %v1976_v47 }
  0xb0   : > { %821 = vmatprep.mubr.f32.mxu0 %v1816_v0  ;;  %982 = vmatprep.mubr.f32.mxu1 %v1816_v0 }
  0xb3   : > { %822 = vmatmul.mubr.f32.gmra.mxu0 %v1983_v52  ;;  %983 = vmatmul.mubr.f32.gmra.mxu1 %v1983_v52 }
  0xb4   : > { %827 = vmatprep.mubr.f32.mxu0 %v1816_v0  ;;  %988 = vmatprep.mubr.f32.mxu1 %v1816_v0 }
  0xb7   : > { %828 = vmatmul.mubr.f32.gmra.mxu0 %v1990_v57  ;;  %989 = vmatmul.mubr.f32.gmra.mxu1 %v1990_v57 }
  0xb8   : > { %833 = vmatprep.mubr.f32.mxu0 %v1816_v0  ;;  %994 = vmatprep.mubr.f32.mxu1 %v1816_v0 }
  0xbb   : > { %834 = vmatmul.mubr.f32.gmra.mxu0 %v1997_v62  ;;  %995 = vmatmul.mubr.f32.gmra.mxu1 %v1997_v62 }
  0xbc   : > { %839 = vmatprep.mubr.f32.mxu0 %v1816_v0  ;;  %1000 = vmatprep.mubr.f32.mxu1 %v1816_v0 }
  0xbf   : > { %840 = vmatmul.mubr.f32.gmra.mxu0 %v2004_v5  ;;  %1001 = vmatmul.mubr.f32.gmra.mxu1 %v2004_v5 }
  0xc0   : > { %845 = vmatprep.mubr.f32.mxu0 %v1816_v0  ;;  %1006 = vmatprep.mubr.f32.mxu1 %v1816_v0 }
  0xc3   : > { %846 = vmatmul.mubr.f32.gmra.mxu0 %v2011_v11  ;;  %1007 = vmatmul.mubr.f32.gmra.mxu1 %v2011_v11 }
  0xc4   : > { %851 = vmatprep.mubr.f32.mxu0 %v1816_v0  ;;  %1012 = vmatprep.mubr.f32.mxu1 %v1816_v0  ;;  %v1035_v0 = vsub.s32 3, %v2088_v7 }
  0xc6   : > { %v2117_v31 = vrot.slane %v2095_v22, %v1035_v0  ;;  %v2126_v37 = vrot.slane %v2099_v25, %v1035_v0 }
  0xc7   : > { %852 = vmatmul.mubr.f32.gmra.mxu0 %v2018_v18  ;;  %1013 = vmatmul.mubr.f32.gmra.mxu1 %v2018_v18 }
 0x10b   : > { %v441_v32 = vpop.f32.mrf.mxu0  ;;  %v602_v33 = vpop.f32.mrf.mxu1 }
 0x10c   : > { %v1061_v34 = vmul.f32 %v2102_v26, %v441_v32  ;;  %v1063_v35 = vmul.f32 %v2105_v27, %v602_v33 }
 0x10d   : > { %v443_v38 = vpop.f32.mrf.mxu0  ;;  %v604_v39 = vpop.f32.mrf.mxu1 }
 0x10e   : > { %v1231_v40 = vadd.f32 %v2108_v28, %v1061_v34  ;;  %v1233_v41 = vadd.f32 %v2111_v29, %v1063_v35  ;;  %v1062_v42 = vmul.f32 %v2114_v30, %v443_v38  ;;  %v1064_v43 = vmul.f32 %v2117_v31, %v604_v39 }
 0x10f   : > { %v447_v44 = vpop.f32.mrf.mxu0  ;;  %v608_v45 = vpop.f32.mrf.mxu1 }
 0x110   : > { %v1359_v46 = vmax.f32 %v1231_v40, 0.0  ;;  %v1361_v47 = vmax.f32 %v1233_v41, 0.0  ;;  %v1232_v48 = vadd.f32 %v2123_v36, %v1062_v42  ;;  %v1234_v49 = vadd.f32 %v2126_v37, %v1064_v43 }
 0x111   : > { %v1069_v50 = vmul.f32 %v2102_v26, %v447_v44  ;;  %v1071_v51 = vmul.f32 %v2105_v27, %v608_v45  ;;  %v449_v52 = vpop.f32.mrf.mxu0  ;;  %v610_v53 = vpop.f32.mrf.mxu1 }
 0x112   : > { %1487 = vst [vmem:[%s2135_s17] sm:$0xff] %v1359_v46  ;;  %1489 = vst [vmem:[%s2135_s17 + $0x10] sm:$0xff] %v1361_v47  ;;  %v1360_v54 = vmax.f32 %v1232_v48, 0.0  ;;  %v1362_v55 = vmax.f32 %v1234_v49, 0.0  ;;  %v1070_v56 = vmul.f32 %v2114_v30, %v449_v52  ;;  %v1072_v57 = vmul.f32 %v2117_v31, %v610_v53 }
 0x113   : > { %v1239_v58 = vadd.f32 %v2108_v28, %v1069_v50  ;;  %v1241_v59 = vadd.f32 %v2111_v29, %v1071_v51  ;;  %v453_v60 = vpop.f32.mrf.mxu0  ;;  %v614_v61 = vpop.f32.mrf.mxu1 }
 0x114   : > { %1488 = vst [vmem:[%s2135_s17 + $0x8] sm:$0xff] %v1360_v54  ;;  %1490 = vst [vmem:[%s2135_s17 + $0x18] sm:$0xff] %v1362_v55  ;;  %v1240_v62 = vadd.f32 %v2123_v36, %v1070_v56  ;;  %v1242_v63 = vadd.f32 %v2126_v37, %v1072_v57  ;;  %v1077_v1 = vmul.f32 %v2102_v26, %v453_v60 }
 0x115   : > { %v1079_v3 = vmul.f32 %v2105_v27, %v614_v61  ;;  %v1367_v4 = vmax.f32 %v1239_v58, 0.0  ;;  %v1369_v5 = vmax.f32 %v1241_v59, 0.0  ;;  %v455_v6 = vpop.f32.mrf.mxu0  ;;  %v616_v8 = vpop.f32.mrf.mxu1 }
 0x116   : > { %v1368_v9 = vmax.f32 %v1240_v62, 0.0  ;;  %v1370_v10 = vmax.f32 %v1242_v63, 0.0  ;;  %v1247_v11 = vadd.f32 %v2108_v28, %v1077_v1  ;;  %v1078_v14 = vmul.f32 %v2114_v30, %v455_v6 }
 0x117   : > { %v1249_v13 = vadd.f32 %v2111_v29, %v1079_v3  ;;  %1495 = vst [vmem:[%s2135_s17 + $0x40] sm:$0xff] %v1367_v4  ;;  %1497 = vst [vmem:[%s2135_s17 + $0x50] sm:$0xff] %v1369_v5  ;;  %v1080_v15 = vmul.f32 %v2117_v31, %v616_v8  ;;  %v459_v16 = vpop.f32.mrf.mxu0  ;;  %v620_v18 = vpop.f32.mrf.mxu1 }
 0x118   : > { %1496 = vst [vmem:[%s2135_s17 + $0x48] sm:$0xff] %v1368_v9  ;;  %1498 = vst [vmem:[%s2135_s17 + $0x58] sm:$0xff] %v1370_v10  ;;  %v1375_v19 = vmax.f32 %v1247_v11, 0.0  ;;  %v1085_v21 = vmul.f32 %v2102_v26, %v459_v16  ;;  %v1087_v23 = vmul.f32 %v2105_v27, %v620_v18  ;;  %v1248_v2 = vadd.f32 %v2123_v36, %v1078_v14 }
 0x119   : > { %v1377_v20 = vmax.f32 %v1249_v13, 0.0  ;;  %v1250_v12 = vadd.f32 %v2126_v37, %v1080_v15  ;;  %v461_v17 = vpop.f32.mrf.mxu0  ;;  %v622_v24 = vpop.f32.mrf.mxu1 }
 0x11a   : > { %1503 = vst [vmem:[%s2135_s17 + $0x80] sm:$0xff] %v1375_v19  ;;  %v1255_v0 = vadd.f32 %v2108_v28, %v1085_v21  ;;  %v1257_v32 = vadd.f32 %v2111_v29, %v1087_v23  ;;  %v1086_v33 = vmul.f32 %v2114_v30, %v461_v17  ;;  %v1088_v34 = vmul.f32 %v2117_v31, %v622_v24 }
 0x11b   : > { %1505 = vst [vmem:[%s2135_s17 + $0x90] sm:$0xff] %v1377_v20  ;;  %v1376_v35 = vmax.f32 %v1248_v2, 0.0  ;;  %v1378_v38 = vmax.f32 %v1250_v12, 0.0  ;;  %v465_v39 = vpop.f32.mrf.mxu0  ;;  %v626_v40 = vpop.f32.mrf.mxu1 }
 0x11c   : > { %v1383_v41 = vmax.f32 %v1255_v0, 0.0  ;;  %v1385_v42 = vmax.f32 %v1257_v32, 0.0  ;;  %v1256_v43 = vadd.f32 %v2123_v36, %v1086_v33  ;;  %v1258_v44 = vadd.f32 %v2126_v37, %v1088_v34 }
 0x11d   : > { %1504 = vst [vmem:[%s2135_s17 + $0x88] sm:$0xff] %v1376_v35  ;;  %1506 = vst [vmem:[%s2135_s17 + $0x98] sm:$0xff] %v1378_v38  ;;  %v1093_v45 = vmul.f32 %v2102_v26, %v465_v39  ;;  %v1095_v46 = vmul.f32 %v2105_v27, %v626_v40  ;;  %v467_v47 = vpop.f32.mrf.mxu0  ;;  %v628_v48 = vpop.f32.mrf.mxu1 }
 0x11e   : > { %1511 = vst [vmem:[%s2135_s17 + $0xc0] sm:$0xff] %v1383_v41  ;;  %1513 = vst [vmem:[%s2135_s17 + $0xd0] sm:$0xff] %v1385_v42  ;;  %v1384_v49 = vmax.f32 %v1256_v43, 0.0  ;;  %v1386_v50 = vmax.f32 %v1258_v44, 0.0  ;;  %v1094_v51 = vmul.f32 %v2114_v30, %v467_v47  ;;  %v1096_v52 = vmul.f32 %v2117_v31, %v628_v48 }
 0x11f   : > { %v1263_v53 = vadd.f32 %v2108_v28, %v1093_v45  ;;  %v1265_v54 = vadd.f32 %v2111_v29, %v1095_v46  ;;  %v471_v55 = vpop.f32.mrf.mxu0  ;;  %v632_v56 = vpop.f32.mrf.mxu1 }
 0x120   : > { %1512 = vst [vmem:[%s2135_s17 + $0xc8] sm:$0xff] %v1384_v49  ;;  %1514 = vst [vmem:[%s2135_s17 + $0xd8] sm:$0xff] %v1386_v50  ;;  %v1264_v57 = vadd.f32 %v2123_v36, %v1094_v51  ;;  %v1266_v58 = vadd.f32 %v2126_v37, %v1096_v52  ;;  %v1101_v59 = vmul.f32 %v2102_v26, %v471_v55 }
 0x121   : > { %v1103_v60 = vmul.f32 %v2105_v27, %v632_v56  ;;  %v1391_v61 = vmax.f32 %v1263_v53, 0.0  ;;  %v1393_v62 = vmax.f32 %v1265_v54, 0.0  ;;  %v473_v63 = vpop.f32.mrf.mxu0  ;;  %v634_v1 = vpop.f32.mrf.mxu1 }
 0x122   : > { %v1392_v3 = vmax.f32 %v1264_v57, 0.0  ;;  %v1394_v4 = vmax.f32 %v1266_v58, 0.0  ;;  %v1271_v5 = vadd.f32 %v2108_v28, %v1101_v59  ;;  %v1102_v8 = vmul.f32 %v2114_v30, %v473_v63 }
 0x123   : > { %v1273_v6 = vadd.f32 %v2111_v29, %v1103_v60  ;;  %1519 = vst [vmem:[%s2135_s17 + $0x100] sm:$0xff] %v1391_v61  ;;  %1521 = vst [vmem:[%s2135_s17 + $0x110] sm:$0xff] %v1393_v62  ;;  %v1104_v9 = vmul.f32 %v2117_v31, %v634_v1  ;;  %v477_v10 = vpop.f32.mrf.mxu0  ;;  %v638_v11 = vpop.f32.mrf.mxu1 }
 0x124   : > { %1520 = vst [vmem:[%s2135_s17 + $0x108] sm:$0xff] %v1392_v3  ;;  %1522 = vst [vmem:[%s2135_s17 + $0x118] sm:$0xff] %v1394_v4  ;;  %v1399_v13 = vmax.f32 %v1271_v5, 0.0  ;;  %v1109_v15 = vmul.f32 %v2102_v26, %v477_v10  ;;  %v1111_v16 = vmul.f32 %v2105_v27, %v638_v11  ;;  %v1272_v18 = vadd.f32 %v2123_v36, %v1102_v8 }
 0x125   : > { %v1401_v14 = vmax.f32 %v1273_v6, 0.0  ;;  %v1274_v19 = vadd.f32 %v2126_v37, %v1104_v9  ;;  %v479_v20 = vpop.f32.mrf.mxu0  ;;  %v640_v21 = vpop.f32.mrf.mxu1 }
 0x126   : > { %1527 = vst [vmem:[%s2135_s17 + $0x140] sm:$0xff] %v1399_v13  ;;  %v1279_v23 = vadd.f32 %v2108_v28, %v1109_v15  ;;  %v1281_v2 = vadd.f32 %v2111_v29, %v1111_v16  ;;  %v1110_v12 = vmul.f32 %v2114_v30, %v479_v20  ;;  %v1112_v17 = vmul.f32 %v2117_v31, %v640_v21 }
 0x127   : > { %1529 = vst [vmem:[%s2135_s17 + $0x150] sm:$0xff] %v1401_v14  ;;  %v1400_v24 = vmax.f32 %v1272_v18, 0.0  ;;  %v1402_v0 = vmax.f32 %v1274_v19, 0.0  ;;  %v483_v32 = vpop.f32.mrf.mxu0  ;;  %v644_v33 = vpop.f32.mrf.mxu1 }
 0x128   : > { %v1407_v34 = vmax.f32 %v1279_v23, 0.0  ;;  %v1409_v35 = vmax.f32 %v1281_v2, 0.0  ;;  %v1280_v38 = vadd.f32 %v2123_v36, %v1110_v12  ;;  %v1282_v39 = vadd.f32 %v2126_v37, %v1112_v17 }
 0x129   : > { %1528 = vst [vmem:[%s2135_s17 + $0x148] sm:$0xff] %v1400_v24  ;;  %1530 = vst [vmem:[%s2135_s17 + $0x158] sm:$0xff] %v1402_v0  ;;  %v1117_v40 = vmul.f32 %v2102_v26, %v483_v32  ;;  %v1119_v41 = vmul.f32 %v2105_v27, %v644_v33  ;;  %v485_v42 = vpop.f32.mrf.mxu0  ;;  %v646_v43 = vpop.f32.mrf.mxu1 }
 0x12a   : > { %1535 = vst [vmem:[%s2135_s17 + $0x180] sm:$0xff] %v1407_v34  ;;  %1537 = vst [vmem:[%s2135_s17 + $0x190] sm:$0xff] %v1409_v35  ;;  %v1408_v44 = vmax.f32 %v1280_v38, 0.0  ;;  %v1410_v45 = vmax.f32 %v1282_v39, 0.0  ;;  %v1118_v46 = vmul.f32 %v2114_v30, %v485_v42  ;;  %v1120_v47 = vmul.f32 %v2117_v31, %v646_v43 }
 0x12b   : > { %v1287_v48 = vadd.f32 %v2108_v28, %v1117_v40  ;;  %v1289_v49 = vadd.f32 %v2111_v29, %v1119_v41  ;;  %v489_v50 = vpop.f32.mrf.mxu0  ;;  %v650_v51 = vpop.f32.mrf.mxu1 }
 0x12c   : > { %1536 = vst [vmem:[%s2135_s17 + $0x188] sm:$0xff] %v1408_v44  ;;  %1538 = vst [vmem:[%s2135_s17 + $0x198] sm:$0xff] %v1410_v45  ;;  %v1288_v52 = vadd.f32 %v2123_v36, %v1118_v46  ;;  %v1290_v53 = vadd.f32 %v2126_v37, %v1120_v47  ;;  %v1125_v54 = vmul.f32 %v2102_v26, %v489_v50 }
 0x12d   : > { %v1127_v55 = vmul.f32 %v2105_v27, %v650_v51  ;;  %v1415_v56 = vmax.f32 %v1287_v48, 0.0  ;;  %v1417_v57 = vmax.f32 %v1289_v49, 0.0  ;;  %v491_v58 = vpop.f32.mrf.mxu0  ;;  %v652_v59 = vpop.f32.mrf.mxu1 }
 0x12e   : > { %v1416_v60 = vmax.f32 %v1288_v52, 0.0  ;;  %v1418_v61 = vmax.f32 %v1290_v53, 0.0  ;;  %v1295_v62 = vadd.f32 %v2108_v28, %v1125_v54  ;;  %v1126_v1 = vmul.f32 %v2114_v30, %v491_v58 }
 0x12f   : > { %v1297_v63 = vadd.f32 %v2111_v29, %v1127_v55  ;;  %1543 = vst [vmem:[%s2135_s17 + $0x1c0] sm:$0xff] %v1415_v56  ;;  %1545 = vst [vmem:[%s2135_s17 + $0x1d0] sm:$0xff] %v1417_v57  ;;  %v1128_v3 = vmul.f32 %v2117_v31, %v652_v59  ;;  %v495_v4 = vpop.f32.mrf.mxu0  ;;  %v656_v5 = vpop.f32.mrf.mxu1 }
 0x130   : > { %1544 = vst [vmem:[%s2135_s17 + $0x1c8] sm:$0xff] %v1416_v60  ;;  %1546 = vst [vmem:[%s2135_s17 + $0x1d8] sm:$0xff] %v1418_v61  ;;  %v1423_v6 = vmax.f32 %v1295_v62, 0.0  ;;  %v1133_v9 = vmul.f32 %v2102_v26, %v495_v4  ;;  %v1135_v10 = vmul.f32 %v2105_v27, %v656_v5  ;;  %v1296_v11 = vadd.f32 %v2123_v36, %v1126_v1 }
 0x131   : > { %v1425_v8 = vmax.f32 %v1297_v63, 0.0  ;;  %v1298_v13 = vadd.f32 %v2126_v37, %v1128_v3  ;;  %v497_v14 = vpop.f32.mrf.mxu0  ;;  %v658_v15 = vpop.f32.mrf.mxu1 }
 0x132   : > { %1551 = vst [vmem:[%s2135_s17 + $0x200] sm:$0xff] %v1423_v6  ;;  %v1303_v16 = vadd.f32 %v2108_v28, %v1133_v9  ;;  %v1305_v18 = vadd.f32 %v2111_v29, %v1135_v10  ;;  %v1134_v19 = vmul.f32 %v2114_v30, %v497_v14  ;;  %v1136_v20 = vmul.f32 %v2117_v31, %v658_v15 }
 0x133   : > { %1553 = vst [vmem:[%s2135_s17 + $0x210] sm:$0xff] %v1425_v8  ;;  %v1424_v21 = vmax.f32 %v1296_v11, 0.0  ;;  %v1426_v23 = vmax.f32 %v1298_v13, 0.0  ;;  %v501_v2 = vpop.f32.mrf.mxu0  ;;  %v662_v12 = vpop.f32.mrf.mxu1 }
 0x134   : > { %v1431_v17 = vmax.f32 %v1303_v16, 0.0  ;;  %v1433_v24 = vmax.f32 %v1305_v18, 0.0  ;;  %v1304_v0 = vadd.f32 %v2123_v36, %v1134_v19  ;;  %v1306_v32 = vadd.f32 %v2126_v37, %v1136_v20 }
 0x135   : > { %1552 = vst [vmem:[%s2135_s17 + $0x208] sm:$0xff] %v1424_v21  ;;  %1554 = vst [vmem:[%s2135_s17 + $0x218] sm:$0xff] %v1426_v23  ;;  %v1141_v33 = vmul.f32 %v2102_v26, %v501_v2  ;;  %v1143_v34 = vmul.f32 %v2105_v27, %v662_v12  ;;  %v503_v35 = vpop.f32.mrf.mxu0  ;;  %v664_v38 = vpop.f32.mrf.mxu1  ;;  %v1039_v20 = vsub.s32 4, %v2088_v7  ;;  %v1047_v21 = vsub.s32 6, %v2088_v7 }
 0x136   : > { %1559 = vst [vmem:[%s2135_s17 + $0x240] sm:$0xff] %v1431_v17  ;;  %1561 = vst [vmem:[%s2135_s17 + $0x250] sm:$0xff] %v1433_v24  ;;  %v1432_v39 = vmax.f32 %v1304_v0, 0.0  ;;  %v1434_v40 = vmax.f32 %v1306_v32, 0.0  ;;  %v1142_v41 = vmul.f32 %v2114_v30, %v503_v35  ;;  %v1144_v42 = vmul.f32 %v2117_v31, %v664_v38 }
 0x137   : > { %v1311_v43 = vadd.f32 %v2108_v28, %v1141_v33  ;;  %v1313_v44 = vadd.f32 %v2111_v29, %v1143_v34  ;;  %v507_v45 = vpop.f32.mrf.mxu0  ;;  %v668_v46 = vpop.f32.mrf.mxu1 }
 0x138   : > { %1560 = vst [vmem:[%s2135_s17 + $0x248] sm:$0xff] %v1432_v39  ;;  %1562 = vst [vmem:[%s2135_s17 + $0x258] sm:$0xff] %v1434_v40  ;;  %v1312_v47 = vadd.f32 %v2123_v36, %v1142_v41  ;;  %v1314_v48 = vadd.f32 %v2126_v37, %v1144_v42  ;;  %v1149_v49 = vmul.f32 %v2102_v26, %v507_v45 }
 0x139   : > { %v1151_v50 = vmul.f32 %v2105_v27, %v668_v46  ;;  %v1439_v51 = vmax.f32 %v1311_v43, 0.0  ;;  %v1441_v52 = vmax.f32 %v1313_v44, 0.0  ;;  %v509_v53 = vpop.f32.mrf.mxu0  ;;  %v670_v54 = vpop.f32.mrf.mxu1  ;;  %v2294_v44 = vrot.slane %v2095_v22, %v1039_v20 }
 0x13a   : > { %v1440_v55 = vmax.f32 %v1312_v47, 0.0  ;;  %v1442_v56 = vmax.f32 %v1314_v48, 0.0  ;;  %v1319_v57 = vadd.f32 %v2108_v28, %v1149_v49  ;;  %v1150_v59 = vmul.f32 %v2114_v30, %v509_v53 }
 0x13b   : > { %v1321_v58 = vadd.f32 %v2111_v29, %v1151_v50  ;;  %1567 = vst [vmem:[%s2135_s17 + $0x280] sm:$0xff] %v1439_v51  ;;  %1569 = vst [vmem:[%s2135_s17 + $0x290] sm:$0xff] %v1441_v52  ;;  %v1152_v60 = vmul.f32 %v2117_v31, %v670_v54  ;;  %v513_v61 = vpop.f32.mrf.mxu0  ;;  %v674_v62 = vpop.f32.mrf.mxu1  ;;  %v2297_v45 = vrot.slane %v2095_v22, %v1047_v21  ;;  %v1043_v54 = vsub.s32 5, %v2088_v7 }
 0x13c   : > { %1568 = vst [vmem:[%s2135_s17 + $0x288] sm:$0xff] %v1440_v55  ;;  %1570 = vst [vmem:[%s2135_s17 + $0x298] sm:$0xff] %v1442_v56  ;;  %v1447_v63 = vmax.f32 %v1319_v57, 0.0  ;;  %v1157_v3 = vmul.f32 %v2102_v26, %v513_v61  ;;  %v1159_v4 = vmul.f32 %v2105_v27, %v674_v62  ;;  %v1320_v5 = vadd.f32 %v2123_v36, %v1150_v59 }
 0x13d   : > { %v1449_v1 = vmax.f32 %v1321_v58, 0.0  ;;  %v1322_v6 = vadd.f32 %v2126_v37, %v1152_v60  ;;  %v515_v8 = vpop.f32.mrf.mxu0  ;;  %v676_v9 = vpop.f32.mrf.mxu1  ;;  %v1051_v55 = vsub.s32 7, %v2088_v7  ;;  %v2317_v7 = vrot.slane %v2099_v25, %v1047_v21 }
 0x13e   : > { %1575 = vst [vmem:[%s2135_s17 + $0x2c0] sm:$0xff] %v1447_v63  ;;  %v1327_v10 = vadd.f32 %v2108_v28, %v1157_v3  ;;  %v1329_v11 = vadd.f32 %v2111_v29, %v1159_v4  ;;  %v1158_v13 = vmul.f32 %v2114_v30, %v515_v8  ;;  %v1160_v14 = vmul.f32 %v2117_v31, %v676_v9 }
 0x13f   : > { %1577 = vst [vmem:[%s2135_s17 + $0x2d0] sm:$0xff] %v1449_v1  ;;  %v1448_v15 = vmax.f32 %v1320_v5, 0.0  ;;  %v1450_v16 = vmax.f32 %v1322_v6, 0.0  ;;  %v519_v18 = vpop.f32.mrf.mxu0  ;;  %v680_v19 = vpop.f32.mrf.mxu1  ;;  %v2314_v1 = vrot.slane %v2099_v25, %v1039_v20 }
 0x140   : > { %v1455_v23 = vmax.f32 %v1327_v10, 0.0  ;;  %v1457_v2 = vmax.f32 %v1329_v11, 0.0  ;;  %v1328_v12 = vadd.f32 %v2123_v36, %v1158_v13  ;;  %v1330_v17 = vadd.f32 %v2126_v37, %v1160_v14 }
 0x141   : > { %1576 = vst [vmem:[%s2135_s17 + $0x2c8] sm:$0xff] %v1448_v15  ;;  %1578 = vst [vmem:[%s2135_s17 + $0x2d8] sm:$0xff] %v1450_v16  ;;  %v1165_v24 = vmul.f32 %v2102_v26, %v519_v18  ;;  %v1167_v0 = vmul.f32 %v2105_v27, %v680_v19  ;;  %v521_v32 = vpop.f32.mrf.mxu0  ;;  %v682_v33 = vpop.f32.mrf.mxu1  ;;  %v2326_v13 = vrot.slane %v2095_v22, %v1043_v54 }
 0x142   : > { %1583 = vst [vmem:[%s2135_s17 + $0x300] sm:$0xff] %v1455_v23  ;;  %1585 = vst [vmem:[%s2135_s17 + $0x310] sm:$0xff] %v1457_v2  ;;  %v1456_v34 = vmax.f32 %v1328_v12, 0.0  ;;  %v1458_v35 = vmax.f32 %v1330_v17, 0.0  ;;  %v1166_v38 = vmul.f32 %v2114_v30, %v521_v32  ;;  %v1168_v39 = vmul.f32 %v2117_v31, %v682_v33 }
 0x143   : > { %v1335_v40 = vadd.f32 %v2108_v28, %v1165_v24  ;;  %v1337_v41 = vadd.f32 %v2111_v29, %v1167_v0  ;;  %v525_v42 = vpop.f32.mrf.mxu0  ;;  %v686_v43 = vpop.f32.mrf.mxu1  ;;  %v2329_v14 = vrot.slane %v2095_v22, %v1051_v55  ;;  %v2338_v22 = vrot.slane %v2099_v25, %v1043_v54 }
 0x144   : > { %1584 = vst [vmem:[%s2135_s17 + $0x308] sm:$0xff] %v1456_v34  ;;  %1586 = vst [vmem:[%s2135_s17 + $0x318] sm:$0xff] %v1458_v35  ;;  %v1336_v46 = vadd.f32 %v2123_v36, %v1166_v38  ;;  %v1338_v47 = vadd.f32 %v2126_v37, %v1168_v39  ;;  %v1173_v48 = vmul.f32 %v2102_v26, %v525_v42 }
 0x145   : > { %v1175_v49 = vmul.f32 %v2105_v27, %v686_v43  ;;  %v1463_v50 = vmax.f32 %v1335_v40, 0.0  ;;  %v1465_v51 = vmax.f32 %v1337_v41, 0.0  ;;  %v527_v52 = vpop.f32.mrf.mxu0  ;;  %v688_v53 = vpop.f32.mrf.mxu1  ;;  %v2341_v23 = vrot.slane %v2099_v25, %v1051_v55 }
 0x146   : > { %v1464_v56 = vmax.f32 %v1336_v46, 0.0  ;;  %v1466_v57 = vmax.f32 %v1338_v47, 0.0  ;;  %v1343_v58 = vadd.f32 %v2108_v28, %v1173_v48  ;;  %v1174_v60 = vmul.f32 %v2114_v30, %v527_v52 }
 0x147   : > { %v1345_v59 = vadd.f32 %v2111_v29, %v1175_v49  ;;  %1591 = vst [vmem:[%s2135_s17 + $0x340] sm:$0xff] %v1463_v50  ;;  %1593 = vst [vmem:[%s2135_s17 + $0x350] sm:$0xff] %v1465_v51  ;;  %v1176_v61 = vmul.f32 %v2117_v31, %v688_v53  ;;  %v531_v62 = vpop.f32.mrf.mxu0  ;;  %v692_v63 = vpop.f32.mrf.mxu1 }
 0x148   : > { %1592 = vst [vmem:[%s2135_s17 + $0x348] sm:$0xff] %v1464_v56  ;;  %1594 = vst [vmem:[%s2135_s17 + $0x358] sm:$0xff] %v1466_v57  ;;  %v1471_v3 = vmax.f32 %v1343_v58, 0.0  ;;  %v1181_v5 = vmul.f32 %v2102_v26, %v531_v62  ;;  %v1183_v6 = vmul.f32 %v2105_v27, %v692_v63  ;;  %v1344_v8 = vadd.f32 %v2123_v36, %v1174_v60 }
 0x149   : > { %v1473_v4 = vmax.f32 %v1345_v59, 0.0  ;;  %v1346_v9 = vadd.f32 %v2126_v37, %v1176_v61  ;;  %v533_v10 = vpop.f32.mrf.mxu0  ;;  %v694_v11 = vpop.f32.mrf.mxu1 }
 0x14a   : > { %1599 = vst [vmem:[%s2135_s17 + $0x380] sm:$0xff] %v1471_v3  ;;  %v1351_v26 = vadd.f32 %v2108_v28, %v1181_v5  ;;  %v1353_v27 = vadd.f32 %v2111_v29, %v1183_v6  ;;  %v1182_v15 = vmul.f32 %v2114_v30, %v533_v10  ;;  %v1184_v16 = vmul.f32 %v2117_v31, %v694_v11 }
 0x14b   : > { %1601 = vst [vmem:[%s2135_s17 + $0x390] sm:$0xff] %v1473_v4  ;;  %v1472_v18 = vmax.f32 %v1344_v8, 0.0  ;;  %v1474_v19 = vmax.f32 %v1346_v9, 0.0  ;;  %v763_v20 = vpop.f32.mrf.mxu0  ;;  %v924_v21 = vpop.f32.mrf.mxu1 }
 0x14c   : > { %v1479_v2 = vmax.f32 %v1351_v26, 0.0  ;;  %v1481_v28 = vmax.f32 %v1353_v27, 0.0  ;;  %v1352_v29 = vadd.f32 %v2123_v36, %v1182_v15  ;;  %v1354_v30 = vadd.f32 %v2126_v37, %v1184_v16 }
 0x14d   : > { %1600 = vst [vmem:[%s2135_s17 + $0x388] sm:$0xff] %v1472_v18  ;;  %1602 = vst [vmem:[%s2135_s17 + $0x398] sm:$0xff] %v1474_v19  ;;  %v1065_v31 = vmul.f32 %v2294_v44, %v763_v20  ;;  %v1067_v12 = vmul.f32 %v2297_v45, %v924_v21  ;;  %v765_v17 = vpop.f32.mrf.mxu0  ;;  %v926_v24 = vpop.f32.mrf.mxu1 }
 0x14e   : > { %1607 = vst [vmem:[%s2135_s17 + $0x3c0] sm:$0xff] %v1479_v2  ;;  %1609 = vst [vmem:[%s2135_s17 + $0x3d0] sm:$0xff] %v1481_v28  ;;  %v1480_v25 = vmax.f32 %v1352_v29, 0.0  ;;  %v1482_v0 = vmax.f32 %v1354_v30, 0.0  ;;  %v1066_v32 = vmul.f32 %v2326_v13, %v765_v17  ;;  %v1068_v36 = vmul.f32 %v2329_v14, %v926_v24 }
 0x14f   : > { %v1235_v37 = vadd.f32 %v2314_v1, %v1065_v31  ;;  %v1237_v33 = vadd.f32 %v2317_v7, %v1067_v12  ;;  %v769_v34 = vpop.f32.mrf.mxu0  ;;  %v930_v35 = vpop.f32.mrf.mxu1 }
 0x150   : > { %1608 = vst [vmem:[%s2135_s17 + $0x3c8] sm:$0xff] %v1480_v25  ;;  %1610 = vst [vmem:[%s2135_s17 + $0x3d8] sm:$0xff] %v1482_v0  ;;  %v1236_v38 = vadd.f32 %v2338_v22, %v1066_v32  ;;  %v1238_v39 = vadd.f32 %v2341_v23, %v1068_v36  ;;  %v1073_v40 = vmul.f32 %v2294_v44, %v769_v34 }
 0x151   : > { %v1075_v41 = vmul.f32 %v2297_v45, %v930_v35  ;;  %v1363_v42 = vmax.f32 %v1235_v37, 0.0  ;;  %v1365_v43 = vmax.f32 %v1237_v33, 0.0  ;;  %v771_v46 = vpop.f32.mrf.mxu0  ;;  %v932_v47 = vpop.f32.mrf.mxu1 }
 0x152   : > { %v1364_v48 = vmax.f32 %v1236_v38, 0.0  ;;  %v1366_v49 = vmax.f32 %v1238_v39, 0.0  ;;  %v1243_v50 = vadd.f32 %v2314_v1, %v1073_v40  ;;  %v1074_v52 = vmul.f32 %v2326_v13, %v771_v46 }
 0x153   : > { %v1245_v51 = vadd.f32 %v2317_v7, %v1075_v41  ;;  %1491 = vst [vmem:[%s2135_s17 + $0x20] sm:$0xff] %v1363_v42  ;;  %1493 = vst [vmem:[%s2135_s17 + $0x30] sm:$0xff] %v1365_v43  ;;  %v1076_v53 = vmul.f32 %v2329_v14, %v932_v47  ;;  %v775_v54 = vpop.f32.mrf.mxu0  ;;  %v936_v55 = vpop.f32.mrf.mxu1 }
 0x154   : > { %1492 = vst [vmem:[%s2135_s17 + $0x28] sm:$0xff] %v1364_v48  ;;  %1494 = vst [vmem:[%s2135_s17 + $0x38] sm:$0xff] %v1366_v49  ;;  %v1371_v56 = vmax.f32 %v1243_v50, 0.0  ;;  %v1081_v58 = vmul.f32 %v2294_v44, %v775_v54  ;;  %v1083_v59 = vmul.f32 %v2297_v45, %v936_v55  ;;  %v1244_v60 = vadd.f32 %v2338_v22, %v1074_v52 }
 0x155   : > { %v1373_v57 = vmax.f32 %v1245_v51, 0.0  ;;  %v1246_v61 = vadd.f32 %v2341_v23, %v1076_v53  ;;  %v777_v62 = vpop.f32.mrf.mxu0  ;;  %v938_v63 = vpop.f32.mrf.mxu1 }
 0x156   : > { %1499 = vst [vmem:[%s2135_s17 + $0x60] sm:$0xff] %v1371_v56  ;;  %v1251_v3 = vadd.f32 %v2314_v1, %v1081_v58  ;;  %v1253_v4 = vadd.f32 %v2317_v7, %v1083_v59  ;;  %v1082_v5 = vmul.f32 %v2326_v13, %v777_v62  ;;  %v1084_v6 = vmul.f32 %v2329_v14, %v938_v63 }
 0x157   : > { %1501 = vst [vmem:[%s2135_s17 + $0x70] sm:$0xff] %v1373_v57  ;;  %v1372_v8 = vmax.f32 %v1244_v60, 0.0  ;;  %v1374_v9 = vmax.f32 %v1246_v61, 0.0  ;;  %v781_v10 = vpop.f32.mrf.mxu0  ;;  %v942_v11 = vpop.f32.mrf.mxu1 }
 0x158   : > { %v1379_v26 = vmax.f32 %v1251_v3, 0.0  ;;  %v1381_v27 = vmax.f32 %v1253_v4, 0.0  ;;  %v1252_v15 = vadd.f32 %v2338_v22, %v1082_v5  ;;  %v1254_v16 = vadd.f32 %v2341_v23, %v1084_v6 }
 0x159   : > { %1500 = vst [vmem:[%s2135_s17 + $0x68] sm:$0xff] %v1372_v8  ;;  %1502 = vst [vmem:[%s2135_s17 + $0x78] sm:$0xff] %v1374_v9  ;;  %v1089_v18 = vmul.f32 %v2294_v44, %v781_v10  ;;  %v1091_v19 = vmul.f32 %v2297_v45, %v942_v11  ;;  %v783_v20 = vpop.f32.mrf.mxu0  ;;  %v944_v21 = vpop.f32.mrf.mxu1 }
 0x15a   : > { %1507 = vst [vmem:[%s2135_s17 + $0xa0] sm:$0xff] %v1379_v26  ;;  %1509 = vst [vmem:[%s2135_s17 + $0xb0] sm:$0xff] %v1381_v27  ;;  %v1380_v2 = vmax.f32 %v1252_v15, 0.0  ;;  %v1382_v28 = vmax.f32 %v1254_v16, 0.0  ;;  %v1090_v29 = vmul.f32 %v2326_v13, %v783_v20  ;;  %v1092_v30 = vmul.f32 %v2329_v14, %v944_v21 }
 0x15b   : > { %v1259_v31 = vadd.f32 %v2314_v1, %v1089_v18  ;;  %v1261_v12 = vadd.f32 %v2317_v7, %v1091_v19  ;;  %v787_v17 = vpop.f32.mrf.mxu0  ;;  %v948_v24 = vpop.f32.mrf.mxu1 }
 0x15c   : > { %1508 = vst [vmem:[%s2135_s17 + $0xa8] sm:$0xff] %v1380_v2  ;;  %1510 = vst [vmem:[%s2135_s17 + $0xb8] sm:$0xff] %v1382_v28  ;;  %v1260_v25 = vadd.f32 %v2338_v22, %v1090_v29  ;;  %v1262_v0 = vadd.f32 %v2341_v23, %v1092_v30  ;;  %v1097_v32 = vmul.f32 %v2294_v44, %v787_v17 }
 0x15d   : > { %v1099_v36 = vmul.f32 %v2297_v45, %v948_v24  ;;  %v1387_v37 = vmax.f32 %v1259_v31, 0.0  ;;  %v1389_v33 = vmax.f32 %v1261_v12, 0.0  ;;  %v789_v34 = vpop.f32.mrf.mxu0  ;;  %v950_v35 = vpop.f32.mrf.mxu1 }
 0x15e   : > { %v1388_v38 = vmax.f32 %v1260_v25, 0.0  ;;  %v1390_v39 = vmax.f32 %v1262_v0, 0.0  ;;  %v1267_v40 = vadd.f32 %v2314_v1, %v1097_v32  ;;  %v1098_v42 = vmul.f32 %v2326_v13, %v789_v34 }
 0x15f   : > { %v1269_v41 = vadd.f32 %v2317_v7, %v1099_v36  ;;  %1515 = vst [vmem:[%s2135_s17 + $0xe0] sm:$0xff] %v1387_v37  ;;  %1517 = vst [vmem:[%s2135_s17 + $0xf0] sm:$0xff] %v1389_v33  ;;  %v1100_v43 = vmul.f32 %v2329_v14, %v950_v35  ;;  %v793_v46 = vpop.f32.mrf.mxu0  ;;  %v954_v47 = vpop.f32.mrf.mxu1 }
 0x160   : > { %1516 = vst [vmem:[%s2135_s17 + $0xe8] sm:$0xff] %v1388_v38  ;;  %1518 = vst [vmem:[%s2135_s17 + $0xf8] sm:$0xff] %v1390_v39  ;;  %v1395_v48 = vmax.f32 %v1267_v40, 0.0  ;;  %v1105_v50 = vmul.f32 %v2294_v44, %v793_v46  ;;  %v1107_v51 = vmul.f32 %v2297_v45, %v954_v47  ;;  %v1268_v52 = vadd.f32 %v2338_v22, %v1098_v42 }
 0x161   : > { %v1397_v49 = vmax.f32 %v1269_v41, 0.0  ;;  %v1270_v53 = vadd.f32 %v2341_v23, %v1100_v43  ;;  %v795_v54 = vpop.f32.mrf.mxu0  ;;  %v956_v55 = vpop.f32.mrf.mxu1 }
 0x162   : > { %1523 = vst [vmem:[%s2135_s17 + $0x120] sm:$0xff] %v1395_v48  ;;  %v1275_v56 = vadd.f32 %v2314_v1, %v1105_v50  ;;  %v1277_v57 = vadd.f32 %v2317_v7, %v1107_v51  ;;  %v1106_v58 = vmul.f32 %v2326_v13, %v795_v54  ;;  %v1108_v59 = vmul.f32 %v2329_v14, %v956_v55 }
 0x163   : > { %1525 = vst [vmem:[%s2135_s17 + $0x130] sm:$0xff] %v1397_v49  ;;  %v1396_v60 = vmax.f32 %v1268_v52, 0.0  ;;  %v1398_v61 = vmax.f32 %v1270_v53, 0.0  ;;  %v799_v62 = vpop.f32.mrf.mxu0  ;;  %v960_v63 = vpop.f32.mrf.mxu1 }
 0x164   : > { %v1403_v3 = vmax.f32 %v1275_v56, 0.0  ;;  %v1405_v4 = vmax.f32 %v1277_v57, 0.0  ;;  %v1276_v5 = vadd.f32 %v2338_v22, %v1106_v58  ;;  %v1278_v6 = vadd.f32 %v2341_v23, %v1108_v59 }
 0x165   : > { %1524 = vst [vmem:[%s2135_s17 + $0x128] sm:$0xff] %v1396_v60  ;;  %1526 = vst [vmem:[%s2135_s17 + $0x138] sm:$0xff] %v1398_v61  ;;  %v1113_v8 = vmul.f32 %v2294_v44, %v799_v62  ;;  %v1115_v9 = vmul.f32 %v2297_v45, %v960_v63  ;;  %v801_v10 = vpop.f32.mrf.mxu0  ;;  %v962_v11 = vpop.f32.mrf.mxu1 }
 0x166   : > { %1531 = vst [vmem:[%s2135_s17 + $0x160] sm:$0xff] %v1403_v3  ;;  %1533 = vst [vmem:[%s2135_s17 + $0x170] sm:$0xff] %v1405_v4  ;;  %v1404_v26 = vmax.f32 %v1276_v5, 0.0  ;;  %v1406_v27 = vmax.f32 %v1278_v6, 0.0  ;;  %v1114_v15 = vmul.f32 %v2326_v13, %v801_v10  ;;  %v1116_v16 = vmul.f32 %v2329_v14, %v962_v11 }
 0x167   : > { %v1283_v18 = vadd.f32 %v2314_v1, %v1113_v8  ;;  %v1285_v19 = vadd.f32 %v2317_v7, %v1115_v9  ;;  %v805_v20 = vpop.f32.mrf.mxu0  ;;  %v966_v21 = vpop.f32.mrf.mxu1 }
 0x168   : > { %1532 = vst [vmem:[%s2135_s17 + $0x168] sm:$0xff] %v1404_v26  ;;  %1534 = vst [vmem:[%s2135_s17 + $0x178] sm:$0xff] %v1406_v27  ;;  %v1284_v2 = vadd.f32 %v2338_v22, %v1114_v15  ;;  %v1286_v28 = vadd.f32 %v2341_v23, %v1116_v16  ;;  %v1121_v29 = vmul.f32 %v2294_v44, %v805_v20 }
 0x169   : > { %v1123_v30 = vmul.f32 %v2297_v45, %v966_v21  ;;  %v1411_v31 = vmax.f32 %v1283_v18, 0.0  ;;  %v1413_v12 = vmax.f32 %v1285_v19, 0.0  ;;  %v807_v17 = vpop.f32.mrf.mxu0  ;;  %v968_v24 = vpop.f32.mrf.mxu1 }
 0x16a   : > { %v1412_v25 = vmax.f32 %v1284_v2, 0.0  ;;  %v1414_v0 = vmax.f32 %v1286_v28, 0.0  ;;  %v1291_v32 = vadd.f32 %v2314_v1, %v1121_v29  ;;  %v1122_v37 = vmul.f32 %v2326_v13, %v807_v17 }
 0x16b   : > { %v1293_v36 = vadd.f32 %v2317_v7, %v1123_v30  ;;  %1539 = vst [vmem:[%s2135_s17 + $0x1a0] sm:$0xff] %v1411_v31  ;;  %1541 = vst [vmem:[%s2135_s17 + $0x1b0] sm:$0xff] %v1413_v12  ;;  %v1124_v33 = vmul.f32 %v2329_v14, %v968_v24  ;;  %v811_v34 = vpop.f32.mrf.mxu0  ;;  %v972_v35 = vpop.f32.mrf.mxu1 }
 0x16c   : > { %1540 = vst [vmem:[%s2135_s17 + $0x1a8] sm:$0xff] %v1412_v25  ;;  %1542 = vst [vmem:[%s2135_s17 + $0x1b8] sm:$0xff] %v1414_v0  ;;  %v1419_v38 = vmax.f32 %v1291_v32, 0.0  ;;  %v1129_v40 = vmul.f32 %v2294_v44, %v811_v34  ;;  %v1131_v41 = vmul.f32 %v2297_v45, %v972_v35  ;;  %v1292_v42 = vadd.f32 %v2338_v22, %v1122_v37 }
 0x16d   : > { %v1421_v39 = vmax.f32 %v1293_v36, 0.0  ;;  %v1294_v43 = vadd.f32 %v2341_v23, %v1124_v33  ;;  %v813_v46 = vpop.f32.mrf.mxu0  ;;  %v974_v47 = vpop.f32.mrf.mxu1 }
 0x16e   : > { %1547 = vst [vmem:[%s2135_s17 + $0x1e0] sm:$0xff] %v1419_v38  ;;  %v1299_v48 = vadd.f32 %v2314_v1, %v1129_v40  ;;  %v1301_v49 = vadd.f32 %v2317_v7, %v1131_v41  ;;  %v1130_v50 = vmul.f32 %v2326_v13, %v813_v46  ;;  %v1132_v51 = vmul.f32 %v2329_v14, %v974_v47 }
 0x16f   : > { %1549 = vst [vmem:[%s2135_s17 + $0x1f0] sm:$0xff] %v1421_v39  ;;  %v1420_v52 = vmax.f32 %v1292_v42, 0.0  ;;  %v1422_v53 = vmax.f32 %v1294_v43, 0.0  ;;  %v817_v54 = vpop.f32.mrf.mxu0  ;;  %v978_v55 = vpop.f32.mrf.mxu1 }
 0x170   : > { %v1427_v56 = vmax.f32 %v1299_v48, 0.0  ;;  %v1429_v57 = vmax.f32 %v1301_v49, 0.0  ;;  %v1300_v58 = vadd.f32 %v2338_v22, %v1130_v50  ;;  %v1302_v59 = vadd.f32 %v2341_v23, %v1132_v51 }
 0x171   : > { %1548 = vst [vmem:[%s2135_s17 + $0x1e8] sm:$0xff] %v1420_v52  ;;  %1550 = vst [vmem:[%s2135_s17 + $0x1f8] sm:$0xff] %v1422_v53  ;;  %v1137_v60 = vmul.f32 %v2294_v44, %v817_v54  ;;  %v1139_v61 = vmul.f32 %v2297_v45, %v978_v55  ;;  %v819_v62 = vpop.f32.mrf.mxu0  ;;  %v980_v63 = vpop.f32.mrf.mxu1 }
 0x172   : > { %1555 = vst [vmem:[%s2135_s17 + $0x220] sm:$0xff] %v1427_v56  ;;  %1557 = vst [vmem:[%s2135_s17 + $0x230] sm:$0xff] %v1429_v57  ;;  %v1428_v3 = vmax.f32 %v1300_v58, 0.0  ;;  %v1430_v4 = vmax.f32 %v1302_v59, 0.0  ;;  %v1138_v5 = vmul.f32 %v2326_v13, %v819_v62  ;;  %v1140_v6 = vmul.f32 %v2329_v14, %v980_v63 }
 0x173   : > { %v1307_v8 = vadd.f32 %v2314_v1, %v1137_v60  ;;  %v1309_v9 = vadd.f32 %v2317_v7, %v1139_v61  ;;  %v823_v10 = vpop.f32.mrf.mxu0  ;;  %v984_v11 = vpop.f32.mrf.mxu1 }
 0x174   : > { %1556 = vst [vmem:[%s2135_s17 + $0x228] sm:$0xff] %v1428_v3  ;;  %1558 = vst [vmem:[%s2135_s17 + $0x238] sm:$0xff] %v1430_v4  ;;  %v1308_v26 = vadd.f32 %v2338_v22, %v1138_v5  ;;  %v1310_v27 = vadd.f32 %v2341_v23, %v1140_v6  ;;  %v1145_v15 = vmul.f32 %v2294_v44, %v823_v10 }
 0x175   : > { %v1147_v16 = vmul.f32 %v2297_v45, %v984_v11  ;;  %v1435_v18 = vmax.f32 %v1307_v8, 0.0  ;;  %v1437_v19 = vmax.f32 %v1309_v9, 0.0  ;;  %v825_v20 = vpop.f32.mrf.mxu0  ;;  %v986_v21 = vpop.f32.mrf.mxu1 }
 0x176   : > { %v1436_v2 = vmax.f32 %v1308_v26, 0.0  ;;  %v1438_v28 = vmax.f32 %v1310_v27, 0.0  ;;  %v1315_v29 = vadd.f32 %v2314_v1, %v1145_v15  ;;  %v1146_v31 = vmul.f32 %v2326_v13, %v825_v20 }
 0x177   : > { %v1317_v30 = vadd.f32 %v2317_v7, %v1147_v16  ;;  %1563 = vst [vmem:[%s2135_s17 + $0x260] sm:$0xff] %v1435_v18  ;;  %1565 = vst [vmem:[%s2135_s17 + $0x270] sm:$0xff] %v1437_v19  ;;  %v1148_v12 = vmul.f32 %v2329_v14, %v986_v21  ;;  %v829_v17 = vpop.f32.mrf.mxu0  ;;  %v990_v24 = vpop.f32.mrf.mxu1 }
 0x178   : > { %1564 = vst [vmem:[%s2135_s17 + $0x268] sm:$0xff] %v1436_v2  ;;  %1566 = vst [vmem:[%s2135_s17 + $0x278] sm:$0xff] %v1438_v28  ;;  %v1443_v25 = vmax.f32 %v1315_v29, 0.0  ;;  %v1153_v32 = vmul.f32 %v2294_v44, %v829_v17  ;;  %v1155_v36 = vmul.f32 %v2297_v45, %v990_v24  ;;  %v1316_v37 = vadd.f32 %v2338_v22, %v1146_v31 }
 0x179   : > { %v1445_v0 = vmax.f32 %v1317_v30, 0.0  ;;  %v1318_v33 = vadd.f32 %v2341_v23, %v1148_v12  ;;  %v831_v34 = vpop.f32.mrf.mxu0  ;;  %v992_v35 = vpop.f32.mrf.mxu1 }
 0x17a   : > { %1571 = vst [vmem:[%s2135_s17 + $0x2a0] sm:$0xff] %v1443_v25  ;;  %v1323_v38 = vadd.f32 %v2314_v1, %v1153_v32  ;;  %v1325_v39 = vadd.f32 %v2317_v7, %v1155_v36  ;;  %v1154_v40 = vmul.f32 %v2326_v13, %v831_v34  ;;  %v1156_v41 = vmul.f32 %v2329_v14, %v992_v35 }
 0x17b   : > { %1573 = vst [vmem:[%s2135_s17 + $0x2b0] sm:$0xff] %v1445_v0  ;;  %v1444_v42 = vmax.f32 %v1316_v37, 0.0  ;;  %v1446_v43 = vmax.f32 %v1318_v33, 0.0  ;;  %v835_v46 = vpop.f32.mrf.mxu0  ;;  %v996_v47 = vpop.f32.mrf.mxu1 }
 0x17c   : > { %v1451_v48 = vmax.f32 %v1323_v38, 0.0  ;;  %v1453_v49 = vmax.f32 %v1325_v39, 0.0  ;;  %v1324_v50 = vadd.f32 %v2338_v22, %v1154_v40  ;;  %v1326_v51 = vadd.f32 %v2341_v23, %v1156_v41 }
 0x17d   : > { %1572 = vst [vmem:[%s2135_s17 + $0x2a8] sm:$0xff] %v1444_v42  ;;  %1574 = vst [vmem:[%s2135_s17 + $0x2b8] sm:$0xff] %v1446_v43  ;;  %v1161_v52 = vmul.f32 %v2294_v44, %v835_v46  ;;  %v1163_v53 = vmul.f32 %v2297_v45, %v996_v47  ;;  %v837_v54 = vpop.f32.mrf.mxu0  ;;  %v998_v55 = vpop.f32.mrf.mxu1 }
 0x17e   : > { %1579 = vst [vmem:[%s2135_s17 + $0x2e0] sm:$0xff] %v1451_v48  ;;  %1581 = vst [vmem:[%s2135_s17 + $0x2f0] sm:$0xff] %v1453_v49  ;;  %v1452_v56 = vmax.f32 %v1324_v50, 0.0  ;;  %v1454_v57 = vmax.f32 %v1326_v51, 0.0  ;;  %v1162_v58 = vmul.f32 %v2326_v13, %v837_v54  ;;  %v1164_v59 = vmul.f32 %v2329_v14, %v998_v55 }
 0x17f   : > { %v1331_v60 = vadd.f32 %v2314_v1, %v1161_v52  ;;  %v1333_v61 = vadd.f32 %v2317_v7, %v1163_v53  ;;  %v841_v62 = vpop.f32.mrf.mxu0  ;;  %v1002_v63 = vpop.f32.mrf.mxu1 }
 0x180   : > { %1580 = vst [vmem:[%s2135_s17 + $0x2e8] sm:$0xff] %v1452_v56  ;;  %1582 = vst [vmem:[%s2135_s17 + $0x2f8] sm:$0xff] %v1454_v57  ;;  %v1332_v3 = vadd.f32 %v2338_v22, %v1162_v58  ;;  %v1334_v4 = vadd.f32 %v2341_v23, %v1164_v59  ;;  %v1169_v5 = vmul.f32 %v2294_v44, %v841_v62 }
 0x181   : > { %v1171_v6 = vmul.f32 %v2297_v45, %v1002_v63  ;;  %v1459_v8 = vmax.f32 %v1331_v60, 0.0  ;;  %v1461_v9 = vmax.f32 %v1333_v61, 0.0  ;;  %v843_v10 = vpop.f32.mrf.mxu0  ;;  %v1004_v11 = vpop.f32.mrf.mxu1 }
 0x182   : > { %v1460_v26 = vmax.f32 %v1332_v3, 0.0  ;;  %v1462_v27 = vmax.f32 %v1334_v4, 0.0  ;;  %v1339_v15 = vadd.f32 %v2314_v1, %v1169_v5  ;;  %v1170_v18 = vmul.f32 %v2326_v13, %v843_v10 }
 0x183   : > { %v1341_v16 = vadd.f32 %v2317_v7, %v1171_v6  ;;  %1587 = vst [vmem:[%s2135_s17 + $0x320] sm:$0xff] %v1459_v8  ;;  %1589 = vst [vmem:[%s2135_s17 + $0x330] sm:$0xff] %v1461_v9  ;;  %v1172_v19 = vmul.f32 %v2329_v14, %v1004_v11  ;;  %v847_v20 = vpop.f32.mrf.mxu0  ;;  %v1008_v21 = vpop.f32.mrf.mxu1 }
 0x184   : > { %1588 = vst [vmem:[%s2135_s17 + $0x328] sm:$0xff] %v1460_v26  ;;  %1590 = vst [vmem:[%s2135_s17 + $0x338] sm:$0xff] %v1462_v27  ;;  %v1467_v2 = vmax.f32 %v1339_v15, 0.0  ;;  %v1177_v29 = vmul.f32 %v2294_v44, %v847_v20  ;;  %v1179_v30 = vmul.f32 %v2297_v45, %v1008_v21  ;;  %v1340_v31 = vadd.f32 %v2338_v22, %v1170_v18 }
 0x185   : > { %v1469_v28 = vmax.f32 %v1341_v16, 0.0  ;;  %v1342_v12 = vadd.f32 %v2341_v23, %v1172_v19  ;;  %v849_v17 = vpop.f32.mrf.mxu0  ;;  %v1010_v24 = vpop.f32.mrf.mxu1 }
 0x186   : > { %1595 = vst [vmem:[%s2135_s17 + $0x360] sm:$0xff] %v1467_v2  ;;  %v1347_v25 = vadd.f32 %v2314_v1, %v1177_v29  ;;  %v1349_v0 = vadd.f32 %v2317_v7, %v1179_v30  ;;  %v1178_v32 = vmul.f32 %v2326_v13, %v849_v17  ;;  %v1180_v36 = vmul.f32 %v2329_v14, %v1010_v24 }
 0x187   : > { %1597 = vst [vmem:[%s2135_s17 + $0x370] sm:$0xff] %v1469_v28  ;;  %v1468_v37 = vmax.f32 %v1340_v31, 0.0  ;;  %v1470_v33 = vmax.f32 %v1342_v12, 0.0  ;;  %v853_v34 = vpop.f32.mrf.mxu0  ;;  %v1014_v35 = vpop.f32.mrf.mxu1 }
 0x188   : > { %v1475_v38 = vmax.f32 %v1347_v25, 0.0  ;;  %v1477_v39 = vmax.f32 %v1349_v0, 0.0  ;;  %v1348_v40 = vadd.f32 %v2338_v22, %v1178_v32  ;;  %v1350_v41 = vadd.f32 %v2341_v23, %v1180_v36 }
 0x189   : > { %1596 = vst [vmem:[%s2135_s17 + $0x368] sm:$0xff] %v1468_v37  ;;  %1598 = vst [vmem:[%s2135_s17 + $0x378] sm:$0xff] %v1470_v33  ;;  %v1185_v42 = vmul.f32 %v2294_v44, %v853_v34  ;;  %v1187_v43 = vmul.f32 %v2297_v45, %v1014_v35  ;;  %v855_v46 = vpop.f32.mrf.mxu0  ;;  %v1016_v47 = vpop.f32.mrf.mxu1 }
 0x18a   : > { %1603 = vst [vmem:[%s2135_s17 + $0x3a0] sm:$0xff] %v1475_v38  ;;  %1605 = vst [vmem:[%s2135_s17 + $0x3b0] sm:$0xff] %v1477_v39  ;;  %v1476_v48 = vmax.f32 %v1348_v40, 0.0  ;;  %v1478_v49 = vmax.f32 %v1350_v41, 0.0  ;;  %v1186_v50 = vmul.f32 %v2326_v13, %v855_v46  ;;  %v1188_v51 = vmul.f32 %v2329_v14, %v1016_v47 }
 0x18b   : > { %v1355_v52 = vadd.f32 %v2314_v1, %v1185_v42  ;;  %v1357_v44 = vadd.f32 %v2317_v7, %v1187_v43 }
 0x18c   : > { %1604 = vst [vmem:[%s2135_s17 + $0x3a8] sm:$0xff] %v1476_v48  ;;  %1606 = vst [vmem:[%s2135_s17 + $0x3b8] sm:$0xff] %v1478_v49  ;;  %v1356_v45 = vadd.f32 %v2338_v22, %v1186_v50  ;;  %v1358_v53 = vadd.f32 %v2341_v23, %v1188_v51 }
 0x18d   : > { %v1483_v54 = vmax.f32 %v1355_v52, 0.0  ;;  %v1485_v55 = vmax.f32 %v1357_v44, 0.0 }
 0x18e   : > { %v1484_v56 = vmax.f32 %v1356_v45, 0.0  ;;  %v1486_v57 = vmax.f32 %v1358_v53, 0.0 }
 0x18f   : > { %1611 = vst [vmem:[%s2135_s17 + $0x3e0] sm:$0xff] %v1483_v54  ;;  %1613 = vst [vmem:[%s2135_s17 + $0x3f0] sm:$0xff] %v1485_v55 }
 0x190   : > { %1612 = vst [vmem:[%s2135_s17 + $0x3e8] sm:$0xff] %v1484_v56  ;;  %1614 = vst [vmem:[%s2135_s17 + $0x3f8] sm:$0xff] %v1486_v57 }
 0x191 PF: > { %s16_s15 = sadd.s32 1, %s1810_s15  }
 0x192   : > { %p13_p3 = scmp.ge.s32.totalorder %s16_s15, 4  }
 0x194   :  { %15 = sbr.rel (!%p13_p3) target bundleno = 2 (0x2), region = 75 }
 0x199   :  { %1639 = vsyncpa [#allocation3], 1 }
 0x19a   :  { %1641 = vsyncpa [#allocation3 + $0x1], 1 }
 0x19b   :  { %1642 = vsyncpa [#allocation5], 1 }

// kernel: pointnet_gem_forward.16
= control target key start
LH: loop header
LB: loop body
LE: loop exit
PB: predicated region body
PF: predicated region fallthrough
CT: control target
= control target key end

     0   :  { %s786_s1 = inlined_call_operand.vmem [shape: f32[512,256], index: 1, kind: input, shape index: {}]   ;;  %s787_s0 = inlined_call_operand.vmem [shape: f32[2,512], index: 0, kind: input, shape index: {}]   ;;  %s788_s2 = inlined_call_operand.vmem [shape: f32[1,256], index: 2, kind: input, shape index: {}]   ;;  %s789_s3 = inlined_call_operand.vmem [shape: f32[1,256], index: 3, kind: input, shape index: {}]   ;;  %s790_s4 = inlined_call_operand.vmem [shape: f32[2,256], index: 4, kind: output, shape index: {}]  }
   0x1   :  { %v49_v0 = vld [vmem:[%s786_s1 + $0xf8] sm:$0xff]  ;;  %v48_v2 = vld [vmem:[%s786_s1 + $0xf0] sm:$0xff]  ;;  %v47_v4 = vld [vmem:[%s786_s1 + $0xe8] sm:$0xff] }
   0x2   :  { %v113_v1 = vld [vmem:[%s786_s1 + $0x2f8] sm:$0xff]  ;;  %168 = vmatprep.subr.mxu0 %v49_v0  ;;  %v112_v3 = vld [vmem:[%s786_s1 + $0x2f0] sm:$0xff]  ;;  %v111_v5 = vld [vmem:[%s786_s1 + $0x2e8] sm:$0xff] }
   0x3   :  { %239 = vmatprep.subr.mxu1 %v113_v1  ;;  %169 = vmatpush1.msra.mxu0 %v48_v2  ;;  %v46_v6 = vld [vmem:[%s786_s1 + $0xe0] sm:$0xff]  ;;  %v45_v8 = vld [vmem:[%s786_s1 + $0xd8] sm:$0xff]  ;;  %v44_v10 = vld [vmem:[%s786_s1 + $0xd0] sm:$0xff] }
   0x4   :  { %240 = vmatpush1.msra.mxu1 %v112_v3  ;;  %v110_v7 = vld [vmem:[%s786_s1 + $0x2e0] sm:$0xff]  ;;  %170 = vmatprep.subr.mxu0 %v47_v4  ;;  %v109_v9 = vld [vmem:[%s786_s1 + $0x2d8] sm:$0xff]  ;;  %v108_v11 = vld [vmem:[%s786_s1 + $0x2d0] sm:$0xff] }
   0x5   :  { %241 = vmatprep.subr.mxu1 %v111_v5  ;;  %171 = vmatpush1.msra.mxu0 %v46_v6  ;;  %v43_v12 = vld [vmem:[%s786_s1 + $0xc8] sm:$0xff]  ;;  %v42_v14 = vld [vmem:[%s786_s1 + $0xc0] sm:$0xff]  ;;  %v41_v16 = vld [vmem:[%s786_s1 + $0xb8] sm:$0xff] }
   0x6   :  { %242 = vmatpush1.msra.mxu1 %v110_v7  ;;  %v107_v13 = vld [vmem:[%s786_s1 + $0x2c8] sm:$0xff]  ;;  %172 = vmatprep.subr.mxu0 %v45_v8  ;;  %v106_v15 = vld [vmem:[%s786_s1 + $0x2c0] sm:$0xff]  ;;  %v105_v17 = vld [vmem:[%s786_s1 + $0x2b8] sm:$0xff] }
   0x7   :  { %243 = vmatprep.subr.mxu1 %v109_v9  ;;  %173 = vmatpush1.msra.mxu0 %v44_v10  ;;  %v40_v18 = vld [vmem:[%s786_s1 + $0xb0] sm:$0xff]  ;;  %v39_v20 = vld [vmem:[%s786_s1 + $0xa8] sm:$0xff]  ;;  %v38_v22 = vld [vmem:[%s786_s1 + $0xa0] sm:$0xff] }
   0x8   :  { %244 = vmatpush1.msra.mxu1 %v108_v11  ;;  %174 = vmatprep.subr.mxu0 %v43_v12  ;;  %v104_v19 = vld [vmem:[%s786_s1 + $0x2b0] sm:$0xff]  ;;  %v103_v21 = vld [vmem:[%s786_s1 + $0x2a8] sm:$0xff]  ;;  %v102_v23 = vld [vmem:[%s786_s1 + $0x2a0] sm:$0xff] }
   0x9   :  { %245 = vmatprep.subr.mxu1 %v107_v13  ;;  %175 = vmatpush1.msra.mxu0 %v42_v14  ;;  %v37_v24 = vld [vmem:[%s786_s1 + $0x98] sm:$0xff]  ;;  %v36_v26 = vld [vmem:[%s786_s1 + $0x90] sm:$0xff]  ;;  %v35_v28 = vld [vmem:[%s786_s1 + $0x88] sm:$0xff] }
   0xa   :  { %246 = vmatpush1.msra.mxu1 %v106_v15  ;;  %176 = vmatprep.subr.mxu0 %v41_v16  ;;  %v101_v25 = vld [vmem:[%s786_s1 + $0x298] sm:$0xff]  ;;  %v100_v27 = vld [vmem:[%s786_s1 + $0x290] sm:$0xff]  ;;  %v99_v29 = vld [vmem:[%s786_s1 + $0x288] sm:$0xff] }
   0xb   :  { %247 = vmatprep.subr.mxu1 %v105_v17  ;;  %177 = vmatpush1.msra.mxu0 %v40_v18  ;;  %v34_v30 = vld [vmem:[%s786_s1 + $0x80] sm:$0xff]  ;;  %v33_v32 = vld [vmem:[%s786_s1 + $0x78] sm:$0xff]  ;;  %v32_v34 = vld [vmem:[%s786_s1 + $0x70] sm:$0xff] }
   0xc   :  { %248 = vmatpush1.msra.mxu1 %v104_v19  ;;  %178 = vmatprep.subr.mxu0 %v39_v20  ;;  %v98_v31 = vld [vmem:[%s786_s1 + $0x280] sm:$0xff]  ;;  %v97_v33 = vld [vmem:[%s786_s1 + $0x278] sm:$0xff]  ;;  %v96_v35 = vld [vmem:[%s786_s1 + $0x270] sm:$0xff] }
   0xd   :  { %249 = vmatprep.subr.mxu1 %v103_v21  ;;  %179 = vmatpush1.msra.mxu0 %v38_v22  ;;  %v31_v36 = vld [vmem:[%s786_s1 + $0x68] sm:$0xff]  ;;  %v30_v38 = vld [vmem:[%s786_s1 + $0x60] sm:$0xff]  ;;  %v29_v40 = vld [vmem:[%s786_s1 + $0x58] sm:$0xff] }
   0xe   :  { %250 = vmatpush1.msra.mxu1 %v102_v23  ;;  %180 = vmatprep.subr.mxu0 %v37_v24  ;;  %v95_v37 = vld [vmem:[%s786_s1 + $0x268] sm:$0xff]  ;;  %v94_v39 = vld [vmem:[%s786_s1 + $0x260] sm:$0xff]  ;;  %v93_v41 = vld [vmem:[%s786_s1 + $0x258] sm:$0xff] }
   0xf   :  { %251 = vmatprep.subr.mxu1 %v101_v25  ;;  %181 = vmatpush1.msra.mxu0 %v36_v26  ;;  %v28_v42 = vld [vmem:[%s786_s1 + $0x50] sm:$0xff]  ;;  %v27_v44 = vld [vmem:[%s786_s1 + $0x48] sm:$0xff]  ;;  %v26_v46 = vld [vmem:[%s786_s1 + $0x40] sm:$0xff] }
  0x10   :  { %252 = vmatpush1.msra.mxu1 %v100_v27  ;;  %182 = vmatprep.subr.mxu0 %v35_v28  ;;  %v92_v43 = vld [vmem:[%s786_s1 + $0x250] sm:$0xff]  ;;  %v91_v45 = vld [vmem:[%s786_s1 + $0x248] sm:$0xff]  ;;  %v90_v47 = vld [vmem:[%s786_s1 + $0x240] sm:$0xff] }
  0x11   :  { %253 = vmatprep.subr.mxu1 %v99_v29  ;;  %183 = vmatpush1.msra.mxu0 %v34_v30  ;;  %v25_v48 = vld [vmem:[%s786_s1 + $0x38] sm:$0xff]  ;;  %v24_v50 = vld [vmem:[%s786_s1 + $0x30] sm:$0xff]  ;;  %v23_v52 = vld [vmem:[%s786_s1 + $0x28] sm:$0xff]  ;;  %v359_v30 = vmov 1983009808  }
  0x12   :  { %254 = vmatpush1.msra.mxu1 %v98_v31  ;;  %184 = vmatprep.subr.mxu0 %v33_v32  ;;  %v89_v49 = vld [vmem:[%s786_s1 + $0x238] sm:$0xff]  ;;  %v88_v51 = vld [vmem:[%s786_s1 + $0x230] sm:$0xff]  ;;  %v87_v53 = vld [vmem:[%s786_s1 + $0x228] sm:$0xff]  ;;  %v149_v31 = vunpack.c.l.s4 %v359_v30  ;;  %v151_v32 = vlaneseq }
  0x13   :  { %255 = vmatprep.subr.mxu1 %v97_v33  ;;  %185 = vmatpush1.msra.mxu0 %v32_v34  ;;  %v22_v54 = vld [vmem:[%s786_s1 + $0x20] sm:$0xff]  ;;  %v21_v56 = vld [vmem:[%s786_s1 + $0x18] sm:$0xff]  ;;  %v20_v58 = vld [vmem:[%s786_s1 + $0x10] sm:$0xff] }
  0x14   :  { %256 = vmatpush1.msra.mxu1 %v96_v35  ;;  %186 = vmatprep.subr.mxu0 %v31_v36  ;;  %v86_v55 = vld [vmem:[%s786_s1 + $0x220] sm:$0xff]  ;;  %v85_v57 = vld [vmem:[%s786_s1 + $0x218] sm:$0xff]  ;;  %v84_v59 = vld [vmem:[%s786_s1 + $0x210] sm:$0xff] }
  0x15   :  { %257 = vmatprep.subr.mxu1 %v95_v37  ;;  %187 = vmatpush1.msra.mxu0 %v30_v38  ;;  %v19_v60 = vld [vmem:[%s786_s1 + $0x8] sm:$0xff]  ;;  %v18_v62 = vld [vmem:[%s786_s1] sm:$0xff]  ;;  %v81_v0 = vld [vmem:[%s786_s1 + $0x1f8] sm:$0xff] }
  0x16   :  { %258 = vmatpush1.msra.mxu1 %v94_v39  ;;  %188 = vmatprep.subr.mxu0 %v29_v40  ;;  %v83_v61 = vld [vmem:[%s786_s1 + $0x208] sm:$0xff]  ;;  %v82_v63 = vld [vmem:[%s786_s1 + $0x200] sm:$0xff]  ;;  %v145_v1 = vld [vmem:[%s786_s1 + $0x3f8] sm:$0xff] }
  0x17   :  { %259 = vmatprep.subr.mxu1 %v93_v41  ;;  %189 = vmatpush1.msra.mxu0 %v28_v42  ;;  %v80_v2 = vld [vmem:[%s786_s1 + $0x1f0] sm:$0xff]  ;;  %v79_v4 = vld [vmem:[%s786_s1 + $0x1e8] sm:$0xff]  ;;  %v78_v6 = vld [vmem:[%s786_s1 + $0x1e0] sm:$0xff]  ;;  %v150_v41 = vunpack.c.0.s8 %v149_v31  ;;  %v691_v42 = vshrl.u32 %v151_v32, 7 }
  0x18   :  { %260 = vmatpush1.msra.mxu1 %v92_v43  ;;  %190 = vmatprep.subr.mxu0 %v27_v44  ;;  %v144_v3 = vld [vmem:[%s786_s1 + $0x3f0] sm:$0xff]  ;;  %v143_v5 = vld [vmem:[%s786_s1 + $0x3e8] sm:$0xff]  ;;  %v142_v7 = vld [vmem:[%s786_s1 + $0x3e0] sm:$0xff] }
  0x19   :  { %261 = vmatprep.subr.mxu1 %v91_v45  ;;  %191 = vmatpush1.msra.mxu0 %v26_v46  ;;  %v77_v8 = vld [vmem:[%s786_s1 + $0x1d8] sm:$0xff]  ;;  %v76_v10 = vld [vmem:[%s786_s1 + $0x1d0] sm:$0xff]  ;;  %v75_v12 = vld [vmem:[%s786_s1 + $0x1c8] sm:$0xff] }
  0x1a   :  { %262 = vmatpush1.msra.mxu1 %v90_v47  ;;  %192 = vmatprep.subr.mxu0 %v25_v48  ;;  %v141_v9 = vld [vmem:[%s786_s1 + $0x3d8] sm:$0xff]  ;;  %v140_v11 = vld [vmem:[%s786_s1 + $0x3d0] sm:$0xff]  ;;  %v139_v13 = vld [vmem:[%s786_s1 + $0x3c8] sm:$0xff] }
  0x1b   :  { %263 = vmatprep.subr.mxu1 %v89_v49  ;;  %193 = vmatpush1.msra.mxu0 %v24_v50  ;;  %v74_v14 = vld [vmem:[%s786_s1 + $0x1c0] sm:$0xff]  ;;  %v73_v16 = vld [vmem:[%s786_s1 + $0x1b8] sm:$0xff]  ;;  %v72_v18 = vld [vmem:[%s786_s1 + $0x1b0] sm:$0xff] }
  0x1c   :  { %264 = vmatpush1.msra.mxu1 %v88_v51  ;;  %194 = vmatprep.subr.mxu0 %v23_v52  ;;  %v138_v15 = vld [vmem:[%s786_s1 + $0x3c0] sm:$0xff]  ;;  %v137_v17 = vld [vmem:[%s786_s1 + $0x3b8] sm:$0xff]  ;;  %v136_v19 = vld [vmem:[%s786_s1 + $0x3b0] sm:$0xff]  ;;  %v153_v52 = vsub.s32 %v150_v41, %v691_v42 }
  0x1d   :  { %265 = vmatprep.subr.mxu1 %v87_v53  ;;  %195 = vmatpush1.msra.mxu0 %v22_v54  ;;  %v71_v20 = vld [vmem:[%s786_s1 + $0x1a8] sm:$0xff]  ;;  %v70_v22 = vld [vmem:[%s786_s1 + $0x1a0] sm:$0xff]  ;;  %v69_v24 = vld [vmem:[%s786_s1 + $0x198] sm:$0xff] }
  0x1e   :  { %266 = vmatpush1.msra.mxu1 %v86_v55  ;;  %196 = vmatprep.subr.mxu0 %v21_v56  ;;  %v135_v21 = vld [vmem:[%s786_s1 + $0x3a8] sm:$0xff]  ;;  %v134_v23 = vld [vmem:[%s786_s1 + $0x3a0] sm:$0xff]  ;;  %v133_v25 = vld [vmem:[%s786_s1 + $0x398] sm:$0xff] }
  0x1f   :  { %267 = vmatprep.subr.mxu1 %v85_v57  ;;  %197 = vmatpush1.msra.mxu0 %v20_v58  ;;  %v68_v26 = vld [vmem:[%s786_s1 + $0x190] sm:$0xff]  ;;  %v67_v28 = vld [vmem:[%s786_s1 + $0x188] sm:$0xff]  ;;  %v66_v33 = vld [vmem:[%s786_s1 + $0x180] sm:$0xff] }
  0x20   :  { %268 = vmatpush1.msra.mxu1 %v84_v59  ;;  %198 = vmatprep.subr.mxu0 %v19_v60  ;;  %v132_v27 = vld [vmem:[%s786_s1 + $0x390] sm:$0xff]  ;;  %v131_v29 = vld [vmem:[%s786_s1 + $0x388] sm:$0xff]  ;;  %v130_v34 = vld [vmem:[%s786_s1 + $0x380] sm:$0xff] }
  0x21   :  { %269 = vmatprep.subr.mxu1 %v83_v61  ;;  %199 = vmatpush1.msra.mxu0 %v18_v62  ;;  %v65_v35 = vld [vmem:[%s786_s1 + $0x178] sm:$0xff]  ;;  %v64_v37 = vld [vmem:[%s786_s1 + $0x170] sm:$0xff]  ;;  %v63_v39 = vld [vmem:[%s786_s1 + $0x168] sm:$0xff] }
  0x22   :  { %270 = vmatpush1.msra.mxu1 %v82_v63  ;;  %200 = vmatprep.subr.mxu0 %v81_v0  ;;  %v129_v36 = vld [vmem:[%s786_s1 + $0x378] sm:$0xff]  ;;  %v128_v38 = vld [vmem:[%s786_s1 + $0x370] sm:$0xff]  ;;  %v127_v40 = vld [vmem:[%s786_s1 + $0x368] sm:$0xff] }
  0x23   :  { %271 = vmatprep.subr.mxu1 %v145_v1  ;;  %201 = vmatpush2.msra.mxu0 %v80_v2  ;;  %v62_v43 = vld [vmem:[%s786_s1 + $0x160] sm:$0xff]  ;;  %v61_v45 = vld [vmem:[%s786_s1 + $0x158] sm:$0xff]  ;;  %v60_v48 = vld [vmem:[%s786_s1 + $0x150] sm:$0xff] }
  0x24   :  { %272 = vmatpush2.msra.mxu1 %v144_v3  ;;  %202 = vmatprep.subr.mxu0 %v79_v4  ;;  %v126_v44 = vld [vmem:[%s786_s1 + $0x360] sm:$0xff]  ;;  %v125_v46 = vld [vmem:[%s786_s1 + $0x358] sm:$0xff]  ;;  %v124_v49 = vld [vmem:[%s786_s1 + $0x350] sm:$0xff] }
  0x25   :  { %273 = vmatprep.subr.mxu1 %v143_v5  ;;  %203 = vmatpush2.msra.mxu0 %v78_v6  ;;  %v17_v47 = vld [vmem:[%s787_s0] sm:$0xff]  ;;  %v59_v50 = vld [vmem:[%s786_s1 + $0x148] sm:$0xff]  ;;  %v57_v56 = vld [vmem:[%s786_s1 + $0x138] sm:$0xff] }
  0x26   :  { %274 = vmatpush2.msra.mxu1 %v142_v7  ;;  %204 = vmatprep.subr.mxu0 %v77_v8  ;;  %v123_v51 = vld [vmem:[%s786_s1 + $0x348] sm:$0xff]  ;;  %v58_v53 = vld [vmem:[%s786_s1 + $0x140] sm:$0xff]  ;;  %v147_v55 = vcombine.high %v17_v47, %v17_v47  ;;  %v121_v57 = vld [vmem:[%s786_s1 + $0x338] sm:$0xff]  ;;  %v154_v62 = vrot.slane %v17_v47, %v153_v52 }
  0x27   :  { %275 = vmatprep.subr.mxu1 %v141_v9  ;;  %205 = vmatpush2.msra.mxu0 %v76_v10  ;;  %v122_v54 = vld [vmem:[%s786_s1 + $0x340] sm:$0xff]  ;;  %v56_v58 = vld [vmem:[%s786_s1 + $0x130] sm:$0xff]  ;;  %v55_v60 = vld [vmem:[%s786_s1 + $0x128] sm:$0xff] }
  0x28   :  { %276 = vmatpush2.msra.mxu1 %v140_v11  ;;  %206 = vmatprep.subr.mxu0 %v75_v12  ;;  %v120_v59 = vld [vmem:[%s786_s1 + $0x330] sm:$0xff]  ;;  %v119_v61 = vld [vmem:[%s786_s1 + $0x328] sm:$0xff]  ;;  %v54_v63 = vld [vmem:[%s786_s1 + $0x120] sm:$0xff]  ;;  %v161_v1 = vrot.slane %v147_v55, %v153_v52  ;;  %v162_v8 = vcombine.high %v154_v62, %v154_v62  ;;  %v314_v12 = vsub.s32 0, %v691_v42 }
  0x29   :  { %277 = vmatprep.subr.mxu1 %v139_v13  ;;  %207 = vmatpush2.msra.mxu0 %v74_v14  ;;  %v118_v0 = vld [vmem:[%s786_s1 + $0x320] sm:$0xff]  ;;  %v53_v2 = vld [vmem:[%s786_s1 + $0x118] sm:$0xff]  ;;  %v52_v4 = vld [vmem:[%s786_s1 + $0x110] sm:$0xff]  ;;  %v318_v14 = vsub.s32 1, %v691_v42 }
  0x2a   :  { %278 = vmatpush2.msra.mxu1 %v138_v15  ;;  %208 = vmatprep.subr.mxu0 %v73_v16  ;;  %v117_v3 = vld [vmem:[%s786_s1 + $0x318] sm:$0xff]  ;;  %v116_v5 = vld [vmem:[%s786_s1 + $0x310] sm:$0xff]  ;;  %v51_v6 = vld [vmem:[%s786_s1 + $0x108] sm:$0xff]  ;;  %v163_v10 = vcombine.high %v161_v1, %v161_v1 }
  0x2b   :  { %279 = vmatprep.subr.mxu1 %v137_v17  ;;  %209 = vmatpush2.msra.mxu0 %v72_v18  ;;  %v115_v7 = vld [vmem:[%s786_s1 + $0x308] sm:$0xff]  ;;  %v50_v9 = vld [vmem:[%s786_s1 + $0x100] sm:$0xff] }
  0x2c   :  { %280 = vmatpush2.msra.mxu1 %v136_v19  ;;  %210 = vmatprep.subr.mxu0 %v71_v20  ;;  %v114_v11 = vld [vmem:[%s786_s1 + $0x300] sm:$0xff] }
  0x2d   :  { %281 = vmatprep.subr.mxu1 %v135_v21  ;;  %211 = vmatpush2.msra.mxu0 %v70_v22  ;;  %v310_v13 = vld [vmem:[%s788_s2] sm:$0x3] }
  0x2e   :  { %282 = vmatpush2.msra.mxu1 %v134_v23  ;;  %212 = vmatprep.subr.mxu0 %v69_v24  ;;  %v324_v15 = vld [vmem:[%s789_s3] sm:$0x3]  ;;  %v315_v16 = vrot.slane %v310_v13, %v314_v12  ;;  %v319_v21 = vrot.slane %v310_v13, %v318_v14 }
  0x2f   :  { %283 = vmatprep.subr.mxu1 %v133_v25  ;;  %213 = vmatpush2.msra.mxu0 %v68_v26  ;;  %v329_v20 = vrot.slane %v324_v15, %v314_v12  ;;  %v333_v26 = vrot.slane %v324_v15, %v318_v14 }
  0x30   :  { %284 = vmatpush2.msra.mxu1 %v132_v27  ;;  %214 = vmatprep.subr.mxu0 %v67_v28 }
  0x31   :  { %285 = vmatprep.subr.mxu1 %v131_v29  ;;  %215 = vmatpush2.msra.mxu0 %v66_v33 }
  0x32   :  { %286 = vmatpush2.msra.mxu1 %v130_v34  ;;  %216 = vmatprep.subr.mxu0 %v65_v35 }
  0x33   :  { %287 = vmatprep.subr.mxu1 %v129_v36  ;;  %217 = vmatpush2.msra.mxu0 %v64_v37 }
  0x34   :  { %288 = vmatpush2.msra.mxu1 %v128_v38  ;;  %218 = vmatprep.subr.mxu0 %v63_v39 }
  0x35   :  { %289 = vmatprep.subr.mxu1 %v127_v40  ;;  %219 = vmatpush2.msra.mxu0 %v62_v43 }
  0x36   :  { %290 = vmatpush2.msra.mxu1 %v126_v44  ;;  %220 = vmatprep.subr.mxu0 %v61_v45 }
  0x37   :  { %291 = vmatprep.subr.mxu1 %v125_v46  ;;  %221 = vmatpush2.msra.mxu0 %v60_v48 }
  0x38   :  { %292 = vmatpush2.msra.mxu1 %v124_v49  ;;  %222 = vmatprep.subr.mxu0 %v59_v50 }
  0x39   :  { %293 = vmatprep.subr.mxu1 %v123_v51  ;;  %223 = vmatpush2.msra.mxu0 %v58_v53 }
  0x3a   :  { %294 = vmatpush2.msra.mxu1 %v122_v54  ;;  %224 = vmatprep.subr.mxu0 %v57_v56 }
  0x3b   :  { %295 = vmatprep.subr.mxu1 %v121_v57  ;;  %225 = vmatpush2.msra.mxu0 %v56_v58 }
  0x3c   :  { %296 = vmatpush2.msra.mxu1 %v120_v59  ;;  %226 = vmatprep.subr.mxu0 %v55_v60 }
  0x3d   :  { %297 = vmatprep.subr.mxu1 %v119_v61  ;;  %227 = vmatpush2.msra.mxu0 %v54_v63 }
  0x3e   :  { %298 = vmatpush2.msra.mxu1 %v118_v0  ;;  %228 = vmatprep.subr.mxu0 %v53_v2 }
  0x3f   :  { %299 = vmatprep.subr.mxu1 %v117_v3  ;;  %229 = vmatpush2.msra.mxu0 %v52_v4 }
  0x40   :  { %300 = vmatpush2.msra.mxu1 %v116_v5  ;;  %230 = vmatprep.subr.mxu0 %v51_v6 }
  0x41   :  { %301 = vmatprep.subr.mxu1 %v115_v7  ;;  %231 = vmatpush2.msra.mxu0 %v50_v9 }
  0x42   :  { %232 = vmatprep.mubr.f32.mxu0 %v162_v8  ;;  %302 = vmatpush2.msra.mxu1 %v114_v11 }
  0x43   :  { %303 = vmatprep.mubr.f32.mxu1 %v163_v10  ;;  %233 = vmatmul.mubr.f32.vlgmr.msra.gmra.mxu0 %v154_v62 }
  0x44   :  { %304 = vmatmul.mubr.f32.vlgmr.msra.gmra.mxu1 %v161_v1 }
 0x103   :  { %v234_v17 = vpop.f32.mrf.mxu0 }
 0x104   :  { %v305_v18 = vpop.f32.mrf.mxu1 }
 0x105   :  { %v306_v19 = vadd.f32 %v305_v18, %v234_v17  ;;  %v236_v22 = vpop.f32.mrf.mxu0 }
 0x106   :  { %v307_v23 = vpop.f32.mrf.mxu1 }
 0x107   :  { %v322_v24 = vmul.f32 %v315_v16, %v306_v19  ;;  %v308_v25 = vadd.f32 %v307_v23, %v236_v22 }
 0x109   :  { %v336_v27 = vadd.f32 %v329_v20, %v322_v24  ;;  %v323_v28 = vmul.f32 %v319_v21, %v308_v25 }
 0x10b   :  { %v337_v29 = vadd.f32 %v333_v26, %v323_v28  ;;  %v338_v30 = vmax.f32 %v336_v27, 0.0 }
 0x10d   :  { %v339_v31 = vmax.f32 %v337_v29, 0.0 }
 0x10f   :  { %v342_v32 = vcombine.low %v338_v30, %v339_v31 }
 0x111   :  { %356 = vst.sshfl [vmem:[%s790_s4] sm:$0x33 pattern:$0x76325410] %v342_v32 }

// kernel: pointnet_gem_forward.17
= control target key start
LH: loop header
LB: loop body
LE: loop exit
PB: predicated region body
PF: predicated region fallthrough
CT: control target
= control target key end

     0   :  { %vm147_vm0 = vcmask 66560   ;;  %s324_s1 = inlined_call_operand.vmem [shape: f32[256,9], index: 1, kind: input, shape index: {}]   ;;  %s325_s0 = inlined_call_operand.vmem [shape: f32[2,256], index: 0, kind: input, shape index: {}]   ;;  %s326_s2 = inlined_call_operand.vmem [shape: f32[1,9], index: 2, kind: input, shape index: {}]   ;;  %s327_s3 = inlined_call_operand.vmem [shape: f32[1,9], index: 3, kind: input, shape index: {}]   ;;  %s328_s4 = inlined_call_operand.vmem [shape: f32[2,9], index: 4, kind: output, shape index: {}]  }
   0x1   :  { %v49_v0 = vld [vmem:[%s324_s1 + $0xf8] sm:$0xff]  ;;  %v48_v2 = vld [vmem:[%s324_s1 + $0xf0] sm:$0xff]  ;;  %v47_v4 = vld [vmem:[%s324_s1 + $0xe8] sm:$0xff] }
   0x2   :  { %v33_v1 = vld [vmem:[%s324_s1 + $0x78] sm:$0xff]  ;;  %156 = vmatprep.subr.mxu0 %v49_v0  ;;  %v32_v3 = vld [vmem:[%s324_s1 + $0x70] sm:$0xff]  ;;  %v31_v5 = vld [vmem:[%s324_s1 + $0x68] sm:$0xff] }
   0x3   :  { %157 = vmatpush3.msra.mxu0 %v33_v1  ;;  %v46_v6 = vld [vmem:[%s324_s1 + $0xe0] sm:$0xff]  ;;  %v45_v8 = vld [vmem:[%s324_s1 + $0xd8] sm:$0xff]  ;;  %v44_v10 = vld [vmem:[%s324_s1 + $0xd0] sm:$0xff] }
   0x4   :  { %158 = vmatprep.subr.mxu0 %v48_v2  ;;  %v30_v7 = vld [vmem:[%s324_s1 + $0x60] sm:$0xff]  ;;  %v29_v9 = vld [vmem:[%s324_s1 + $0x58] sm:$0xff]  ;;  %v28_v11 = vld [vmem:[%s324_s1 + $0x50] sm:$0xff] }
   0x5   :  { %159 = vmatpush3.msra.mxu0 %v32_v3  ;;  %v43_v12 = vld [vmem:[%s324_s1 + $0xc8] sm:$0xff]  ;;  %v153_v13 = vld.sshfl [vmem:[%s325_s0] sm:$0x33 pattern:$0x76325410]  ;;  %v41_v18 = vld [vmem:[%s324_s1 + $0xb8] sm:$0xff] }
   0x6   :  { %160 = vmatprep.subr.mxu0 %v47_v4  ;;  %v27_v14 = vld [vmem:[%s324_s1 + $0x48] sm:$0xff]  ;;  %v58_v15 = vcombine.high %v153_v13, %v153_v13  ;;  %v42_v16 = vld [vmem:[%s324_s1 + $0xc0] sm:$0xff]  ;;  %v25_v19 = vld [vmem:[%s324_s1 + $0x38] sm:$0xff] }
   0x7   :  { %161 = vmatpush3.msra.mxu0 %v31_v5  ;;  %v26_v17 = vld [vmem:[%s324_s1 + $0x40] sm:$0xff]  ;;  %v40_v20 = vld [vmem:[%s324_s1 + $0xb0] sm:$0xff]  ;;  %v39_v22 = vld [vmem:[%s324_s1 + $0xa8] sm:$0xff] }
   0x8   :  { %162 = vmatprep.subr.mxu0 %v46_v6  ;;  %125 = vmatprep.mubr.f32.mxu0 %v58_v15  ;;  %v24_v21 = vld [vmem:[%s324_s1 + $0x30] sm:$0xff]  ;;  %v23_v23 = vld [vmem:[%s324_s1 + $0x28] sm:$0xff]  ;;  %v38_v24 = vld [vmem:[%s324_s1 + $0xa0] sm:$0xff] }
   0x9   :  { %163 = vmatpush3.msra.mxu0 %v30_v7  ;;  %v22_v25 = vld [vmem:[%s324_s1 + $0x20] sm:$0xff]  ;;  %v37_v26 = vld [vmem:[%s324_s1 + $0x98] sm:$0xff]  ;;  %v36_v28 = vld [vmem:[%s324_s1 + $0x90] sm:$0xff] }
   0xa   :  { %164 = vmatprep.subr.mxu0 %v45_v8  ;;  %v21_v27 = vld [vmem:[%s324_s1 + $0x18] sm:$0xff]  ;;  %v20_v29 = vld [vmem:[%s324_s1 + $0x10] sm:$0xff]  ;;  %v35_v30 = vld [vmem:[%s324_s1 + $0x88] sm:$0xff] }
   0xb   :  { %165 = vmatpush3.msra.mxu0 %v29_v9  ;;  %v19_v31 = vld [vmem:[%s324_s1 + $0x8] sm:$0xff]  ;;  %v34_v32 = vld [vmem:[%s324_s1 + $0x80] sm:$0xff] }
   0xc   :  { %166 = vmatprep.subr.mxu0 %v44_v10  ;;  %v18_v33 = vld [vmem:[%s324_s1] sm:$0xff] }
   0xd   :  { %167 = vmatpush3.msra.mxu0 %v28_v11  ;;  %v154_v36 = vld [vmem:[%s326_s2] ss:$0 sm:$0xff] }
   0xe   :  { %168 = vmatprep.subr.mxu0 %v43_v12  ;;  %v155_v38 = vld [vmem:[%s327_s3] ss:$0 sm:$0xff] }
   0xf   :  { %169 = vmatpush3.msra.mxu0 %v27_v14 }
  0x10   :  { %170 = vmatprep.subr.mxu0 %v42_v16 }
  0x11   :  { %171 = vmatpush3.msra.mxu0 %v26_v17 }
  0x12   :  { %172 = vmatprep.subr.mxu0 %v41_v18 }
  0x13   :  { %173 = vmatpush3.msra.mxu0 %v25_v19 }
  0x14   :  { %174 = vmatprep.subr.mxu0 %v40_v20 }
  0x15   :  { %175 = vmatpush3.msra.mxu0 %v24_v21 }
  0x16   :  { %176 = vmatprep.subr.mxu0 %v39_v22 }
  0x17   :  { %177 = vmatpush3.msra.mxu0 %v23_v23 }
  0x18   :  { %178 = vmatprep.subr.mxu0 %v38_v24 }
  0x19   :  { %179 = vmatpush3.msra.mxu0 %v22_v25 }
  0x1a   :  { %180 = vmatprep.subr.mxu0 %v37_v26 }
  0x1b   :  { %181 = vmatpush3.msra.mxu0 %v21_v27 }
  0x1c   :  { %182 = vmatprep.subr.mxu0 %v36_v28 }
  0x1d   :  { %183 = vmatpush3.msra.mxu0 %v20_v29 }
  0x1e   :  { %184 = vmatprep.subr.mxu0 %v35_v30 }
  0x1f   :  { %185 = vmatpush3.msra.mxu0 %v19_v31 }
  0x20   :  { %186 = vmatprep.subr.mxu0 %v34_v32 }
  0x21   :  { %187 = vmatpush3.msra.mxu0 %v18_v33 }
  0x22   :  { %126 = vmatmul.mubr.f32.vlgmr.msra.gmra.mxu0 %v153_v13 }
  0xe2   :  { %v188_v34 = vpop.f32.mrf.mxu0 }
  0xe4   :  { %v189_v35 = vpop.f32.mrf.mxu0 }
  0xe5   :  { %v190_v37 = vadd.f32 %v189_v35, %v188_v34 }
  0xe7   :  { %v138_v39 = vmul.f32 %v190_v37, %v154_v36 }
  0xe9   :  { %v146_v40 = vadd.f32 %v155_v38, %v138_v39 }
  0xeb   :  { %148 = vst.msk [vmem:[%s328_s4] sm:$0x3] %vm147_vm0, %v146_v40 }

// kernel: pointnet_gem_forward.15
= control target key start
LH: loop header
LB: loop body
LE: loop exit
PB: predicated region body
PF: predicated region fallthrough
CT: control target
= control target key end

     0   :  { %s2861_s1 = inlined_call_operand.vmem [shape: f32[1024,512], index: 1, kind: input, shape index: {}]   ;;  %s2862_s0 = inlined_call_operand.vmem [shape: f32[2,1024], index: 0, kind: input, shape index: {}]   ;;  %s2863_s2 = inlined_call_operand.vmem [shape: f32[1,512], index: 2, kind: input, shape index: {}]   ;;  %s2864_s3 = inlined_call_operand.vmem [shape: f32[1,512], index: 3, kind: input, shape index: {}]   ;;  %s2865_s4 = inlined_call_operand.vmem [shape: f32[2,512], index: 4, kind: output, shape index: {}]  }
   0x1   :  { %v80_v0 = vld [vmem:[%s2861_s1 + $0x1e8] sm:$0xff]  ;;  %v79_v2 = vld [vmem:[%s2861_s1 + $0x1e0] sm:$0xff] }
   0x2   :  { %v208_v1 = vld [vmem:[%s2861_s1 + $0x5e8] sm:$0xff]  ;;  %575 = vmatprep.subr.mxu0 %v80_v0  ;;  %v207_v3 = vld [vmem:[%s2861_s1 + $0x5e0] sm:$0xff] }
   0x3   :  { %646 = vmatprep.subr.mxu1 %v208_v1  ;;  %v76_v4 = vld [vmem:[%s2861_s1 + $0x1c8] sm:$0xff]  ;;  %576 = vmatpush1.msra.mxu0 %v79_v2  ;;  %v75_v6 = vld [vmem:[%s2861_s1 + $0x1c0] sm:$0xff] }
   0x4   :  { %v204_v5 = vld [vmem:[%s2861_s1 + $0x5c8] sm:$0xff]  ;;  %647 = vmatpush1.msra.mxu1 %v207_v3  ;;  %v203_v7 = vld [vmem:[%s2861_s1 + $0x5c0] sm:$0xff]  ;;  %577 = vmatprep.subr.mxu0 %v76_v4 }
   0x5   :  { %v72_v8 = vld [vmem:[%s2861_s1 + $0x1a8] sm:$0xff]  ;;  %648 = vmatprep.subr.mxu1 %v204_v5  ;;  %v71_v10 = vld [vmem:[%s2861_s1 + $0x1a0] sm:$0xff]  ;;  %578 = vmatpush1.msra.mxu0 %v75_v6 }
   0x6   :  { %v200_v9 = vld [vmem:[%s2861_s1 + $0x5a8] sm:$0xff]  ;;  %v199_v11 = vld [vmem:[%s2861_s1 + $0x5a0] sm:$0xff]  ;;  %649 = vmatpush1.msra.mxu1 %v203_v7  ;;  %579 = vmatprep.subr.mxu0 %v72_v8 }
   0x7   :  { %v68_v12 = vld [vmem:[%s2861_s1 + $0x188] sm:$0xff]  ;;  %650 = vmatprep.subr.mxu1 %v200_v9  ;;  %v67_v14 = vld [vmem:[%s2861_s1 + $0x180] sm:$0xff]  ;;  %580 = vmatpush1.msra.mxu0 %v71_v10 }
   0x8   :  { %v196_v13 = vld [vmem:[%s2861_s1 + $0x588] sm:$0xff]  ;;  %v195_v15 = vld [vmem:[%s2861_s1 + $0x580] sm:$0xff]  ;;  %651 = vmatpush1.msra.mxu1 %v199_v11  ;;  %581 = vmatprep.subr.mxu0 %v68_v12 }
   0x9   :  { %v64_v16 = vld [vmem:[%s2861_s1 + $0x168] sm:$0xff]  ;;  %652 = vmatprep.subr.mxu1 %v196_v13  ;;  %v63_v18 = vld [vmem:[%s2861_s1 + $0x160] sm:$0xff]  ;;  %582 = vmatpush1.msra.mxu0 %v67_v14 }
   0xa   :  { %v192_v17 = vld [vmem:[%s2861_s1 + $0x568] sm:$0xff]  ;;  %v191_v19 = vld [vmem:[%s2861_s1 + $0x560] sm:$0xff]  ;;  %653 = vmatpush1.msra.mxu1 %v195_v15  ;;  %583 = vmatprep.subr.mxu0 %v64_v16 }
   0xb   :  { %v60_v20 = vld [vmem:[%s2861_s1 + $0x148] sm:$0xff]  ;;  %654 = vmatprep.subr.mxu1 %v192_v17  ;;  %v59_v22 = vld [vmem:[%s2861_s1 + $0x140] sm:$0xff]  ;;  %584 = vmatpush1.msra.mxu0 %v63_v18 }
   0xc   :  { %v188_v21 = vld [vmem:[%s2861_s1 + $0x548] sm:$0xff]  ;;  %v187_v23 = vld [vmem:[%s2861_s1 + $0x540] sm:$0xff]  ;;  %655 = vmatpush1.msra.mxu1 %v191_v19  ;;  %585 = vmatprep.subr.mxu0 %v60_v20 }
   0xd   :  { %v56_v24 = vld [vmem:[%s2861_s1 + $0x128] sm:$0xff]  ;;  %656 = vmatprep.subr.mxu1 %v188_v21  ;;  %v55_v26 = vld [vmem:[%s2861_s1 + $0x120] sm:$0xff]  ;;  %586 = vmatpush1.msra.mxu0 %v59_v22 }
   0xe   :  { %v184_v25 = vld [vmem:[%s2861_s1 + $0x528] sm:$0xff]  ;;  %v183_v27 = vld [vmem:[%s2861_s1 + $0x520] sm:$0xff]  ;;  %657 = vmatpush1.msra.mxu1 %v187_v23  ;;  %587 = vmatprep.subr.mxu0 %v56_v24 }
   0xf   :  { %v52_v28 = vld [vmem:[%s2861_s1 + $0x108] sm:$0xff]  ;;  %658 = vmatprep.subr.mxu1 %v184_v25  ;;  %v51_v30 = vld [vmem:[%s2861_s1 + $0x100] sm:$0xff]  ;;  %588 = vmatpush1.msra.mxu0 %v55_v26 }
  0x10   :  { %v180_v29 = vld [vmem:[%s2861_s1 + $0x508] sm:$0xff]  ;;  %v179_v31 = vld [vmem:[%s2861_s1 + $0x500] sm:$0xff]  ;;  %659 = vmatpush1.msra.mxu1 %v183_v27  ;;  %589 = vmatprep.subr.mxu0 %v52_v28 }
  0x11   :  { %v48_v32 = vld [vmem:[%s2861_s1 + $0xe8] sm:$0xff]  ;;  %660 = vmatprep.subr.mxu1 %v180_v29  ;;  %v47_v34 = vld [vmem:[%s2861_s1 + $0xe0] sm:$0xff]  ;;  %590 = vmatpush1.msra.mxu0 %v51_v30  ;;  %v1229_v30 = vmov 1983009808  }
  0x12   :  { %v176_v33 = vld [vmem:[%s2861_s1 + $0x4e8] sm:$0xff]  ;;  %v175_v35 = vld [vmem:[%s2861_s1 + $0x4e0] sm:$0xff]  ;;  %661 = vmatpush1.msra.mxu1 %v179_v31  ;;  %591 = vmatprep.subr.mxu0 %v48_v32  ;;  %v535_v31 = vunpack.c.l.s4 %v1229_v30  ;;  %v537_v32 = vlaneseq }
  0x13   :  { %v44_v36 = vld [vmem:[%s2861_s1 + $0xc8] sm:$0xff]  ;;  %662 = vmatprep.subr.mxu1 %v176_v33  ;;  %v43_v38 = vld [vmem:[%s2861_s1 + $0xc0] sm:$0xff]  ;;  %592 = vmatpush1.msra.mxu0 %v47_v34 }
  0x14   :  { %v172_v37 = vld [vmem:[%s2861_s1 + $0x4c8] sm:$0xff]  ;;  %v171_v39 = vld [vmem:[%s2861_s1 + $0x4c0] sm:$0xff]  ;;  %663 = vmatpush1.msra.mxu1 %v175_v35  ;;  %593 = vmatprep.subr.mxu0 %v44_v36 }
  0x15   :  { %v40_v40 = vld [vmem:[%s2861_s1 + $0xa8] sm:$0xff]  ;;  %664 = vmatprep.subr.mxu1 %v172_v37  ;;  %v39_v42 = vld [vmem:[%s2861_s1 + $0xa0] sm:$0xff]  ;;  %594 = vmatpush1.msra.mxu0 %v43_v38 }
  0x16   :  { %v168_v41 = vld [vmem:[%s2861_s1 + $0x4a8] sm:$0xff]  ;;  %v167_v43 = vld [vmem:[%s2861_s1 + $0x4a0] sm:$0xff]  ;;  %665 = vmatpush1.msra.mxu1 %v171_v39  ;;  %595 = vmatprep.subr.mxu0 %v40_v40 }
  0x17   :  { %v36_v44 = vld [vmem:[%s2861_s1 + $0x88] sm:$0xff]  ;;  %666 = vmatprep.subr.mxu1 %v168_v41  ;;  %v35_v46 = vld [vmem:[%s2861_s1 + $0x80] sm:$0xff]  ;;  %596 = vmatpush1.msra.mxu0 %v39_v42  ;;  %v536_v41 = vunpack.c.0.s8 %v535_v31  ;;  %v1561_v42 = vshrl.u32 %v537_v32, 7 }
  0x18   :  { %v164_v45 = vld [vmem:[%s2861_s1 + $0x488] sm:$0xff]  ;;  %v163_v47 = vld [vmem:[%s2861_s1 + $0x480] sm:$0xff]  ;;  %667 = vmatpush1.msra.mxu1 %v167_v43  ;;  %597 = vmatprep.subr.mxu0 %v36_v44 }
  0x19   :  { %v32_v48 = vld [vmem:[%s2861_s1 + $0x68] sm:$0xff]  ;;  %668 = vmatprep.subr.mxu1 %v164_v45  ;;  %v31_v50 = vld [vmem:[%s2861_s1 + $0x60] sm:$0xff]  ;;  %598 = vmatpush1.msra.mxu0 %v35_v46 }
  0x1a   :  { %v160_v49 = vld [vmem:[%s2861_s1 + $0x468] sm:$0xff]  ;;  %v159_v51 = vld [vmem:[%s2861_s1 + $0x460] sm:$0xff]  ;;  %669 = vmatpush1.msra.mxu1 %v163_v47  ;;  %599 = vmatprep.subr.mxu0 %v32_v48 }
  0x1b   :  { %v28_v52 = vld [vmem:[%s2861_s1 + $0x48] sm:$0xff]  ;;  %670 = vmatprep.subr.mxu1 %v160_v49  ;;  %v27_v54 = vld [vmem:[%s2861_s1 + $0x40] sm:$0xff]  ;;  %600 = vmatpush1.msra.mxu0 %v31_v50 }
  0x1c   :  { %v156_v53 = vld [vmem:[%s2861_s1 + $0x448] sm:$0xff]  ;;  %v155_v55 = vld [vmem:[%s2861_s1 + $0x440] sm:$0xff]  ;;  %671 = vmatpush1.msra.mxu1 %v159_v51  ;;  %601 = vmatprep.subr.mxu0 %v28_v52  ;;  %v1591_v52 = vsub.s32 %v536_v41, %v1561_v42 }
  0x1d   :  { %v24_v56 = vld [vmem:[%s2861_s1 + $0x28] sm:$0xff]  ;;  %672 = vmatprep.subr.mxu1 %v156_v53  ;;  %v23_v58 = vld [vmem:[%s2861_s1 + $0x20] sm:$0xff]  ;;  %602 = vmatpush1.msra.mxu0 %v27_v54 }
  0x1e   :  { %v152_v57 = vld [vmem:[%s2861_s1 + $0x428] sm:$0xff]  ;;  %v151_v59 = vld [vmem:[%s2861_s1 + $0x420] sm:$0xff]  ;;  %673 = vmatpush1.msra.mxu1 %v155_v55  ;;  %603 = vmatprep.subr.mxu0 %v24_v56 }
  0x1f   :  { %v20_v60 = vld [vmem:[%s2861_s1 + $0x8] sm:$0xff]  ;;  %674 = vmatprep.subr.mxu1 %v152_v57  ;;  %v19_v62 = vld [vmem:[%s2861_s1] sm:$0xff]  ;;  %604 = vmatpush1.msra.mxu0 %v23_v58 }
  0x20   :  { %v148_v61 = vld [vmem:[%s2861_s1 + $0x408] sm:$0xff]  ;;  %v147_v63 = vld [vmem:[%s2861_s1 + $0x400] sm:$0xff]  ;;  %675 = vmatpush1.msra.mxu1 %v151_v59  ;;  %605 = vmatprep.subr.mxu0 %v20_v60 }
  0x21   :  { %v144_v0 = vld [vmem:[%s2861_s1 + $0x3e8] sm:$0xff]  ;;  %676 = vmatprep.subr.mxu1 %v148_v61  ;;  %v143_v2 = vld [vmem:[%s2861_s1 + $0x3e0] sm:$0xff]  ;;  %606 = vmatpush1.msra.mxu0 %v19_v62 }
  0x22   :  { %v272_v1 = vld [vmem:[%s2861_s1 + $0x7e8] sm:$0xff]  ;;  %v271_v3 = vld [vmem:[%s2861_s1 + $0x7e0] sm:$0xff]  ;;  %677 = vmatpush1.msra.mxu1 %v147_v63  ;;  %607 = vmatprep.subr.mxu0 %v144_v0 }
  0x23   :  { %v140_v4 = vld [vmem:[%s2861_s1 + $0x3c8] sm:$0xff]  ;;  %678 = vmatprep.subr.mxu1 %v272_v1  ;;  %v139_v6 = vld [vmem:[%s2861_s1 + $0x3c0] sm:$0xff]  ;;  %608 = vmatpush2.msra.mxu0 %v143_v2 }
  0x24   :  { %v268_v5 = vld [vmem:[%s2861_s1 + $0x7c8] sm:$0xff]  ;;  %v267_v7 = vld [vmem:[%s2861_s1 + $0x7c0] sm:$0xff]  ;;  %679 = vmatpush2.msra.mxu1 %v271_v3  ;;  %609 = vmatprep.subr.mxu0 %v140_v4 }
  0x25   :  { %v136_v8 = vld [vmem:[%s2861_s1 + $0x3a8] sm:$0xff]  ;;  %680 = vmatprep.subr.mxu1 %v268_v5  ;;  %v135_v10 = vld [vmem:[%s2861_s1 + $0x3a0] sm:$0xff]  ;;  %610 = vmatpush2.msra.mxu0 %v139_v6 }
  0x26   :  { %v264_v9 = vld [vmem:[%s2861_s1 + $0x7a8] sm:$0xff]  ;;  %v263_v11 = vld [vmem:[%s2861_s1 + $0x7a0] sm:$0xff]  ;;  %681 = vmatpush2.msra.mxu1 %v267_v7  ;;  %611 = vmatprep.subr.mxu0 %v136_v8 }
  0x27   :  { %v132_v12 = vld [vmem:[%s2861_s1 + $0x388] sm:$0xff]  ;;  %682 = vmatprep.subr.mxu1 %v264_v9  ;;  %v131_v14 = vld [vmem:[%s2861_s1 + $0x380] sm:$0xff]  ;;  %612 = vmatpush2.msra.mxu0 %v135_v10 }
  0x28   :  { %v260_v13 = vld [vmem:[%s2861_s1 + $0x788] sm:$0xff]  ;;  %v259_v15 = vld [vmem:[%s2861_s1 + $0x780] sm:$0xff]  ;;  %683 = vmatpush2.msra.mxu1 %v263_v11  ;;  %613 = vmatprep.subr.mxu0 %v132_v12 }
  0x29   :  { %v128_v16 = vld [vmem:[%s2861_s1 + $0x368] sm:$0xff]  ;;  %684 = vmatprep.subr.mxu1 %v260_v13  ;;  %v127_v18 = vld [vmem:[%s2861_s1 + $0x360] sm:$0xff]  ;;  %614 = vmatpush2.msra.mxu0 %v131_v14 }
  0x2a   :  { %v256_v17 = vld [vmem:[%s2861_s1 + $0x768] sm:$0xff]  ;;  %v255_v19 = vld [vmem:[%s2861_s1 + $0x760] sm:$0xff]  ;;  %685 = vmatpush2.msra.mxu1 %v259_v15  ;;  %615 = vmatprep.subr.mxu0 %v128_v16 }
  0x2b   :  { %v124_v20 = vld [vmem:[%s2861_s1 + $0x348] sm:$0xff]  ;;  %686 = vmatprep.subr.mxu1 %v256_v17  ;;  %v123_v22 = vld [vmem:[%s2861_s1 + $0x340] sm:$0xff]  ;;  %616 = vmatpush2.msra.mxu0 %v127_v18 }
  0x2c   :  { %v252_v21 = vld [vmem:[%s2861_s1 + $0x748] sm:$0xff]  ;;  %v251_v23 = vld [vmem:[%s2861_s1 + $0x740] sm:$0xff]  ;;  %687 = vmatpush2.msra.mxu1 %v255_v19  ;;  %617 = vmatprep.subr.mxu0 %v124_v20 }
  0x2d   :  { %v120_v24 = vld [vmem:[%s2861_s1 + $0x328] sm:$0xff]  ;;  %688 = vmatprep.subr.mxu1 %v252_v21  ;;  %v119_v26 = vld [vmem:[%s2861_s1 + $0x320] sm:$0xff]  ;;  %618 = vmatpush2.msra.mxu0 %v123_v22 }
  0x2e   :  { %v248_v25 = vld [vmem:[%s2861_s1 + $0x728] sm:$0xff]  ;;  %v247_v27 = vld [vmem:[%s2861_s1 + $0x720] sm:$0xff]  ;;  %689 = vmatpush2.msra.mxu1 %v251_v23  ;;  %619 = vmatprep.subr.mxu0 %v120_v24 }
  0x2f   :  { %v116_v28 = vld [vmem:[%s2861_s1 + $0x308] sm:$0xff]  ;;  %690 = vmatprep.subr.mxu1 %v248_v25  ;;  %v115_v33 = vld [vmem:[%s2861_s1 + $0x300] sm:$0xff]  ;;  %620 = vmatpush2.msra.mxu0 %v119_v26 }
  0x30   :  { %v244_v29 = vld [vmem:[%s2861_s1 + $0x708] sm:$0xff]  ;;  %v243_v34 = vld [vmem:[%s2861_s1 + $0x700] sm:$0xff]  ;;  %691 = vmatpush2.msra.mxu1 %v247_v27  ;;  %621 = vmatprep.subr.mxu0 %v116_v28 }
  0x31   :  { %v112_v35 = vld [vmem:[%s2861_s1 + $0x2e8] sm:$0xff]  ;;  %692 = vmatprep.subr.mxu1 %v244_v29  ;;  %v111_v37 = vld [vmem:[%s2861_s1 + $0x2e0] sm:$0xff]  ;;  %622 = vmatpush2.msra.mxu0 %v115_v33 }
  0x32   :  { %v240_v36 = vld [vmem:[%s2861_s1 + $0x6e8] sm:$0xff]  ;;  %v239_v38 = vld [vmem:[%s2861_s1 + $0x6e0] sm:$0xff]  ;;  %693 = vmatpush2.msra.mxu1 %v243_v34  ;;  %623 = vmatprep.subr.mxu0 %v112_v35 }
  0x33   :  { %v108_v39 = vld [vmem:[%s2861_s1 + $0x2c8] sm:$0xff]  ;;  %694 = vmatprep.subr.mxu1 %v240_v36  ;;  %v107_v43 = vld [vmem:[%s2861_s1 + $0x2c0] sm:$0xff]  ;;  %624 = vmatpush2.msra.mxu0 %v111_v37 }
  0x34   :  { %v236_v40 = vld [vmem:[%s2861_s1 + $0x6c8] sm:$0xff]  ;;  %v235_v44 = vld [vmem:[%s2861_s1 + $0x6c0] sm:$0xff]  ;;  %695 = vmatpush2.msra.mxu1 %v239_v38  ;;  %625 = vmatprep.subr.mxu0 %v108_v39 }
  0x35   :  { %v104_v45 = vld [vmem:[%s2861_s1 + $0x2a8] sm:$0xff]  ;;  %v17_v47 = vld [vmem:[%s2862_s0] sm:$0xff]  ;;  %696 = vmatprep.subr.mxu1 %v236_v40  ;;  %626 = vmatpush2.msra.mxu0 %v107_v43 }
  0x36   :  { %v232_v46 = vld [vmem:[%s2861_s1 + $0x6a8] sm:$0xff]  ;;  %v103_v48 = vld [vmem:[%s2861_s1 + $0x2a0] sm:$0xff]  ;;  %697 = vmatpush2.msra.mxu1 %v235_v44  ;;  %627 = vmatprep.subr.mxu0 %v104_v45  ;;  %v533_v55 = vcombine.high %v17_v47, %v17_v47  ;;  %v1618_v62 = vrot.slane %v17_v47, %v1591_v52 }
  0x37   :  { %v231_v49 = vld [vmem:[%s2861_s1 + $0x6a0] sm:$0xff]  ;;  %v100_v50 = vld [vmem:[%s2861_s1 + $0x288] sm:$0xff]  ;;  %698 = vmatprep.subr.mxu1 %v232_v46  ;;  %628 = vmatpush2.msra.mxu0 %v103_v48 }
  0x38   :  { %v228_v51 = vld [vmem:[%s2861_s1 + $0x688] sm:$0xff]  ;;  %v99_v53 = vld [vmem:[%s2861_s1 + $0x280] sm:$0xff]  ;;  %699 = vmatpush2.msra.mxu1 %v231_v49  ;;  %629 = vmatprep.subr.mxu0 %v100_v50  ;;  %v1627_v1 = vrot.slane %v533_v55, %v1591_v52  ;;  %v1649_v8 = vcombine.high %v1618_v62, %v1618_v62 }
  0x39   :  { %v227_v54 = vld [vmem:[%s2861_s1 + $0x680] sm:$0xff]  ;;  %v96_v56 = vld [vmem:[%s2861_s1 + $0x268] sm:$0xff]  ;;  %700 = vmatprep.subr.mxu1 %v228_v51  ;;  %630 = vmatpush2.msra.mxu0 %v99_v53 }
  0x3a   :  { %v224_v57 = vld [vmem:[%s2861_s1 + $0x668] sm:$0xff]  ;;  %v95_v58 = vld [vmem:[%s2861_s1 + $0x260] sm:$0xff]  ;;  %701 = vmatpush2.msra.mxu1 %v227_v54  ;;  %631 = vmatprep.subr.mxu0 %v96_v56  ;;  %v1656_v10 = vcombine.high %v1627_v1, %v1627_v1 }
  0x3b   :  { %v223_v59 = vld [vmem:[%s2861_s1 + $0x660] sm:$0xff]  ;;  %v92_v60 = vld [vmem:[%s2861_s1 + $0x248] sm:$0xff]  ;;  %702 = vmatprep.subr.mxu1 %v224_v57  ;;  %632 = vmatpush2.msra.mxu0 %v95_v58 }
  0x3c   :  { %v220_v61 = vld [vmem:[%s2861_s1 + $0x648] sm:$0xff]  ;;  %v91_v63 = vld [vmem:[%s2861_s1 + $0x240] sm:$0xff]  ;;  %703 = vmatpush2.msra.mxu1 %v223_v59  ;;  %633 = vmatprep.subr.mxu0 %v92_v60 }
  0x3d   :  { %v219_v0 = vld [vmem:[%s2861_s1 + $0x640] sm:$0xff]  ;;  %v88_v2 = vld [vmem:[%s2861_s1 + $0x228] sm:$0xff]  ;;  %704 = vmatprep.subr.mxu1 %v220_v61  ;;  %634 = vmatpush2.msra.mxu0 %v91_v63 }
  0x3e   :  { %v216_v3 = vld [vmem:[%s2861_s1 + $0x628] sm:$0xff]  ;;  %v87_v4 = vld [vmem:[%s2861_s1 + $0x220] sm:$0xff]  ;;  %705 = vmatpush2.msra.mxu1 %v219_v0  ;;  %635 = vmatprep.subr.mxu0 %v88_v2 }
  0x3f   :  { %v215_v5 = vld [vmem:[%s2861_s1 + $0x620] sm:$0xff]  ;;  %v84_v6 = vld [vmem:[%s2861_s1 + $0x208] sm:$0xff]  ;;  %706 = vmatprep.subr.mxu1 %v216_v3  ;;  %636 = vmatpush2.msra.mxu0 %v87_v4 }
  0x40   :  { %v212_v7 = vld [vmem:[%s2861_s1 + $0x608] sm:$0xff]  ;;  %v83_v9 = vld [vmem:[%s2861_s1 + $0x200] sm:$0xff]  ;;  %707 = vmatpush2.msra.mxu1 %v215_v5  ;;  %637 = vmatprep.subr.mxu0 %v84_v6 }
  0x41   :  { %v211_v11 = vld [vmem:[%s2861_s1 + $0x600] sm:$0xff]  ;;  %708 = vmatprep.subr.mxu1 %v212_v7  ;;  %638 = vmatpush2.msra.mxu0 %v83_v9  ;;  %v336_v12 = vld [vmem:[%s2861_s1 + $0x9e8] sm:$0xff] }
  0x42   :  { %639 = vmatprep.mubr.f32.mxu0 %v1649_v8  ;;  %v464_v13 = vld [vmem:[%s2861_s1 + $0xde8] sm:$0xff]  ;;  %709 = vmatpush2.msra.mxu1 %v211_v11  ;;  %v335_v14 = vld [vmem:[%s2861_s1 + $0x9e0] sm:$0xff] }
  0x43   :  { %710 = vmatprep.mubr.f32.mxu1 %v1656_v10  ;;  %v463_v15 = vld [vmem:[%s2861_s1 + $0xde0] sm:$0xff]  ;;  %640 = vmatmul.mubr.f32.vlgmr.msra.gmra.mxu0 %v1618_v62  ;;  %v332_v16 = vld [vmem:[%s2861_s1 + $0x9c8] sm:$0xff] }
  0x44   :  { %711 = vmatmul.mubr.f32.vlgmr.msra.gmra.mxu1 %v1627_v1  ;;  %v460_v17 = vld [vmem:[%s2861_s1 + $0xdc8] sm:$0xff]  ;;  %717 = vmatprep.subr.mxu0 %v336_v12  ;;  %v331_v18 = vld [vmem:[%s2861_s1 + $0x9c0] sm:$0xff] }
  0x45   :  { %788 = vmatprep.subr.mxu1 %v464_v13  ;;  %v459_v19 = vld [vmem:[%s2861_s1 + $0xdc0] sm:$0xff]  ;;  %718 = vmatpush1.msra.mxu0 %v335_v14  ;;  %v328_v20 = vld [vmem:[%s2861_s1 + $0x9a8] sm:$0xff] }
  0x46   :  { %789 = vmatpush1.msra.mxu1 %v463_v15  ;;  %v456_v21 = vld [vmem:[%s2861_s1 + $0xda8] sm:$0xff]  ;;  %719 = vmatprep.subr.mxu0 %v332_v16  ;;  %v327_v22 = vld [vmem:[%s2861_s1 + $0x9a0] sm:$0xff] }
  0x47   :  { %790 = vmatprep.subr.mxu1 %v460_v17  ;;  %v455_v23 = vld [vmem:[%s2861_s1 + $0xda0] sm:$0xff]  ;;  %720 = vmatpush1.msra.mxu0 %v331_v18  ;;  %v324_v24 = vld [vmem:[%s2861_s1 + $0x988] sm:$0xff] }
  0x48   :  { %791 = vmatpush1.msra.mxu1 %v459_v19  ;;  %v452_v25 = vld [vmem:[%s2861_s1 + $0xd88] sm:$0xff]  ;;  %721 = vmatprep.subr.mxu0 %v328_v20  ;;  %v323_v26 = vld [vmem:[%s2861_s1 + $0x980] sm:$0xff] }
  0x49   :  { %792 = vmatprep.subr.mxu1 %v456_v21  ;;  %v451_v27 = vld [vmem:[%s2861_s1 + $0xd80] sm:$0xff]  ;;  %722 = vmatpush1.msra.mxu0 %v327_v22  ;;  %v320_v28 = vld [vmem:[%s2861_s1 + $0x968] sm:$0xff] }
  0x4a   :  { %793 = vmatpush1.msra.mxu1 %v455_v23  ;;  %v448_v29 = vld [vmem:[%s2861_s1 + $0xd68] sm:$0xff]  ;;  %723 = vmatprep.subr.mxu0 %v324_v24  ;;  %v319_v30 = vld [vmem:[%s2861_s1 + $0x960] sm:$0xff] }
  0x4b   :  { %794 = vmatprep.subr.mxu1 %v452_v25  ;;  %v447_v31 = vld [vmem:[%s2861_s1 + $0xd60] sm:$0xff]  ;;  %724 = vmatpush1.msra.mxu0 %v323_v26  ;;  %v316_v32 = vld [vmem:[%s2861_s1 + $0x948] sm:$0xff] }
  0x4c   :  { %795 = vmatpush1.msra.mxu1 %v451_v27  ;;  %v444_v33 = vld [vmem:[%s2861_s1 + $0xd48] sm:$0xff]  ;;  %725 = vmatprep.subr.mxu0 %v320_v28  ;;  %v315_v34 = vld [vmem:[%s2861_s1 + $0x940] sm:$0xff] }
  0x4d   :  { %796 = vmatprep.subr.mxu1 %v448_v29  ;;  %v443_v35 = vld [vmem:[%s2861_s1 + $0xd40] sm:$0xff]  ;;  %726 = vmatpush1.msra.mxu0 %v319_v30  ;;  %v312_v36 = vld [vmem:[%s2861_s1 + $0x928] sm:$0xff] }
  0x4e   :  { %797 = vmatpush1.msra.mxu1 %v447_v31  ;;  %v440_v37 = vld [vmem:[%s2861_s1 + $0xd28] sm:$0xff]  ;;  %727 = vmatprep.subr.mxu0 %v316_v32  ;;  %v311_v38 = vld [vmem:[%s2861_s1 + $0x920] sm:$0xff] }
  0x4f   :  { %798 = vmatprep.subr.mxu1 %v444_v33  ;;  %v439_v39 = vld [vmem:[%s2861_s1 + $0xd20] sm:$0xff]  ;;  %728 = vmatpush1.msra.mxu0 %v315_v34  ;;  %v308_v40 = vld [vmem:[%s2861_s1 + $0x908] sm:$0xff] }
  0x50   :  { %799 = vmatpush1.msra.mxu1 %v443_v35  ;;  %v436_v41 = vld [vmem:[%s2861_s1 + $0xd08] sm:$0xff]  ;;  %729 = vmatprep.subr.mxu0 %v312_v36  ;;  %v307_v43 = vld [vmem:[%s2861_s1 + $0x900] sm:$0xff] }
  0x51   :  { %800 = vmatprep.subr.mxu1 %v440_v37  ;;  %v435_v44 = vld [vmem:[%s2861_s1 + $0xd00] sm:$0xff]  ;;  %730 = vmatpush1.msra.mxu0 %v311_v38  ;;  %v304_v45 = vld [vmem:[%s2861_s1 + $0x8e8] sm:$0xff] }
  0x52   :  { %801 = vmatpush1.msra.mxu1 %v439_v39  ;;  %v432_v46 = vld [vmem:[%s2861_s1 + $0xce8] sm:$0xff]  ;;  %731 = vmatprep.subr.mxu0 %v308_v40  ;;  %v303_v47 = vld [vmem:[%s2861_s1 + $0x8e0] sm:$0xff] }
  0x53   :  { %802 = vmatprep.subr.mxu1 %v436_v41  ;;  %v431_v48 = vld [vmem:[%s2861_s1 + $0xce0] sm:$0xff]  ;;  %732 = vmatpush1.msra.mxu0 %v307_v43  ;;  %v300_v49 = vld [vmem:[%s2861_s1 + $0x8c8] sm:$0xff] }
  0x54   :  { %803 = vmatpush1.msra.mxu1 %v435_v44  ;;  %v428_v50 = vld [vmem:[%s2861_s1 + $0xcc8] sm:$0xff]  ;;  %733 = vmatprep.subr.mxu0 %v304_v45  ;;  %v299_v51 = vld [vmem:[%s2861_s1 + $0x8c0] sm:$0xff] }
  0x55   :  { %804 = vmatprep.subr.mxu1 %v432_v46  ;;  %v427_v53 = vld [vmem:[%s2861_s1 + $0xcc0] sm:$0xff]  ;;  %734 = vmatpush1.msra.mxu0 %v303_v47  ;;  %v296_v54 = vld [vmem:[%s2861_s1 + $0x8a8] sm:$0xff] }
  0x56   :  { %805 = vmatpush1.msra.mxu1 %v431_v48  ;;  %v424_v55 = vld [vmem:[%s2861_s1 + $0xca8] sm:$0xff]  ;;  %735 = vmatprep.subr.mxu0 %v300_v49  ;;  %v295_v56 = vld [vmem:[%s2861_s1 + $0x8a0] sm:$0xff] }
  0x57   :  { %806 = vmatprep.subr.mxu1 %v428_v50  ;;  %v423_v57 = vld [vmem:[%s2861_s1 + $0xca0] sm:$0xff]  ;;  %736 = vmatpush1.msra.mxu0 %v299_v51  ;;  %v292_v58 = vld [vmem:[%s2861_s1 + $0x888] sm:$0xff] }
  0x58   :  { %807 = vmatpush1.msra.mxu1 %v427_v53  ;;  %v420_v59 = vld [vmem:[%s2861_s1 + $0xc88] sm:$0xff]  ;;  %737 = vmatprep.subr.mxu0 %v296_v54  ;;  %v291_v60 = vld [vmem:[%s2861_s1 + $0x880] sm:$0xff] }
  0x59   :  { %808 = vmatprep.subr.mxu1 %v424_v55  ;;  %v419_v61 = vld [vmem:[%s2861_s1 + $0xc80] sm:$0xff]  ;;  %738 = vmatpush1.msra.mxu0 %v295_v56  ;;  %v288_v63 = vld [vmem:[%s2861_s1 + $0x868] sm:$0xff] }
  0x5a   :  { %809 = vmatpush1.msra.mxu1 %v423_v57  ;;  %v416_v0 = vld [vmem:[%s2861_s1 + $0xc68] sm:$0xff]  ;;  %739 = vmatprep.subr.mxu0 %v292_v58  ;;  %v287_v2 = vld [vmem:[%s2861_s1 + $0x860] sm:$0xff] }
  0x5b   :  { %810 = vmatprep.subr.mxu1 %v420_v59  ;;  %v415_v3 = vld [vmem:[%s2861_s1 + $0xc60] sm:$0xff]  ;;  %740 = vmatpush1.msra.mxu0 %v291_v60  ;;  %v284_v4 = vld [vmem:[%s2861_s1 + $0x848] sm:$0xff] }
  0x5c   :  { %811 = vmatpush1.msra.mxu1 %v419_v61  ;;  %v412_v5 = vld [vmem:[%s2861_s1 + $0xc48] sm:$0xff]  ;;  %741 = vmatprep.subr.mxu0 %v288_v63  ;;  %v283_v6 = vld [vmem:[%s2861_s1 + $0x840] sm:$0xff] }
  0x5d   :  { %812 = vmatprep.subr.mxu1 %v416_v0  ;;  %v411_v7 = vld [vmem:[%s2861_s1 + $0xc40] sm:$0xff]  ;;  %742 = vmatpush1.msra.mxu0 %v287_v2  ;;  %v280_v9 = vld [vmem:[%s2861_s1 + $0x828] sm:$0xff] }
  0x5e   :  { %813 = vmatpush1.msra.mxu1 %v415_v3  ;;  %v408_v11 = vld [vmem:[%s2861_s1 + $0xc28] sm:$0xff]  ;;  %743 = vmatprep.subr.mxu0 %v284_v4  ;;  %v279_v12 = vld [vmem:[%s2861_s1 + $0x820] sm:$0xff] }
  0x5f   :  { %814 = vmatprep.subr.mxu1 %v412_v5  ;;  %v407_v13 = vld [vmem:[%s2861_s1 + $0xc20] sm:$0xff]  ;;  %744 = vmatpush1.msra.mxu0 %v283_v6  ;;  %v276_v14 = vld [vmem:[%s2861_s1 + $0x808] sm:$0xff] }
  0x60   :  { %815 = vmatpush1.msra.mxu1 %v411_v7  ;;  %v404_v15 = vld [vmem:[%s2861_s1 + $0xc08] sm:$0xff]  ;;  %745 = vmatprep.subr.mxu0 %v280_v9  ;;  %v275_v16 = vld [vmem:[%s2861_s1 + $0x800] sm:$0xff] }
  0x61   :  { %816 = vmatprep.subr.mxu1 %v408_v11  ;;  %v403_v17 = vld [vmem:[%s2861_s1 + $0xc00] sm:$0xff]  ;;  %746 = vmatpush1.msra.mxu0 %v279_v12  ;;  %v400_v18 = vld [vmem:[%s2861_s1 + $0xbe8] sm:$0xff] }
  0x62   :  { %817 = vmatpush1.msra.mxu1 %v407_v13  ;;  %v528_v19 = vld [vmem:[%s2861_s1 + $0xfe8] sm:$0xff]  ;;  %747 = vmatprep.subr.mxu0 %v276_v14  ;;  %v399_v20 = vld [vmem:[%s2861_s1 + $0xbe0] sm:$0xff] }
  0x63   :  { %818 = vmatprep.subr.mxu1 %v404_v15  ;;  %v527_v21 = vld [vmem:[%s2861_s1 + $0xfe0] sm:$0xff]  ;;  %748 = vmatpush1.msra.mxu0 %v275_v16  ;;  %v396_v22 = vld [vmem:[%s2861_s1 + $0xbc8] sm:$0xff] }
  0x64   :  { %819 = vmatpush1.msra.mxu1 %v403_v17  ;;  %v524_v23 = vld [vmem:[%s2861_s1 + $0xfc8] sm:$0xff]  ;;  %749 = vmatprep.subr.mxu0 %v400_v18  ;;  %v395_v24 = vld [vmem:[%s2861_s1 + $0xbc0] sm:$0xff] }
  0x65   :  { %820 = vmatprep.subr.mxu1 %v528_v19  ;;  %v523_v25 = vld [vmem:[%s2861_s1 + $0xfc0] sm:$0xff]  ;;  %750 = vmatpush2.msra.mxu0 %v399_v20  ;;  %v392_v26 = vld [vmem:[%s2861_s1 + $0xba8] sm:$0xff] }
  0x66   :  { %821 = vmatpush2.msra.mxu1 %v527_v21  ;;  %v520_v27 = vld [vmem:[%s2861_s1 + $0xfa8] sm:$0xff]  ;;  %751 = vmatprep.subr.mxu0 %v396_v22  ;;  %v391_v28 = vld [vmem:[%s2861_s1 + $0xba0] sm:$0xff] }
  0x67   :  { %822 = vmatprep.subr.mxu1 %v524_v23  ;;  %v519_v29 = vld [vmem:[%s2861_s1 + $0xfa0] sm:$0xff]  ;;  %752 = vmatpush2.msra.mxu0 %v395_v24  ;;  %v388_v30 = vld [vmem:[%s2861_s1 + $0xb88] sm:$0xff] }
  0x68   :  { %823 = vmatpush2.msra.mxu1 %v523_v25  ;;  %v516_v31 = vld [vmem:[%s2861_s1 + $0xf88] sm:$0xff]  ;;  %753 = vmatprep.subr.mxu0 %v392_v26  ;;  %v387_v32 = vld [vmem:[%s2861_s1 + $0xb80] sm:$0xff] }
  0x69   :  { %824 = vmatprep.subr.mxu1 %v520_v27  ;;  %v515_v33 = vld [vmem:[%s2861_s1 + $0xf80] sm:$0xff]  ;;  %754 = vmatpush2.msra.mxu0 %v391_v28  ;;  %v384_v34 = vld [vmem:[%s2861_s1 + $0xb68] sm:$0xff] }
  0x6a   :  { %825 = vmatpush2.msra.mxu1 %v519_v29  ;;  %v512_v35 = vld [vmem:[%s2861_s1 + $0xf68] sm:$0xff]  ;;  %755 = vmatprep.subr.mxu0 %v388_v30  ;;  %v383_v36 = vld [vmem:[%s2861_s1 + $0xb60] sm:$0xff]  ;;  %v82_v30 = vld [vmem:[%s2861_s1 + $0x1f8] sm:$0xff] }
  0x6b   :  { %826 = vmatprep.subr.mxu1 %v516_v31  ;;  %v511_v37 = vld [vmem:[%s2861_s1 + $0xf60] sm:$0xff]  ;;  %756 = vmatpush2.msra.mxu0 %v387_v32  ;;  %v380_v38 = vld [vmem:[%s2861_s1 + $0xb48] sm:$0xff]  ;;  %v210_v31 = vld [vmem:[%s2861_s1 + $0x5f8] sm:$0xff] }
  0x6c   :  { %827 = vmatpush2.msra.mxu1 %v515_v33  ;;  %v508_v39 = vld [vmem:[%s2861_s1 + $0xf48] sm:$0xff]  ;;  %757 = vmatprep.subr.mxu0 %v384_v34  ;;  %v379_v40 = vld [vmem:[%s2861_s1 + $0xb40] sm:$0xff]  ;;  %v81_v32 = vld [vmem:[%s2861_s1 + $0x1f0] sm:$0xff] }
  0x6d   :  { %828 = vmatprep.subr.mxu1 %v512_v35  ;;  %v507_v41 = vld [vmem:[%s2861_s1 + $0xf40] sm:$0xff]  ;;  %758 = vmatpush2.msra.mxu0 %v383_v36  ;;  %v376_v43 = vld [vmem:[%s2861_s1 + $0xb28] sm:$0xff]  ;;  %v209_v33 = vld [vmem:[%s2861_s1 + $0x5f0] sm:$0xff] }
  0x6e   :  { %829 = vmatpush2.msra.mxu1 %v511_v37  ;;  %v504_v44 = vld [vmem:[%s2861_s1 + $0xf28] sm:$0xff]  ;;  %759 = vmatprep.subr.mxu0 %v380_v38  ;;  %v375_v45 = vld [vmem:[%s2861_s1 + $0xb20] sm:$0xff]  ;;  %v78_v34 = vld [vmem:[%s2861_s1 + $0x1d8] sm:$0xff] }
  0x6f   :  { %830 = vmatprep.subr.mxu1 %v508_v39  ;;  %v503_v46 = vld [vmem:[%s2861_s1 + $0xf20] sm:$0xff]  ;;  %760 = vmatpush2.msra.mxu0 %v379_v40  ;;  %v372_v47 = vld [vmem:[%s2861_s1 + $0xb08] sm:$0xff]  ;;  %v206_v35 = vld [vmem:[%s2861_s1 + $0x5d8] sm:$0xff] }
  0x70   :  { %831 = vmatpush2.msra.mxu1 %v507_v41  ;;  %v500_v48 = vld [vmem:[%s2861_s1 + $0xf08] sm:$0xff]  ;;  %761 = vmatprep.subr.mxu0 %v376_v43  ;;  %v371_v49 = vld [vmem:[%s2861_s1 + $0xb00] sm:$0xff]  ;;  %v77_v36 = vld [vmem:[%s2861_s1 + $0x1d0] sm:$0xff] }
  0x71   :  { %832 = vmatprep.subr.mxu1 %v504_v44  ;;  %v499_v50 = vld [vmem:[%s2861_s1 + $0xf00] sm:$0xff]  ;;  %762 = vmatpush2.msra.mxu0 %v375_v45  ;;  %v368_v51 = vld [vmem:[%s2861_s1 + $0xae8] sm:$0xff]  ;;  %v205_v37 = vld [vmem:[%s2861_s1 + $0x5d0] sm:$0xff] }
  0x72   :  { %833 = vmatpush2.msra.mxu1 %v503_v46  ;;  %v496_v53 = vld [vmem:[%s2861_s1 + $0xee8] sm:$0xff]  ;;  %763 = vmatprep.subr.mxu0 %v372_v47  ;;  %v367_v54 = vld [vmem:[%s2861_s1 + $0xae0] sm:$0xff]  ;;  %v74_v38 = vld [vmem:[%s2861_s1 + $0x1b8] sm:$0xff] }
  0x73   :  { %834 = vmatprep.subr.mxu1 %v500_v48  ;;  %v495_v55 = vld [vmem:[%s2861_s1 + $0xee0] sm:$0xff]  ;;  %764 = vmatpush2.msra.mxu0 %v371_v49  ;;  %v364_v56 = vld [vmem:[%s2861_s1 + $0xac8] sm:$0xff]  ;;  %v202_v39 = vld [vmem:[%s2861_s1 + $0x5b8] sm:$0xff] }
  0x74   :  { %835 = vmatpush2.msra.mxu1 %v499_v50  ;;  %v492_v57 = vld [vmem:[%s2861_s1 + $0xec8] sm:$0xff]  ;;  %765 = vmatprep.subr.mxu0 %v368_v51  ;;  %v363_v58 = vld [vmem:[%s2861_s1 + $0xac0] sm:$0xff]  ;;  %v73_v40 = vld [vmem:[%s2861_s1 + $0x1b0] sm:$0xff] }
  0x75   :  { %836 = vmatprep.subr.mxu1 %v496_v53  ;;  %v491_v59 = vld [vmem:[%s2861_s1 + $0xec0] sm:$0xff]  ;;  %766 = vmatpush2.msra.mxu0 %v367_v54  ;;  %v360_v60 = vld [vmem:[%s2861_s1 + $0xaa8] sm:$0xff]  ;;  %v201_v41 = vld [vmem:[%s2861_s1 + $0x5b0] sm:$0xff] }
  0x76   :  { %837 = vmatpush2.msra.mxu1 %v495_v55  ;;  %v488_v61 = vld [vmem:[%s2861_s1 + $0xea8] sm:$0xff]  ;;  %767 = vmatprep.subr.mxu0 %v364_v56  ;;  %v359_v0 = vld [vmem:[%s2861_s1 + $0xaa0] sm:$0xff]  ;;  %v70_v43 = vld [vmem:[%s2861_s1 + $0x198] sm:$0xff] }
  0x77   :  { %v18_v63 = vld [vmem:[%s2862_s0 + $0x8] sm:$0xff]  ;;  %838 = vmatprep.subr.mxu1 %v492_v57  ;;  %v487_v2 = vld [vmem:[%s2861_s1 + $0xea0] sm:$0xff]  ;;  %768 = vmatpush2.msra.mxu0 %v363_v58  ;;  %v198_v44 = vld [vmem:[%s2861_s1 + $0x598] sm:$0xff] }
  0x78   :  { %839 = vmatpush2.msra.mxu1 %v491_v59  ;;  %v356_v3 = vld [vmem:[%s2861_s1 + $0xa88] sm:$0xff]  ;;  %769 = vmatprep.subr.mxu0 %v360_v60  ;;  %v355_v5 = vld [vmem:[%s2861_s1 + $0xa80] sm:$0xff]  ;;  %v550_v7 = vcombine.high %v18_v63, %v18_v63  ;;  %v2023_v16 = vrot.slane %v18_v63, %v1591_v52  ;;  %v69_v45 = vld [vmem:[%s2861_s1 + $0x190] sm:$0xff] }
  0x79   :  { %v484_v4 = vld [vmem:[%s2861_s1 + $0xe88] sm:$0xff]  ;;  %840 = vmatprep.subr.mxu1 %v488_v61  ;;  %v483_v6 = vld [vmem:[%s2861_s1 + $0xe80] sm:$0xff]  ;;  %770 = vmatpush2.msra.mxu0 %v359_v0  ;;  %v197_v46 = vld [vmem:[%s2861_s1 + $0x590] sm:$0xff] }
  0x7a   :  { %841 = vmatpush2.msra.mxu1 %v487_v2  ;;  %v352_v9 = vld [vmem:[%s2861_s1 + $0xa68] sm:$0xff]  ;;  %771 = vmatprep.subr.mxu0 %v356_v3  ;;  %v351_v12 = vld [vmem:[%s2861_s1 + $0xa60] sm:$0xff]  ;;  %v2038_v21 = vrot.slane %v550_v7, %v1591_v52  ;;  %v2054_v26 = vcombine.high %v2023_v16, %v2023_v16  ;;  %v66_v47 = vld [vmem:[%s2861_s1 + $0x178] sm:$0xff] }
  0x7b   :  { %v480_v11 = vld [vmem:[%s2861_s1 + $0xe68] sm:$0xff]  ;;  %842 = vmatprep.subr.mxu1 %v484_v4  ;;  %v479_v13 = vld [vmem:[%s2861_s1 + $0xe60] sm:$0xff]  ;;  %772 = vmatpush2.msra.mxu0 %v355_v5  ;;  %v194_v48 = vld [vmem:[%s2861_s1 + $0x578] sm:$0xff] }
  0x7c   :  { %843 = vmatpush2.msra.mxu1 %v483_v6  ;;  %v348_v14 = vld [vmem:[%s2861_s1 + $0xa48] sm:$0xff]  ;;  %773 = vmatprep.subr.mxu0 %v352_v9  ;;  %v347_v17 = vld [vmem:[%s2861_s1 + $0xa40] sm:$0xff]  ;;  %v2064_v29 = vcombine.high %v2038_v21, %v2038_v21  ;;  %v65_v49 = vld [vmem:[%s2861_s1 + $0x170] sm:$0xff] }
  0x7d   :  { %v476_v15 = vld [vmem:[%s2861_s1 + $0xe48] sm:$0xff]  ;;  %844 = vmatprep.subr.mxu1 %v480_v11  ;;  %v475_v18 = vld [vmem:[%s2861_s1 + $0xe40] sm:$0xff]  ;;  %774 = vmatpush2.msra.mxu0 %v351_v12  ;;  %v193_v50 = vld [vmem:[%s2861_s1 + $0x570] sm:$0xff] }
  0x7e   :  { %845 = vmatpush2.msra.mxu1 %v479_v13  ;;  %v344_v19 = vld [vmem:[%s2861_s1 + $0xa28] sm:$0xff]  ;;  %775 = vmatprep.subr.mxu0 %v348_v14  ;;  %v343_v22 = vld [vmem:[%s2861_s1 + $0xa20] sm:$0xff]  ;;  %v62_v51 = vld [vmem:[%s2861_s1 + $0x158] sm:$0xff] }
  0x7f   :  { %v472_v20 = vld [vmem:[%s2861_s1 + $0xe28] sm:$0xff]  ;;  %846 = vmatprep.subr.mxu1 %v476_v15  ;;  %v471_v23 = vld [vmem:[%s2861_s1 + $0xe20] sm:$0xff]  ;;  %776 = vmatpush2.msra.mxu0 %v347_v17  ;;  %v190_v53 = vld [vmem:[%s2861_s1 + $0x558] sm:$0xff] }
  0x80   :  { %847 = vmatpush2.msra.mxu1 %v475_v18  ;;  %v340_v24 = vld [vmem:[%s2861_s1 + $0xa08] sm:$0xff]  ;;  %777 = vmatprep.subr.mxu0 %v344_v19  ;;  %v339_v27 = vld [vmem:[%s2861_s1 + $0xa00] sm:$0xff]  ;;  %v61_v54 = vld [vmem:[%s2861_s1 + $0x150] sm:$0xff] }
  0x81   :  { %v468_v25 = vld [vmem:[%s2861_s1 + $0xe08] sm:$0xff]  ;;  %848 = vmatprep.subr.mxu1 %v472_v20  ;;  %778 = vmatpush2.msra.mxu0 %v343_v22  ;;  %v467_v28 = vld [vmem:[%s2861_s1 + $0xe00] sm:$0xff]  ;;  %v189_v55 = vld [vmem:[%s2861_s1 + $0x550] sm:$0xff] }
  0x82   :  { %849 = vmatpush2.msra.mxu1 %v471_v23  ;;  %779 = vmatprep.subr.mxu0 %v340_v24  ;;  %v58_v56 = vld [vmem:[%s2861_s1 + $0x138] sm:$0xff]  ;;  %v57_v58 = vld [vmem:[%s2861_s1 + $0x130] sm:$0xff] }
  0x83   :  { %850 = vmatprep.subr.mxu1 %v468_v25  ;;  %780 = vmatpush2.msra.mxu0 %v339_v27  ;;  %v186_v57 = vld [vmem:[%s2861_s1 + $0x538] sm:$0xff]  ;;  %v185_v59 = vld [vmem:[%s2861_s1 + $0x530] sm:$0xff] }
  0x84   :  { %781 = vmatprep.mubr.f32.mxu0 %v2054_v26  ;;  %851 = vmatpush2.msra.mxu1 %v467_v28  ;;  %v54_v60 = vld [vmem:[%s2861_s1 + $0x118] sm:$0xff]  ;;  %v53_v63 = vld [vmem:[%s2861_s1 + $0x110] sm:$0xff] }
  0x85   :  { %782 = vmatmul.mubr.f32.vlgmr.msra.gmra.mxu0 %v2023_v16  ;;  %852 = vmatprep.mubr.f32.mxu1 %v2064_v29  ;;  %v182_v61 = vld [vmem:[%s2861_s1 + $0x518] sm:$0xff]  ;;  %v181_v0 = vld [vmem:[%s2861_s1 + $0x510] sm:$0xff] }
  0x86   :  { %859 = vmatprep.subr.mxu0 %v82_v30  ;;  %930 = vmatprep.subr.mxu1 %v210_v31  ;;  %v50_v2 = vld [vmem:[%s2861_s1 + $0xf8] sm:$0xff]  ;;  %v49_v4 = vld [vmem:[%s2861_s1 + $0xf0] sm:$0xff] }
  0x87   :  { %853 = vmatmul.mubr.f32.vlgmr.msra.gmra.mxu1 %v2038_v21  ;;  %860 = vmatpush1.msra.mxu0 %v81_v32  ;;  %v178_v3 = vld [vmem:[%s2861_s1 + $0x4f8] sm:$0xff]  ;;  %v177_v5 = vld [vmem:[%s2861_s1 + $0x4f0] sm:$0xff] }
  0x88   :  { %931 = vmatpush1.msra.mxu1 %v209_v33  ;;  %861 = vmatprep.subr.mxu0 %v78_v34  ;;  %v46_v6 = vld [vmem:[%s2861_s1 + $0xd8] sm:$0xff]  ;;  %v45_v9 = vld [vmem:[%s2861_s1 + $0xd0] sm:$0xff] }
  0x89   :  { %932 = vmatprep.subr.mxu1 %v206_v35  ;;  %862 = vmatpush1.msra.mxu0 %v77_v36  ;;  %v174_v7 = vld [vmem:[%s2861_s1 + $0x4d8] sm:$0xff]  ;;  %v173_v11 = vld [vmem:[%s2861_s1 + $0x4d0] sm:$0xff] }
  0x8a   :  { %933 = vmatpush1.msra.mxu1 %v205_v37  ;;  %863 = vmatprep.subr.mxu0 %v74_v38  ;;  %v42_v12 = vld [vmem:[%s2861_s1 + $0xb8] sm:$0xff]  ;;  %v41_v14 = vld [vmem:[%s2861_s1 + $0xb0] sm:$0xff] }
  0x8b   :  { %934 = vmatprep.subr.mxu1 %v202_v39  ;;  %864 = vmatpush1.msra.mxu0 %v73_v40  ;;  %v170_v13 = vld [vmem:[%s2861_s1 + $0x4b8] sm:$0xff]  ;;  %v169_v15 = vld [vmem:[%s2861_s1 + $0x4b0] sm:$0xff] }
  0x8c   :  { %935 = vmatpush1.msra.mxu1 %v201_v41  ;;  %865 = vmatprep.subr.mxu0 %v70_v43  ;;  %v38_v17 = vld [vmem:[%s2861_s1 + $0x98] sm:$0xff]  ;;  %v37_v19 = vld [vmem:[%s2861_s1 + $0x90] sm:$0xff] }
  0x8d   :  { %936 = vmatprep.subr.mxu1 %v198_v44  ;;  %866 = vmatpush1.msra.mxu0 %v69_v45  ;;  %v166_v18 = vld [vmem:[%s2861_s1 + $0x498] sm:$0xff]  ;;  %v165_v20 = vld [vmem:[%s2861_s1 + $0x490] sm:$0xff] }
  0x8e   :  { %937 = vmatpush1.msra.mxu1 %v197_v46  ;;  %867 = vmatprep.subr.mxu0 %v66_v47  ;;  %v34_v22 = vld [vmem:[%s2861_s1 + $0x78] sm:$0xff]  ;;  %v33_v24 = vld [vmem:[%s2861_s1 + $0x70] sm:$0xff] }
  0x8f   :  { %938 = vmatprep.subr.mxu1 %v194_v48  ;;  %868 = vmatpush1.msra.mxu0 %v65_v49  ;;  %v162_v23 = vld [vmem:[%s2861_s1 + $0x478] sm:$0xff]  ;;  %v161_v25 = vld [vmem:[%s2861_s1 + $0x470] sm:$0xff] }
  0x90   :  { %939 = vmatpush1.msra.mxu1 %v193_v50  ;;  %869 = vmatprep.subr.mxu0 %v62_v51  ;;  %v30_v27 = vld [vmem:[%s2861_s1 + $0x58] sm:$0xff]  ;;  %v29_v30 = vld [vmem:[%s2861_s1 + $0x50] sm:$0xff] }
  0x91   :  { %940 = vmatprep.subr.mxu1 %v190_v53  ;;  %870 = vmatpush1.msra.mxu0 %v61_v54  ;;  %v158_v28 = vld [vmem:[%s2861_s1 + $0x458] sm:$0xff]  ;;  %v157_v31 = vld [vmem:[%s2861_s1 + $0x450] sm:$0xff] }
  0x92   :  { %941 = vmatpush1.msra.mxu1 %v189_v55  ;;  %871 = vmatprep.subr.mxu0 %v58_v56  ;;  %v26_v32 = vld [vmem:[%s2861_s1 + $0x38] sm:$0xff]  ;;  %v25_v34 = vld [vmem:[%s2861_s1 + $0x30] sm:$0xff] }
  0x93   :  { %942 = vmatprep.subr.mxu1 %v186_v57  ;;  %872 = vmatpush1.msra.mxu0 %v57_v58  ;;  %v154_v33 = vld [vmem:[%s2861_s1 + $0x438] sm:$0xff]  ;;  %v153_v35 = vld [vmem:[%s2861_s1 + $0x430] sm:$0xff] }
  0x94   :  { %943 = vmatpush1.msra.mxu1 %v185_v59  ;;  %873 = vmatprep.subr.mxu0 %v54_v60  ;;  %v22_v36 = vld [vmem:[%s2861_s1 + $0x18] sm:$0xff]  ;;  %v21_v38 = vld [vmem:[%s2861_s1 + $0x10] sm:$0xff] }
  0x95   :  { %944 = vmatprep.subr.mxu1 %v182_v61  ;;  %874 = vmatpush1.msra.mxu0 %v53_v63  ;;  %v150_v37 = vld [vmem:[%s2861_s1 + $0x418] sm:$0xff]  ;;  %v149_v39 = vld [vmem:[%s2861_s1 + $0x410] sm:$0xff] }
  0x96   :  { %945 = vmatpush1.msra.mxu1 %v181_v0  ;;  %875 = vmatprep.subr.mxu0 %v50_v2  ;;  %v146_v40 = vld [vmem:[%s2861_s1 + $0x3f8] sm:$0xff]  ;;  %v145_v43 = vld [vmem:[%s2861_s1 + $0x3f0] sm:$0xff] }
  0x97   :  { %946 = vmatprep.subr.mxu1 %v178_v3  ;;  %876 = vmatpush1.msra.mxu0 %v49_v4  ;;  %v274_v41 = vld [vmem:[%s2861_s1 + $0x7f8] sm:$0xff]  ;;  %v273_v44 = vld [vmem:[%s2861_s1 + $0x7f0] sm:$0xff] }
  0x98   :  { %947 = vmatpush1.msra.mxu1 %v177_v5  ;;  %877 = vmatprep.subr.mxu0 %v46_v6  ;;  %v142_v45 = vld [vmem:[%s2861_s1 + $0x3d8] sm:$0xff]  ;;  %v141_v47 = vld [vmem:[%s2861_s1 + $0x3d0] sm:$0xff] }
  0x99   :  { %948 = vmatprep.subr.mxu1 %v174_v7  ;;  %878 = vmatpush1.msra.mxu0 %v45_v9  ;;  %v270_v46 = vld [vmem:[%s2861_s1 + $0x7d8] sm:$0xff]  ;;  %v269_v48 = vld [vmem:[%s2861_s1 + $0x7d0] sm:$0xff] }
  0x9a   :  { %949 = vmatpush1.msra.mxu1 %v173_v11  ;;  %879 = vmatprep.subr.mxu0 %v42_v12  ;;  %v138_v49 = vld [vmem:[%s2861_s1 + $0x3b8] sm:$0xff]  ;;  %v137_v51 = vld [vmem:[%s2861_s1 + $0x3b0] sm:$0xff] }
  0x9b   :  { %950 = vmatprep.subr.mxu1 %v170_v13  ;;  %880 = vmatpush1.msra.mxu0 %v41_v14  ;;  %v266_v50 = vld [vmem:[%s2861_s1 + $0x7b8] sm:$0xff]  ;;  %v265_v53 = vld [vmem:[%s2861_s1 + $0x7b0] sm:$0xff] }
  0x9c   :  { %951 = vmatpush1.msra.mxu1 %v169_v15  ;;  %881 = vmatprep.subr.mxu0 %v38_v17  ;;  %v134_v54 = vld [vmem:[%s2861_s1 + $0x398] sm:$0xff]  ;;  %v133_v56 = vld [vmem:[%s2861_s1 + $0x390] sm:$0xff] }
  0x9d   :  { %952 = vmatprep.subr.mxu1 %v166_v18  ;;  %882 = vmatpush1.msra.mxu0 %v37_v19  ;;  %v262_v55 = vld [vmem:[%s2861_s1 + $0x798] sm:$0xff]  ;;  %v261_v57 = vld [vmem:[%s2861_s1 + $0x790] sm:$0xff] }
  0x9e   :  { %953 = vmatpush1.msra.mxu1 %v165_v20  ;;  %883 = vmatprep.subr.mxu0 %v34_v22  ;;  %v130_v58 = vld [vmem:[%s2861_s1 + $0x378] sm:$0xff]  ;;  %v129_v60 = vld [vmem:[%s2861_s1 + $0x370] sm:$0xff] }
  0x9f   :  { %954 = vmatprep.subr.mxu1 %v162_v23  ;;  %884 = vmatpush1.msra.mxu0 %v33_v24  ;;  %v258_v59 = vld [vmem:[%s2861_s1 + $0x778] sm:$0xff]  ;;  %v257_v61 = vld [vmem:[%s2861_s1 + $0x770] sm:$0xff] }
  0xa0   :  { %955 = vmatpush1.msra.mxu1 %v161_v25  ;;  %885 = vmatprep.subr.mxu0 %v30_v27  ;;  %v126_v63 = vld [vmem:[%s2861_s1 + $0x358] sm:$0xff]  ;;  %v125_v2 = vld [vmem:[%s2861_s1 + $0x350] sm:$0xff] }
  0xa1   :  { %956 = vmatprep.subr.mxu1 %v158_v28  ;;  %886 = vmatpush1.msra.mxu0 %v29_v30  ;;  %v254_v0 = vld [vmem:[%s2861_s1 + $0x758] sm:$0xff]  ;;  %v253_v3 = vld [vmem:[%s2861_s1 + $0x750] sm:$0xff] }
  0xa2   :  { %957 = vmatpush1.msra.mxu1 %v157_v31  ;;  %887 = vmatprep.subr.mxu0 %v26_v32  ;;  %v122_v4 = vld [vmem:[%s2861_s1 + $0x338] sm:$0xff]  ;;  %v121_v6 = vld [vmem:[%s2861_s1 + $0x330] sm:$0xff] }
  0xa3   :  { %958 = vmatprep.subr.mxu1 %v154_v33  ;;  %888 = vmatpush1.msra.mxu0 %v25_v34  ;;  %v250_v5 = vld [vmem:[%s2861_s1 + $0x738] sm:$0xff]  ;;  %v249_v7 = vld [vmem:[%s2861_s1 + $0x730] sm:$0xff] }
  0xa4   :  { %959 = vmatpush1.msra.mxu1 %v153_v35  ;;  %889 = vmatprep.subr.mxu0 %v22_v36  ;;  %v118_v9 = vld [vmem:[%s2861_s1 + $0x318] sm:$0xff]  ;;  %v117_v12 = vld [vmem:[%s2861_s1 + $0x310] sm:$0xff] }
  0xa5   :  { %960 = vmatprep.subr.mxu1 %v150_v37  ;;  %890 = vmatpush1.msra.mxu0 %v21_v38  ;;  %v246_v11 = vld [vmem:[%s2861_s1 + $0x718] sm:$0xff]  ;;  %v245_v13 = vld [vmem:[%s2861_s1 + $0x710] sm:$0xff] }
  0xa6   :  { %961 = vmatpush1.msra.mxu1 %v149_v39  ;;  %891 = vmatprep.subr.mxu0 %v146_v40  ;;  %v114_v14 = vld [vmem:[%s2861_s1 + $0x2f8] sm:$0xff]  ;;  %v113_v17 = vld [vmem:[%s2861_s1 + $0x2f0] sm:$0xff] }
  0xa7   :  { %962 = vmatprep.subr.mxu1 %v274_v41  ;;  %892 = vmatpush2.msra.mxu0 %v145_v43  ;;  %v242_v15 = vld [vmem:[%s2861_s1 + $0x6f8] sm:$0xff]  ;;  %v241_v18 = vld [vmem:[%s2861_s1 + $0x6f0] sm:$0xff] }
  0xa8   :  { %963 = vmatpush2.msra.mxu1 %v273_v44  ;;  %893 = vmatprep.subr.mxu0 %v142_v45  ;;  %v110_v19 = vld [vmem:[%s2861_s1 + $0x2d8] sm:$0xff]  ;;  %v109_v22 = vld [vmem:[%s2861_s1 + $0x2d0] sm:$0xff] }
  0xa9   :  { %964 = vmatprep.subr.mxu1 %v270_v46  ;;  %894 = vmatpush2.msra.mxu0 %v141_v47  ;;  %v238_v20 = vld [vmem:[%s2861_s1 + $0x6d8] sm:$0xff]  ;;  %v237_v23 = vld [vmem:[%s2861_s1 + $0x6d0] sm:$0xff] }
  0xaa   :  { %965 = vmatpush2.msra.mxu1 %v269_v48  ;;  %895 = vmatprep.subr.mxu0 %v138_v49  ;;  %v106_v24 = vld [vmem:[%s2861_s1 + $0x2b8] sm:$0xff]  ;;  %v105_v27 = vld [vmem:[%s2861_s1 + $0x2b0] sm:$0xff] }
  0xab   :  { %966 = vmatprep.subr.mxu1 %v266_v50  ;;  %896 = vmatpush2.msra.mxu0 %v137_v51  ;;  %v234_v25 = vld [vmem:[%s2861_s1 + $0x6b8] sm:$0xff]  ;;  %v233_v28 = vld [vmem:[%s2861_s1 + $0x6b0] sm:$0xff] }
  0xac   :  { %967 = vmatpush2.msra.mxu1 %v265_v53  ;;  %897 = vmatprep.subr.mxu0 %v134_v54  ;;  %v102_v30 = vld [vmem:[%s2861_s1 + $0x298] sm:$0xff]  ;;  %v101_v32 = vld [vmem:[%s2861_s1 + $0x290] sm:$0xff] }
  0xad   :  { %968 = vmatprep.subr.mxu1 %v262_v55  ;;  %898 = vmatpush2.msra.mxu0 %v133_v56  ;;  %v230_v31 = vld [vmem:[%s2861_s1 + $0x698] sm:$0xff]  ;;  %v229_v33 = vld [vmem:[%s2861_s1 + $0x690] sm:$0xff] }
  0xae   :  { %969 = vmatpush2.msra.mxu1 %v261_v57  ;;  %899 = vmatprep.subr.mxu0 %v130_v58  ;;  %v98_v34 = vld [vmem:[%s2861_s1 + $0x278] sm:$0xff]  ;;  %v97_v36 = vld [vmem:[%s2861_s1 + $0x270] sm:$0xff] }
  0xaf   :  { %970 = vmatprep.subr.mxu1 %v258_v59  ;;  %900 = vmatpush2.msra.mxu0 %v129_v60  ;;  %v226_v35 = vld [vmem:[%s2861_s1 + $0x678] sm:$0xff]  ;;  %v225_v37 = vld [vmem:[%s2861_s1 + $0x670] sm:$0xff] }
  0xb0   :  { %971 = vmatpush2.msra.mxu1 %v257_v61  ;;  %901 = vmatprep.subr.mxu0 %v126_v63  ;;  %v94_v38 = vld [vmem:[%s2861_s1 + $0x258] sm:$0xff]  ;;  %v93_v40 = vld [vmem:[%s2861_s1 + $0x250] sm:$0xff] }
  0xb1   :  { %972 = vmatprep.subr.mxu1 %v254_v0  ;;  %902 = vmatpush2.msra.mxu0 %v125_v2  ;;  %v222_v39 = vld [vmem:[%s2861_s1 + $0x658] sm:$0xff]  ;;  %v221_v41 = vld [vmem:[%s2861_s1 + $0x650] sm:$0xff] }
  0xb2   :  { %973 = vmatpush2.msra.mxu1 %v253_v3  ;;  %903 = vmatprep.subr.mxu0 %v122_v4  ;;  %v90_v43 = vld [vmem:[%s2861_s1 + $0x238] sm:$0xff]  ;;  %v89_v45 = vld [vmem:[%s2861_s1 + $0x230] sm:$0xff] }
  0xb3   :  { %974 = vmatprep.subr.mxu1 %v250_v5  ;;  %904 = vmatpush2.msra.mxu0 %v121_v6  ;;  %v218_v44 = vld [vmem:[%s2861_s1 + $0x638] sm:$0xff]  ;;  %v217_v46 = vld [vmem:[%s2861_s1 + $0x630] sm:$0xff] }
  0xb4   :  { %975 = vmatpush2.msra.mxu1 %v249_v7  ;;  %905 = vmatprep.subr.mxu0 %v118_v9  ;;  %v86_v47 = vld [vmem:[%s2861_s1 + $0x218] sm:$0xff]  ;;  %v85_v49 = vld [vmem:[%s2861_s1 + $0x210] sm:$0xff] }
  0xb5   :  { %976 = vmatprep.subr.mxu1 %v246_v11  ;;  %906 = vmatpush2.msra.mxu0 %v117_v12  ;;  %v214_v48 = vld [vmem:[%s2861_s1 + $0x618] sm:$0xff]  ;;  %v213_v50 = vld [vmem:[%s2861_s1 + $0x610] sm:$0xff] }
  0xb6   :  { %977 = vmatpush2.msra.mxu1 %v245_v13  ;;  %907 = vmatprep.subr.mxu0 %v114_v14  ;;  %v338_v51 = vld [vmem:[%s2861_s1 + $0x9f8] sm:$0xff]  ;;  %v337_v54 = vld [vmem:[%s2861_s1 + $0x9f0] sm:$0xff] }
  0xb7   :  { %978 = vmatprep.subr.mxu1 %v242_v15  ;;  %908 = vmatpush2.msra.mxu0 %v113_v17  ;;  %v466_v53 = vld [vmem:[%s2861_s1 + $0xdf8] sm:$0xff]  ;;  %v465_v55 = vld [vmem:[%s2861_s1 + $0xdf0] sm:$0xff] }
  0xb8   :  { %979 = vmatpush2.msra.mxu1 %v241_v18  ;;  %909 = vmatprep.subr.mxu0 %v110_v19  ;;  %v333_v56 = vld [vmem:[%s2861_s1 + $0x9d0] sm:$0xff]  ;;  %v458_v57 = vld [vmem:[%s2861_s1 + $0xdb8] sm:$0xff] }
  0xb9   :  { %980 = vmatprep.subr.mxu1 %v238_v20  ;;  %910 = vmatpush2.msra.mxu0 %v109_v22  ;;  %v329_v58 = vld [vmem:[%s2861_s1 + $0x9b0] sm:$0xff]  ;;  %v326_v60 = vld [vmem:[%s2861_s1 + $0x998] sm:$0xff] }
  0xba   :  { %981 = vmatpush2.msra.mxu1 %v237_v23  ;;  %911 = vmatprep.subr.mxu0 %v106_v24  ;;  %v457_v59 = vld [vmem:[%s2861_s1 + $0xdb0] sm:$0xff]  ;;  %v454_v61 = vld [vmem:[%s2861_s1 + $0xd98] sm:$0xff] }
  0xbb   :  { %982 = vmatprep.subr.mxu1 %v234_v25  ;;  %912 = vmatpush2.msra.mxu0 %v105_v27  ;;  %v325_v63 = vld [vmem:[%s2861_s1 + $0x990] sm:$0xff]  ;;  %v322_v2 = vld [vmem:[%s2861_s1 + $0x978] sm:$0xff] }
  0xbc   :  { %983 = vmatpush2.msra.mxu1 %v233_v28  ;;  %913 = vmatprep.subr.mxu0 %v102_v30  ;;  %v453_v0 = vld [vmem:[%s2861_s1 + $0xd90] sm:$0xff]  ;;  %v450_v3 = vld [vmem:[%s2861_s1 + $0xd78] sm:$0xff] }
  0xbd   :  { %984 = vmatprep.subr.mxu1 %v230_v31  ;;  %914 = vmatpush2.msra.mxu0 %v101_v32  ;;  %v321_v4 = vld [vmem:[%s2861_s1 + $0x970] sm:$0xff]  ;;  %v318_v6 = vld [vmem:[%s2861_s1 + $0x958] sm:$0xff] }
  0xbe   :  { %985 = vmatpush2.msra.mxu1 %v229_v33  ;;  %915 = vmatprep.subr.mxu0 %v98_v34  ;;  %v449_v5 = vld [vmem:[%s2861_s1 + $0xd70] sm:$0xff]  ;;  %v446_v7 = vld [vmem:[%s2861_s1 + $0xd58] sm:$0xff] }
  0xbf   :  { %986 = vmatprep.subr.mxu1 %v226_v35  ;;  %916 = vmatpush2.msra.mxu0 %v97_v36  ;;  %v317_v9 = vld [vmem:[%s2861_s1 + $0x950] sm:$0xff]  ;;  %v314_v12 = vld [vmem:[%s2861_s1 + $0x938] sm:$0xff] }
  0xc0   :  { %987 = vmatpush2.msra.mxu1 %v225_v37  ;;  %917 = vmatprep.subr.mxu0 %v94_v38  ;;  %v445_v11 = vld [vmem:[%s2861_s1 + $0xd50] sm:$0xff]  ;;  %v442_v13 = vld [vmem:[%s2861_s1 + $0xd38] sm:$0xff] }
  0xc1   :  { %988 = vmatprep.subr.mxu1 %v222_v39  ;;  %918 = vmatpush2.msra.mxu0 %v93_v40  ;;  %v313_v14 = vld [vmem:[%s2861_s1 + $0x930] sm:$0xff]  ;;  %v310_v17 = vld [vmem:[%s2861_s1 + $0x918] sm:$0xff] }
  0xc2   :  { %989 = vmatpush2.msra.mxu1 %v221_v41  ;;  %919 = vmatprep.subr.mxu0 %v90_v43  ;;  %v441_v15 = vld [vmem:[%s2861_s1 + $0xd30] sm:$0xff]  ;;  %v438_v18 = vld [vmem:[%s2861_s1 + $0xd18] sm:$0xff] }
  0xc3   :  { %990 = vmatprep.subr.mxu1 %v218_v44  ;;  %920 = vmatpush2.msra.mxu0 %v89_v45  ;;  %v309_v19 = vld [vmem:[%s2861_s1 + $0x910] sm:$0xff]  ;;  %v306_v22 = vld [vmem:[%s2861_s1 + $0x8f8] sm:$0xff] }
  0xc4   :  { %991 = vmatpush2.msra.mxu1 %v217_v46  ;;  %921 = vmatprep.subr.mxu0 %v86_v47  ;;  %v437_v20 = vld [vmem:[%s2861_s1 + $0xd10] sm:$0xff]  ;;  %v434_v23 = vld [vmem:[%s2861_s1 + $0xcf8] sm:$0xff] }
  0xc5   :  { %992 = vmatprep.subr.mxu1 %v214_v48  ;;  %922 = vmatpush2.msra.mxu0 %v85_v49  ;;  %v305_v24 = vld [vmem:[%s2861_s1 + $0x8f0] sm:$0xff]  ;;  %v302_v27 = vld [vmem:[%s2861_s1 + $0x8d8] sm:$0xff] }
  0xc6   :  { %923 = vmatprep.mubr.f32.mxu0 %v1649_v8  ;;  %993 = vmatpush2.msra.mxu1 %v213_v50  ;;  %v334_v8 = vld [vmem:[%s2861_s1 + $0x9d8] sm:$0xff]  ;;  %v433_v25 = vld [vmem:[%s2861_s1 + $0xcf0] sm:$0xff] }
  0xc7   :  { %994 = vmatprep.mubr.f32.mxu1 %v1656_v10  ;;  %924 = vmatmul.mubr.f32.vlgmr.msra.gmra.mxu0 %v1618_v62  ;;  %v462_v10 = vld [vmem:[%s2861_s1 + $0xdd8] sm:$0xff]  ;;  %v461_v62 = vld [vmem:[%s2861_s1 + $0xdd0] sm:$0xff] }
  0xc8   :  { %995 = vmatmul.mubr.f32.vlgmr.msra.gmra.mxu1 %v1627_v1  ;;  %1001 = vmatprep.subr.mxu0 %v338_v51  ;;  %v330_v1 = vld [vmem:[%s2861_s1 + $0x9b8] sm:$0xff]  ;;  %v301_v30 = vld [vmem:[%s2861_s1 + $0x8d0] sm:$0xff] }
  0xc9   :  { %1072 = vmatprep.subr.mxu1 %v466_v53  ;;  %1002 = vmatpush1.msra.mxu0 %v337_v54  ;;  %v430_v28 = vld [vmem:[%s2861_s1 + $0xcd8] sm:$0xff]  ;;  %v429_v31 = vld [vmem:[%s2861_s1 + $0xcd0] sm:$0xff] }
  0xca   :  { %1073 = vmatpush1.msra.mxu1 %v465_v55  ;;  %1003 = vmatprep.subr.mxu0 %v334_v8  ;;  %v298_v32 = vld [vmem:[%s2861_s1 + $0x8b8] sm:$0xff]  ;;  %v297_v34 = vld [vmem:[%s2861_s1 + $0x8b0] sm:$0xff] }
  0xcb   :  { %1074 = vmatprep.subr.mxu1 %v462_v10  ;;  %1004 = vmatpush1.msra.mxu0 %v333_v56  ;;  %v426_v33 = vld [vmem:[%s2861_s1 + $0xcb8] sm:$0xff]  ;;  %v425_v35 = vld [vmem:[%s2861_s1 + $0xcb0] sm:$0xff] }
  0xcc   :  { %1075 = vmatpush1.msra.mxu1 %v461_v62  ;;  %1005 = vmatprep.subr.mxu0 %v330_v1  ;;  %v294_v36 = vld [vmem:[%s2861_s1 + $0x898] sm:$0xff]  ;;  %v293_v38 = vld [vmem:[%s2861_s1 + $0x890] sm:$0xff] }
  0xcd   :  { %1076 = vmatprep.subr.mxu1 %v458_v57  ;;  %1006 = vmatpush1.msra.mxu0 %v329_v58  ;;  %v422_v37 = vld [vmem:[%s2861_s1 + $0xc98] sm:$0xff]  ;;  %v421_v39 = vld [vmem:[%s2861_s1 + $0xc90] sm:$0xff] }
  0xce   :  { %1077 = vmatpush1.msra.mxu1 %v457_v59  ;;  %1007 = vmatprep.subr.mxu0 %v326_v60  ;;  %v290_v40 = vld [vmem:[%s2861_s1 + $0x878] sm:$0xff]  ;;  %v289_v43 = vld [vmem:[%s2861_s1 + $0x870] sm:$0xff] }
  0xcf   :  { %1078 = vmatprep.subr.mxu1 %v454_v61  ;;  %1008 = vmatpush1.msra.mxu0 %v325_v63  ;;  %v418_v41 = vld [vmem:[%s2861_s1 + $0xc78] sm:$0xff]  ;;  %v417_v44 = vld [vmem:[%s2861_s1 + $0xc70] sm:$0xff] }
  0xd0   :  { %1079 = vmatpush1.msra.mxu1 %v453_v0  ;;  %1009 = vmatprep.subr.mxu0 %v322_v2  ;;  %v286_v45 = vld [vmem:[%s2861_s1 + $0x858] sm:$0xff]  ;;  %v285_v47 = vld [vmem:[%s2861_s1 + $0x850] sm:$0xff] }
  0xd1   :  { %1080 = vmatprep.subr.mxu1 %v450_v3  ;;  %1010 = vmatpush1.msra.mxu0 %v321_v4  ;;  %v414_v46 = vld [vmem:[%s2861_s1 + $0xc58] sm:$0xff]  ;;  %v413_v48 = vld [vmem:[%s2861_s1 + $0xc50] sm:$0xff] }
  0xd2   :  { %1081 = vmatpush1.msra.mxu1 %v449_v5  ;;  %1011 = vmatprep.subr.mxu0 %v318_v6  ;;  %v282_v49 = vld [vmem:[%s2861_s1 + $0x838] sm:$0xff]  ;;  %v281_v51 = vld [vmem:[%s2861_s1 + $0x830] sm:$0xff] }
  0xd3   :  { %1082 = vmatprep.subr.mxu1 %v446_v7  ;;  %1012 = vmatpush1.msra.mxu0 %v317_v9  ;;  %v410_v50 = vld [vmem:[%s2861_s1 + $0xc38] sm:$0xff]  ;;  %v409_v53 = vld [vmem:[%s2861_s1 + $0xc30] sm:$0xff] }
  0xd4   :  { %1083 = vmatpush1.msra.mxu1 %v445_v11  ;;  %1013 = vmatprep.subr.mxu0 %v314_v12  ;;  %v278_v54 = vld [vmem:[%s2861_s1 + $0x818] sm:$0xff]  ;;  %v277_v8 = vld [vmem:[%s2861_s1 + $0x810] sm:$0xff] }
  0xd5   :  { %1084 = vmatprep.subr.mxu1 %v442_v13  ;;  %1014 = vmatpush1.msra.mxu0 %v313_v14  ;;  %v406_v55 = vld [vmem:[%s2861_s1 + $0xc18] sm:$0xff]  ;;  %v405_v10 = vld [vmem:[%s2861_s1 + $0xc10] sm:$0xff] }
  0xd6   :  { %1085 = vmatpush1.msra.mxu1 %v441_v15  ;;  %1015 = vmatprep.subr.mxu0 %v310_v17  ;;  %v402_v56 = vld [vmem:[%s2861_s1 + $0xbf8] sm:$0xff]  ;;  %v401_v1 = vld [vmem:[%s2861_s1 + $0xbf0] sm:$0xff] }
  0xd7   :  { %1086 = vmatprep.subr.mxu1 %v438_v18  ;;  %1016 = vmatpush1.msra.mxu0 %v309_v19  ;;  %v530_v62 = vld [vmem:[%s2861_s1 + $0xff8] sm:$0xff]  ;;  %v529_v57 = vld [vmem:[%s2861_s1 + $0xff0] sm:$0xff] }
  0xd8   :  { %1087 = vmatpush1.msra.mxu1 %v437_v20  ;;  %1017 = vmatprep.subr.mxu0 %v306_v22  ;;  %v398_v58 = vld [vmem:[%s2861_s1 + $0xbd8] sm:$0xff]  ;;  %v397_v60 = vld [vmem:[%s2861_s1 + $0xbd0] sm:$0xff] }
  0xd9   :  { %1088 = vmatprep.subr.mxu1 %v434_v23  ;;  %1018 = vmatpush1.msra.mxu0 %v305_v24  ;;  %v526_v59 = vld [vmem:[%s2861_s1 + $0xfd8] sm:$0xff]  ;;  %v525_v61 = vld [vmem:[%s2861_s1 + $0xfd0] sm:$0xff] }
  0xda   :  { %1089 = vmatpush1.msra.mxu1 %v433_v25  ;;  %1019 = vmatprep.subr.mxu0 %v302_v27  ;;  %v394_v63 = vld [vmem:[%s2861_s1 + $0xbb8] sm:$0xff]  ;;  %v393_v2 = vld [vmem:[%s2861_s1 + $0xbb0] sm:$0xff] }
  0xdb   :  { %1090 = vmatprep.subr.mxu1 %v430_v28  ;;  %1020 = vmatpush1.msra.mxu0 %v301_v30  ;;  %v522_v0 = vld [vmem:[%s2861_s1 + $0xfb8] sm:$0xff]  ;;  %v521_v3 = vld [vmem:[%s2861_s1 + $0xfb0] sm:$0xff] }
  0xdc   :  { %1091 = vmatpush1.msra.mxu1 %v429_v31  ;;  %1021 = vmatprep.subr.mxu0 %v298_v32  ;;  %v390_v4 = vld [vmem:[%s2861_s1 + $0xb98] sm:$0xff]  ;;  %v389_v6 = vld [vmem:[%s2861_s1 + $0xb90] sm:$0xff] }
  0xdd   :  { %1092 = vmatprep.subr.mxu1 %v426_v33  ;;  %1022 = vmatpush1.msra.mxu0 %v297_v34  ;;  %v518_v5 = vld [vmem:[%s2861_s1 + $0xf98] sm:$0xff]  ;;  %v517_v7 = vld [vmem:[%s2861_s1 + $0xf90] sm:$0xff] }
  0xde   :  { %1093 = vmatpush1.msra.mxu1 %v425_v35  ;;  %1023 = vmatprep.subr.mxu0 %v294_v36  ;;  %v386_v9 = vld [vmem:[%s2861_s1 + $0xb78] sm:$0xff]  ;;  %v385_v12 = vld [vmem:[%s2861_s1 + $0xb70] sm:$0xff] }
  0xdf   :  { %1094 = vmatprep.subr.mxu1 %v422_v37  ;;  %1024 = vmatpush1.msra.mxu0 %v293_v38  ;;  %v514_v11 = vld [vmem:[%s2861_s1 + $0xf78] sm:$0xff]  ;;  %v513_v13 = vld [vmem:[%s2861_s1 + $0xf70] sm:$0xff] }
  0xe0   :  { %1095 = vmatpush1.msra.mxu1 %v421_v39  ;;  %1025 = vmatprep.subr.mxu0 %v290_v40  ;;  %v382_v14 = vld [vmem:[%s2861_s1 + $0xb58] sm:$0xff]  ;;  %v381_v17 = vld [vmem:[%s2861_s1 + $0xb50] sm:$0xff] }
  0xe1   :  { %1096 = vmatprep.subr.mxu1 %v418_v41  ;;  %1026 = vmatpush1.msra.mxu0 %v289_v43  ;;  %v510_v15 = vld [vmem:[%s2861_s1 + $0xf58] sm:$0xff]  ;;  %v509_v18 = vld [vmem:[%s2861_s1 + $0xf50] sm:$0xff] }
  0xe2   :  { %1097 = vmatpush1.msra.mxu1 %v417_v44  ;;  %1027 = vmatprep.subr.mxu0 %v286_v45  ;;  %v378_v19 = vld [vmem:[%s2861_s1 + $0xb38] sm:$0xff]  ;;  %v377_v22 = vld [vmem:[%s2861_s1 + $0xb30] sm:$0xff] }
  0xe3   :  { %1098 = vmatprep.subr.mxu1 %v414_v46  ;;  %1028 = vmatpush1.msra.mxu0 %v285_v47  ;;  %v506_v20 = vld [vmem:[%s2861_s1 + $0xf38] sm:$0xff]  ;;  %v505_v23 = vld [vmem:[%s2861_s1 + $0xf30] sm:$0xff] }
  0xe4   :  { %1099 = vmatpush1.msra.mxu1 %v413_v48  ;;  %1029 = vmatprep.subr.mxu0 %v282_v49  ;;  %v374_v24 = vld [vmem:[%s2861_s1 + $0xb18] sm:$0xff]  ;;  %v373_v27 = vld [vmem:[%s2861_s1 + $0xb10] sm:$0xff] }
  0xe5   :  { %1100 = vmatprep.subr.mxu1 %v410_v50  ;;  %1030 = vmatpush1.msra.mxu0 %v281_v51  ;;  %v502_v25 = vld [vmem:[%s2861_s1 + $0xf18] sm:$0xff]  ;;  %v501_v28 = vld [vmem:[%s2861_s1 + $0xf10] sm:$0xff] }
  0xe6   :  { %1101 = vmatpush1.msra.mxu1 %v409_v53  ;;  %1031 = vmatprep.subr.mxu0 %v278_v54  ;;  %v370_v30 = vld [vmem:[%s2861_s1 + $0xaf8] sm:$0xff]  ;;  %v369_v32 = vld [vmem:[%s2861_s1 + $0xaf0] sm:$0xff] }
  0xe7   :  { %1102 = vmatprep.subr.mxu1 %v406_v55  ;;  %1032 = vmatpush1.msra.mxu0 %v277_v8  ;;  %v498_v31 = vld [vmem:[%s2861_s1 + $0xef8] sm:$0xff]  ;;  %v497_v33 = vld [vmem:[%s2861_s1 + $0xef0] sm:$0xff] }
  0xe8   :  { %1103 = vmatpush1.msra.mxu1 %v405_v10  ;;  %1033 = vmatprep.subr.mxu0 %v402_v56  ;;  %v366_v34 = vld [vmem:[%s2861_s1 + $0xad8] sm:$0xff]  ;;  %v365_v36 = vld [vmem:[%s2861_s1 + $0xad0] sm:$0xff] }
  0xe9   :  { %1104 = vmatprep.subr.mxu1 %v530_v62  ;;  %1034 = vmatpush2.msra.mxu0 %v401_v1  ;;  %v494_v35 = vld [vmem:[%s2861_s1 + $0xed8] sm:$0xff]  ;;  %v493_v37 = vld [vmem:[%s2861_s1 + $0xed0] sm:$0xff] }
  0xea   :  { %1105 = vmatpush2.msra.mxu1 %v529_v57  ;;  %1035 = vmatprep.subr.mxu0 %v398_v58  ;;  %v362_v38 = vld [vmem:[%s2861_s1 + $0xab8] sm:$0xff]  ;;  %v361_v40 = vld [vmem:[%s2861_s1 + $0xab0] sm:$0xff] }
  0xeb   :  { %1106 = vmatprep.subr.mxu1 %v526_v59  ;;  %1036 = vmatpush2.msra.mxu0 %v397_v60  ;;  %v490_v39 = vld [vmem:[%s2861_s1 + $0xeb8] sm:$0xff]  ;;  %v489_v41 = vld [vmem:[%s2861_s1 + $0xeb0] sm:$0xff] }
  0xec   :  { %1107 = vmatpush2.msra.mxu1 %v525_v61  ;;  %1037 = vmatprep.subr.mxu0 %v394_v63  ;;  %v358_v43 = vld [vmem:[%s2861_s1 + $0xa98] sm:$0xff]  ;;  %v357_v45 = vld [vmem:[%s2861_s1 + $0xa90] sm:$0xff] }
  0xed   :  { %1108 = vmatprep.subr.mxu1 %v522_v0  ;;  %1038 = vmatpush2.msra.mxu0 %v393_v2  ;;  %v486_v44 = vld [vmem:[%s2861_s1 + $0xe98] sm:$0xff]  ;;  %v485_v46 = vld [vmem:[%s2861_s1 + $0xe90] sm:$0xff] }
  0xee   :  { %1109 = vmatpush2.msra.mxu1 %v521_v3  ;;  %1039 = vmatprep.subr.mxu0 %v390_v4  ;;  %v354_v47 = vld [vmem:[%s2861_s1 + $0xa78] sm:$0xff]  ;;  %v353_v49 = vld [vmem:[%s2861_s1 + $0xa70] sm:$0xff] }
  0xef   :  { %1110 = vmatprep.subr.mxu1 %v518_v5  ;;  %1040 = vmatpush2.msra.mxu0 %v389_v6  ;;  %v482_v48 = vld [vmem:[%s2861_s1 + $0xe78] sm:$0xff]  ;;  %v481_v50 = vld [vmem:[%s2861_s1 + $0xe70] sm:$0xff] }
  0xf0   :  { %1111 = vmatpush2.msra.mxu1 %v517_v7  ;;  %1041 = vmatprep.subr.mxu0 %v386_v9  ;;  %v350_v51 = vld [vmem:[%s2861_s1 + $0xa58] sm:$0xff]  ;;  %v349_v54 = vld [vmem:[%s2861_s1 + $0xa50] sm:$0xff]  ;;  %v1151_v7 = vsub.s32 1, %v1561_v42 }
  0xf1   :  { %1112 = vmatprep.subr.mxu1 %v514_v11  ;;  %1042 = vmatpush2.msra.mxu0 %v385_v12  ;;  %v478_v53 = vld [vmem:[%s2861_s1 + $0xe58] sm:$0xff]  ;;  %v477_v55 = vld [vmem:[%s2861_s1 + $0xe50] sm:$0xff] }
  0xf2   :  { %1113 = vmatpush2.msra.mxu1 %v513_v13  ;;  %1043 = vmatprep.subr.mxu0 %v382_v14  ;;  %v346_v8 = vld [vmem:[%s2861_s1 + $0xa38] sm:$0xff]  ;;  %v345_v56 = vld [vmem:[%s2861_s1 + $0xa30] sm:$0xff] }
  0xf3   :  { %1114 = vmatprep.subr.mxu1 %v510_v15  ;;  %1044 = vmatpush2.msra.mxu0 %v381_v17  ;;  %v474_v10 = vld [vmem:[%s2861_s1 + $0xe38] sm:$0xff]  ;;  %v473_v62 = vld [vmem:[%s2861_s1 + $0xe30] sm:$0xff] }
  0xf4   :  { %1115 = vmatpush2.msra.mxu1 %v509_v18  ;;  %1045 = vmatprep.subr.mxu0 %v378_v19  ;;  %v342_v1 = vld [vmem:[%s2861_s1 + $0xa18] sm:$0xff]  ;;  %v341_v58 = vld [vmem:[%s2861_s1 + $0xa10] sm:$0xff]  ;;  %v1169_v18 = vld [vmem:[%s2864_s3] sm:$0xf]  ;;  %v1155_v19 = vsub.s32 2, %v1561_v42 }
  0xf5   :  { %1116 = vmatprep.subr.mxu1 %v506_v20  ;;  %1046 = vmatpush2.msra.mxu0 %v377_v22  ;;  %v470_v57 = vld [vmem:[%s2861_s1 + $0xe18] sm:$0xff]  ;;  %v469_v59 = vld [vmem:[%s2861_s1 + $0xe10] sm:$0xff]  ;;  %v1178_v22 = vrot.slane %v1169_v18, %v1151_v7 }
  0xf6   :  { %1117 = vmatpush2.msra.mxu1 %v505_v23  ;;  %1047 = vmatprep.subr.mxu0 %v374_v24 }
  0xf7   :  { %1118 = vmatprep.subr.mxu1 %v502_v25  ;;  %1048 = vmatpush2.msra.mxu0 %v373_v27  ;;  %v1159_v27 = vsub.s32 3, %v1561_v42 }
  0xf8   :  { %1119 = vmatpush2.msra.mxu1 %v501_v28  ;;  %1049 = vmatprep.subr.mxu0 %v370_v30 }
  0xf9   :  { %1120 = vmatprep.subr.mxu1 %v498_v31  ;;  %1050 = vmatpush2.msra.mxu0 %v369_v32 }
  0xfa   :  { %1121 = vmatpush2.msra.mxu1 %v497_v33  ;;  %1051 = vmatprep.subr.mxu0 %v366_v34 }
  0xfb   :  { %1122 = vmatprep.subr.mxu1 %v494_v35  ;;  %1052 = vmatpush2.msra.mxu0 %v365_v36 }
  0xfc   :  { %1123 = vmatpush2.msra.mxu1 %v493_v37  ;;  %1053 = vmatprep.subr.mxu0 %v362_v38 }
  0xfd   :  { %1124 = vmatprep.subr.mxu1 %v490_v39  ;;  %1054 = vmatpush2.msra.mxu0 %v361_v40  ;;  %v1182_v39 = vrot.slane %v1169_v18, %v1155_v19 }
  0xfe   :  { %1125 = vmatpush2.msra.mxu1 %v489_v41  ;;  %1055 = vmatprep.subr.mxu0 %v358_v43 }
  0xff   :  { %1126 = vmatprep.subr.mxu1 %v486_v44  ;;  %1056 = vmatpush2.msra.mxu0 %v357_v45 }
 0x100   :  { %1127 = vmatpush2.msra.mxu1 %v485_v46  ;;  %1057 = vmatprep.subr.mxu0 %v354_v47  ;;  %v1186_v47 = vrot.slane %v1169_v18, %v1159_v27 }
 0x101   :  { %1128 = vmatprep.subr.mxu1 %v482_v48  ;;  %1058 = vmatpush2.msra.mxu0 %v353_v49 }
 0x102   :  { %1129 = vmatpush2.msra.mxu1 %v481_v50  ;;  %1059 = vmatprep.subr.mxu0 %v350_v51 }
 0x103   :  { %1130 = vmatprep.subr.mxu1 %v478_v53  ;;  %1060 = vmatpush2.msra.mxu0 %v349_v54  ;;  %v641_v60 = vpop.f32.mrf.mxu0 }
 0x104   :  { %1131 = vmatpush2.msra.mxu1 %v477_v55  ;;  %1061 = vmatprep.subr.mxu0 %v346_v8  ;;  %v712_v61 = vpop.f32.mrf.mxu1 }
 0x105   :  { %1132 = vmatprep.subr.mxu1 %v474_v10  ;;  %1062 = vmatpush2.msra.mxu0 %v345_v56  ;;  %v643_v63 = vpop.f32.mrf.mxu0  ;;  %v713_v9 = vadd.f32 %v712_v61, %v641_v60 }
 0x106   :  { %1133 = vmatpush2.msra.mxu1 %v473_v62  ;;  %1063 = vmatprep.subr.mxu0 %v342_v1  ;;  %v714_v2 = vpop.f32.mrf.mxu1 }
 0x107   :  { %1134 = vmatprep.subr.mxu1 %v470_v57  ;;  %1064 = vmatpush2.msra.mxu0 %v341_v58  ;;  %v715_v5 = vadd.f32 %v714_v2, %v643_v63 }
 0x108   :  { %1065 = vmatprep.mubr.f32.mxu0 %v2054_v26  ;;  %1135 = vmatpush2.msra.mxu1 %v469_v59 }
 0x109   :  { %1136 = vmatprep.mubr.f32.mxu1 %v2064_v29  ;;  %1066 = vmatmul.mubr.f32.vlgmr.msra.gmra.mxu0 %v2023_v16  ;;  %v1143_v16 = vld [vmem:[%s2863_s2] sm:$0xf] }
 0x10a   :  { %1137 = vmatmul.mubr.f32.vlgmr.msra.gmra.mxu1 %v2038_v21  ;;  %v1147_v21 = vsub.s32 0, %v1561_v42  ;;  %v1152_v12 = vrot.slane %v1143_v16, %v1151_v7  ;;  %v1156_v35 = vrot.slane %v1143_v16, %v1155_v19  ;;  %v1160_v41 = vrot.slane %v1143_v16, %v1159_v27 }
 0x10c   :  { %v1148_v17 = vrot.slane %v1143_v16, %v1147_v21  ;;  %v1174_v28 = vrot.slane %v1169_v18, %v1147_v21 }
 0x145   :  { %v783_v0 = vpop.f32.mrf.mxu0 }
 0x146   :  { %v784_v11 = vadd.f32 %v783_v0, %v713_v9 }
 0x147   :  { %v854_v3 = vpop.f32.mrf.mxu1  ;;  %v785_v4 = vpop.f32.mrf.mxu0 }
 0x148   :  { %v786_v6 = vadd.f32 %v785_v4, %v715_v5  ;;  %v855_v15 = vadd.f32 %v854_v3, %v784_v11 }
 0x149   :  { %v856_v26 = vpop.f32.mrf.mxu1 }
 0x14a   :  { %v857_v29 = vadd.f32 %v856_v26, %v786_v6  ;;  %v1165_v32 = vmul.f32 %v1148_v17, %v855_v15 }
 0x14c   :  { %v1166_v20 = vmul.f32 %v1152_v12, %v857_v29  ;;  %v1191_v44 = vadd.f32 %v1174_v28, %v1165_v32 }
 0x14e   :  { %v1192_v36 = vadd.f32 %v1178_v22, %v1166_v20  ;;  %v1195_v50 = vmax.f32 %v1191_v44, 0.0 }
 0x150   :  { %v1196_v48 = vmax.f32 %v1192_v36, 0.0 }
 0x152   :  { %v1203_v53 = vcombine.low %v1195_v50, %v1196_v48 }
 0x154   :  { %v1211_v10 = vrot.slane %v1203_v53, %v1591_v52 }
 0x187   :  { %v925_v13 = vpop.f32.mrf.mxu0 }
 0x188   :  { %v996_v14 = vpop.f32.mrf.mxu1 }
 0x189   :  { %v927_v23 = vpop.f32.mrf.mxu0  ;;  %v997_v25 = vadd.f32 %v996_v14, %v925_v13 }
 0x18a   :  { %v998_v24 = vpop.f32.mrf.mxu1 }
 0x18b   :  { %v999_v33 = vadd.f32 %v998_v24, %v927_v23 }
 0x1c9   :  { %v1067_v30 = vpop.f32.mrf.mxu0 }
 0x1ca   :  { %v1138_v31 = vpop.f32.mrf.mxu1  ;;  %v1068_v34 = vadd.f32 %v1067_v30, %v997_v25 }
 0x1cb   :  { %v1069_v37 = vpop.f32.mrf.mxu0 }
 0x1cc   :  { %v1139_v38 = vadd.f32 %v1138_v31, %v1068_v34  ;;  %v1070_v40 = vadd.f32 %v1069_v37, %v999_v33  ;;  %v1140_v43 = vpop.f32.mrf.mxu1 }
 0x1ce   :  { %v1167_v45 = vmul.f32 %v1156_v35, %v1139_v38  ;;  %v1141_v46 = vadd.f32 %v1140_v43, %v1070_v40 }
 0x1d0   :  { %v1193_v42 = vadd.f32 %v1182_v39, %v1167_v45  ;;  %v1168_v49 = vmul.f32 %v1160_v41, %v1141_v46 }
 0x1d2   :  { %v1194_v51 = vadd.f32 %v1186_v47, %v1168_v49  ;;  %v1197_v54 = vmax.f32 %v1193_v42, 0.0 }
 0x1d4   :  { %v1198_v55 = vmax.f32 %v1194_v51, 0.0 }
 0x1d6   :  { %v1204_v8 = vcombine.low %v1197_v54, %v1198_v55 }
 0x1d8   :  { %v1218_v56 = vrot.slane %v1204_v8, %v1591_v52 }
 0x1da   :  { %v1219_v62 = vcombine.low %v1211_v10, %v1218_v56 }
 0x1dc   :  { %1221 = vst [vmem:[%s2865_s4] sm:$0xff] %v1219_v62 }

// kernel: pointnet_gem_forward.18
= control target key start
LH: loop header
LB: loop body
LE: loop exit
PB: predicated region body
PF: predicated region fallthrough
CT: control target
= control target key end

     0   :  { %s566_s9 = smov 0   ;;  %s662_s0 = inlined_call_operand.vmem [shape: f32[2,128,3], index: 0, kind: input, shape index: {}]   ;;  %s663_s1 = inlined_call_operand.vmem [shape: f32[2,3,3], index: 1, kind: input, shape index: {}]   ;;  %s664_s2 = inlined_call_operand.vmem [shape: f32[2,128,3], index: 2, kind: output, shape index: {}]  }
   0x1 LB: > { %s459_s10 = sadd.s32 4294967295, %s549_s9   ;;  %p463_p0 = scmp.ge.s32.totalorder %s549_s9, 1  ;;  %s549_s9 = sphi %s566_s9, %s12_s9  }
   0x2   : > { %p121_p1 = scmp.lt.s32.totalorder %s549_s9, 3 }
   0x4   : > { %p122_p2 = pnand %p463_p0, %p121_p1 }
   0x5   : > { %p147_p3 = scmp.lt.s32.totalorder (!%p122_p2), %s459_s10, 1 }
   0x6   : > { %125 = sbr.rel (%p122_p2) target bundleno = 226 (0xe2), region = 28 }
   0xb   : > { %s666_s10 = smov (!%p147_p3, %s459_s10), 1  ;;  %vm227_vm0 = vcmask 1042432   ;;  %vm178_vm1 = vcmask 23552  }
   0xc   : > { %s488_s11 = sshll.u32 %s666_s10, 7  ;;  %s466_s12 = sshll.u32 %s666_s10, 2 }
   0xd   : > { %s583_s15 = scalar_lea.vmem %s662_s0, %s488_s11  ;;  %s155_s18 = scalar_lea.vmem %s663_s1, %s466_s12 }
   0xe   : > { %v177_v0 = vld [vmem:[%s155_s18] sm:$0x7]  ;;  %v162_v3 = vld [vmem:[%s583_s15 + $0x8] sm:$0xff]  ;;  %v163_v5 = vld [vmem:[%s583_s15 + $0x10] sm:$0xff]  ;;  %s625_s21 = scalar_lea.vmem %s664_s2, %s488_s11 }
   0xf   : > { %v161_v1 = vld [vmem:[%s583_s15] sm:$0xff]  ;;  %507 = vmatprep.subr.msk.mxu0 %vm227_vm0, %v177_v0  ;;  %533 = vmatprep.subr.msk.mxu1 %vm227_vm0, %v177_v0  ;;  %v170_v4 = vld [vmem:[%s583_s15 + $0x48] sm:$0xff]  ;;  %v171_v6 = vld [vmem:[%s583_s15 + $0x50] sm:$0xff] }
  0x10   : > { %v169_v2 = vld [vmem:[%s583_s15 + $0x40] sm:$0xff]  ;;  %508 = vmatpush3.msk.msra.mxu0 %vm227_vm0, %v177_v0  ;;  %534 = vmatpush3.msk.msra.mxu1 %vm227_vm0, %v177_v0  ;;  %v164_v7 = vld [vmem:[%s583_s15 + $0x18] sm:$0xff]  ;;  %v166_v11 = vld [vmem:[%s583_s15 + $0x28] sm:$0xff] }
  0x11   : > { %509 = vmatprep.mubr.msk.f32.mxu0 %vm178_vm1, %v161_v1  ;;  %521 = vmatprep.mubr.msk.f32.mxu1 %vm178_vm1, %v169_v2  ;;  %v172_v8 = vld [vmem:[%s583_s15 + $0x58] sm:$0xff]  ;;  %v165_v9 = vld [vmem:[%s583_s15 + $0x20] sm:$0xff]  ;;  %v174_v12 = vld [vmem:[%s583_s15 + $0x68] sm:$0xff] }
  0x12   : > { %510 = vmatmul.mubr.msk.f32.vlgmr.msra.gmra.mxu0 %vm178_vm1, %v162_v3  ;;  %522 = vmatmul.mubr.msk.f32.vlgmr.msra.gmra.mxu1 %vm178_vm1, %v170_v4  ;;  %v173_v10 = vld [vmem:[%s583_s15 + $0x60] sm:$0xff]  ;;  %v167_v13 = vld [vmem:[%s583_s15 + $0x30] sm:$0xff]  ;;  %v168_v15 = vld [vmem:[%s583_s15 + $0x38] sm:$0xff] }
  0x13   : > { %512 = vmatprep.mubr.msk.f32.mxu0 %vm178_vm1, %v163_v5  ;;  %524 = vmatprep.mubr.msk.f32.mxu1 %vm178_vm1, %v171_v6  ;;  %v175_v14 = vld [vmem:[%s583_s15 + $0x70] sm:$0xff]  ;;  %v176_v16 = vld [vmem:[%s583_s15 + $0x78] sm:$0xff] }
  0x16   : > { %513 = vmatmul.mubr.msk.f32.gmra.mxu0 %vm178_vm1, %v164_v7  ;;  %525 = vmatmul.mubr.msk.f32.gmra.mxu1 %vm178_vm1, %v172_v8 }
  0x17   : > { %515 = vmatprep.mubr.msk.f32.mxu0 %vm178_vm1, %v165_v9  ;;  %527 = vmatprep.mubr.msk.f32.mxu1 %vm178_vm1, %v173_v10 }
  0x1a   : > { %516 = vmatmul.mubr.msk.f32.gmra.mxu0 %vm178_vm1, %v166_v11  ;;  %528 = vmatmul.mubr.msk.f32.gmra.mxu1 %vm178_vm1, %v174_v12 }
  0x1b   : > { %518 = vmatprep.mubr.msk.f32.mxu0 %vm178_vm1, %v167_v13  ;;  %530 = vmatprep.mubr.msk.f32.mxu1 %vm178_vm1, %v175_v14 }
  0x1e   : > { %519 = vmatmul.mubr.msk.f32.gmra.mxu0 %vm178_vm1, %v168_v15  ;;  %531 = vmatmul.mubr.msk.f32.gmra.mxu1 %vm178_vm1, %v176_v16 }
  0xd2   : > { %v511_v17 = vpop.f32.mrf.mxu0  ;;  %v523_v18 = vpop.f32.mrf.mxu1 }
  0xd3   : > { %377 = vst.msk [vmem:[%s625_s21 + $0x8] sm:$0xff] %vm178_vm1, %v511_v17  ;;  %385 = vst.msk [vmem:[%s625_s21 + $0x48] sm:$0xff] %vm178_vm1, %v523_v18 }
  0xd4   : > { %v297_v19 = vpop.f32.mrf.mxu0  ;;  %v337_v20 = vpop.f32.mrf.mxu1 }
  0xd5   : > { %376 = vst.msk [vmem:[%s625_s21] sm:$0xff] %vm178_vm1, %v297_v19  ;;  %384 = vst.msk [vmem:[%s625_s21 + $0x40] sm:$0xff] %vm178_vm1, %v337_v20 }
  0xd6   : > { %v514_v21 = vpop.f32.mrf.mxu0  ;;  %v526_v22 = vpop.f32.mrf.mxu1 }
  0xd7   : > { %379 = vst.msk [vmem:[%s625_s21 + $0x18] sm:$0xff] %vm178_vm1, %v514_v21  ;;  %387 = vst.msk [vmem:[%s625_s21 + $0x58] sm:$0xff] %vm178_vm1, %v526_v22 }
  0xd8   : > { %v307_v23 = vpop.f32.mrf.mxu0  ;;  %v347_v24 = vpop.f32.mrf.mxu1 }
  0xd9   : > { %378 = vst.msk [vmem:[%s625_s21 + $0x10] sm:$0xff] %vm178_vm1, %v307_v23  ;;  %386 = vst.msk [vmem:[%s625_s21 + $0x50] sm:$0xff] %vm178_vm1, %v347_v24 }
  0xda   : > { %v517_v25 = vpop.f32.mrf.mxu0  ;;  %v529_v26 = vpop.f32.mrf.mxu1 }
  0xdb   : > { %381 = vst.msk [vmem:[%s625_s21 + $0x28] sm:$0xff] %vm178_vm1, %v517_v25  ;;  %389 = vst.msk [vmem:[%s625_s21 + $0x68] sm:$0xff] %vm178_vm1, %v529_v26 }
  0xdc   : > { %v317_v27 = vpop.f32.mrf.mxu0  ;;  %v357_v28 = vpop.f32.mrf.mxu1 }
  0xdd   : > { %380 = vst.msk [vmem:[%s625_s21 + $0x20] sm:$0xff] %vm178_vm1, %v317_v27  ;;  %388 = vst.msk [vmem:[%s625_s21 + $0x60] sm:$0xff] %vm178_vm1, %v357_v28 }
  0xde   : > { %v520_v29 = vpop.f32.mrf.mxu0  ;;  %v532_v30 = vpop.f32.mrf.mxu1 }
  0xdf   : > { %383 = vst.msk [vmem:[%s625_s21 + $0x38] sm:$0xff] %vm178_vm1, %v520_v29  ;;  %391 = vst.msk [vmem:[%s625_s21 + $0x78] sm:$0xff] %vm178_vm1, %v532_v30 }
  0xe0   : > { %v327_v31 = vpop.f32.mrf.mxu0  ;;  %v367_v32 = vpop.f32.mrf.mxu1 }
  0xe1   : > { %382 = vst.msk [vmem:[%s625_s21 + $0x30] sm:$0xff] %vm178_vm1, %v327_v31  ;;  %390 = vst.msk [vmem:[%s625_s21 + $0x70] sm:$0xff] %vm178_vm1, %v367_v32 }
  0xe2 PF: > { %s12_s9 = sadd.s32 1, %s549_s9  }
  0xe3   : > { %p9_p4 = scmp.ge.s32.totalorder %s12_s9, 4  }
  0xe5   :  { %11 = sbr.rel (!%p9_p4) target bundleno = 1 (0x1), region = 61 }

// kernel: pointnet_gem_forward.19
= control target key start
LH: loop header
LB: loop body
LE: loop exit
PB: predicated region body
PF: predicated region fallthrough
CT: control target
= control target key end

     0   :  { %s667_s15 = smov 0   ;;  %s786_s0 = inlined_call_operand.vmem [shape: f32[256,3], index: 0, kind: input, shape index: {}]   ;;  %s787_s1 = inlined_call_operand.vmem [shape: f32[3,64], index: 1, kind: input, shape index: {}]   ;;  %s788_s2 = inlined_call_operand.vmem [shape: f32[1,64], index: 2, kind: input, shape index: {}]   ;;  %s789_s3 = inlined_call_operand.vmem [shape: f32[1,64], index: 3, kind: input, shape index: {}]   ;;  %s790_s4 = inlined_call_operand.vmem [shape: f32[256,64], index: 4, kind: output, shape index: {}]  }
   0x1 LB: > { %s551_s16 = sadd.s32 4294967295, %s640_s15   ;;  %p555_p0 = scmp.ge.s32.totalorder %s640_s15, 1  ;;  %s640_s15 = sphi %s667_s15, %s14_s15  }
   0x2   : > { %p163_p1 = scmp.lt.s32.totalorder %s640_s15, 3 }
   0x4   : > { %p164_p2 = pnand %p555_p0, %p163_p1 }
   0x5   : > { %s556_s19 = sshll.u32 (!%p164_p2), %s551_s16, 4 }
   0x6   : > { %167 = sbr.rel (%p164_p2) target bundleno = 231 (0xe7), region = 36  ;;  %p190_p3 = scmp.lt.s32.totalorder (!%p164_p2), %s556_s19, 31 }
   0xb   : > { %v217_v0 = vld [vmem:[%s787_s1] sm:$0x7]  ;;  %vm267_vm0 = vcmask 1042432   ;;  %s792_s19 = smov (!%p190_p3, %s556_s19), 31  ;;  %vm218_vm1 = vcmask 23552   ;;  %vm478_vm2 = vcmask 523264  }
   0xc   : > { %598 = vmatprep.subr.msk.mxu0 %vm267_vm0, %v217_v0  ;;  %624 = vmatprep.subr.msk.mxu1 %vm267_vm0, %v217_v0  ;;  %s557_s20 = sshll.u32 %s792_s19, 3  ;;  %v705_v17 = vld [vmem:[%s788_s2] ss:$0 sm:$0xff] }
   0xd   : > { %599 = vmatpush3.msk.msra.mxu0 %vm267_vm0, %v217_v0  ;;  %625 = vmatpush3.msk.msra.mxu1 %vm267_vm0, %v217_v0  ;;  %s193_s23 = scalar_lea.vmem %s786_s0, %s557_s20  ;;  %v710_v19 = vld [vmem:[%s789_s3] ss:$0 sm:$0xff]  ;;  %s723_s30 = scalar_lea.vmem %s790_s4, %s557_s20 }
   0xe   : > { %v201_v1 = vld [vmem:[%s193_s23] sm:$0xff]  ;;  %v202_v3 = vld [vmem:[%s193_s23 + $0x8] sm:$0xff]  ;;  %v203_v5 = vld [vmem:[%s193_s23 + $0x10] sm:$0xff] }
   0xf   : > { %v209_v2 = vld [vmem:[%s193_s23 + $0x40] sm:$0xff]  ;;  %600 = vmatprep.mubr.msk.f32.mxu0 %vm218_vm1, %v201_v1  ;;  %v210_v4 = vld [vmem:[%s193_s23 + $0x48] sm:$0xff]  ;;  %v211_v6 = vld [vmem:[%s193_s23 + $0x50] sm:$0xff] }
  0x10   : > { %612 = vmatprep.mubr.msk.f32.mxu1 %vm218_vm1, %v209_v2  ;;  %601 = vmatmul.mubr.msk.f32.vlgmr.msra.gmra.mxu0 %vm218_vm1, %v202_v3  ;;  %v204_v7 = vld [vmem:[%s193_s23 + $0x18] sm:$0xff]  ;;  %v205_v9 = vld [vmem:[%s193_s23 + $0x20] sm:$0xff]  ;;  %v206_v11 = vld [vmem:[%s193_s23 + $0x28] sm:$0xff] }
  0x11   : > { %613 = vmatmul.mubr.msk.f32.vlgmr.msra.gmra.mxu1 %vm218_vm1, %v210_v4  ;;  %603 = vmatprep.mubr.msk.f32.mxu0 %vm218_vm1, %v203_v5  ;;  %v212_v8 = vld [vmem:[%s193_s23 + $0x58] sm:$0xff]  ;;  %v213_v10 = vld [vmem:[%s193_s23 + $0x60] sm:$0xff]  ;;  %v214_v12 = vld [vmem:[%s193_s23 + $0x68] sm:$0xff] }
  0x12   : > { %615 = vmatprep.mubr.msk.f32.mxu1 %vm218_vm1, %v211_v6  ;;  %v207_v13 = vld [vmem:[%s193_s23 + $0x30] sm:$0xff]  ;;  %v208_v15 = vld [vmem:[%s193_s23 + $0x38] sm:$0xff] }
  0x13   : > { %v215_v14 = vld [vmem:[%s193_s23 + $0x70] sm:$0xff]  ;;  %v216_v16 = vld [vmem:[%s193_s23 + $0x78] sm:$0xff] }
  0x14   : > { %604 = vmatmul.mubr.msk.f32.gmra.mxu0 %vm218_vm1, %v204_v7 }
  0x15   : > { %616 = vmatmul.mubr.msk.f32.gmra.mxu1 %vm218_vm1, %v212_v8  ;;  %606 = vmatprep.mubr.msk.f32.mxu0 %vm218_vm1, %v205_v9 }
  0x16   : > { %618 = vmatprep.mubr.msk.f32.mxu1 %vm218_vm1, %v213_v10 }
  0x18   : > { %607 = vmatmul.mubr.msk.f32.gmra.mxu0 %vm218_vm1, %v206_v11 }
  0x19   : > { %619 = vmatmul.mubr.msk.f32.gmra.mxu1 %vm218_vm1, %v214_v12  ;;  %609 = vmatprep.mubr.msk.f32.mxu0 %vm218_vm1, %v207_v13 }
  0x1a   : > { %621 = vmatprep.mubr.msk.f32.mxu1 %vm218_vm1, %v215_v14 }
  0x1c   : > { %610 = vmatmul.mubr.msk.f32.gmra.mxu0 %vm218_vm1, %v208_v15 }
  0x1d   : > { %622 = vmatmul.mubr.msk.f32.gmra.mxu1 %vm218_vm1, %v216_v16 }
  0xd0   : > { %v602_v18 = vpop.f32.mrf.mxu0 }
  0xd1   : > { %v614_v20 = vpop.f32.mrf.mxu1  ;;  %v424_v21 = vmul.f32 %v602_v18, %v705_v17 }
  0xd2   : > { %v432_v22 = vmul.f32 %v614_v20, %v705_v17  ;;  %v337_v23 = vpop.f32.mrf.mxu0 }
  0xd3   : > { %v377_v24 = vpop.f32.mrf.mxu1  ;;  %v447_v25 = vadd.f32 %v710_v19, %v424_v21  ;;  %v423_v27 = vmul.f32 %v705_v17, %v337_v23 }
  0xd4   : > { %v455_v26 = vadd.f32 %v710_v19, %v432_v22  ;;  %v431_v28 = vmul.f32 %v705_v17, %v377_v24  ;;  %v605_v29 = vpop.f32.mrf.mxu0 }
  0xd5   : > { %v617_v30 = vpop.f32.mrf.mxu1  ;;  %v463_v31 = vmax.f32 %v447_v25, 0.0  ;;  %v446_v33 = vadd.f32 %v710_v19, %v423_v27  ;;  %v426_v35 = vmul.f32 %v605_v29, %v705_v17 }
  0xd6   : > { %v471_v32 = vmax.f32 %v455_v26, 0.0  ;;  %v454_v34 = vadd.f32 %v710_v19, %v431_v28  ;;  %v434_v36 = vmul.f32 %v617_v30, %v705_v17  ;;  %v347_v37 = vpop.f32.mrf.mxu0 }
  0xd7   : > { %v387_v38 = vpop.f32.mrf.mxu1  ;;  %480 = vst.msk [vmem:[%s723_s30 + $0x8] sm:$0xff] %vm478_vm2, %v463_v31  ;;  %v462_v39 = vmax.f32 %v446_v33, 0.0  ;;  %v425_v41 = vmul.f32 %v705_v17, %v347_v37  ;;  %v449_v43 = vadd.f32 %v710_v19, %v426_v35 }
  0xd8   : > { %488 = vst.msk [vmem:[%s723_s30 + $0x48] sm:$0xff] %vm478_vm2, %v471_v32  ;;  %v470_v40 = vmax.f32 %v454_v34, 0.0  ;;  %v433_v42 = vmul.f32 %v705_v17, %v387_v38  ;;  %v457_v44 = vadd.f32 %v710_v19, %v434_v36  ;;  %v608_v45 = vpop.f32.mrf.mxu0 }
  0xd9   : > { %v620_v46 = vpop.f32.mrf.mxu1  ;;  %479 = vst.msk [vmem:[%s723_s30] sm:$0xff] %vm478_vm2, %v462_v39  ;;  %v448_v47 = vadd.f32 %v710_v19, %v425_v41  ;;  %v428_v49 = vmul.f32 %v608_v45, %v705_v17  ;;  %v465_v51 = vmax.f32 %v449_v43, 0.0 }
  0xda   : > { %487 = vst.msk [vmem:[%s723_s30 + $0x40] sm:$0xff] %vm478_vm2, %v470_v40  ;;  %v456_v48 = vadd.f32 %v710_v19, %v433_v42  ;;  %v436_v50 = vmul.f32 %v620_v46, %v705_v17  ;;  %v473_v52 = vmax.f32 %v457_v44, 0.0  ;;  %v357_v53 = vpop.f32.mrf.mxu0 }
  0xdb   : > { %v397_v54 = vpop.f32.mrf.mxu1  ;;  %v464_v55 = vmax.f32 %v448_v47, 0.0  ;;  %v451_v57 = vadd.f32 %v710_v19, %v428_v49  ;;  %482 = vst.msk [vmem:[%s723_s30 + $0x18] sm:$0xff] %vm478_vm2, %v465_v51  ;;  %v427_v59 = vmul.f32 %v705_v17, %v357_v53 }
  0xdc   : > { %v472_v56 = vmax.f32 %v456_v48, 0.0  ;;  %v459_v58 = vadd.f32 %v710_v19, %v436_v50  ;;  %490 = vst.msk [vmem:[%s723_s30 + $0x58] sm:$0xff] %vm478_vm2, %v473_v52  ;;  %v435_v60 = vmul.f32 %v705_v17, %v397_v54  ;;  %v611_v61 = vpop.f32.mrf.mxu0 }
  0xdd   : > { %v623_v62 = vpop.f32.mrf.mxu1  ;;  %481 = vst.msk [vmem:[%s723_s30 + $0x10] sm:$0xff] %vm478_vm2, %v464_v55  ;;  %v467_v63 = vmax.f32 %v451_v57, 0.0  ;;  %v430_v1 = vmul.f32 %v611_v61, %v705_v17  ;;  %v450_v3 = vadd.f32 %v710_v19, %v427_v59 }
  0xde   : > { %489 = vst.msk [vmem:[%s723_s30 + $0x50] sm:$0xff] %vm478_vm2, %v472_v56  ;;  %v475_v0 = vmax.f32 %v459_v58, 0.0  ;;  %v438_v2 = vmul.f32 %v623_v62, %v705_v17  ;;  %v458_v4 = vadd.f32 %v710_v19, %v435_v60  ;;  %v367_v5 = vpop.f32.mrf.mxu0 }
  0xdf   : > { %v407_v6 = vpop.f32.mrf.mxu1  ;;  %484 = vst.msk [vmem:[%s723_s30 + $0x28] sm:$0xff] %vm478_vm2, %v467_v63  ;;  %v453_v7 = vadd.f32 %v710_v19, %v430_v1  ;;  %v429_v9 = vmul.f32 %v705_v17, %v367_v5  ;;  %v466_v11 = vmax.f32 %v450_v3, 0.0 }
  0xe0   : > { %492 = vst.msk [vmem:[%s723_s30 + $0x68] sm:$0xff] %vm478_vm2, %v475_v0  ;;  %v461_v8 = vadd.f32 %v710_v19, %v438_v2  ;;  %v437_v10 = vmul.f32 %v705_v17, %v407_v6  ;;  %v474_v12 = vmax.f32 %v458_v4, 0.0 }
  0xe1   : > { %v469_v13 = vmax.f32 %v453_v7, 0.0  ;;  %v452_v15 = vadd.f32 %v710_v19, %v429_v9  ;;  %483 = vst.msk [vmem:[%s723_s30 + $0x20] sm:$0xff] %vm478_vm2, %v466_v11 }
  0xe2   : > { %v477_v14 = vmax.f32 %v461_v8, 0.0  ;;  %v460_v16 = vadd.f32 %v710_v19, %v437_v10  ;;  %491 = vst.msk [vmem:[%s723_s30 + $0x60] sm:$0xff] %vm478_vm2, %v474_v12 }
  0xe3   : > { %486 = vst.msk [vmem:[%s723_s30 + $0x38] sm:$0xff] %vm478_vm2, %v469_v13  ;;  %v468_v18 = vmax.f32 %v452_v15, 0.0 }
  0xe4   : > { %494 = vst.msk [vmem:[%s723_s30 + $0x78] sm:$0xff] %vm478_vm2, %v477_v14  ;;  %v476_v20 = vmax.f32 %v460_v16, 0.0 }
  0xe5   : > { %485 = vst.msk [vmem:[%s723_s30 + $0x30] sm:$0xff] %vm478_vm2, %v468_v18 }
  0xe6   : > { %493 = vst.msk [vmem:[%s723_s30 + $0x70] sm:$0xff] %vm478_vm2, %v476_v20 }
  0xe7 PF: > { %s14_s15 = sadd.s32 1, %s640_s15  }
  0xe8   : > { %p11_p4 = scmp.ge.s32.totalorder %s14_s15, 4  }
  0xea   :  { %13 = sbr.rel (!%p11_p4) target bundleno = 1 (0x1), region = 66 }

// kernel: pointnet_gem_forward.20
= control target key start
LH: loop header
LB: loop body
LE: loop exit
PB: predicated region body
PF: predicated region fallthrough
CT: control target
= control target key end

     0   :  { %s703_s15 = smov 0   ;;  %s861_s0 = inlined_call_operand.vmem [shape: f32[256,64], index: 0, kind: input, shape index: {}]   ;;  %s862_s1 = inlined_call_operand.vmem [shape: f32[64,64], index: 1, kind: input, shape index: {}]   ;;  %s863_s2 = inlined_call_operand.vmem [shape: f32[1,64], index: 2, kind: input, shape index: {}]   ;;  %s864_s3 = inlined_call_operand.vmem [shape: f32[1,64], index: 3, kind: input, shape index: {}]   ;;  %s865_s4 = inlined_call_operand.vmem [shape: f32[256,64], index: 4, kind: output, shape index: {}]  }
   0x1 LB: > { %s553_s16 = sadd.s32 4294967295, %s676_s15   ;;  %p557_p0 = scmp.ge.s32.totalorder %s676_s15, 1  ;;  %s676_s15 = sphi %s703_s15, %s14_s15  }
   0x2   : > { %p163_p1 = scmp.lt.s32.totalorder %s676_s15, 3 }
   0x4   : > { %p164_p2 = pnand %p557_p0, %p163_p1 }
   0x5   : > { %s558_s21 = sshll.u32 (!%p164_p2), %s553_s16, 4 }
   0x6   : > { %167 = sbr.rel (%p164_p2) target bundleno = 243 (0xf3), region = 36  ;;  %p190_p3 = scmp.lt.s32.totalorder (!%p164_p2), %s558_s21, 31 }
   0xb   : > { %v224_v0 = vld [vmem:[%s862_s1 + $0x38] sm:$0xff]  ;;  %v223_v1 = vld [vmem:[%s862_s1 + $0x30] sm:$0xff]  ;;  %v222_v2 = vld [vmem:[%s862_s1 + $0x28] sm:$0xff]  ;;  %s867_s21 = smov (!%p190_p3, %s558_s21), 31  ;;  %vm225_vm0 = vcmask 523264  }
   0xc   : > { %606 = vmatprep.subr.mxu0 %v224_v0  ;;  %646 = vmatprep.subr.mxu1 %v224_v0  ;;  %v221_v3 = vld [vmem:[%s862_s1 + $0x20] sm:$0xff]  ;;  %v220_v4 = vld [vmem:[%s862_s1 + $0x18] sm:$0xff]  ;;  %v219_v5 = vld [vmem:[%s862_s1 + $0x10] sm:$0xff]  ;;  %s559_s30 = sshll.u32 %s867_s21, 3 }
   0xd   : > { %607 = vmatpush3.msra.mxu0 %v224_v0  ;;  %654 = vmatpush3.msra.mxu1 %v224_v0  ;;  %v218_v6 = vld [vmem:[%s862_s1 + $0x8] sm:$0xff]  ;;  %s740_s9 = scalar_lea.vmem %s861_s0, %s559_s30  ;;  %v217_v7 = vld [vmem:[%s862_s1] sm:$0xff]  ;;  %s798_s19 = scalar_lea.vmem %s865_s4, %s559_s30 }
   0xe   : > { %608 = vmatprep.subr.mxu0 %v223_v1  ;;  %647 = vmatprep.subr.mxu1 %v223_v1  ;;  %v201_v8 = vld [vmem:[%s740_s9] sm:$0xff]  ;;  %v202_v10 = vld [vmem:[%s740_s9 + $0x8] sm:$0xff]  ;;  %v203_v12 = vld [vmem:[%s740_s9 + $0x10] sm:$0xff] }
   0xf   : > { %609 = vmatpush3.msra.mxu0 %v223_v1  ;;  %655 = vmatpush3.msra.mxu1 %v223_v1  ;;  %v209_v9 = vld [vmem:[%s740_s9 + $0x40] sm:$0xff]  ;;  %v210_v11 = vld [vmem:[%s740_s9 + $0x48] sm:$0xff]  ;;  %v211_v13 = vld [vmem:[%s740_s9 + $0x50] sm:$0xff] }
  0x10   : > { %610 = vmatprep.subr.mxu0 %v222_v2  ;;  %648 = vmatprep.subr.mxu1 %v222_v2  ;;  %v204_v14 = vld [vmem:[%s740_s9 + $0x18] sm:$0xff]  ;;  %v205_v16 = vld [vmem:[%s740_s9 + $0x20] sm:$0xff]  ;;  %v206_v18 = vld [vmem:[%s740_s9 + $0x28] sm:$0xff] }
  0x11   : > { %611 = vmatpush3.msra.mxu0 %v222_v2  ;;  %656 = vmatpush3.msra.mxu1 %v222_v2  ;;  %v212_v15 = vld [vmem:[%s740_s9 + $0x58] sm:$0xff]  ;;  %v213_v17 = vld [vmem:[%s740_s9 + $0x60] sm:$0xff]  ;;  %v214_v19 = vld [vmem:[%s740_s9 + $0x68] sm:$0xff] }
  0x12   : > { %612 = vmatprep.subr.mxu0 %v221_v3  ;;  %649 = vmatprep.subr.mxu1 %v221_v3  ;;  %v207_v20 = vld [vmem:[%s740_s9 + $0x30] sm:$0xff]  ;;  %v208_v22 = vld [vmem:[%s740_s9 + $0x38] sm:$0xff]  ;;  %v780_v24 = vld [vmem:[%s863_s2] ss:$0 sm:$0xff] }
  0x13   : > { %613 = vmatpush3.msra.mxu0 %v221_v3  ;;  %657 = vmatpush3.msra.mxu1 %v221_v3  ;;  %v215_v21 = vld [vmem:[%s740_s9 + $0x70] sm:$0xff]  ;;  %v216_v23 = vld [vmem:[%s740_s9 + $0x78] sm:$0xff]  ;;  %v785_v26 = vld [vmem:[%s864_s3] ss:$0 sm:$0xff] }
  0x14   : > { %614 = vmatprep.subr.mxu0 %v220_v4  ;;  %650 = vmatprep.subr.mxu1 %v220_v4 }
  0x15   : > { %615 = vmatpush3.msra.mxu0 %v220_v4  ;;  %658 = vmatpush3.msra.mxu1 %v220_v4 }
  0x16   : > { %616 = vmatprep.subr.mxu0 %v219_v5  ;;  %651 = vmatprep.subr.mxu1 %v219_v5 }
  0x17   : > { %617 = vmatpush3.msra.mxu0 %v219_v5  ;;  %659 = vmatpush3.msra.mxu1 %v219_v5 }
  0x18   : > { %618 = vmatprep.subr.mxu0 %v218_v6  ;;  %652 = vmatprep.subr.mxu1 %v218_v6 }
  0x19   : > { %619 = vmatpush3.msra.mxu0 %v218_v6  ;;  %660 = vmatpush3.msra.mxu1 %v218_v6 }
  0x1a   : > { %620 = vmatprep.subr.mxu0 %v217_v7  ;;  %653 = vmatprep.subr.mxu1 %v217_v7 }
  0x1b   : > { %621 = vmatpush3.msra.mxu0 %v217_v7  ;;  %661 = vmatpush3.msra.mxu1 %v217_v7 }
  0x1c   : > { %622 = vmatprep.mubr.msk.f32.mxu0 %vm225_vm0, %v201_v8  ;;  %634 = vmatprep.mubr.msk.f32.mxu1 %vm225_vm0, %v209_v9 }
  0x1d   : > { %623 = vmatmul.mubr.msk.f32.vlgmr.msra.gmra.mxu0 %vm225_vm0, %v202_v10  ;;  %635 = vmatmul.mubr.msk.f32.vlgmr.msra.gmra.mxu1 %vm225_vm0, %v210_v11 }
  0x1e   : > { %625 = vmatprep.mubr.msk.f32.mxu0 %vm225_vm0, %v203_v12  ;;  %637 = vmatprep.mubr.msk.f32.mxu1 %vm225_vm0, %v211_v13 }
  0x21   : > { %626 = vmatmul.mubr.msk.f32.gmra.mxu0 %vm225_vm0, %v204_v14  ;;  %638 = vmatmul.mubr.msk.f32.gmra.mxu1 %vm225_vm0, %v212_v15 }
  0x22   : > { %628 = vmatprep.mubr.msk.f32.mxu0 %vm225_vm0, %v205_v16  ;;  %640 = vmatprep.mubr.msk.f32.mxu1 %vm225_vm0, %v213_v17 }
  0x25   : > { %629 = vmatmul.mubr.msk.f32.gmra.mxu0 %vm225_vm0, %v206_v18  ;;  %641 = vmatmul.mubr.msk.f32.gmra.mxu1 %vm225_vm0, %v214_v19 }
  0x26   : > { %631 = vmatprep.mubr.msk.f32.mxu0 %vm225_vm0, %v207_v20  ;;  %643 = vmatprep.mubr.msk.f32.mxu1 %vm225_vm0, %v215_v21 }
  0x29   : > { %632 = vmatmul.mubr.msk.f32.gmra.mxu0 %vm225_vm0, %v208_v22  ;;  %644 = vmatmul.mubr.msk.f32.gmra.mxu1 %vm225_vm0, %v216_v23 }
  0xdd   : > { %v624_v25 = vpop.f32.mrf.mxu0  ;;  %v636_v27 = vpop.f32.mrf.mxu1 }
  0xde   : > { %v427_v28 = vmul.f32 %v624_v25, %v780_v24  ;;  %v435_v29 = vmul.f32 %v636_v27, %v780_v24 }
  0xdf   : > { %v340_v30 = vpop.f32.mrf.mxu0  ;;  %v380_v31 = vpop.f32.mrf.mxu1 }
  0xe0   : > { %v450_v32 = vadd.f32 %v785_v26, %v427_v28  ;;  %v458_v33 = vadd.f32 %v785_v26, %v435_v29  ;;  %v426_v34 = vmul.f32 %v780_v24, %v340_v30  ;;  %v434_v35 = vmul.f32 %v780_v24, %v380_v31 }
  0xe1   : > { %v627_v36 = vpop.f32.mrf.mxu0  ;;  %v639_v37 = vpop.f32.mrf.mxu1 }
  0xe2   : > { %v466_v38 = vmax.f32 %v450_v32, 0.0  ;;  %v474_v39 = vmax.f32 %v458_v33, 0.0  ;;  %v449_v40 = vadd.f32 %v785_v26, %v426_v34  ;;  %v457_v41 = vadd.f32 %v785_v26, %v434_v35 }
  0xe3   : > { %v429_v42 = vmul.f32 %v627_v36, %v780_v24  ;;  %v437_v43 = vmul.f32 %v639_v37, %v780_v24  ;;  %v350_v44 = vpop.f32.mrf.mxu0  ;;  %v390_v45 = vpop.f32.mrf.mxu1 }
  0xe4   : > { %482 = vst.msk [vmem:[%s798_s19 + $0x8] sm:$0xff] %vm225_vm0, %v466_v38  ;;  %490 = vst.msk [vmem:[%s798_s19 + $0x48] sm:$0xff] %vm225_vm0, %v474_v39  ;;  %v465_v46 = vmax.f32 %v449_v40, 0.0  ;;  %v473_v47 = vmax.f32 %v457_v41, 0.0  ;;  %v428_v48 = vmul.f32 %v780_v24, %v350_v44  ;;  %v436_v49 = vmul.f32 %v780_v24, %v390_v45 }
  0xe5   : > { %v452_v50 = vadd.f32 %v785_v26, %v429_v42  ;;  %v460_v51 = vadd.f32 %v785_v26, %v437_v43  ;;  %v630_v52 = vpop.f32.mrf.mxu0  ;;  %v642_v53 = vpop.f32.mrf.mxu1 }
  0xe6   : > { %481 = vst.msk [vmem:[%s798_s19] sm:$0xff] %vm225_vm0, %v465_v46  ;;  %489 = vst.msk [vmem:[%s798_s19 + $0x40] sm:$0xff] %vm225_vm0, %v473_v47  ;;  %v451_v54 = vadd.f32 %v785_v26, %v428_v48  ;;  %v459_v55 = vadd.f32 %v785_v26, %v436_v49  ;;  %v431_v56 = vmul.f32 %v630_v52, %v780_v24 }
  0xe7   : > { %v439_v57 = vmul.f32 %v642_v53, %v780_v24  ;;  %v468_v58 = vmax.f32 %v452_v50, 0.0  ;;  %v476_v59 = vmax.f32 %v460_v51, 0.0  ;;  %v360_v60 = vpop.f32.mrf.mxu0  ;;  %v400_v61 = vpop.f32.mrf.mxu1 }
  0xe8   : > { %v467_v62 = vmax.f32 %v451_v54, 0.0  ;;  %v475_v63 = vmax.f32 %v459_v55, 0.0  ;;  %v454_v0 = vadd.f32 %v785_v26, %v431_v56  ;;  %v430_v2 = vmul.f32 %v780_v24, %v360_v60 }
  0xe9   : > { %v462_v1 = vadd.f32 %v785_v26, %v439_v57  ;;  %484 = vst.msk [vmem:[%s798_s19 + $0x18] sm:$0xff] %vm225_vm0, %v468_v58  ;;  %492 = vst.msk [vmem:[%s798_s19 + $0x58] sm:$0xff] %vm225_vm0, %v476_v59  ;;  %v438_v3 = vmul.f32 %v780_v24, %v400_v61  ;;  %v633_v4 = vpop.f32.mrf.mxu0  ;;  %v645_v5 = vpop.f32.mrf.mxu1 }
  0xea   : > { %483 = vst.msk [vmem:[%s798_s19 + $0x10] sm:$0xff] %vm225_vm0, %v467_v62  ;;  %491 = vst.msk [vmem:[%s798_s19 + $0x50] sm:$0xff] %vm225_vm0, %v475_v63  ;;  %v470_v6 = vmax.f32 %v454_v0, 0.0  ;;  %v433_v8 = vmul.f32 %v633_v4, %v780_v24  ;;  %v441_v9 = vmul.f32 %v645_v5, %v780_v24  ;;  %v453_v10 = vadd.f32 %v785_v26, %v430_v2 }
  0xeb   : > { %v478_v7 = vmax.f32 %v462_v1, 0.0  ;;  %v461_v11 = vadd.f32 %v785_v26, %v438_v3  ;;  %v370_v12 = vpop.f32.mrf.mxu0  ;;  %v410_v13 = vpop.f32.mrf.mxu1 }
  0xec   : > { %486 = vst.msk [vmem:[%s798_s19 + $0x28] sm:$0xff] %vm225_vm0, %v470_v6  ;;  %v456_v14 = vadd.f32 %v785_v26, %v433_v8  ;;  %v464_v15 = vadd.f32 %v785_v26, %v441_v9  ;;  %v432_v16 = vmul.f32 %v780_v24, %v370_v12  ;;  %v440_v17 = vmul.f32 %v780_v24, %v410_v13 }
  0xed   : > { %494 = vst.msk [vmem:[%s798_s19 + $0x68] sm:$0xff] %vm225_vm0, %v478_v7  ;;  %v469_v18 = vmax.f32 %v453_v10, 0.0  ;;  %v477_v19 = vmax.f32 %v461_v11, 0.0 }
  0xee   : > { %v472_v20 = vmax.f32 %v456_v14, 0.0  ;;  %v480_v21 = vmax.f32 %v464_v15, 0.0  ;;  %v455_v22 = vadd.f32 %v785_v26, %v432_v16  ;;  %v463_v23 = vadd.f32 %v785_v26, %v440_v17 }
  0xef   : > { %485 = vst.msk [vmem:[%s798_s19 + $0x20] sm:$0xff] %vm225_vm0, %v469_v18  ;;  %493 = vst.msk [vmem:[%s798_s19 + $0x60] sm:$0xff] %vm225_vm0, %v477_v19 }
  0xf0   : > { %488 = vst.msk [vmem:[%s798_s19 + $0x38] sm:$0xff] %vm225_vm0, %v472_v20  ;;  %496 = vst.msk [vmem:[%s798_s19 + $0x78] sm:$0xff] %vm225_vm0, %v480_v21  ;;  %v471_v25 = vmax.f32 %v455_v22, 0.0  ;;  %v479_v27 = vmax.f32 %v463_v23, 0.0 }
  0xf2   : > { %487 = vst.msk [vmem:[%s798_s19 + $0x30] sm:$0xff] %vm225_vm0, %v471_v25  ;;  %495 = vst.msk [vmem:[%s798_s19 + $0x70] sm:$0xff] %vm225_vm0, %v479_v27 }
  0xf3 PF: > { %s14_s15 = sadd.s32 1, %s676_s15  }
  0xf4   : > { %p11_p4 = scmp.ge.s32.totalorder %s14_s15, 4  }
  0xf6   :  { %13 = sbr.rel (!%p11_p4) target bundleno = 1 (0x1), region = 66 }

// kernel: pointnet_gem_forward.21
= control target key start
LH: loop header
LB: loop body
LE: loop exit
PB: predicated region body
PF: predicated region fallthrough
CT: control target
= control target key end

     0   :  { %8 = vsyncpa [#allocation4], 0  ;;  %vm239_vm0 = vcmask 523264   ;;  %vm330_vm1 = vcmask 1041409   ;;  %vm333_vm2 = vcmask 517120   ;;  %s695_s0 = inlined_call_operand.<no memory space> [shape: f32[1], index: 0, kind: input, shape index: {}]   ;;  %s696_s1 = inlined_call_operand.vmem [shape: f32[2,128,64], index: 1, kind: input, shape index: {}]   ;;  %s697_s2 = inlined_call_operand.hbm [shape: f32[2,64], index: 2, kind: output, shape index: {}]  }
   0x1   :  { %v14_v0 = vld [vmem:[%s696_s1] sm:$0xff]  ;;  %v15_v1 = vld [vmem:[%s696_s1 + $0x8] sm:$0xff]  ;;  %v16_v2 = vld [vmem:[%s696_s1 + $0x10] sm:$0xff]  ;;  %v607_v57 = vstv %s695_s0 }
   0x2   :  { %v17_v3 = vld [vmem:[%s696_s1 + $0x18] sm:$0xff]  ;;  %v46_v4 = vmax.f32 %v14_v0, 1e-06  ;;  %v18_v5 = vld [vmem:[%s696_s1 + $0x20] sm:$0xff]  ;;  %v47_v6 = vmax.f32 %v15_v1, 1e-06 }
   0x3   :  { %v19_v7 = vld [vmem:[%s696_s1 + $0x28] sm:$0xff]  ;;  %v48_v8 = vmax.f32 %v16_v2, 1e-06  ;;  %v20_v9 = vld [vmem:[%s696_s1 + $0x30] sm:$0xff]  ;;  %v49_v10 = vmax.f32 %v17_v3, 1e-06 }
   0x4   :  { %v21_v11 = vld [vmem:[%s696_s1 + $0x38] sm:$0xff]  ;;  %v50_v12 = vmax.f32 %v18_v5, 1e-06  ;;  %350 = vlog2.f32 %v46_v4  ;;  %v22_v13 = vld [vmem:[%s696_s1 + $0x40] sm:$0xff]  ;;  %v51_v14 = vmax.f32 %v19_v7, 1e-06 }
   0x5   :  { %352 = vlog2.f32 %v47_v6  ;;  %v23_v15 = vld [vmem:[%s696_s1 + $0x48] sm:$0xff]  ;;  %v52_v16 = vmax.f32 %v20_v9, 1e-06  ;;  %v24_v17 = vld [vmem:[%s696_s1 + $0x50] sm:$0xff]  ;;  %v53_v18 = vmax.f32 %v21_v11, 1e-06 }
   0x6   :  { %354 = vlog2.f32 %v48_v8  ;;  %v25_v19 = vld [vmem:[%s696_s1 + $0x58] sm:$0xff]  ;;  %v54_v20 = vmax.f32 %v22_v13, 1e-06  ;;  %v26_v21 = vld [vmem:[%s696_s1 + $0x60] sm:$0xff]  ;;  %v55_v22 = vmax.f32 %v23_v15, 1e-06 }
   0x7   :  { %356 = vlog2.f32 %v49_v10  ;;  %v27_v23 = vld [vmem:[%s696_s1 + $0x68] sm:$0xff]  ;;  %v56_v24 = vmax.f32 %v24_v17, 1e-06  ;;  %v28_v25 = vld [vmem:[%s696_s1 + $0x70] sm:$0xff]  ;;  %v57_v26 = vmax.f32 %v25_v19, 1e-06 }
   0x8   :  { %358 = vlog2.f32 %v50_v12  ;;  %v29_v27 = vld [vmem:[%s696_s1 + $0x78] sm:$0xff]  ;;  %v58_v28 = vmax.f32 %v26_v21, 1e-06  ;;  %v30_v29 = vld [vmem:[%s696_s1 + $0x80] sm:$0xff]  ;;  %v59_v30 = vmax.f32 %v27_v23, 1e-06 }
   0x9   :  { %360 = vlog2.f32 %v51_v14  ;;  %v31_v31 = vld [vmem:[%s696_s1 + $0x88] sm:$0xff]  ;;  %v60_v32 = vmax.f32 %v28_v25, 1e-06  ;;  %v32_v33 = vld [vmem:[%s696_s1 + $0x90] sm:$0xff]  ;;  %v61_v34 = vmax.f32 %v29_v27, 1e-06 }
   0xa   :  { %362 = vlog2.f32 %v52_v16  ;;  %v33_v35 = vld [vmem:[%s696_s1 + $0x98] sm:$0xff]  ;;  %v62_v36 = vmax.f32 %v30_v29, 1e-06  ;;  %v34_v38 = vld [vmem:[%s696_s1 + $0xa0] sm:$0xff]  ;;  %v63_v39 = vmax.f32 %v31_v31, 1e-06 }
   0xb   :  { %364 = vlog2.f32 %v53_v18  ;;  %v35_v41 = vld [vmem:[%s696_s1 + $0xa8] sm:$0xff]  ;;  %v64_v42 = vmax.f32 %v32_v33, 1e-06  ;;  %v36_v44 = vld [vmem:[%s696_s1 + $0xb0] sm:$0xff]  ;;  %v65_v45 = vmax.f32 %v33_v35, 1e-06 }
   0xc   :  { %366 = vlog2.f32 %v54_v20  ;;  %v37_v47 = vld [vmem:[%s696_s1 + $0xb8] sm:$0xff]  ;;  %v66_v48 = vmax.f32 %v34_v38, 1e-06  ;;  %v38_v50 = vld [vmem:[%s696_s1 + $0xc0] sm:$0xff]  ;;  %v67_v51 = vmax.f32 %v35_v41, 1e-06 }
   0xd   :  { %368 = vlog2.f32 %v55_v22  ;;  %v39_v54 = vld [vmem:[%s696_s1 + $0xc8] sm:$0xff]  ;;  %v68_v55 = vmax.f32 %v36_v44, 1e-06  ;;  %v40_v59 = vld [vmem:[%s696_s1 + $0xd0] sm:$0xff]  ;;  %v41_v60 = vld [vmem:[%s696_s1 + $0xd8] sm:$0xff] }
   0xe   :  { %370 = vlog2.f32 %v56_v24  ;;  %v69_v61 = vmax.f32 %v37_v47, 1e-06  ;;  %v70_v0 = vmax.f32 %v38_v50, 1e-06  ;;  %v42_v3 = vld [vmem:[%s696_s1 + $0xe0] sm:$0xff]  ;;  %v43_v23 = vld [vmem:[%s696_s1 + $0xe8] sm:$0xff] }
   0xf   :  { %372 = vlog2.f32 %v57_v26  ;;  %v71_v4 = vmax.f32 %v39_v54, 1e-06  ;;  %v72_v8 = vmax.f32 %v40_v59, 1e-06  ;;  %v73_v9 = vmax.f32 %v41_v60, 1e-06 }
  0x10   :  { %374 = vlog2.f32 %v58_v28  ;;  %v74_v16 = vmax.f32 %v42_v3, 1e-06  ;;  %v44_v27 = vld [vmem:[%s696_s1 + $0xf0] sm:$0xff]  ;;  %v45_v28 = vld [vmem:[%s696_s1 + $0xf8] sm:$0xff]  ;;  %s510_s1 = smov [#allocation3]  }
  0x11   :  { %v351_v37 = vpop.eup %350  ;;  %376 = vlog2.f32 %v59_v30  ;;  %v76_v41 = vmax.f32 %v44_v27, 1e-06  ;;  %s341_s18 = sshll.u32 %s510_s1, 4  ;;  %s342_s18 = int_to_ptr.vmem [resolvable:$true] %s341_s18 }
  0x12   :  { %v353_v40 = vpop.eup %352  ;;  %378 = vlog2.f32 %v60_v32  ;;  %v79_v52 = vmul.f32 0.6931472, %v351_v37  ;;  %v75_v37 = vmax.f32 %v43_v23, 1e-06  ;;  %s488_s19 = scalar_lea.vmem %s342_s18, 32  ;;  %p493_p1 = scmp.lt.s32.totalorder %s342_s18, %s342_s18 }
  0x13   :  { %v355_v43 = vpop.eup %354  ;;  %380 = vlog2.f32 %v61_v34  ;;  %v81_v56 = vmul.f32 0.6931472, %v353_v40  ;;  %p489_p0 = scmp.ne.s32.totalorder %s342_s18, %s488_s19  ;;  %p494_p2 = scmp.lt.s32.totalorder %s488_s19, %s488_s19 }
  0x14   :  { %v357_v46 = vpop.eup %356  ;;  %382 = vlog2.f32 %v62_v36  ;;  %v83_v62 = vmul.f32 0.6931472, %v355_v43  ;;  %v143_v6 = vmul.f32 %v607_v57, %v79_v52 }
  0x15   :  { %v359_v49 = vpop.eup %358  ;;  %384 = vlog2.f32 %v63_v39  ;;  %v85_v1 = vmul.f32 0.6931472, %v357_v46  ;;  %v144_v10 = vmul.f32 %v607_v57, %v81_v56  ;;  %p495_p3 = por %p494_p2, %p493_p1 }
  0x16   :  { %v361_v53 = vpop.eup %360  ;;  %386 = vlog2.f32 %v64_v42  ;;  %v87_v5 = vmul.f32 0.6931472, %v359_v49  ;;  %v145_v14 = vmul.f32 %v607_v57, %v83_v62  ;;  %v175_v21 = vmul.f32 1.442695, %v143_v6 }
  0x17   :  { %v363_v58 = vpop.eup %362  ;;  %388 = vlog2.f32 %v65_v45  ;;  %v89_v12 = vmul.f32 0.6931472, %v361_v53  ;;  %v146_v17 = vmul.f32 %v607_v57, %v85_v1  ;;  %v177_v25 = vmul.f32 1.442695, %v144_v10  ;;  %p496_p4 = pnand %p495_p3, %p489_p0 }
  0x18   :  { %v365_v63 = vpop.eup %364  ;;  %390 = vlog2.f32 %v66_v48  ;;  %v91_v13 = vmul.f32 0.6931472, %v363_v58  ;;  %v147_v20 = vmul.f32 %v607_v57, %v87_v5  ;;  %v179_v31 = vmul.f32 1.442695, %v145_v14 }
  0x19   :  { %v367_v2 = vpop.eup %366  ;;  %392 = vlog2.f32 %v67_v51  ;;  %v93_v19 = vmul.f32 0.6931472, %v365_v63  ;;  %v148_v29 = vmul.f32 %v607_v57, %v89_v12  ;;  %v181_v35 = vmul.f32 1.442695, %v146_v17 }
  0x1a   :  { %v369_v7 = vpop.eup %368  ;;  %394 = vlog2.f32 %v68_v55  ;;  %v95_v24 = vmul.f32 0.6931472, %v367_v2  ;;  %v149_v30 = vmul.f32 %v607_v57, %v91_v13  ;;  %v183_v39 = vmul.f32 1.442695, %v147_v20 }
  0x1b   :  { %v371_v11 = vpop.eup %370  ;;  %396 = vlog2.f32 %v69_v61  ;;  %v97_v33 = vmul.f32 0.6931472, %v369_v7  ;;  %v150_v38 = vmul.f32 %v607_v57, %v93_v19  ;;  %v77_v45 = vmax.f32 %v45_v28, 1e-06 }
  0x1c   :  { %v373_v15 = vpop.eup %372  ;;  %398 = vlog2.f32 %v70_v0  ;;  %v99_v34 = vmul.f32 0.6931472, %v371_v11  ;;  %v151_v43 = vmul.f32 %v607_v57, %v95_v24  ;;  %v185_v47 = vmul.f32 1.442695, %v148_v29 }
  0x1d   :  { %v375_v18 = vpop.eup %374  ;;  %400 = vlog2.f32 %v71_v4  ;;  %v101_v42 = vmul.f32 0.6931472, %v373_v15  ;;  %v152_v49 = vmul.f32 %v607_v57, %v97_v33  ;;  %v187_v51 = vmul.f32 1.442695, %v149_v30 }
  0x1e   :  { %v377_v22 = vpop.eup %376  ;;  %402 = vlog2.f32 %v72_v8  ;;  %v103_v46 = vmul.f32 0.6931472, %v375_v18  ;;  %v153_v50 = vmul.f32 %v607_v57, %v99_v34  ;;  %v189_v55 = vmul.f32 1.442695, %v150_v38 }
  0x1f   :  { %v379_v26 = vpop.eup %378  ;;  %404 = vlog2.f32 %v73_v9  ;;  %v105_v53 = vmul.f32 0.6931472, %v377_v22  ;;  %v154_v59 = vmul.f32 %v607_v57, %v101_v42  ;;  %v191_v60 = vmul.f32 1.442695, %v151_v43 }
  0x20   :  { %v381_v32 = vpop.eup %380  ;;  %406 = vlog2.f32 %v74_v16  ;;  %v107_v62 = vmul.f32 0.6931472, %v379_v26  ;;  %v155_v0 = vmul.f32 %v607_v57, %v103_v46  ;;  %v193_v4 = vmul.f32 1.442695, %v152_v49 }
  0x21   :  { %v383_v36 = vpop.eup %382  ;;  %408 = vpow2.f32 %v175_v21  ;;  %v109_v2 = vmul.f32 0.6931472, %v381_v32  ;;  %v156_v7 = vmul.f32 %v607_v57, %v105_v53  ;;  %v195_v12 = vmul.f32 1.442695, %v153_v50 }
  0x22   :  { %v385_v40 = vpop.eup %384  ;;  %410 = vpow2.f32 %v177_v25  ;;  %v111_v54 = vmul.f32 0.6931472, %v383_v36  ;;  %v197_v16 = vmul.f32 1.442695, %v154_v59  ;;  %v157_v18 = vmul.f32 %v607_v57, %v107_v62 }
  0x23   :  { %v387_v44 = vpop.eup %386  ;;  %412 = vpow2.f32 %v179_v31  ;;  %v113_v58 = vmul.f32 0.6931472, %v385_v40  ;;  %v199_v20 = vmul.f32 1.442695, %v155_v0  ;;  %v158_v22 = vmul.f32 %v607_v57, %v109_v2 }
  0x24   :  { %v389_v48 = vpop.eup %388  ;;  %414 = vpow2.f32 %v181_v35  ;;  %v115_v63 = vmul.f32 0.6931472, %v387_v44  ;;  %v159_v8 = vmul.f32 %v607_v57, %v111_v54 }
  0x25   :  { %v391_v52 = vpop.eup %390  ;;  %416 = vpow2.f32 %v183_v39  ;;  %v117_v3 = vmul.f32 0.6931472, %v389_v48  ;;  %v160_v11 = vmul.f32 %v607_v57, %v113_v58  ;;  %v205_v0 = vmul.f32 1.442695, %v158_v22 }
  0x26   :  { %v393_v56 = vpop.eup %392  ;;  %418 = vlog2.f32 %v75_v37  ;;  %v119_v6 = vmul.f32 0.6931472, %v391_v52  ;;  %v161_v15 = vmul.f32 %v607_v57, %v115_v63  ;;  %v207_v24 = vmul.f32 1.442695, %v159_v8 }
  0x27   :  { %v395_v61 = vpop.eup %394  ;;  %420 = vpow2.f32 %v185_v47  ;;  %v121_v10 = vmul.f32 0.6931472, %v393_v56  ;;  %v162_v19 = vmul.f32 %v607_v57, %v117_v3  ;;  %v209_v28 = vmul.f32 1.442695, %v160_v11 }
  0x28   :  { %v397_v1 = vpop.eup %396  ;;  %422 = vlog2.f32 %v76_v41  ;;  %v123_v14 = vmul.f32 0.6931472, %v395_v61  ;;  %v163_v23 = vmul.f32 %v607_v57, %v119_v6  ;;  %v211_v32 = vmul.f32 1.442695, %v161_v15 }
  0x29   :  { %v399_v5 = vpop.eup %398  ;;  %424 = vpow2.f32 %v187_v51  ;;  %v125_v26 = vmul.f32 0.6931472, %v397_v1  ;;  %v164_v27 = vmul.f32 %v607_v57, %v121_v10  ;;  %v213_v35 = vmul.f32 1.442695, %v162_v19 }
  0x2a   :  { %v401_v9 = vpop.eup %400  ;;  %426 = vlog2.f32 %v77_v45  ;;  %v127_v30 = vmul.f32 0.6931472, %v399_v5  ;;  %v165_v31 = vmul.f32 %v607_v57, %v123_v14  ;;  %v215_v38 = vmul.f32 1.442695, %v163_v23 }
  0x2b   :  { %v403_v13 = vpop.eup %402  ;;  %428 = vpow2.f32 %v189_v55  ;;  %v129_v34 = vmul.f32 0.6931472, %v401_v9  ;;  %v166_v42 = vmul.f32 %v607_v57, %v125_v26  ;;  %v217_v43 = vmul.f32 1.442695, %v164_v27 }
  0x2c   :  { %v405_v17 = vpop.eup %404  ;;  %430 = vpow2.f32 %v191_v60  ;;  %v131_v46 = vmul.f32 0.6931472, %v403_v13  ;;  %v201_v47 = vmul.f32 1.442695, %v156_v7  ;;  %v167_v50 = vmul.f32 %v607_v57, %v127_v30 }
  0x2d   :  { %v407_v21 = vpop.eup %406  ;;  %432 = vpow2.f32 %v193_v4  ;;  %v219_v51 = vmul.f32 1.442695, %v165_v31  ;;  %v133_v54 = vmul.f32 0.6931472, %v405_v17  ;;  %v203_v55 = vmul.f32 1.442695, %v157_v18 }
  0x2e   :  { %v409_v25 = vpop.eup %408  ;;  %434 = vpow2.f32 %v195_v12  ;;  %v168_v59 = vmul.f32 %v607_v57, %v129_v34  ;;  %v221_v60 = vmul.f32 1.442695, %v166_v42  ;;  %v135_v63 = vmul.f32 0.6931472, %v407_v21 }
  0x2f   :  { %v411_v29 = vpop.eup %410  ;;  %436 = vpow2.f32 %v197_v16  ;;  %v240_v36 = vsel %vm239_vm0, %v409_v25, 0.0  ;;  %v169_v3 = vmul.f32 %v607_v57, %v131_v46  ;;  %v223_v4 = vmul.f32 1.442695, %v167_v50 }
  0x30   :  { %v413_v33 = vpop.eup %412  ;;  %438 = vpow2.f32 %v199_v20  ;;  %v241_v39 = vsel %vm239_vm0, %v411_v29, 0.0  ;;  %v170_v10 = vmul.f32 %v607_v57, %v133_v54  ;;  %v225_v11 = vmul.f32 1.442695, %v168_v59 }
  0x31   :  { %v415_v37 = vpop.eup %414  ;;  %440 = vpow2.f32 %v207_v24  ;;  %v243_v40 = vsel %vm239_vm0, %v413_v33, 0.0  ;;  %v242_v44 = vadd.f32 %v241_v39, %v240_v36  ;;  %v171_v17 = vmul.f32 %v607_v57, %v135_v63 }
  0x32   :  { %v417_v41 = vpop.eup %416  ;;  %442 = vpow2.f32 %v209_v28  ;;  %v245_v48 = vsel %vm239_vm0, %v415_v37, 0.0  ;;  %v227_v18 = vmul.f32 1.442695, %v169_v3  ;;  %v229_v25 = vmul.f32 1.442695, %v170_v10 }
  0x33   :  { %v419_v45 = vpop.eup %418  ;;  %444 = vpow2.f32 %v211_v32  ;;  %v244_v52 = vadd.f32 %v243_v40, %v242_v44  ;;  %v247_v56 = vsel %vm239_vm0, %v417_v41, 0.0  ;;  %v231_v32 = vmul.f32 1.442695, %v171_v17 }
  0x34   :  { %v421_v49 = vpop.eup %420  ;;  %446 = vpow2.f32 %v213_v35  ;;  %v137_v7 = vmul.f32 0.6931472, %v419_v45 }
  0x35   :  { %v423_v53 = vpop.eup %422  ;;  %448 = vpow2.f32 %v215_v38  ;;  %v246_v61 = vadd.f32 %v245_v48, %v244_v52  ;;  %v249_v1 = vsel %vm239_vm0, %v421_v49, 0.0 }
  0x36   :  { %v425_v58 = vpop.eup %424  ;;  %450 = vpow2.f32 %v217_v43  ;;  %v139_v14 = vmul.f32 0.6931472, %v423_v53  ;;  %v172_v24 = vmul.f32 %v607_v57, %v137_v7 }
  0x37   :  { %v427_v62 = vpop.eup %426  ;;  %452 = vpow2.f32 %v201_v47  ;;  %v248_v5 = vadd.f32 %v247_v56, %v246_v61  ;;  %v251_v8 = vsel %vm239_vm0, %v425_v58, 0.0 }
  0x38   :  { %v429_v2 = vpop.eup %428  ;;  %454 = vpow2.f32 %v219_v51  ;;  %v141_v21 = vmul.f32 0.6931472, %v427_v62  ;;  %v173_v28 = vmul.f32 %v607_v57, %v139_v14  ;;  %v233_v41 = vmul.f32 1.442695, %v172_v24 }
  0x39   :  { %v431_v6 = vpop.eup %430  ;;  %456 = vpow2.f32 %v203_v55  ;;  %v250_v12 = vadd.f32 %v249_v1, %v248_v5  ;;  %v253_v15 = vsel %vm239_vm0, %v429_v2, 0.0 }
  0x3a   :  { %v433_v9 = vpop.eup %432  ;;  %458 = vpow2.f32 %v221_v60  ;;  %v255_v22 = vsel %vm239_vm0, %v431_v6, 0.0  ;;  %v174_v36 = vmul.f32 %v607_v57, %v141_v21  ;;  %v235_v48 = vmul.f32 1.442695, %v173_v28 }
  0x3b   :  { %v435_v13 = vpop.eup %434  ;;  %460 = vpow2.f32 %v205_v0  ;;  %v252_v19 = vadd.f32 %v251_v8, %v250_v12  ;;  %v257_v29 = vsel %vm239_vm0, %v433_v9, 0.0 }
  0x3c   :  { %v437_v16 = vpop.eup %436  ;;  %462 = vpow2.f32 %v223_v4  ;;  %v259_v37 = vsel %vm239_vm0, %v435_v13, 0.0  ;;  %v237_v55 = vmul.f32 1.442695, %v174_v36 }
  0x3d   :  { %v439_v20 = vpop.eup %438  ;;  %464 = vpow2.f32 %v225_v11  ;;  %v254_v26 = vadd.f32 %v253_v15, %v252_v19  ;;  %v261_v45 = vsel %vm239_vm0, %v437_v16, 0.0 }
  0x3e   :  { %v441_v23 = vpop.eup %440  ;;  %466 = vpow2.f32 %v227_v18  ;;  %v263_v52 = vsel %vm239_vm0, %v439_v20, 0.0 }
  0x3f   :  { %v443_v27 = vpop.eup %442  ;;  %v277_v30 = vsel %vm239_vm0, %v441_v23, 0.0  ;;  %v256_v33 = vadd.f32 %v255_v22, %v254_v26  ;;  %468 = vpow2.f32 %v229_v25 }
  0x40   :  { %v445_v31 = vpop.eup %444  ;;  %v278_v34 = vsel %vm239_vm0, %v443_v27, 0.0  ;;  %470 = vpow2.f32 %v231_v32 }
  0x41   :  { %v447_v35 = vpop.eup %446  ;;  %v279_v38 = vadd.f32 %v278_v34, %v277_v30  ;;  %v280_v39 = vsel %vm239_vm0, %v445_v31, 0.0  ;;  %v258_v42 = vadd.f32 %v257_v29, %v256_v33  ;;  %472 = vpow2.f32 %v233_v41 }
  0x42   :  { %v449_v40 = vpop.eup %448  ;;  %v282_v43 = vsel %vm239_vm0, %v447_v35, 0.0  ;;  %474 = vpow2.f32 %v235_v48 }
  0x43   :  { %v451_v44 = vpop.eup %450  ;;  %v281_v46 = vadd.f32 %v280_v39, %v279_v38  ;;  %v260_v49 = vadd.f32 %v259_v37, %v258_v42  ;;  %v284_v50 = vsel %vm239_vm0, %v449_v40, 0.0  ;;  %476 = vpow2.f32 %v237_v55 }
  0x44   :  { %v453_v47 = vpop.eup %452  ;;  %v286_v58 = vsel %vm239_vm0, %v451_v44, 0.0 }
  0x45   :  { %v455_v51 = vpop.eup %454  ;;  %v283_v53 = vadd.f32 %v282_v43, %v281_v46  ;;  %v262_v56 = vadd.f32 %v261_v45, %v260_v49  ;;  %v265_v60 = vsel %vm239_vm0, %v453_v47, 0.0 }
  0x46   :  { %v457_v54 = vpop.eup %456  ;;  %v288_v0 = vsel %vm239_vm0, %v455_v51, 0.0 }
  0x47   :  { %v459_v59 = vpop.eup %458  ;;  %v285_v61 = vadd.f32 %v284_v50, %v283_v53  ;;  %v264_v63 = vadd.f32 %v263_v52, %v262_v56  ;;  %v267_v2 = vsel %vm239_vm0, %v457_v54, 0.0 }
  0x48   :  { %v461_v62 = vpop.eup %460  ;;  %v290_v5 = vsel %vm239_vm0, %v459_v59, 0.0 }
  0x49   :  { %v463_v1 = vpop.eup %462  ;;  %v287_v3 = vadd.f32 %v286_v58, %v285_v61  ;;  %v266_v4 = vadd.f32 %v265_v60, %v264_v63  ;;  %v269_v7 = vsel %vm239_vm0, %v461_v62, 0.0 }
  0x4a   :  { %v465_v6 = vpop.eup %464  ;;  %v292_v10 = vsel %vm239_vm0, %v463_v1, 0.0 }
  0x4b   :  { %v289_v8 = vadd.f32 %v288_v0, %v287_v3  ;;  %v268_v9 = vadd.f32 %v267_v2, %v266_v4  ;;  %v467_v11 = vpop.eup %466  ;;  %v294_v14 = vsel %vm239_vm0, %v465_v6, 0.0 }
  0x4c   :  { %v469_v15 = vpop.eup %468  ;;  %v296_v18 = vsel %vm239_vm0, %v467_v11, 0.0 }
  0x4d   :  { %v291_v12 = vadd.f32 %v290_v5, %v289_v8  ;;  %v270_v13 = vadd.f32 %v269_v7, %v268_v9  ;;  %v471_v19 = vpop.eup %470  ;;  %v298_v22 = vsel %vm239_vm0, %v469_v15, 0.0 }
  0x4e   :  { %v473_v23 = vpop.eup %472  ;;  %v300_v26 = vsel %vm239_vm0, %v471_v19, 0.0 }
  0x4f   :  { %v293_v16 = vadd.f32 %v292_v10, %v291_v12  ;;  %v271_v17 = vrot.slane %v270_v13, 4  ;;  %v475_v27 = vpop.eup %474  ;;  %v302_v30 = vsel %vm239_vm0, %v473_v23, 0.0 }
  0x50   :  { %v477_v31 = vpop.eup %476  ;;  %v304_v34 = vsel %vm239_vm0, %v475_v27, 0.0 }
  0x51   :  { %v295_v20 = vadd.f32 %v294_v14, %v293_v16  ;;  %v272_v21 = vadd.f32 %v271_v17, %v270_v13  ;;  %v306_v36 = vsel %vm239_vm0, %v477_v31, 0.0 }
  0x53   :  { %v297_v24 = vadd.f32 %v296_v18, %v295_v20  ;;  %v273_v25 = vrot.slane %v272_v21, 2 }
  0x55   :  { %v299_v28 = vadd.f32 %v298_v22, %v297_v24  ;;  %v274_v29 = vadd.f32 %v273_v25, %v272_v21 }
  0x57   :  { %v301_v32 = vadd.f32 %v300_v26, %v299_v28  ;;  %v275_v33 = vrot.slane %v274_v29, 1 }
  0x59   :  { %v303_v35 = vadd.f32 %v302_v30, %v301_v32  ;;  %v276_v37 = vadd.f32 %v275_v33, %v274_v29 }
  0x5b   :  { %v305_v38 = vadd.f32 %v304_v34, %v303_v35  ;;  %v315_v41 = vmul.f32 0.0078125, %v276_v37 }
  0x5d   :  { %v307_v39 = vadd.f32 %v306_v36, %v305_v38  ;;  %478 = vlog2.f32 %v315_v41 }
  0x5e   :  { %480 = vrcp.f32 %v607_v57 }
  0x5f   :  { %v308_v40 = vrot.slane %v307_v39, 4 }
  0x61   :  { %v309_v42 = vadd.f32 %v308_v40, %v307_v39 }
  0x63   :  { %v310_v43 = vrot.slane %v309_v42, 2 }
  0x65   :  { %v311_v44 = vadd.f32 %v310_v43, %v309_v42 }
  0x67   :  { %v312_v45 = vrot.slane %v311_v44, 1 }
  0x69   :  { %v313_v46 = vadd.f32 %v312_v45, %v311_v44 }
  0x6a   :  { %v479_v48 = vpop.eup %478 }
  0x6b   :  { %v316_v47 = vmul.f32 0.0078125, %v313_v46  ;;  %v318_v49 = vmul.f32 0.6931472, %v479_v48  ;;  %v481_v50 = vpop.eup %480 }
  0x6d   :  { %482 = vlog2.f32 %v316_v47  ;;  %v322_v51 = vmul.f32 %v481_v50, %v318_v49 }
  0x6f   :  { %v324_v54 = vmul.f32 1.442695, %v322_v51 }
  0x71   :  { %484 = vpow2.f32 %v324_v54 }
  0x7a   :  { %v483_v52 = vpop.eup %482 }
  0x7b   :  { %v320_v53 = vmul.f32 0.6931472, %v483_v52 }
  0x7d   :  { %v323_v55 = vmul.f32 %v481_v50, %v320_v53 }
  0x7e   :  { %v485_v58 = vpop.eup %484 }
  0x7f   :  { %v326_v56 = vmul.f32 1.442695, %v323_v55 }
  0x81   :  { %486 = vpow2.f32 %v326_v56 }
  0x8e   :  { %v487_v57 = vpop.eup %486 }
  0x8f   :  { %v331_v59 = vsel %vm330_vm1, %v487_v57, %v485_v58 }
  0x90   :  { %334 = vst.msk [vmem:[#allocation3] sm:$0x3] %vm333_vm2, %v331_v59 }
  0x91   :  { %499 = shalt.err (!%p496_p4)
}
  0x92   :  { %344 = dma.vmem_to_hbm [thread:$0]  %s342_s18, 32, %s697_s2, [#allocation4]  }
  0x93   :  { %508 = dma.done.wait [#allocation4], 32  }
  0x94   :  { %509 = vsyncadd [#allocation4], 4294967264 }
  0x95   :  { %348 = vsyncpa [#allocation4], 1 }

</bundles_post_ra>
